<compile_context>
chip_gen: v7x
topology: tpu7x:2x2x1
jax: 0.10.0
libtpu: 0.0.40
codegen_flags: <defaults>
</compile_context>

<pallas_src>
import jax
import jax.numpy as jnp
import numpy as np
from jax.experimental import pallas as pl
from jax.experimental.pallas import tpu as pltpu

N_DIM = 3
N_POINTS = 500
N_PAD = 512            # points padded to a multiple of 128 (>= 500)
C_IN_PAD = 8           # input channels padded 3 -> 8 so layer 1 can use the MXU
C1, C2, C3 = 64, 128, 1024
C3_CHUNK = 256         # output-channel chunk width for the fused conv3+maxpool
OUT_PAD = 128          # fc3 outputs padded from 9 -> 128 lanes (lane-dense store)
BN_EPS = 1e-5


def _default_conv3_epilogue_dtype():
    """bf16 conv3 epilogue on bf16-VALU chips (v6e/v7x); f32 on v5e."""
    try:
        kind = jax.devices()[0].device_kind.lower()
    except Exception:
        return jnp.bfloat16
    if "v5 lite" in kind or "v5e" in kind or "v5lite" in kind:
        return jnp.float32
    return jnp.bfloat16


# ----------------------------------------------------------------------------
# Pallas kernel: full STN forward for Bt batch elements per grid step.
# ----------------------------------------------------------------------------
def stn_kernel(x_ref,
               w1, t1, w2, t2, w3, t3, w4, t4, w5, t5, w6, t6,
               out_ref, g_ref):
    Bt = out_ref.shape[0]

    # ---- layer 1 on the MXU: (Bt*N_PAD, 8) x (8, 64).  BN scale is folded
    # into w1 host-side, so the epilogue is shift + ReLU only.
    h = jnp.dot(x_ref[...], w1[...], preferred_element_type=jnp.float32)
    h = jnp.maximum(h + t1[...], 0.0).astype(jnp.bfloat16)

    # ---- layer 2: bf16 MXU matmul, f32 accumulation, shift + ReLU.
    h = jnp.dot(h, w2[...], preferred_element_type=jnp.float32)
    h = jnp.maximum(h + t2[...], 0.0).astype(jnp.bfloat16)

    # ---- layer 3 fused with the max-pool over points, chunked over the 1024
    # output channels.  No point mask is needed: padded point rows replicate
    # the last real point (edge padding in the wrapper), so the per-channel
    # max over 512 rows equals the max over the 500 real points exactly.
    # The fori_loop (fully unrolled, 4 trips) bounds the live range of each
    # (Bt*512, 256) intermediate to one chunk; every chunk's (Bt, 256) max is
    # written straight into the (Bt, 1024) VMEM scratch.
    def chunk_body(ci, carry):
        c = pl.multiple_of(ci * C3_CHUNK, C3_CHUNK)
        t3c = t3[:, pl.ds(c, C3_CHUNK)]
        y = jnp.dot(h, w3[:, pl.ds(c, C3_CHUNK)],
                    preferred_element_type=jnp.float32)
        y = jnp.maximum(y.astype(t3c.dtype) + t3c, 0.0)      # bf16 on v6e/v7x
        y = y.reshape(Bt, N_PAD, C3_CHUNK)
        g_ref[:, pl.ds(c, C3_CHUNK)] = jnp.max(y, axis=1).astype(jnp.bfloat16)
        return carry

    jax.lax.fori_loop(0, C3 // C3_CHUNK, chunk_body, 0, unroll=True)

    # ---- FC head: all Bt rows at once on the MXU (bf16 in / f32 acc); the BN
    # scale is folded into w4/w5 and the scale + identity into w6/t6.
    g = g_ref[...]
    g = jnp.maximum(jnp.dot(g, w4[...], preferred_element_type=jnp.float32)
                    + t4[...], 0.0).astype(jnp.bfloat16)
    g = jnp.maximum(jnp.dot(g, w5[...], preferred_element_type=jnp.float32)
                    + t5[...], 0.0).astype(jnp.bfloat16)
    # t6 already contains the flattened 3x3 identity on lanes 0/4/8; lanes >= 9
    # are padding and are sliced off by the wrapper.
    out_ref[...] = (jnp.dot(g, w6[...], preferred_element_type=jnp.float32)
                    + t6[...])


def _const_spec(shape):
    # Whole-array block, same block for every grid step (weights are constant).
    # TODO(synk): pipeline_mode=pl.Buffered(1) would single-buffer these and
    #             save ~2 MiB VMEM on v7x; left default-buffered for portability.
    return pl.BlockSpec(shape, lambda b: (0,) * len(shape))


def _pick_batch_tile(B, batch_tile):
    if B <= 8:
        return B                                   # single step, full-array block
    bt = max(8, (min(batch_tile, B) // 8) * 8)     # sublane-aligned batch tile
    # keep >= 2 grid steps so the "parallel" batch axis can feed both v7x
    # TensorCores: largest multiple of 8 that still leaves >= 2 steps.
    bt = min(bt, max(8, ((B - 1) // 8) * 8))
    return bt


def stn_forward(x_ncw, params, batch_tile=8, conv3_epilogue_dtype=None):
    """x_ncw: (B, 3, N_POINTS) float32  ->  (B, 3, 3) float32."""
    if conv3_epilogue_dtype is None:
        conv3_epilogue_dtype = _default_conv3_epilogue_dtype()

    B = x_ncw.shape[0]
    # NOTE(v5e): batch_tile=16 amortizes per-step overhead further and still
    # fits the f32 per-chunk intermediate comfortably in 128 MiB VMEM.
    Bt = _pick_batch_tile(B, batch_tile)
    B_pad = ((B + Bt - 1) // Bt) * Bt
    n_steps = B_pad // Bt

    # Glue: points-major layout; zero-pad channels 3->8 (layer-1 MXU dot);
    # edge-pad points 500->512 by replicating the last real point (makes the
    # max-pool over 512 rows exact with no in-kernel mask); edge-pad the batch
    # (padded rows are sliced off afterwards).  Flatten to (B_pad*N_PAD, 8) so
    # no in-kernel reshape of the input is needed.
    x = jnp.transpose(x_ncw, (0, 2, 1)).astype(jnp.float32)              # (B, N, 3)
    x = jnp.pad(x, ((0, 0), (0, 0), (0, C_IN_PAD - N_DIM)))              # chans -> 8
    x = jnp.pad(x, ((0, B_pad - B), (0, N_PAD - N_POINTS), (0, 0)), mode="edge")
    x = x.reshape(B_pad * N_PAD, C_IN_PAD).astype(jnp.bfloat16)

    # Fold BN scale into the weights so in-kernel epilogues are shift+ReLU only.
    (w1, t1), (w2, t2), (w3, t3), (w4, t4), (w5, t5), (w6, t6) = \
        [(w * s, t) for (w, s, t) in params]

    # layer 1: pad input channels 3 -> 8 with zeros (they contribute nothing).
    w1p = jnp.pad(w1, ((0, C_IN_PAD - N_DIM), (0, 0)))

    # fc3: pad outputs 9 -> 128 lanes (lane-dense matmul + store) and fold the
    # flattened 3x3 identity into the shift.
    eye_flat = jnp.eye(N_DIM, dtype=jnp.float32).reshape(1, N_DIM * N_DIM)
    pad9 = OUT_PAD - N_DIM * N_DIM
    w6p = jnp.pad(w6, ((0, 0), (0, pad9)))
    t6p = jnp.pad(t6 + eye_flat, ((0, 0), (0, pad9)))

    flat = [w1p.astype(jnp.bfloat16), t1,
            w2.astype(jnp.bfloat16), t2,
            w3.astype(jnp.bfloat16), t3.astype(conv3_epilogue_dtype),
            w4.astype(jnp.bfloat16), t4,
            w5.astype(jnp.bfloat16), t5,
            w6p.astype(jnp.bfloat16), t6p]

    in_specs = [pl.BlockSpec((Bt * N_PAD, C_IN_PAD), lambda b: (b, 0))]
    in_specs += [_const_spec(a.shape) for a in flat]

    out = pl.pallas_call(
        stn_kernel,
        out_shape=jax.ShapeDtypeStruct((B_pad, OUT_PAD), jnp.float32),
        grid=(n_steps,),
        in_specs=in_specs,
        out_specs=pl.BlockSpec((Bt, OUT_PAD), lambda b: (b, 0)),
        scratch_shapes=[pltpu.VMEM((Bt, C3), jnp.bfloat16)],
        compiler_params=pltpu.CompilerParams(
            dimension_semantics=("parallel",),
            vmem_limit_bytes=32 * 1024 * 1024),
    )(x, *flat)

    return out[:B, :N_DIM * N_DIM].reshape(B, N_DIM, N_DIM)


# ----------------------------------------------------------------------------
# Deterministic parameter init (shapes from STN.__init__) with (bias, BN)
# folded into a per-channel scale/shift pair.
# ----------------------------------------------------------------------------
def make_params(key):
    dims = [(N_DIM, C1), (C1, C2), (C2, C3),            # conv1..conv3 (1x1)
            (C3, 512), (512, 256), (256, N_DIM ** 2)]   # fc1..fc3
    has_bn = [True, True, True, True, True, False]

    params = []
    for (cin, cout), bn in zip(dims, has_bn):
        key, kw, kb, kg, kbe, km, kv = jax.random.split(key, 7)
        w = jax.random.normal(kw, (cin, cout), jnp.float32) * (1.0 / np.sqrt(cin))
        b = jax.random.normal(kb, (cout,), jnp.float32) * 0.1
        if bn:
            gamma = 1.0 + 0.1 * jax.random.normal(kg, (cout,), jnp.float32)
            beta = 0.1 * jax.random.normal(kbe, (cout,), jnp.float32)
            mean = 0.1 * jax.random.normal(km, (cout,), jnp.float32)
            var = 0.5 + jax.random.uniform(kv, (cout,), jnp.float32)
            scale = gamma / jnp.sqrt(var + BN_EPS)
            shift = (b - mean) * scale + beta
        else:
            scale = jnp.ones((cout,), jnp.float32)
            shift = b
        params.append((w, scale.reshape(1, cout), shift.reshape(1, cout)))
    return params


# Pure-f32 reference (mirrors the PyTorch forward, BN in eval mode).
def stn_reference(x_ncw, params):
    h = jnp.transpose(x_ncw, (0, 2, 1)).astype(jnp.float32)          # (B, N, 3)
    for (w, s, t) in params[:3]:
        h = jnp.maximum(jnp.dot(h, w) * s + t, 0.0)
    g = jnp.max(h, axis=1)                                           # (B, 1024)
    for (w, s, t) in params[3:5]:
        g = jnp.maximum(jnp.dot(g, w) * s + t, 0.0)
    w, s, t = params[5]
    y = jnp.dot(g, w) * s + t
    y = y + jnp.eye(N_DIM, dtype=y.dtype).reshape(1, N_DIM * N_DIM)
    return y.reshape(-1, N_DIM, N_DIM)


# Reference mirroring the kernel's mixed precision (folded bf16 weights, bf16
# MXU operands / f32 accumulation, conv3 epilogue dtype) for a tight check.
def stn_reference_mixed(x_ncw, params, conv3_epilogue_dtype=jnp.bfloat16):
    bf = jnp.bfloat16

    def mm(a, w):
        return jnp.dot(a.astype(bf), w.astype(bf),
                       preferred_element_type=jnp.float32)

    (w1, t1), (w2, t2), (w3, t3), (w4, t4), (w5, t5), (w6, t6) = \
        [(w * s, t) for (w, s, t) in params]

    h = jnp.transpose(x_ncw, (0, 2, 1))                              # (B, N, 3)
    h = jnp.maximum(mm(h, w1) + t1, 0.0).astype(bf)
    h = jnp.maximum(mm(h, w2) + t2, 0.0).astype(bf)
    y = mm(h, w3)
    y = jnp.maximum(y.astype(conv3_epilogue_dtype)
                    + t3.astype(conv3_epilogue_dtype), 0.0)
    g = jnp.max(y, axis=1).astype(bf)                                # (B, 1024)
    g = jnp.maximum(mm(g, w4) + t4, 0.0).astype(bf)
    g = jnp.maximum(mm(g, w5) + t5, 0.0).astype(bf)
    out = mm(g, w6) + t6
    out = out + jnp.eye(N_DIM, dtype=jnp.float32).reshape(1, N_DIM * N_DIM)
    return out.reshape(-1, N_DIM, N_DIM)


if __name__ == "__main__":
    key = jax.random.PRNGKey(0)
    kx, kp = jax.random.split(key)

    B = 2
    x = jax.random.normal(kx, (B, N_DIM, N_POINTS), jnp.float32)  # NCW, like torch
    params = make_params(kp)

    ep_dtype = _default_conv3_epilogue_dtype()
    out = stn_forward(x, params, conv3_epilogue_dtype=ep_dtype)
    out = jax.block_until_ready(out)
    assert out.shape == (B, N_DIM, N_DIM)

    # Check against a reference using the same mixed precision as the kernel.
    ref_mixed = stn_reference_mixed(x, params, conv3_epilogue_dtype=ep_dtype)
    np.testing.assert_allclose(np.asarray(out), np.asarray(ref_mixed),
                               rtol=3e-2, atol=3e-2)

    # Loose sanity check against the full-f32 reference (bf16 rounding error).
    ref_f32 = stn_reference(x, params)
    np.testing.assert_allclose(np.asarray(out), np.asarray(ref_f32),
                               rtol=2e-1, atol=2e-1)

    print("KERNEL_OK")
</pallas_src>

<mosaic_0001>
module attributes {stable_mosaic.version = 11 : i64} {
  func.func @stn_kernel(%arg0: i32, %arg1: memref<1024x8xbf16, #tpu.memory_space<vmem>>, %arg2: memref<8x64xbf16, #tpu.memory_space<vmem>>, %arg3: memref<1x64xf32, #tpu.memory_space<vmem>>, %arg4: memref<64x128xbf16, #tpu.memory_space<vmem>>, %arg5: memref<1x128xf32, #tpu.memory_space<vmem>>, %arg6: memref<128x1024xbf16, #tpu.memory_space<vmem>>, %arg7: memref<1x1024xbf16, #tpu.memory_space<vmem>>, %arg8: memref<1024x512xbf16, #tpu.memory_space<vmem>>, %arg9: memref<1x512xf32, #tpu.memory_space<vmem>>, %arg10: memref<512x256xbf16, #tpu.memory_space<vmem>>, %arg11: memref<1x256xf32, #tpu.memory_space<vmem>>, %arg12: memref<256x128xbf16, #tpu.memory_space<vmem>>, %arg13: memref<1x128xf32, #tpu.memory_space<vmem>>, %arg14: memref<2x128xf32, #tpu.memory_space<vmem>>, %arg15: memref<2x1024xbf16, #tpu.memory_space<vmem>>) attributes {dimension_semantics = [#tpu.dimension_semantics<parallel>], iteration_bounds = array<i64: 1>, scalar_prefetch = 0 : i64, scratch_operands = 1 : i64, tpu.core_type = #tpu.core_type<tc>, window_params = [{transform_indices = @transform_0, window_bounds = array<i64: 1024, 8>}, {pipeline_mode = #tpu.pipeline_mode<synchronous>, transform_indices = @transform_1, window_bounds = array<i64: 8, 64>}, {pipeline_mode = #tpu.pipeline_mode<synchronous>, transform_indices = @transform_2, window_bounds = array<i64: 1, 64>}, {pipeline_mode = #tpu.pipeline_mode<synchronous>, transform_indices = @transform_3, window_bounds = array<i64: 64, 128>}, {pipeline_mode = #tpu.pipeline_mode<synchronous>, transform_indices = @transform_4, window_bounds = array<i64: 1, 128>}, {pipeline_mode = #tpu.pipeline_mode<synchronous>, transform_indices = @transform_5, window_bounds = array<i64: 128, 1024>}, {pipeline_mode = #tpu.pipeline_mode<synchronous>, transform_indices = @transform_6, window_bounds = array<i64: 1, 1024>}, {pipeline_mode = #tpu.pipeline_mode<synchronous>, transform_indices = @transform_7, window_bounds = array<i64: 1024, 512>}, {pipeline_mode = #tpu.pipeline_mode<synchronous>, transform_indices = @transform_8, window_bounds = array<i64: 1, 512>}, {pipeline_mode = #tpu.pipeline_mode<synchronous>, transform_indices = @transform_9, window_bounds = array<i64: 512, 256>}, {pipeline_mode = #tpu.pipeline_mode<synchronous>, transform_indices = @transform_10, window_bounds = array<i64: 1, 256>}, {pipeline_mode = #tpu.pipeline_mode<synchronous>, transform_indices = @transform_11, window_bounds = array<i64: 256, 128>}, {pipeline_mode = #tpu.pipeline_mode<synchronous>, transform_indices = @transform_12, window_bounds = array<i64: 1, 128>}, {transform_indices = @transform_13, window_bounds = array<i64: 2, 128>}]} {
    %c0 = arith.constant 0 : index
    %c0_0 = arith.constant 0 : index
    %0 = vector.load %arg1[%c0, %c0_0] : memref<1024x8xbf16, #tpu.memory_space<vmem>>, vector<1024x8xbf16>
    %c0_1 = arith.constant 0 : index
    %c0_2 = arith.constant 0 : index
    %1 = vector.load %arg2[%c0_1, %c0_2] : memref<8x64xbf16, #tpu.memory_space<vmem>>, vector<8x64xbf16>
    %cst = arith.constant dense<0.000000e+00> : vector<1024x64xf32>
    %2 = tpu.matmul %0, %1, %cst {dimension_numbers = #tpu.dot_dimension_numbers<[1], [0], [0], [1], [0, 0, 1, 1], [], []>} : vector<1024x8xbf16>, vector<8x64xbf16>, vector<1024x64xf32> -> vector<1024x64xf32>
    %c0_3 = arith.constant 0 : index
    %c0_4 = arith.constant 0 : index
    %3 = vector.load %arg3[%c0_3, %c0_4] : memref<1x64xf32, #tpu.memory_space<vmem>>, vector<1x64xf32>
    %4 = vector.broadcast %3 : vector<1x64xf32> to vector<1024x64xf32>
    %5 = arith.addf %2, %4 : vector<1024x64xf32>
    %cst_5 = arith.constant 0.000000e+00 : f32
    %6 = vector.broadcast %cst_5 : f32 to vector<1024x64xf32>
    %7 = arith.maximumf %5, %6 : vector<1024x64xf32>
    %8 = arith.truncf %7 : vector<1024x64xf32> to vector<1024x64xbf16>
    %c0_6 = arith.constant 0 : index
    %c0_7 = arith.constant 0 : index
    %9 = vector.load %arg4[%c0_6, %c0_7] : memref<64x128xbf16, #tpu.memory_space<vmem>>, vector<64x128xbf16>
    %cst_8 = arith.constant dense<0.000000e+00> : vector<1024x128xf32>
    %10 = tpu.matmul %8, %9, %cst_8 {dimension_numbers = #tpu.dot_dimension_numbers<[1], [0], [0], [1], [0, 0, 1, 1], [], []>} : vector<1024x64xbf16>, vector<64x128xbf16>, vector<1024x128xf32> -> vector<1024x128xf32>
    %c0_9 = arith.constant 0 : index
    %c0_10 = arith.constant 0 : index
    %11 = vector.load %arg5[%c0_9, %c0_10] : memref<1x128xf32, #tpu.memory_space<vmem>>, vector<1x128xf32>
    %12 = vector.broadcast %11 : vector<1x128xf32> to vector<1024x128xf32>
    %13 = arith.addf %10, %12 : vector<1024x128xf32>
    %cst_11 = arith.constant 0.000000e+00 : f32
    %14 = vector.broadcast %cst_11 : f32 to vector<1024x128xf32>
    %15 = arith.maximumf %13, %14 : vector<1024x128xf32>
    %16 = arith.truncf %15 : vector<1024x128xf32> to vector<1024x128xbf16>
    %c0_i32 = arith.constant 0 : i32
    %c256_i32 = arith.constant 256 : i32
    %17 = arith.muli %c0_i32, %c256_i32 : i32
    %18 = tpu.assume_multiple %17, 256 : i32
    %c0_12 = arith.constant 0 : index
    %19 = arith.index_cast %18 : i32 to index
    %20 = vector.load %arg7[%c0_12, %19] : memref<1x1024xbf16, #tpu.memory_space<vmem>>, vector<1x256xbf16>
    %c0_13 = arith.constant 0 : index
    %21 = arith.index_cast %18 : i32 to index
    %22 = vector.load %arg6[%c0_13, %21] : memref<128x1024xbf16, #tpu.memory_space<vmem>>, vector<128x256xbf16>
    %cst_14 = arith.constant dense<0.000000e+00> : vector<1024x256xf32>
    %23 = tpu.matmul %16, %22, %cst_14 {dimension_numbers = #tpu.dot_dimension_numbers<[1], [0], [0], [1], [0, 0, 1, 1], [], []>} : vector<1024x128xbf16>, vector<128x256xbf16>, vector<1024x256xf32> -> vector<1024x256xf32>
    %24 = arith.truncf %23 : vector<1024x256xf32> to vector<1024x256xbf16>
    %25 = vector.broadcast %20 : vector<1x256xbf16> to vector<1024x256xbf16>
    %26 = arith.addf %24, %25 : vector<1024x256xbf16>
    %cst_15 = arith.constant 0.000000e+00 : bf16
    %27 = vector.broadcast %cst_15 : bf16 to vector<1024x256xbf16>
    %28 = arith.maximumf %26, %27 : vector<1024x256xbf16>
    %29 = vector.shape_cast %28 : vector<1024x256xbf16> to vector<2x512x256xbf16>
    %cst_16 = arith.constant dense<0xFF80> : vector<2x256xbf16>
    %30 = vector.multi_reduction <maximumf>, %29, %cst_16 [1] : vector<2x512x256xbf16> to vector<2x256xbf16>
    %c0_17 = arith.constant 0 : index
    %31 = arith.index_cast %18 : i32 to index
    %32 = vector.load %arg15[%c0_17, %31] : memref<2x1024xbf16, #tpu.memory_space<vmem>>, vector<2x256xbf16>
    tpu.vector_store %arg15[%c0_17, %31], %30 {strides = array<i32>} : memref<2x1024xbf16, #tpu.memory_space<vmem>>, vector<2x256xbf16>,
    %c1_i32 = arith.constant 1 : i32
    %c256_i32_18 = arith.constant 256 : i32
    %33 = arith.muli %c1_i32, %c256_i32_18 : i32
    %34 = tpu.assume_multiple %33, 256 : i32
    %c0_19 = arith.constant 0 : index
    %35 = arith.index_cast %34 : i32 to index
    %36 = vector.load %arg7[%c0_19, %35] : memref<1x1024xbf16, #tpu.memory_space<vmem>>, vector<1x256xbf16>
    %c0_20 = arith.constant 0 : index
    %37 = arith.index_cast %34 : i32 to index
    %38 = vector.load %arg6[%c0_20, %37] : memref<128x1024xbf16, #tpu.memory_space<vmem>>, vector<128x256xbf16>
    %cst_21 = arith.constant dense<0.000000e+00> : vector<1024x256xf32>
    %39 = tpu.matmul %16, %38, %cst_21 {dimension_numbers = #tpu.dot_dimension_numbers<[1], [0], [0], [1], [0, 0, 1, 1], [], []>} : vector<1024x128xbf16>, vector<128x256xbf16>, vector<1024x256xf32> -> vector<1024x256xf32>
    %40 = arith.truncf %39 : vector<1024x256xf32> to vector<1024x256xbf16>
    %41 = vector.broadcast %36 : vector<1x256xbf16> to vector<1024x256xbf16>
    %42 = arith.addf %40, %41 : vector<1024x256xbf16>
    %cst_22 = arith.constant 0.000000e+00 : bf16
    %43 = vector.broadcast %cst_22 : bf16 to vector<1024x256xbf16>
    %44 = arith.maximumf %42, %43 : vector<1024x256xbf16>
    %45 = vector.shape_cast %44 : vector<1024x256xbf16> to vector<2x512x256xbf16>
    %cst_23 = arith.constant dense<0xFF80> : vector<2x256xbf16>
    %46 = vector.multi_reduction <maximumf>, %45, %cst_23 [1] : vector<2x512x256xbf16> to vector<2x256xbf16>
    %c0_24 = arith.constant 0 : index
    %47 = arith.index_cast %34 : i32 to index
    %48 = vector.load %arg15[%c0_24, %47] : memref<2x1024xbf16, #tpu.memory_space<vmem>>, vector<2x256xbf16>
    tpu.vector_store %arg15[%c0_24, %47], %46 {strides = array<i32>} : memref<2x1024xbf16, #tpu.memory_space<vmem>>, vector<2x256xbf16>,
    %c2_i32 = arith.constant 2 : i32
    %c256_i32_25 = arith.constant 256 : i32
    %49 = arith.muli %c2_i32, %c256_i32_25 : i32
    %50 = tpu.assume_multiple %49, 256 : i32
    %c0_26 = arith.constant 0 : index
    %51 = arith.index_cast %50 : i32 to index
    %52 = vector.load %arg7[%c0_26, %51] : memref<1x1024xbf16, #tpu.memory_space<vmem>>, vector<1x256xbf16>
    %c0_27 = arith.constant 0 : index
    %53 = arith.index_cast %50 : i32 to index
    %54 = vector.load %arg6[%c0_27, %53] : memref<128x1024xbf16, #tpu.memory_space<vmem>>, vector<128x256xbf16>
    %cst_28 = arith.constant dense<0.000000e+00> : vector<1024x256xf32>
    %55 = tpu.matmul %16, %54, %cst_28 {dimension_numbers = #tpu.dot_dimension_numbers<[1], [0], [0], [1], [0, 0, 1, 1], [], []>} : vector<1024x128xbf16>, vector<128x256xbf16>, vector<1024x256xf32> -> vector<1024x256xf32>
    %56 = arith.truncf %55 : vector<1024x256xf32> to vector<1024x256xbf16>
    %57 = vector.broadcast %52 : vector<1x256xbf16> to vector<1024x256xbf16>
    %58 = arith.addf %56, %57 : vector<1024x256xbf16>
    %cst_29 = arith.constant 0.000000e+00 : bf16
    %59 = vector.broadcast %cst_29 : bf16 to vector<1024x256xbf16>
    %60 = arith.maximumf %58, %59 : vector<1024x256xbf16>
    %61 = vector.shape_cast %60 : vector<1024x256xbf16> to vector<2x512x256xbf16>
    %cst_30 = arith.constant dense<0xFF80> : vector<2x256xbf16>
    %62 = vector.multi_reduction <maximumf>, %61, %cst_30 [1] : vector<2x512x256xbf16> to vector<2x256xbf16>
    %c0_31 = arith.constant 0 : index
    %63 = arith.index_cast %50 : i32 to index
    %64 = vector.load %arg15[%c0_31, %63] : memref<2x1024xbf16, #tpu.memory_space<vmem>>, vector<2x256xbf16>
    tpu.vector_store %arg15[%c0_31, %63], %62 {strides = array<i32>} : memref<2x1024xbf16, #tpu.memory_space<vmem>>, vector<2x256xbf16>,
    %c3_i32 = arith.constant 3 : i32
    %c256_i32_32 = arith.constant 256 : i32
    %65 = arith.muli %c3_i32, %c256_i32_32 : i32
    %66 = tpu.assume_multiple %65, 256 : i32
    %c0_33 = arith.constant 0 : index
    %67 = arith.index_cast %66 : i32 to index
    %68 = vector.load %arg7[%c0_33, %67] : memref<1x1024xbf16, #tpu.memory_space<vmem>>, vector<1x256xbf16>
    %c0_34 = arith.constant 0 : index
    %69 = arith.index_cast %66 : i32 to index
    %70 = vector.load %arg6[%c0_34, %69] : memref<128x1024xbf16, #tpu.memory_space<vmem>>, vector<128x256xbf16>
    %cst_35 = arith.constant dense<0.000000e+00> : vector<1024x256xf32>
    %71 = tpu.matmul %16, %70, %cst_35 {dimension_numbers = #tpu.dot_dimension_numbers<[1], [0], [0], [1], [0, 0, 1, 1], [], []>} : vector<1024x128xbf16>, vector<128x256xbf16>, vector<1024x256xf32> -> vector<1024x256xf32>
    %72 = arith.truncf %71 : vector<1024x256xf32> to vector<1024x256xbf16>
    %73 = vector.broadcast %68 : vector<1x256xbf16> to vector<1024x256xbf16>
    %74 = arith.addf %72, %73 : vector<1024x256xbf16>
    %cst_36 = arith.constant 0.000000e+00 : bf16
    %75 = vector.broadcast %cst_36 : bf16 to vector<1024x256xbf16>
    %76 = arith.maximumf %74, %75 : vector<1024x256xbf16>
    %77 = vector.shape_cast %76 : vector<1024x256xbf16> to vector<2x512x256xbf16>
    %cst_37 = arith.constant dense<0xFF80> : vector<2x256xbf16>
    %78 = vector.multi_reduction <maximumf>, %77, %cst_37 [1] : vector<2x512x256xbf16> to vector<2x256xbf16>
    %c0_38 = arith.constant 0 : index
    %79 = arith.index_cast %66 : i32 to index
    %80 = vector.load %arg15[%c0_38, %79] : memref<2x1024xbf16, #tpu.memory_space<vmem>>, vector<2x256xbf16>
    tpu.vector_store %arg15[%c0_38, %79], %78 {strides = array<i32>} : memref<2x1024xbf16, #tpu.memory_space<vmem>>, vector<2x256xbf16>,
    %c4_i32 = arith.constant 4 : i32
    %c0_39 = arith.constant 0 : index
    %c0_40 = arith.constant 0 : index
    %81 = vector.load %arg15[%c0_39, %c0_40] : memref<2x1024xbf16, #tpu.memory_space<vmem>>, vector<2x1024xbf16>
    %c0_41 = arith.constant 0 : index
    %c0_42 = arith.constant 0 : index
    %82 = vector.load %arg8[%c0_41, %c0_42] : memref<1024x512xbf16, #tpu.memory_space<vmem>>, vector<1024x512xbf16>
    %cst_43 = arith.constant dense<0.000000e+00> : vector<2x512xf32>
    %83 = tpu.matmul %81, %82, %cst_43 {dimension_numbers = #tpu.dot_dimension_numbers<[1], [0], [0], [1], [0, 0, 1, 1], [], []>} : vector<2x1024xbf16>, vector<1024x512xbf16>, vector<2x512xf32> -> vector<2x512xf32>
    %c0_44 = arith.constant 0 : index
    %c0_45 = arith.constant 0 : index
    %84 = vector.load %arg9[%c0_44, %c0_45] : memref<1x512xf32, #tpu.memory_space<vmem>>, vector<1x512xf32>
    %85 = vector.broadcast %84 : vector<1x512xf32> to vector<2x512xf32>
    %86 = arith.addf %83, %85 : vector<2x512xf32>
    %cst_46 = arith.constant 0.000000e+00 : f32
    %87 = vector.broadcast %cst_46 : f32 to vector<2x512xf32>
    %88 = arith.maximumf %86, %87 : vector<2x512xf32>
    %89 = arith.truncf %88 : vector<2x512xf32> to vector<2x512xbf16>
    %c0_47 = arith.constant 0 : index
    %c0_48 = arith.constant 0 : index
    %90 = vector.load %arg10[%c0_47, %c0_48] : memref<512x256xbf16, #tpu.memory_space<vmem>>, vector<512x256xbf16>
    %cst_49 = arith.constant dense<0.000000e+00> : vector<2x256xf32>
    %91 = tpu.matmul %89, %90, %cst_49 {dimension_numbers = #tpu.dot_dimension_numbers<[1], [0], [0], [1], [0, 0, 1, 1], [], []>} : vector<2x512xbf16>, vector<512x256xbf16>, vector<2x256xf32> -> vector<2x256xf32>
    %c0_50 = arith.constant 0 : index
    %c0_51 = arith.constant 0 : index
    %92 = vector.load %arg11[%c0_50, %c0_51] : memref<1x256xf32, #tpu.memory_space<vmem>>, vector<1x256xf32>
    %93 = vector.broadcast %92 : vector<1x256xf32> to vector<2x256xf32>
    %94 = arith.addf %91, %93 : vector<2x256xf32>
    %cst_52 = arith.constant 0.000000e+00 : f32
    %95 = vector.broadcast %cst_52 : f32 to vector<2x256xf32>
    %96 = arith.maximumf %94, %95 : vector<2x256xf32>
    %97 = arith.truncf %96 : vector<2x256xf32> to vector<2x256xbf16>
    %c0_53 = arith.constant 0 : index
    %c0_54 = arith.constant 0 : index
    %98 = vector.load %arg12[%c0_53, %c0_54] : memref<256x128xbf16, #tpu.memory_space<vmem>>, vector<256x128xbf16>
    %cst_55 = arith.constant dense<0.000000e+00> : vector<2x128xf32>
    %99 = tpu.matmul %97, %98, %cst_55 {dimension_numbers = #tpu.dot_dimension_numbers<[1], [0], [0], [1], [0, 0, 1, 1], [], []>} : vector<2x256xbf16>, vector<256x128xbf16>, vector<2x128xf32> -> vector<2x128xf32>
    %c0_56 = arith.constant 0 : index
    %c0_57 = arith.constant 0 : index
    %100 = vector.load %arg13[%c0_56, %c0_57] : memref<1x128xf32, #tpu.memory_space<vmem>>, vector<1x128xf32>
    %101 = vector.broadcast %100 : vector<1x128xf32> to vector<2x128xf32>
    %102 = arith.addf %99, %101 : vector<2x128xf32>
    %c0_58 = arith.constant 0 : index
    %c0_59 = arith.constant 0 : index
    %103 = vector.load %arg14[%c0_58, %c0_59] : memref<2x128xf32, #tpu.memory_space<vmem>>, vector<2x128xf32>
    tpu.vector_store %arg14[%c0_58, %c0_59], %102 {strides = array<i32>} : memref<2x128xf32, #tpu.memory_space<vmem>>, vector<2x128xf32>,
    return
  }
  func.func @transform_0(%arg0: i32) -> (i32, i32) {
    %c0_i32 = arith.constant 0 : i32
    %c0_i32_0 = arith.constant 0 : i32
    return %arg0, %c0_i32 : i32, i32
  }
  func.func @transform_1(%arg0: i32) -> (i32, i32) {
    %c0_i32 = arith.constant 0 : i32
    %c0_i32_0 = arith.constant 0 : i32
    %c0_i32_1 = arith.constant 0 : i32
    return %c0_i32, %c0_i32_0 : i32, i32
  }
  func.func @transform_2(%arg0: i32) -> (i32, i32) {
    %c0_i32 = arith.constant 0 : i32
    %c0_i32_0 = arith.constant 0 : i32
    %c0_i32_1 = arith.constant 0 : i32
    return %c0_i32, %c0_i32_0 : i32, i32
  }
  func.func @transform_3(%arg0: i32) -> (i32, i32) {
    %c0_i32 = arith.constant 0 : i32
    %c0_i32_0 = arith.constant 0 : i32
    %c0_i32_1 = arith.constant 0 : i32
    return %c0_i32, %c0_i32_0 : i32, i32
  }
  func.func @transform_4(%arg0: i32) -> (i32, i32) {
    %c0_i32 = arith.constant 0 : i32
    %c0_i32_0 = arith.constant 0 : i32
    %c0_i32_1 = arith.constant 0 : i32
    return %c0_i32, %c0_i32_0 : i32, i32
  }
  func.func @transform_5(%arg0: i32) -> (i32, i32) {
    %c0_i32 = arith.constant 0 : i32
    %c0_i32_0 = arith.constant 0 : i32
    %c0_i32_1 = arith.constant 0 : i32
    return %c0_i32, %c0_i32_0 : i32, i32
  }
  func.func @transform_6(%arg0: i32) -> (i32, i32) {
    %c0_i32 = arith.constant 0 : i32
    %c0_i32_0 = arith.constant 0 : i32
    %c0_i32_1 = arith.constant 0 : i32
    return %c0_i32, %c0_i32_0 : i32, i32
  }
  func.func @transform_7(%arg0: i32) -> (i32, i32) {
    %c0_i32 = arith.constant 0 : i32
    %c0_i32_0 = arith.constant 0 : i32
    %c0_i32_1 = arith.constant 0 : i32
    return %c0_i32, %c0_i32_0 : i32, i32
  }
  func.func @transform_8(%arg0: i32) -> (i32, i32) {
    %c0_i32 = arith.constant 0 : i32
    %c0_i32_0 = arith.constant 0 : i32
    %c0_i32_1 = arith.constant 0 : i32
    return %c0_i32, %c0_i32_0 : i32, i32
  }
  func.func @transform_9(%arg0: i32) -> (i32, i32) {
    %c0_i32 = arith.constant 0 : i32
    %c0_i32_0 = arith.constant 0 : i32
    %c0_i32_1 = arith.constant 0 : i32
    return %c0_i32, %c0_i32_0 : i32, i32
  }
  func.func @transform_10(%arg0: i32) -> (i32, i32) {
    %c0_i32 = arith.constant 0 : i32
    %c0_i32_0 = arith.constant 0 : i32
    %c0_i32_1 = arith.constant 0 : i32
    return %c0_i32, %c0_i32_0 : i32, i32
  }
  func.func @transform_11(%arg0: i32) -> (i32, i32) {
    %c0_i32 = arith.constant 0 : i32
    %c0_i32_0 = arith.constant 0 : i32
    %c0_i32_1 = arith.constant 0 : i32
    return %c0_i32, %c0_i32_0 : i32, i32
  }
  func.func @transform_12(%arg0: i32) -> (i32, i32) {
    %c0_i32 = arith.constant 0 : i32
    %c0_i32_0 = arith.constant 0 : i32
    %c0_i32_1 = arith.constant 0 : i32
    return %c0_i32, %c0_i32_0 : i32, i32
  }
  func.func @transform_13(%arg0: i32) -> (i32, i32) {
    %c0_i32 = arith.constant 0 : i32
    %c0_i32_0 = arith.constant 0 : i32
    return %arg0, %c0_i32 : i32, i32
  }
}

</mosaic_0001>

<bundles_post_ra>
// kernel: tpu_custom_call.1
= control target key start
LH: loop header
LB: loop body
LE: loop exit
PB: predicated region body
PF: predicated region fallthrough
CT: control target
= control target key end

     0   :  { %18 = vsyncpa [#allocation4], 0  ;;  %s15760_s0 = inlined_call_operand.vmem [shape: bf16[1024,8], index: 0, kind: input, shape index: {}]   ;;  %s15761_s1 = inlined_call_operand.vmem [shape: bf16[8,64], index: 1, kind: input, shape index: {}]   ;;  %s15762_s2 = inlined_call_operand.hbm [shape: f32[1,64], index: 2, kind: input, shape index: {}]   ;;  %s15763_s3 = inlined_call_operand.vmem [shape: bf16[64,128], index: 3, kind: input, shape index: {}]   ;;  %s15764_s4 = inlined_call_operand.hbm [shape: f32[1,128], index: 4, kind: input, shape index: {}]   ;;  %s15765_s5 = inlined_call_operand.vmem [shape: bf16[128,1024], index: 5, kind: input, shape index: {}]   ;;  %s15766_s6 = inlined_call_operand.vmem [shape: bf16[1,1024], index: 6, kind: input, shape index: {}]   ;;  %s15767_s7 = inlined_call_operand.hbm [shape: bf16[1024,512], index: 7, kind: input, shape index: {}]   ;;  %s15768_s8 = inlined_call_operand.vmem [shape: f32[1,512], index: 8, kind: input, shape index: {}]   ;;  %s15769_s9 = inlined_call_operand.hbm [shape: bf16[512,256], index: 9, kind: input, shape index: {}]   ;;  %s15770_s10 = inlined_call_operand.vmem [shape: f32[1,256], index: 10, kind: input, shape index: {}]   ;;  %s15771_s11 = inlined_call_operand.hbm [shape: bf16[256,128], index: 11, kind: input, shape index: {}]   ;;  %s15772_s12 = inlined_call_operand.vmem [shape: f32[1,128], index: 12, kind: input, shape index: {}]   ;;  %s15773_s13 = inlined_call_operand.hbm [shape: f32[2,128], index: 13, kind: output, shape index: {}]  }
   0x1   :  { %19 = vsyncpa [#allocation7], 0 }
   0x2   :  { %20 = vsyncpa [#allocation10], 0 }
   0x3   :  { %21 = vsyncpa [#allocation5], 0  ;;  %s12714_s25 = smov [#allocation6]   ;;  %s12715_s27 = smov [#allocation9]  }
   0x4   :  { %s44_s26 = sshll.u32 %s12714_s25, 4  ;;  %s71_s28 = sshll.u32 %s12715_s27, 4  ;;  %s45_s26 = int_to_ptr.vmem [resolvable:$true] %s44_s26  ;;  %s12799_s28 = int_to_ptr.vmem [resolvable:$true] %s71_s28 }
   0x5   :  { %s12574_s14 = scalar_lea.hbm %s15764_s4, 16 }
   0x6   :  { %p12575_p0 = scmp.ne.s32.totalorder %s15764_s4, %s12574_s14  ;;  %p12578_p1 = scmp.lt.u32.totalorder %s12574_s14, %s15764_s4 }
   0x8   :  { %p12580_p2 = pnand %p12578_p1, %p12575_p0 }
   0xa   :  { %12583 = shalt.err (!%p12580_p2)
}
   0xb   :  { %s12584_s19 = scalar_lea.vmem %s45_s26, 16  ;;  %s12588_s20 = scalar_lea.vmem %s45_s26, 32 }
   0xc   :  { %p12585_p3 = scmp.ne.s32.totalorder %s45_s26, %s12584_s19  ;;  %p12589_p4 = scmp.lt.s32.totalorder %s45_s26, %s45_s26 }
   0xd   :  { %p12590_p5 = scmp.lt.s32.totalorder %s12588_s20, %s12584_s19 }
   0xf   :  { %p12591_p6 = por %p12590_p5, %p12589_p4 }
  0x11   :  { %p12592_p7 = pnand %p12591_p6, %p12585_p3 }
  0x13   :  { %12595 = shalt.err (!%p12592_p7)
}
  0x14   :  { %47 = dma.hbm_to_vmem [thread:$0]  %s15764_s4, 16, %s45_s26, [#allocation7]  }
  0x15   :  { %s12596_s25 = scalar_lea.hbm %s15769_s9, 8192 }
  0x16   :  { %p12597_p8 = scmp.ne.s32.totalorder %s15769_s9, %s12596_s25  ;;  %p12600_p9 = scmp.lt.u32.totalorder %s12596_s25, %s15769_s9 }
  0x18   :  { %p12602_p10 = pnand %p12600_p9, %p12597_p8 }
  0x1a   :  { %12605 = shalt.err (!%p12602_p10)
}
  0x1b   :  { %s12606_s15 = scalar_lea.vmem %s12799_s28, 8192  ;;  %p12611_p12 = scmp.lt.s32.totalorder %s12799_s28, %s12799_s28 }
  0x1c   :  { %p12607_p11 = scmp.ne.s32.totalorder %s12799_s28, %s12606_s15  ;;  %p12612_p13 = scmp.lt.s32.totalorder %s12606_s15, %s12606_s15 }
  0x1e   :  { %p12613_p0 = por %p12612_p13, %p12611_p12 }
  0x20   :  { %p12614_p1 = pnand %p12613_p0, %p12607_p11 }
  0x22   :  { %12617 = shalt.err (!%p12614_p1)
}
  0x23   :  { %s12716_s4 = smov 128   ;;  %s12717_s26 = smov 8  }
  0x24   :  { %77 = dma.hbm_to_vmem [thread:$0]  %s15769_s9, 8192, %s12799_s28, [#allocation10], %s12716_s4, %s12716_s4, %s12717_s26  }
  0x25   :  { %s12718_s18 = smov [#allocation3]   ;;  %s12719_s20 = smov [#allocation8]  }
  0x26   :  { %s32_s19 = sshll.u32 %s12718_s18, 4  ;;  %s57_s21 = sshll.u32 %s12719_s20, 4  ;;  %s33_s19 = int_to_ptr.vmem [resolvable:$true] %s32_s19  ;;  %s12830_s21 = int_to_ptr.vmem [resolvable:$true] %s57_s21 }
  0x27   :  { %s12618_s24 = scalar_lea.hbm %s15762_s2, 16 }
  0x28   :  { %p12619_p2 = scmp.ne.s32.totalorder %s15762_s2, %s12618_s24  ;;  %p12622_p3 = scmp.lt.u32.totalorder %s12618_s24, %s15762_s2 }
  0x2a   :  { %p12624_p4 = pnand %p12622_p3, %p12619_p2 }
  0x2c   :  { %12627 = shalt.err (!%p12624_p4)
}
  0x2d   :  { %s12628_s9 = scalar_lea.vmem %s33_s19, 16  ;;  %s12632_s28 = scalar_lea.vmem %s33_s19, 32 }
  0x2e   :  { %p12629_p5 = scmp.ne.s32.totalorder %s33_s19, %s12628_s9  ;;  %p12633_p6 = scmp.lt.s32.totalorder %s33_s19, %s33_s19 }
  0x2f   :  { %p12634_p7 = scmp.lt.s32.totalorder %s12632_s28, %s12628_s9 }
  0x31   :  { %p12635_p8 = por %p12634_p7, %p12633_p6 }
  0x33   :  { %p12636_p9 = pnand %p12635_p8, %p12629_p5 }
  0x35   :  { %12639 = shalt.err (!%p12636_p9)
}
  0x36   :  { %35 = dma.hbm_to_vmem [thread:$0]  %s15762_s2, 16, %s33_s19, [#allocation4]  }
  0x37   :  { %s12640_s16 = scalar_lea.hbm %s15767_s7, 32768 }
  0x38   :  { %p12641_p10 = scmp.ne.s32.totalorder %s15767_s7, %s12640_s16  ;;  %p12644_p11 = scmp.lt.u32.totalorder %s12640_s16, %s15767_s7 }
  0x3a   :  { %p12646_p12 = pnand %p12644_p11, %p12641_p10 }
  0x3c   :  { %12649 = shalt.err (!%p12646_p12)
}
  0x3d   :  { %s12650_s23 = scalar_lea.vmem %s12830_s21, 32768  ;;  %p12655_p0 = scmp.lt.s32.totalorder %s12830_s21, %s12830_s21 }
  0x3e   :  { %p12651_p13 = scmp.ne.s32.totalorder %s12830_s21, %s12650_s23  ;;  %p12656_p1 = scmp.lt.s32.totalorder %s12650_s23, %s12650_s23 }
  0x40   :  { %p12657_p2 = por %p12656_p1, %p12655_p0 }
  0x42   :  { %p12658_p3 = pnand %p12657_p2, %p12651_p13 }
  0x44   :  { %12661 = shalt.err (!%p12658_p3)
}
  0x45   :  { %s12720_s2 = smov 256   ;;  %s12721_s19 = smov 16  }
  0x46   :  { %63 = dma.hbm_to_vmem [thread:$0]  %s15767_s7, 32768, %s12830_s21, [#allocation7], %s12720_s2, %s12720_s2, %s12721_s19  }
  0x47   :  { %s12722_s27 = smov [#allocation11]   ;;  %s12662_s28 = scalar_lea.hbm %s15771_s11, 2048 }
  0x48   :  { %s85_s29 = sshll.u32 %s12722_s27, 4  ;;  %p12663_p4 = scmp.ne.s32.totalorder %s15771_s11, %s12662_s28  ;;  %s86_s29 = int_to_ptr.vmem [resolvable:$true] %s85_s29 }
  0x49   :  { %p12666_p5 = scmp.lt.u32.totalorder %s12662_s28, %s15771_s11 }
  0x4b   :  { %p12668_p6 = pnand %p12666_p5, %p12663_p4 }
  0x4d   :  { %12671 = shalt.err (!%p12668_p6)
}
  0x4e   :  { %s12672_s16 = scalar_lea.vmem %s86_s29, 2048  ;;  %p12677_p8 = scmp.lt.s32.totalorder %s86_s29, %s86_s29 }
  0x4f   :  { %p12673_p7 = scmp.ne.s32.totalorder %s86_s29, %s12672_s16  ;;  %p12678_p9 = scmp.lt.s32.totalorder %s12672_s16, %s12672_s16 }
  0x51   :  { %p12679_p10 = por %p12678_p9, %p12677_p8 }
  0x53   :  { %p12680_p11 = pnand %p12679_p10, %p12673_p7 }
  0x55   :  { %12683 = shalt.err (!%p12680_p11)
}
  0x56   :  { %s12723_s7 = smov 64   ;;  %s12724_s21 = smov 4  }
  0x57   :  { %91 = dma.hbm_to_vmem [thread:$0]  %s15771_s11, 2048, %s86_s29, [#allocation10], %s12723_s7, %s12723_s7, %s12724_s21  }
  0x58   :  { %12706 = dma.done.wait [#allocation4], 16  }
  0x59   :  { %12707 = vsyncadd [#allocation4], 4294967280 }
  0x5a   :  { %12708 = dma.done.wait [#allocation7], 32784  }
  0x5b   :  { %12709 = vsyncadd [#allocation7], 4294934512 }
  0x5c   :  { %12710 = dma.done.wait [#allocation10], 10240  }
  0x5d   :  { %12711 = vsyncadd [#allocation10], 4294957056  ;;  %vm759_vm0 = vcmask 1043456   ;;  %vm566_vm1 = vcmask 64512   ;;  %v238_v0 = vld [vmem:[%s15761_s1] sm:$0xf] }
  0x5e   :  { %11990 = vmatprep.subr.msk.bf16.mxu0 %vm759_vm0, %v238_v0  ;;  %v761_v1 = vsel %vm759_vm0, %v238_v0, 0  ;;  %v12007_v2 = vld [vmem:[%s15760_s0] sm:$0xff]   ;;  %11991 = vmatprep.subr.msk.bf16.mxu1 %vm759_vm0, %v238_v0  ;;  %v12008_v3 = vld [vmem:[%s15760_s0 + $0x8] sm:$0xff]   ;;  %v12009_v4 = vld [vmem:[%s15760_s0 + $0x10] sm:$0xff]   ;;  %vm1539_vm2 = vcmask 523264   ;;  %vm3891_vm3 = vcmask 1041409  }
  0x5f   :  { %11689 = vmatpush3.bf16.msra.mxu0 %v761_v1  ;;  %11955 = vmatpush3.bf16.msra.mxu1 %v761_v1  ;;  %v12010_v5 = vld [vmem:[%s15760_s0 + $0x18] sm:$0xff]   ;;  %v12011_v6 = vld [vmem:[%s15760_s0 + $0x20] sm:$0xff]   ;;  %v12012_v7 = vld [vmem:[%s15760_s0 + $0x28] sm:$0xff]   ;;  %s12728_s27 = smov [#allocation12]  }
  0x60   :  { %11690 = vmatprep.mubr.msk.bf16.mxu0 %vm566_vm1, %v12007_v2  ;;  %v12013_v8 = vld [vmem:[%s15760_s0 + $0x30] sm:$0xff]   ;;  %v12014_v9 = vld [vmem:[%s15760_s0 + $0x38] sm:$0xff]   ;;  %v12015_v10 = vld [vmem:[%s15760_s0 + $0x40] sm:$0xff]   ;;  %s10864_s29 = sshll.u32 %s12728_s27, 4  ;;  %s10865_s29 = int_to_ptr.vmem [resolvable:$true] %s10864_s29 }
  0x61   :  { %v12016_v11 = vld [vmem:[%s15760_s0 + $0x48] sm:$0xff]   ;;  %v12017_v12 = vld [vmem:[%s15760_s0 + $0x50] sm:$0xff]   ;;  %v12018_v13 = vld [vmem:[%s15760_s0 + $0x58] sm:$0xff]   ;;  %s12684_s30 = scalar_lea.vmem %s10865_s29, 32  ;;  %p12689_p13 = scmp.lt.s32.totalorder %s10865_s29, %s10865_s29 }
  0x62   :  { %11691 = vmatmul.mubr.msk.bf16.vlgmr.msra.gmra.mrb[0].mxu0 %vm566_vm1, %v12008_v3  ;;  %v12019_v14 = vld [vmem:[%s15760_s0 + $0x60] sm:$0xff]   ;;  %v12052_v16 = vld [vmem:[%s15760_s0 + $0x1a8] sm:$0xff]   ;;  %v12021_v19 = vld [vmem:[%s15760_s0 + $0x70] sm:$0xff]   ;;  %p12685_p12 = scmp.ne.s32.totalorder %s10865_s29, %s12684_s30  ;;  %p12690_p0 = scmp.lt.s32.totalorder %s12684_s30, %s12684_s30 }
  0x63   :  { %11694 = vmatprep.mubr.msk.bf16.mxu0 %vm566_vm1, %v12009_v4  ;;  %v12051_v15 = vld [vmem:[%s15760_s0 + $0x1a0] sm:$0xff]   ;;  %v12020_v18 = vld [vmem:[%s15760_s0 + $0x68] sm:$0xff]   ;;  %v12056_v20 = vld [vmem:[%s15760_s0 + $0x1b0] sm:$0xff]  }
  0x64   :  { %11794 = vmatprep.mubr.msk.bf16.mxu1 %vm566_vm1, %v12051_v15  ;;  %v12053_v17 = vld [vmem:[%s15763_s3] sm:$0xff]   ;;  %v12057_v21 = vld [vmem:[%s15760_s0 + $0x1b8] sm:$0xff]   ;;  %v12060_v24 = vld [vmem:[%s15763_s3 + $0x8] sm:$0xff]   ;;  %p12691_p1 = por %p12690_p0, %p12689_p13 }
  0x65   :  { %11795 = vmatmul.mubr.msk.bf16.vlgmr.msra.gmra.mrb[0].mxu1 %vm566_vm1, %v12052_v16  ;;  %11818 = vmatprep.subr.bf16.mxu1 %v12053_v17  ;;  %v12022_v22 = vld [vmem:[%s15760_s0 + $0x78] sm:$0xff]   ;;  %v12023_v23 = vld [vmem:[%s15760_s0 + $0x80] sm:$0xff]   ;;  %v12062_v26 = vld [vmem:[%s15760_s0 + $0x1c8] sm:$0xff]  }
  0x66   :  { %11819 = vmatpush3.bf16.msra.mxu1 %v12053_v17  ;;  %11798 = vmatprep.mubr.msk.bf16.mxu1 %vm566_vm1, %v12056_v20  ;;  %v12061_v25 = vld [vmem:[%s15760_s0 + $0x1c0] sm:$0xff]   ;;  %v12024_v27 = vld [vmem:[%s15760_s0 + $0x88] sm:$0xff]   ;;  %v12025_v28 = vld [vmem:[%s15760_s0 + $0x90] sm:$0xff]   ;;  %p12692_p2 = pnand %p12691_p1, %p12685_p12 }
  0x67   :  { %11820 = vmatprep.subr.bf16.mxu1 %v12060_v24  ;;  %v12065_v29 = vld [vmem:[%s15760_s0 + $0x1d0] sm:$0xff]   ;;  %v12066_v30 = vld [vmem:[%s15760_s0 + $0x1d8] sm:$0xff]   ;;  %v12027_v33 = vld [vmem:[%s15760_s0 + $0xa0] sm:$0xff]  }
  0x68   :  { %v12067_v31 = vld [vmem:[%s15763_s3 + $0x10] sm:$0xff]   ;;  %v12026_v32 = vld [vmem:[%s15760_s0 + $0x98] sm:$0xff]   ;;  %v12070_v34 = vld [vmem:[%s15760_s0 + $0x1e0] sm:$0xff]  }
  0x69   :  { %v12071_v35 = vld [vmem:[%s15760_s0 + $0x1e8] sm:$0xff]   ;;  %v12072_v36 = vld [vmem:[%s15763_s3 + $0x18] sm:$0xff]   ;;  %v12073_v37 = vld [vmem:[%s15760_s0 + $0x1f0] sm:$0xff]  }
  0x6a   :  { %11695 = vmatmul.mubr.msk.bf16.gmra.mrb[4].mxu0 %vm566_vm1, %v12010_v5  ;;  %11821 = vmatpush3.bf16.msra.mxu1 %v12060_v24  ;;  %v12028_v38 = vld [vmem:[%s15760_s0 + $0xa8] sm:$0xff]   ;;  %v12029_v39 = vld [vmem:[%s15760_s0 + $0xb0] sm:$0xff]   ;;  %v12074_v40 = vld [vmem:[%s15760_s0 + $0x1f8] sm:$0xff]  }
  0x6b   :  { %11698 = vmatprep.mubr.msk.bf16.mxu0 %vm566_vm1, %v12011_v6  ;;  %11822 = vmatprep.subr.bf16.mxu1 %v12067_v31  ;;  %v12030_v41 = vld [vmem:[%s15760_s0 + $0xb8] sm:$0xff]   ;;  %v12031_v42 = vld [vmem:[%s15760_s0 + $0xc0] sm:$0xff]   ;;  %v12032_v43 = vld [vmem:[%s15760_s0 + $0xc8] sm:$0xff]  }
  0x6c   :  { %v12033_v44 = vld [vmem:[%s15760_s0 + $0xd0] sm:$0xff]   ;;  %v12034_v45 = vld [vmem:[%s15760_s0 + $0xd8] sm:$0xff]   ;;  %v13050_v46 = vld [vmem:[%s15765_s5 + $0x8] sm:$0xff] }
  0x6d   :  { %11799 = vmatmul.mubr.msk.bf16.gmra.mrb[4].mxu1 %vm566_vm1, %v12057_v21  ;;  %v13055_v47 = vld [vmem:[%s15765_s5 + $0x28] sm:$0xff]  ;;  %v12035_v48 = vld [vmem:[%s15760_s0 + $0xe0] sm:$0xff]   ;;  %v12037_v52 = vld [vmem:[%s15760_s0 + $0xf0] sm:$0xff]  }
  0x6e   :  { %11802 = vmatprep.mubr.msk.bf16.mxu1 %vm566_vm1, %v12061_v25  ;;  %11823 = vmatpush3.bf16.msra.mxu1 %v12067_v31  ;;  %v11108_v49 = vcombine.low %v13050_v46, %v13055_v47  ;;  %v11109_v50 = vcombine.high %v13050_v46, %v13055_v47  ;;  %v12036_v51 = vld [vmem:[%s15760_s0 + $0xe8] sm:$0xff]   ;;  %v12038_v53 = vld [vmem:[%s15760_s0 + $0xf8] sm:$0xff]   ;;  %v12039_v54 = vld [vmem:[%s15760_s0 + $0x100] sm:$0xff]  }
  0x6f   :  { %11824 = vmatprep.subr.bf16.mxu1 %v12072_v36  ;;  %v12040_v55 = vld [vmem:[%s15760_s0 + $0x108] sm:$0xff]   ;;  %v12041_v56 = vld [vmem:[%s15760_s0 + $0x110] sm:$0xff]   ;;  %v12042_v57 = vld [vmem:[%s15760_s0 + $0x118] sm:$0xff]  }
  0x70   :  { %v12043_v58 = vld [vmem:[%s15760_s0 + $0x120] sm:$0xff]   ;;  %v12044_v59 = vld [vmem:[%s15760_s0 + $0x128] sm:$0xff]   ;;  %v12045_v60 = vld [vmem:[%s15760_s0 + $0x130] sm:$0xff]  }
  0x71   :  { %v12046_v61 = vld [vmem:[%s15760_s0 + $0x138] sm:$0xff]   ;;  %v2470_v62 = vld [vmem:[%s15765_s5] sm:$0xff]  ;;  %v12048_v3 = vld [vmem:[%s15760_s0 + $0x148] sm:$0xff]  }
  0x72   :  { %11699 = vmatmul.mubr.msk.bf16.gmra.mrb[8].mxu0 %vm566_vm1, %v12012_v7  ;;  %11825 = vmatpush3.bf16.msra.mxu1 %v12072_v36  ;;  %v2471_v63 = vld [vmem:[%s15765_s5 + $0x20] sm:$0xff]  ;;  %v12049_v4 = vld [vmem:[%s15760_s0 + $0x150] sm:$0xff]   ;;  %v12050_v5 = vld [vmem:[%s15760_s0 + $0x158] sm:$0xff]  }
  0x73   :  { %11702 = vmatprep.mubr.msk.bf16.mxu0 %vm566_vm1, %v12013_v8  ;;  %4011 = vmatprep.subr.bf16.mxu1 %v11109_v50  ;;  %v12047_v0 = vld [vmem:[%s15760_s0 + $0x140] sm:$0xff]   ;;  %v11073_v1 = vcombine.low %v2470_v62, %v2471_v63  ;;  %v11074_v2 = vcombine.high %v2470_v62, %v2471_v63  ;;  %v12055_v7 = vld [vmem:[%s15760_s0 + $0x168] sm:$0xff]   ;;  %v12058_v8 = vld [vmem:[%s15760_s0 + $0x170] sm:$0xff]  }
  0x74   :  { %v12054_v6 = vld [vmem:[%s15760_s0 + $0x160] sm:$0xff]   ;;  %v12064_v15 = vld [vmem:[%s15760_s0 + $0x188] sm:$0xff]   ;;  %v12068_v16 = vld [vmem:[%s15760_s0 + $0x190] sm:$0xff]  }
  0x75   :  { %11803 = vmatmul.mubr.msk.bf16.gmra.mrb[8].mxu1 %vm566_vm1, %v12062_v26  ;;  %2566 = vmatprep.subr.bf16.mxu0 %v11074_v2  ;;  %v2474_v17 = vld [vmem:[%s15765_s5 + $0x80] sm:$0xff]  ;;  %v11095_v36 = vld [vmem:[%s15765_s5 + $0x68] sm:$0xff] }
  0x76   :  { %11806 = vmatprep.mubr.msk.bf16.mxu1 %vm566_vm1, %v12065_v29  ;;  %2567 = vmatpush1.bf16.msra.mxu0 %v11073_v1  ;;  %v11098_v63 = vld [vmem:[%s15765_s5 + $0xc8] sm:$0xff] }
  0x7a   :  { %11703 = vmatmul.mubr.msk.bf16.gmra.mrb[12].mxu0 %vm566_vm1, %v12014_v9  ;;  %v2472_v9 = vld [vmem:[%s15765_s5 + $0x40] sm:$0xff] }
  0x7b   :  { %11706 = vmatprep.mubr.msk.bf16.mxu0 %vm566_vm1, %v12015_v10  ;;  %v2473_v10 = vld [vmem:[%s15765_s5 + $0x60] sm:$0xff] }
  0x7d   :  { %11807 = vmatmul.mubr.msk.bf16.gmra.mrb[12].mxu1 %vm566_vm1, %v12066_v30 }
  0x7e   :  { %11810 = vmatprep.mubr.msk.bf16.mxu1 %vm566_vm1, %v12070_v34 }
  0x82   :  { %11707 = vmatmul.mubr.msk.bf16.gmra.mrb[16].mxu0 %vm566_vm1, %v12016_v11  ;;  %v11075_v11 = vcombine.low %v2472_v9, %v2473_v10 }
  0x83   :  { %11710 = vmatprep.mubr.msk.bf16.mxu0 %vm566_vm1, %v12017_v12  ;;  %v11076_v12 = vcombine.high %v2472_v9, %v2473_v10 }
  0x85   :  { %11811 = vmatmul.mubr.msk.bf16.gmra.mrb[16].mxu1 %vm566_vm1, %v12071_v35  ;;  %2568 = vmatprep.subr.bf16.mxu0 %v11076_v12  ;;  %v11094_v35 = vld [vmem:[%s15765_s5 + $0x48] sm:$0xff] }
  0x86   :  { %11814 = vmatprep.mubr.msk.bf16.mxu1 %vm566_vm1, %v12073_v37  ;;  %2569 = vmatpush1.bf16.msra.mxu0 %v11075_v11 }
  0x8a   :  { %11711 = vmatmul.mubr.msk.bf16.gmra.mrb[20].mxu0 %vm566_vm1, %v12018_v13  ;;  %v12059_v13 = vld [vmem:[%s15760_s0 + $0x178] sm:$0xff]  }
  0x8b   :  { %11714 = vmatprep.mubr.msk.bf16.mxu0 %vm566_vm1, %v12019_v14  ;;  %v12063_v14 = vld [vmem:[%s15760_s0 + $0x180] sm:$0xff]  }
  0x8d   :  { %11815 = vmatmul.mubr.msk.bf16.gmra.mrb[20].mxu1 %vm566_vm1, %v12074_v40 }
  0x92   :  { %11715 = vmatmul.mubr.msk.bf16.gmra.mrb[24].mxu0 %vm566_vm1, %v12020_v18  ;;  %v2475_v18 = vld [vmem:[%s15765_s5 + $0xa0] sm:$0xff] }
  0x93   :  { %11718 = vmatprep.mubr.msk.bf16.mxu0 %vm566_vm1, %v12021_v19  ;;  %v12069_v19 = vld [vmem:[%s15760_s0 + $0x198] sm:$0xff]   ;;  %v11077_v20 = vcombine.low %v2474_v17, %v2475_v18  ;;  %v11078_v21 = vcombine.high %v2474_v17, %v2475_v18 }
  0x95   :  { %2570 = vmatprep.subr.bf16.mxu0 %v11078_v21 }
  0x96   :  { %2571 = vmatpush1.bf16.msra.mxu0 %v11077_v20 }
  0x9a   :  { %11719 = vmatmul.mubr.msk.bf16.gmra.mrb[28].mxu0 %vm566_vm1, %v12022_v22  ;;  %v13176_v22 = vld [vmem:[#allocation3] ss:$0 sm:$0xff] }
  0x9b   :  { %11722 = vmatprep.mubr.msk.bf16.mxu0 %vm566_vm1, %v12023_v23 }
  0xa2   :  { %11723 = vmatmul.mubr.msk.bf16.gmra.mrb[32].mxu0 %vm566_vm1, %v12024_v27 }
  0xa3   :  { %11726 = vmatprep.mubr.msk.bf16.mxu0 %vm566_vm1, %v12025_v28 }
  0xaa   :  { %11727 = vmatmul.mubr.msk.bf16.gmra.mrb[36].mxu0 %vm566_vm1, %v12026_v32 }
  0xab   :  { %11730 = vmatprep.mubr.msk.bf16.mxu0 %vm566_vm1, %v12027_v33 }
  0xb2   :  { %11731 = vmatmul.mubr.msk.bf16.gmra.mrb[40].mxu0 %vm566_vm1, %v12028_v38 }
  0xb3   :  { %11734 = vmatprep.mubr.msk.bf16.mxu0 %vm566_vm1, %v12029_v39 }
  0xba   :  { %11735 = vmatmul.mubr.msk.bf16.gmra.mrb[44].mxu0 %vm566_vm1, %v12030_v41 }
  0xbb   :  { %11738 = vmatprep.mubr.msk.bf16.mxu0 %vm566_vm1, %v12031_v42  ;;  %v11111_v42 = vcombine.high %v11094_v35, %v11095_v36 }
  0xc2   :  { %11739 = vmatmul.mubr.msk.bf16.gmra.mrb[48].mxu0 %vm566_vm1, %v12032_v43 }
  0xc3   :  { %11742 = vmatprep.mubr.msk.bf16.mxu0 %vm566_vm1, %v12033_v44 }
  0xca   :  { %11743 = vmatmul.mubr.msk.bf16.gmra.mrb[52].mxu0 %vm566_vm1, %v12034_v45  ;;  %v11096_v45 = vld [vmem:[%s15765_s5 + $0x88] sm:$0xff] }
  0xcb   :  { %11746 = vmatprep.mubr.msk.bf16.mxu0 %vm566_vm1, %v12035_v48  ;;  %v11097_v48 = vld [vmem:[%s15765_s5 + $0xa8] sm:$0xff] }
  0xcc   :  { %v11112_v1 = vcombine.low %v11096_v45, %v11097_v48 }
  0xd2   :  { %11747 = vmatmul.mubr.msk.bf16.gmra.mrb[56].mxu0 %vm566_vm1, %v12036_v51 }
  0xd3   :  { %11750 = vmatprep.mubr.msk.bf16.mxu0 %vm566_vm1, %v12037_v52  ;;  %v2476_v52 = vld [vmem:[%s15765_s5 + $0xc0] sm:$0xff] }
  0xda   :  { %11751 = vmatmul.mubr.msk.bf16.gmra.mrb[60].mxu0 %vm566_vm1, %v12038_v53  ;;  %v2477_v53 = vld [vmem:[%s15765_s5 + $0xe0] sm:$0xff] }
  0xdb   :  { %11754 = vmatprep.mubr.msk.bf16.mxu0 %vm566_vm1, %v12039_v54 }
  0xe2   :  { %11755 = vmatmul.mubr.msk.bf16.gmra.mrb[64].mxu0 %vm566_vm1, %v12040_v55  ;;  %v11110_v55 = vcombine.low %v11094_v35, %v11095_v36 }
  0xe3   :  { %11758 = vmatprep.mubr.msk.bf16.mxu0 %vm566_vm1, %v12041_v56  ;;  %v11079_v56 = vcombine.low %v2476_v52, %v2477_v53 }
  0xea   :  { %11759 = vmatmul.mubr.msk.bf16.gmra.mrb[68].mxu0 %vm566_vm1, %v12042_v57  ;;  %v11080_v57 = vcombine.high %v2476_v52, %v2477_v53  ;;  %v2478_v52 = vld [vmem:[%s15765_s5 + $0x100] sm:$0xff] }
  0xeb   :  { %11762 = vmatprep.mubr.msk.bf16.mxu0 %vm566_vm1, %v12043_v58  ;;  %v2479_v53 = vld [vmem:[%s15765_s5 + $0x120] sm:$0xff] }
  0xec   :  { %2572 = vmatprep.subr.bf16.mxu0 %v11080_v57  ;;  %v11082_v57 = vcombine.high %v2478_v52, %v2479_v53 }
  0xed   :  { %2573 = vmatpush1.bf16.msra.mxu0 %v11079_v56  ;;  %v11081_v56 = vcombine.low %v2478_v52, %v2479_v53 }
  0xee   :  { %2574 = vmatprep.subr.bf16.mxu0 %v11082_v57 }
  0xf1   :  { %2575 = vmatpush1.bf16.msra.mxu0 %v11081_v56 }
  0xf2   :  { %11763 = vmatmul.mubr.msk.bf16.gmra.mrb[72].mxu0 %vm566_vm1, %v12044_v59 }
  0xf3   :  { %11766 = vmatprep.mubr.msk.bf16.mxu0 %vm566_vm1, %v12045_v60  ;;  %v11113_v60 = vcombine.high %v11096_v45, %v11097_v48 }
  0xfa   :  { %11767 = vmatmul.mubr.msk.bf16.gmra.mrb[76].mxu0 %vm566_vm1, %v12046_v61 }
  0xfb   :  { %11770 = vmatprep.mubr.msk.bf16.mxu0 %vm566_vm1, %v12047_v0  ;;  %v11099_v0 = vld [vmem:[%s15765_s5 + $0xe8] sm:$0xff] }
  0xfc   :  { %v11114_v12 = vcombine.low %v11098_v63, %v11099_v0 }
 0x102   :  { %11771 = vmatmul.mubr.msk.bf16.gmra.mrb[80].mxu0 %vm566_vm1, %v12048_v3 }
 0x103   :  { %11774 = vmatprep.mubr.msk.bf16.mxu0 %vm566_vm1, %v12049_v4  ;;  %v11115_v4 = vcombine.high %v11098_v63, %v11099_v0 }
 0x10a   :  { %11775 = vmatmul.mubr.msk.bf16.gmra.mrb[84].mxu0 %vm566_vm1, %v12050_v5 }
 0x10b   :  { %11778 = vmatprep.mubr.msk.bf16.mxu0 %vm566_vm1, %v12054_v6 }
 0x112   :  { %11779 = vmatmul.mubr.msk.bf16.gmra.mrb[88].mxu0 %vm566_vm1, %v12055_v7  ;;  %v11100_v7 = vld [vmem:[%s15765_s5 + $0x108] sm:$0xff] }
 0x113   :  { %11782 = vmatprep.mubr.msk.bf16.mxu0 %vm566_vm1, %v12058_v8  ;;  %v11101_v8 = vld [vmem:[%s15765_s5 + $0x128] sm:$0xff] }
 0x114   :  { %v11116_v21 = vcombine.low %v11100_v7, %v11101_v8 }
 0x11a   :  { %11783 = vmatmul.mubr.msk.bf16.gmra.mrb[92].mxu0 %vm566_vm1, %v12059_v13 }
 0x11b   :  { %11786 = vmatprep.mubr.msk.bf16.mxu0 %vm566_vm1, %v12063_v14 }
 0x122   :  { %11787 = vmatmul.mubr.msk.bf16.gmra.mrb[96].mxu0 %vm566_vm1, %v12064_v15  ;;  %v11117_v15 = vcombine.high %v11100_v7, %v11101_v8  ;;  %v11102_v7 = vld [vmem:[%s15765_s5 + $0x148] sm:$0xff] }
 0x123   :  { %11790 = vmatprep.mubr.msk.bf16.mxu0 %vm566_vm1, %v12068_v16  ;;  %v11103_v8 = vld [vmem:[%s15765_s5 + $0x168] sm:$0xff] }
 0x12a   :  { %11791 = vmatmul.mubr.msk.bf16.gmra.mrb[100].mxu0 %vm566_vm1, %v12069_v19 }
 0x135   :  { %v11692_v23 = vpop.f32.mrb[0].mxu0 }
 0x136   :  { %v806_v24 = vadd.f32 %v11692_v23, %v13176_v22  ;;  %v797_v25 = vpop.f32.mrb[1].mxu0 }
 0x137   :  { %v798_v26 = vadd.f32 %v13176_v22, %v797_v25  ;;  %v11693_v27 = vpop.f32.mrb[2].mxu0 }
 0x138   :  { %v809_v28 = vadd.f32 %v11693_v27, %v13176_v22  ;;  %v800_v29 = vpop.f32.mrb[3].mxu0  ;;  %v1310_v31 = vmax.f32 %v806_v24, 0.0  ;;  %v11796_v0 = vpop.f32.mrb[0].mxu1 }
 0x139   :  { %v801_v30 = vadd.f32 %v13176_v22, %v800_v29  ;;  %v1308_v33 = vmax.f32 %v798_v26, 0.0 }
 0x13a   :  { %v1311_v32 = vmax.f32 %v809_v28, 0.0 }
 0x13b   :  { %v1309_v34 = vmax.f32 %v801_v30, 0.0 }
 0x13c   :  { %v1437_v37 = vpack.c.bf16 %v1311_v32, %v1310_v31 }
 0x13d   :  { %v1436_v38 = vpack.c.bf16 %v1309_v34, %v1308_v33  ;;  %v11696_v39 = vpop.f32.mrb[4].mxu0 }
 0x13e   :  { %v822_v40 = vadd.f32 %v11696_v39, %v13176_v22  ;;  %v813_v41 = vpop.f32.mrb[5].mxu0 }
 0x13f   :  { %v814_v43 = vadd.f32 %v13176_v22, %v813_v41  ;;  %v11697_v44 = vpop.f32.mrb[6].mxu0  ;;  %11826 = vmatprep.mubr.msk.bf16.mxu1 %vm1539_vm2, %v1436_v38 }
 0x140   :  { %v825_v50 = vadd.f32 %v11697_v44, %v13176_v22  ;;  %v816_v51 = vpop.f32.mrb[7].mxu0  ;;  %11827 = vmatmul.mubr.msk.bf16.vlgmr.msra.gmra.mrb[24].mxu1 %vm1539_vm2, %v1437_v37  ;;  %v1314_v58 = vmax.f32 %v822_v40, 0.0 }
 0x141   :  { %v817_v54 = vadd.f32 %v13176_v22, %v816_v51  ;;  %4012 = vmatpush1.bf16.msra.mxu1 %v11108_v49  ;;  %v1312_v61 = vmax.f32 %v814_v43, 0.0 }
 0x142   :  { %v1315_v59 = vmax.f32 %v825_v50, 0.0  ;;  %4013 = vmatprep.subr.bf16.mxu1 %v11111_v42 }
 0x143   :  { %v1313_v62 = vmax.f32 %v817_v54, 0.0 }
 0x144   :  { %v1439_v46 = vpack.c.bf16 %v1315_v59, %v1314_v58 }
 0x145   :  { %v1438_v47 = vpack.c.bf16 %v1313_v62, %v1312_v61  ;;  %v11700_v49 = vpop.f32.mrb[8].mxu0  ;;  %4014 = vmatpush1.bf16.msra.mxu1 %v11110_v55 }
 0x146   :  { %v838_v2 = vadd.f32 %v11700_v49, %v13176_v22  ;;  %v829_v3 = vpop.f32.mrb[9].mxu0  ;;  %4015 = vmatprep.subr.bf16.mxu1 %v11113_v60 }
 0x147   :  { %v830_v5 = vadd.f32 %v13176_v22, %v829_v3  ;;  %v11701_v6 = vpop.f32.mrb[10].mxu0  ;;  %11830 = vmatprep.mubr.msk.bf16.mxu1 %vm1539_vm2, %v1438_v47  ;;  %v1213_v47 = vpop.f32.mrb[1].mxu1 }
 0x148   :  { %v841_v9 = vadd.f32 %v11701_v6, %v13176_v22  ;;  %v832_v10 = vpop.f32.mrb[11].mxu0  ;;  %11831 = vmatmul.mubr.msk.bf16.gmra.mrb[28].mxu1 %vm1539_vm2, %v1439_v46  ;;  %v1318_v13 = vmax.f32 %v838_v2, 0.0  ;;  %v11797_v2 = vpop.f32.mrb[2].mxu1 }
 0x149   :  { %v833_v11 = vadd.f32 %v13176_v22, %v832_v10  ;;  %4016 = vmatpush1.bf16.msra.mxu1 %v11112_v1  ;;  %v1316_v16 = vmax.f32 %v830_v5, 0.0  ;;  %v1216_v5 = vpop.f32.mrb[3].mxu1  ;;  %v1214_v10 = vadd.f32 %v13176_v22, %v1213_v47 }
 0x14a   :  { %v1319_v14 = vmax.f32 %v841_v9, 0.0  ;;  %4017 = vmatprep.subr.bf16.mxu1 %v11115_v4  ;;  %v1222_v9 = vadd.f32 %v11796_v0, %v13176_v22 }
 0x14b   :  { %v1317_v17 = vmax.f32 %v833_v11, 0.0  ;;  %v1225_v11 = vadd.f32 %v11797_v2, %v13176_v22 }
 0x14c   :  { %v1441_v18 = vpack.c.bf16 %v1319_v14, %v1318_v13  ;;  %v11118_v14 = vcombine.low %v11102_v7, %v11103_v8 }
 0x14d   :  { %v1440_v19 = vpack.c.bf16 %v1317_v17, %v1316_v16  ;;  %v11704_v20 = vpop.f32.mrb[12].mxu0  ;;  %4018 = vmatpush1.bf16.msra.mxu1 %v11114_v12  ;;  %v1217_v16 = vadd.f32 %v13176_v22, %v1216_v5 }
 0x14e   :  { %v854_v23 = vadd.f32 %v11704_v20, %v13176_v22  ;;  %v845_v24 = vpop.f32.mrb[13].mxu0  ;;  %4019 = vmatprep.subr.bf16.mxu1 %v11117_v15  ;;  %v11119_v15 = vcombine.high %v11102_v7, %v11103_v8  ;;  %v1412_v20 = vmax.f32 %v1214_v10, 0.0  ;;  %v2481_v10 = vld [vmem:[%s15765_s5 + $0x160] sm:$0xff] }
 0x14f   :  { %v846_v25 = vadd.f32 %v13176_v22, %v845_v24  ;;  %v11705_v26 = vpop.f32.mrb[14].mxu0  ;;  %11834 = vmatprep.mubr.msk.bf16.mxu1 %vm1539_vm2, %v1440_v19  ;;  %v1414_v19 = vmax.f32 %v1222_v9, 0.0  ;;  %v2480_v9 = vld [vmem:[%s15765_s5 + $0x140] sm:$0xff] }
 0x150   :  { %v857_v27 = vadd.f32 %v11705_v26, %v13176_v22  ;;  %v848_v28 = vpop.f32.mrb[15].mxu0  ;;  %11835 = vmatmul.mubr.msk.bf16.gmra.mrb[32].mxu1 %vm1539_vm2, %v1441_v18  ;;  %v1322_v30 = vmax.f32 %v854_v23, 0.0 }
 0x151   :  { %v849_v29 = vadd.f32 %v13176_v22, %v848_v28  ;;  %4020 = vmatpush1.bf16.msra.mxu1 %v11116_v21  ;;  %v1320_v32 = vmax.f32 %v846_v25, 0.0  ;;  %v1415_v21 = vmax.f32 %v1225_v11, 0.0  ;;  %v1413_v25 = vmax.f32 %v1217_v16, 0.0 }
 0x152   :  { %v1323_v31 = vmax.f32 %v857_v27, 0.0  ;;  %4021 = vmatprep.subr.bf16.mxu1 %v11119_v15  ;;  %v11083_v16 = vcombine.low %v2480_v9, %v2481_v10 }
 0x153   :  { %v1321_v33 = vmax.f32 %v849_v29, 0.0  ;;  %v13266_v28 = vpack.c.bf16 %v1415_v21, %v1414_v19  ;;  %v11800_v29 = vpop.f32.mrb[4].mxu1  ;;  %v11084_v19 = vcombine.high %v2480_v9, %v2481_v10 }
 0x154   :  { %v1443_v34 = vpack.c.bf16 %v1323_v31, %v1322_v30  ;;  %v13269_v31 = vpack.c.bf16 %v1413_v25, %v1412_v20 }
 0x155   :  { %v1442_v35 = vpack.c.bf16 %v1321_v33, %v1320_v32  ;;  %v11708_v36 = vpop.f32.mrb[16].mxu0  ;;  %4022 = vmatpush1.bf16.msra.mxu1 %v11118_v14  ;;  %v1229_v32 = vpop.f32.mrb[5].mxu1  ;;  %2576 = vmatprep.subr.bf16.mxu0 %v11084_v19 }
 0x156   :  { %v870_v37 = vadd.f32 %v11708_v36, %v13176_v22  ;;  %v861_v38 = vpop.f32.mrb[17].mxu0  ;;  %2577 = vmatpush1.bf16.msra.mxu0 %v11083_v16 }
 0x157   :  { %v862_v39 = vadd.f32 %v13176_v22, %v861_v38  ;;  %v11709_v40 = vpop.f32.mrb[18].mxu0  ;;  %11838 = vmatprep.mubr.msk.bf16.mxu1 %vm1539_vm2, %v1442_v35  ;;  %v11801_v35 = vpop.f32.mrb[6].mxu1 }
 0x158   :  { %v873_v41 = vadd.f32 %v11709_v40, %v13176_v22  ;;  %v864_v42 = vpop.f32.mrb[19].mxu0  ;;  %11839 = vmatmul.mubr.msk.bf16.gmra.mrb[36].mxu1 %vm1539_vm2, %v1443_v34  ;;  %v1326_v44 = vmax.f32 %v870_v37, 0.0  ;;  %v1232_v38 = vpop.f32.mrb[7].mxu1  ;;  %v1238_v40 = vadd.f32 %v11800_v29, %v13176_v22 }
 0x159   :  { %v865_v43 = vadd.f32 %v13176_v22, %v864_v42  ;;  %v1324_v48 = vmax.f32 %v862_v39, 0.0  ;;  %v1241_v42 = vadd.f32 %v11801_v35, %v13176_v22 }
 0x15a   :  { %v1327_v45 = vmax.f32 %v873_v41, 0.0  ;;  %v1230_v41 = vadd.f32 %v13176_v22, %v1229_v32 }
 0x15b   :  { %v1325_v50 = vmax.f32 %v865_v43, 0.0  ;;  %v1419_v53 = vmax.f32 %v1241_v42, 0.0 }
 0x15c   :  { %v1445_v51 = vpack.c.bf16 %v1327_v45, %v1326_v44  ;;  %v1233_v45 = vadd.f32 %v13176_v22, %v1232_v38  ;;  %v1416_v52 = vmax.f32 %v1230_v41, 0.0 }
 0x15d   :  { %v1444_v54 = vpack.c.bf16 %v1325_v50, %v1324_v48  ;;  %v11712_v55 = vpop.f32.mrb[20].mxu0 }
 0x15e   :  { %v886_v58 = vadd.f32 %v11712_v55, %v13176_v22  ;;  %v877_v59 = vpop.f32.mrb[21].mxu0  ;;  %v1417_v56 = vmax.f32 %v1233_v45, 0.0 }
 0x15f   :  { %v878_v60 = vadd.f32 %v13176_v22, %v877_v59  ;;  %v11713_v61 = vpop.f32.mrb[22].mxu0  ;;  %11842 = vmatprep.mubr.msk.bf16.mxu1 %vm1539_vm2, %v1444_v54 }
 0x160   :  { %v889_v62 = vadd.f32 %v11713_v61, %v13176_v22  ;;  %v880_v63 = vpop.f32.mrb[23].mxu0  ;;  %11843 = vmatmul.mubr.msk.bf16.gmra.mrb[40].mxu1 %vm1539_vm2, %v1445_v51  ;;  %v1330_v49 = vmax.f32 %v886_v58, 0.0  ;;  %v1418_v51 = vmax.f32 %v1238_v40, 0.0  ;;  %v13283_v61 = vpack.c.bf16 %v1417_v56, %v1416_v52 }
 0x161   :  { %v881_v46 = vadd.f32 %v13176_v22, %v880_v63  ;;  %v1328_v3 = vmax.f32 %v878_v60, 0.0 }
 0x162   :  { %v1331_v1 = vmax.f32 %v889_v62, 0.0  ;;  %v13280_v59 = vpack.c.bf16 %v1419_v53, %v1418_v51  ;;  %v11804_v62 = vpop.f32.mrb[8].mxu1 }
 0x163   :  { %v1329_v4 = vmax.f32 %v881_v46, 0.0  ;;  %v1245_v46 = vpop.f32.mrb[9].mxu1 }
 0x164   :  { %v1447_v6 = vpack.c.bf16 %v1331_v1, %v1330_v49  ;;  %v11805_v1 = vpop.f32.mrb[10].mxu1 }
 0x165   :  { %v1446_v12 = vpack.c.bf16 %v1329_v4, %v1328_v3  ;;  %v11716_v13 = vpop.f32.mrb[24].mxu0  ;;  %v1254_v3 = vadd.f32 %v11804_v62, %v13176_v22  ;;  %v1246_v4 = vadd.f32 %v13176_v22, %v1245_v46  ;;  %v1257_v5 = vadd.f32 %v11805_v1, %v13176_v22 }
 0x166   :  { %v902_v17 = vadd.f32 %v11716_v13, %v13176_v22  ;;  %v893_v18 = vpop.f32.mrb[25].mxu0 }
 0x167   :  { %v894_v23 = vadd.f32 %v13176_v22, %v893_v18  ;;  %v11717_v24 = vpop.f32.mrb[26].mxu0  ;;  %11846 = vmatprep.mubr.msk.bf16.mxu1 %vm1539_vm2, %v1446_v12  ;;  %v1422_v14 = vmax.f32 %v1254_v3, 0.0  ;;  %v1420_v15 = vmax.f32 %v1246_v4, 0.0  ;;  %v1423_v20 = vmax.f32 %v1257_v5, 0.0  ;;  %v11104_v4 = vld [vmem:[%s15765_s5 + $0x188] sm:$0xff] }
 0x168   :  { %v905_v26 = vadd.f32 %v11717_v24, %v13176_v22  ;;  %v896_v27 = vpop.f32.mrb[27].mxu0  ;;  %11847 = vmatmul.mubr.msk.bf16.gmra.mrb[44].mxu1 %vm1539_vm2, %v1447_v6  ;;  %v1334_v33 = vmax.f32 %v902_v17, 0.0  ;;  %v1248_v6 = vpop.f32.mrb[11].mxu1  ;;  %v11105_v5 = vld [vmem:[%s15765_s5 + $0x1a8] sm:$0xff] }
 0x169   :  { %v897_v30 = vadd.f32 %v13176_v22, %v896_v27  ;;  %v1332_v36 = vmax.f32 %v894_v23, 0.0  ;;  %v1249_v11 = vadd.f32 %v13176_v22, %v1248_v6  ;;  %v11808_v29 = vpop.f32.mrb[12].mxu1 }
 0x16a   :  { %v1335_v34 = vmax.f32 %v905_v26, 0.0  ;;  %v13301_v26 = vpack.c.bf16 %v1423_v20, %v1422_v14  ;;  %v1270_v38 = vadd.f32 %v11808_v29, %v13176_v22 }
 0x16b   :  { %v1333_v37 = vmax.f32 %v897_v30, 0.0  ;;  %v1421_v21 = vmax.f32 %v1249_v11, 0.0 }
 0x16c   :  { %v1449_v39 = vpack.c.bf16 %v1335_v34, %v1334_v33  ;;  %v1261_v33 = vpop.f32.mrb[13].mxu1 }
 0x16d   :  { %v1448_v43 = vpack.c.bf16 %v1333_v37, %v1332_v36  ;;  %v11720_v44 = vpop.f32.mrb[28].mxu0  ;;  %v13303_v27 = vpack.c.bf16 %v1421_v21, %v1420_v15  ;;  %v11809_v36 = vpop.f32.mrb[14].mxu1 }
 0x16e   :  { %v918_v48 = vadd.f32 %v11720_v44, %v13176_v22  ;;  %v909_v50 = vpop.f32.mrb[29].mxu0  ;;  %v1273_v40 = vadd.f32 %v11809_v36, %v13176_v22  ;;  %v1264_v41 = vpop.f32.mrb[15].mxu1  ;;  %v2483_v36 = vld [vmem:[%s15765_s5 + $0x1a0] sm:$0xff] }
 0x16f   :  { %v910_v54 = vadd.f32 %v13176_v22, %v909_v50  ;;  %v11721_v55 = vpop.f32.mrb[30].mxu0  ;;  %11850 = vmatprep.mubr.msk.bf16.mxu1 %vm1539_vm2, %v1448_v43  ;;  %v1265_v44 = vadd.f32 %v13176_v22, %v1264_v41  ;;  %v1426_v50 = vmax.f32 %v1270_v38, 0.0 }
 0x170   :  { %v921_v57 = vadd.f32 %v11721_v55, %v13176_v22  ;;  %v912_v58 = vpop.f32.mrb[31].mxu0  ;;  %11851 = vmatmul.mubr.msk.bf16.gmra.mrb[48].mxu1 %vm1539_vm2, %v1449_v39  ;;  %v1338_v63 = vmax.f32 %v918_v48, 0.0  ;;  %v1262_v39 = vadd.f32 %v13176_v22, %v1261_v33  ;;  %v1427_v52 = vmax.f32 %v1273_v40, 0.0 }
 0x171   :  { %v913_v60 = vadd.f32 %v13176_v22, %v912_v58  ;;  %v1336_v47 = vmax.f32 %v910_v54, 0.0  ;;  %v1425_v55 = vmax.f32 %v1265_v44, 0.0 }
 0x172   :  { %v1339_v0 = vmax.f32 %v921_v57, 0.0  ;;  %v1424_v51 = vmax.f32 %v1262_v39, 0.0  ;;  %v13314_v58 = vpack.c.bf16 %v1427_v52, %v1426_v50 }
 0x173   :  { %v1337_v49 = vmax.f32 %v913_v60, 0.0 }
 0x174   :  { %v1451_v2 = vpack.c.bf16 %v1339_v0, %v1338_v63  ;;  %v13317_v62 = vpack.c.bf16 %v1425_v55, %v1424_v51  ;;  %v11812_v63 = vpop.f32.mrb[16].mxu1 }
 0x175   :  { %v1450_v7 = vpack.c.bf16 %v1337_v49, %v1336_v47  ;;  %v11724_v8 = vpop.f32.mrb[32].mxu0  ;;  %v1277_v47 = vpop.f32.mrb[17].mxu1  ;;  %v1286_v6 = vadd.f32 %v11812_v63, %v13176_v22 }
 0x176   :  { %v934_v12 = vadd.f32 %v11724_v8, %v13176_v22  ;;  %v925_v13 = vpop.f32.mrb[33].mxu0 }
 0x177   :  { %v926_v17 = vadd.f32 %v13176_v22, %v925_v13  ;;  %v11725_v18 = vpop.f32.mrb[34].mxu0  ;;  %11854 = vmatprep.mubr.msk.bf16.mxu1 %vm1539_vm2, %v1450_v7  ;;  %v1278_v7 = vadd.f32 %v13176_v22, %v1277_v47  ;;  %v11121_v13 = vcombine.high %v11104_v4, %v11105_v5 }
 0x178   :  { %v937_v23 = vadd.f32 %v11725_v18, %v13176_v22  ;;  %v928_v24 = vpop.f32.mrb[35].mxu0  ;;  %11855 = vmatmul.mubr.msk.bf16.gmra.mrb[52].mxu1 %vm1539_vm2, %v1451_v2  ;;  %v1342_v30 = vmax.f32 %v934_v12, 0.0  ;;  %v11813_v2 = vpop.f32.mrb[18].mxu1  ;;  %v11120_v12 = vcombine.low %v11104_v4, %v11105_v5 }
 0x179   :  { %v929_v25 = vadd.f32 %v13176_v22, %v928_v24  ;;  %v1340_v34 = vmax.f32 %v926_v17, 0.0  ;;  %v1289_v8 = vadd.f32 %v11813_v2, %v13176_v22  ;;  %v1280_v9 = vpop.f32.mrb[19].mxu1  ;;  %v1430_v17 = vmax.f32 %v1286_v6, 0.0  ;;  %4023 = vmatprep.subr.bf16.mxu1 %v11121_v13 }
 0x17a   :  { %v1343_v32 = vmax.f32 %v937_v23, 0.0  ;;  %v1281_v14 = vadd.f32 %v13176_v22, %v1280_v9  ;;  %v1428_v18 = vmax.f32 %v1278_v7, 0.0  ;;  %4024 = vmatpush1.bf16.msra.mxu1 %v11120_v12 }
 0x17b   :  { %v1341_v35 = vmax.f32 %v929_v25, 0.0  ;;  %v1431_v19 = vmax.f32 %v1289_v8, 0.0 }
 0x17c   :  { %v1453_v37 = vpack.c.bf16 %v1343_v32, %v1342_v30  ;;  %v1429_v23 = vmax.f32 %v1281_v14, 0.0  ;;  %v2484_v14 = vld [vmem:[%s15765_s5 + $0x1c0] sm:$0xff] }
 0x17d   :  { %v1452_v42 = vpack.c.bf16 %v1341_v35, %v1340_v34  ;;  %v11728_v43 = vpop.f32.mrb[36].mxu0  ;;  %v13334_v29 = vpack.c.bf16 %v1431_v19, %v1430_v17  ;;  %v11816_v34 = vpop.f32.mrb[20].mxu1  ;;  %v2482_v35 = vld [vmem:[%s15765_s5 + $0x180] sm:$0xff] }
 0x17e   :  { %v950_v45 = vadd.f32 %v11728_v43, %v13176_v22  ;;  %v941_v48 = vpop.f32.mrb[37].mxu0  ;;  %v13337_v33 = vpack.c.bf16 %v1429_v23, %v1428_v18  ;;  %v1302_v38 = vadd.f32 %v11816_v34, %v13176_v22  ;;  %v1293_v39 = vpop.f32.mrb[21].mxu1  ;;  %v11085_v40 = vcombine.low %v2482_v35, %v2483_v36 }
 0x17f   :  { %v942_v53 = vadd.f32 %v13176_v22, %v941_v48  ;;  %v11729_v54 = vpop.f32.mrb[38].mxu0  ;;  %11858 = vmatprep.mubr.msk.bf16.mxu1 %vm1539_vm2, %v1452_v42  ;;  %v11086_v41 = vcombine.high %v2482_v35, %v2483_v36  ;;  %v1294_v44 = vadd.f32 %v13176_v22, %v1293_v39  ;;  %v15786_v35 = vmov 0  }
 0x180   :  { %v953_v56 = vadd.f32 %v11729_v54, %v13176_v22  ;;  %v944_v57 = vpop.f32.mrb[39].mxu0  ;;  %11859 = vmatmul.mubr.msk.bf16.gmra.mrb[56].mxu1 %vm1539_vm2, %v1453_v37  ;;  %v1346_v0 = vmax.f32 %v950_v45, 0.0  ;;  %v11817_v45 = vpop.f32.mrb[22].mxu1  ;;  %v1434_v50 = vmax.f32 %v1302_v38, 0.0  ;;  %2598 = vmatprep.mubr.bf16.mxu0 %v15786_v35 }
 0x181   :  { %v945_v60 = vadd.f32 %v13176_v22, %v944_v57  ;;  %v1344_v49 = vmax.f32 %v942_v53, 0.0  ;;  %v1305_v51 = vadd.f32 %v11817_v45, %v13176_v22  ;;  %v1296_v52 = vpop.f32.mrb[23].mxu1  ;;  %2578 = vmatprep.subr.bf16.mxu0 %v11086_v41  ;;  %v1432_v55 = vmax.f32 %v1294_v44, 0.0 }
 0x182   :  { %v1347_v46 = vmax.f32 %v953_v56, 0.0  ;;  %v1297_v56 = vadd.f32 %v13176_v22, %v1296_v52  ;;  %2579 = vmatpush1.bf16.msra.mxu0 %v11085_v40  ;;  %v11106_v52 = vld [vmem:[%s15765_s5 + $0x1c8] sm:$0xff] }
 0x183   :  { %v1345_v1 = vmax.f32 %v945_v60, 0.0  ;;  %v1435_v63 = vmax.f32 %v1305_v51, 0.0 }
 0x184   :  { %v1455_v3 = vpack.c.bf16 %v1347_v46, %v1346_v0  ;;  %v1433_v47 = vmax.f32 %v1297_v56, 0.0 }
 0x185   :  { %v1454_v10 = vpack.c.bf16 %v1345_v1, %v1344_v49  ;;  %v11732_v11 = vpop.f32.mrb[40].mxu0  ;;  %v13354_v2 = vpack.c.bf16 %v1435_v63, %v1434_v50 }
 0x186   :  { %v966_v15 = vadd.f32 %v11732_v11, %v13176_v22  ;;  %v957_v16 = vpop.f32.mrb[41].mxu0  ;;  %v13357_v4 = vpack.c.bf16 %v1433_v47, %v1432_v55 }
 0x187   :  { %v958_v20 = vadd.f32 %v13176_v22, %v957_v16  ;;  %v11733_v21 = vpop.f32.mrb[42].mxu0  ;;  %11862 = vmatprep.mubr.msk.bf16.mxu1 %vm1539_vm2, %v1454_v10 }
 0x188   :  { %v969_v24 = vadd.f32 %v11733_v21, %v13176_v22  ;;  %v960_v25 = vpop.f32.mrb[43].mxu0  ;;  %11863 = vmatmul.mubr.msk.bf16.gmra.mrb[60].mxu1 %vm1539_vm2, %v1455_v3  ;;  %v1350_v30 = vmax.f32 %v966_v15, 0.0  ;;  %v2485_v15 = vld [vmem:[%s15765_s5 + $0x1e0] sm:$0xff] }
 0x189   :  { %v961_v32 = vadd.f32 %v13176_v22, %v960_v25  ;;  %v1348_v42 = vmax.f32 %v958_v20, 0.0  ;;  %v11088_v18 = vcombine.high %v2484_v14, %v2485_v15  ;;  %v11087_v21 = vcombine.low %v2484_v14, %v2485_v15 }
 0x18a   :  { %v1351_v37 = vmax.f32 %v969_v24, 0.0 }
 0x18b   :  { %v1349_v43 = vmax.f32 %v961_v32, 0.0  ;;  %2580 = vmatprep.subr.bf16.mxu0 %v11088_v18 }
 0x18c   :  { %v1457_v48 = vpack.c.bf16 %v1351_v37, %v1350_v30  ;;  %2581 = vmatpush1.bf16.msra.mxu0 %v11087_v21 }
 0x18d   :  { %v1456_v53 = vpack.c.bf16 %v1349_v43, %v1348_v42  ;;  %v11736_v54 = vpop.f32.mrb[44].mxu0 }
 0x18e   :  { %v982_v57 = vadd.f32 %v11736_v54, %v13176_v22  ;;  %v973_v60 = vpop.f32.mrb[45].mxu0 }
 0x18f   :  { %v974_v0 = vadd.f32 %v13176_v22, %v973_v60  ;;  %v11737_v46 = vpop.f32.mrb[46].mxu0  ;;  %11866 = vmatprep.mubr.msk.bf16.mxu1 %vm1539_vm2, %v1456_v53  ;;  %v11107_v53 = vld [vmem:[%s15765_s5 + $0x1e8] sm:$0xff] }
 0x190   :  { %v985_v49 = vadd.f32 %v11737_v46, %v13176_v22  ;;  %v976_v1 = vpop.f32.mrb[47].mxu0  ;;  %11867 = vmatmul.mubr.msk.bf16.gmra.mrb[64].mxu1 %vm1539_vm2, %v1457_v48  ;;  %v1354_v5 = vmax.f32 %v982_v57, 0.0  ;;  %v11122_v55 = vcombine.low %v11106_v52, %v11107_v53  ;;  %v11123_v56 = vcombine.high %v11106_v52, %v11107_v53 }
 0x191   :  { %v977_v3 = vadd.f32 %v13176_v22, %v976_v1  ;;  %v1352_v7 = vmax.f32 %v974_v0, 0.0 }
 0x192   :  { %v1355_v6 = vmax.f32 %v985_v49, 0.0  ;;  %4025 = vmatprep.subr.bf16.mxu1 %v11123_v56 }
 0x193   :  { %v1353_v8 = vmax.f32 %v977_v3, 0.0  ;;  %4026 = vmatpush1.bf16.msra.mxu1 %v11122_v55 }
 0x194   :  { %v1459_v9 = vpack.c.bf16 %v1355_v6, %v1354_v5 }
 0x195   :  { %v1458_v10 = vpack.c.bf16 %v1353_v8, %v1352_v7  ;;  %v11740_v11 = vpop.f32.mrb[48].mxu0 }
 0x196   :  { %v998_v12 = vadd.f32 %v11740_v11, %v13176_v22  ;;  %v989_v13 = vpop.f32.mrb[49].mxu0 }
 0x197   :  { %v990_v16 = vadd.f32 %v13176_v22, %v989_v13  ;;  %v11741_v17 = vpop.f32.mrb[50].mxu0  ;;  %11870 = vmatprep.mubr.msk.bf16.mxu1 %vm1539_vm2, %v1458_v10 }
 0x198   :  { %v1001_v19 = vadd.f32 %v11741_v17, %v13176_v22  ;;  %v992_v20 = vpop.f32.mrb[51].mxu0  ;;  %11871 = vmatmul.mubr.msk.bf16.gmra.mrb[68].mxu1 %vm1539_vm2, %v1459_v9  ;;  %v1358_v24 = vmax.f32 %v998_v12, 0.0 }
 0x199   :  { %v993_v23 = vadd.f32 %v13176_v22, %v992_v20  ;;  %v1356_v30 = vmax.f32 %v990_v16, 0.0 }
 0x19a   :  { %v1359_v25 = vmax.f32 %v1001_v19, 0.0 }
 0x19b   :  { %v1357_v32 = vmax.f32 %v993_v23, 0.0 }
 0x19c   :  { %v1461_v34 = vpack.c.bf16 %v1359_v25, %v1358_v24 }
 0x19d   :  { %v1460_v36 = vpack.c.bf16 %v1357_v32, %v1356_v30  ;;  %v11744_v37 = vpop.f32.mrb[52].mxu0 }
 0x19e   :  { %v1014_v38 = vadd.f32 %v11744_v37, %v13176_v22  ;;  %v1005_v39 = vpop.f32.mrb[53].mxu0 }
 0x19f   :  { %v1006_v40 = vadd.f32 %v13176_v22, %v1005_v39  ;;  %v11745_v41 = vpop.f32.mrb[54].mxu0  ;;  %11874 = vmatprep.mubr.msk.bf16.mxu1 %vm1539_vm2, %v1460_v36 }
 0x1a0   :  { %v1017_v42 = vadd.f32 %v11745_v41, %v13176_v22  ;;  %v1008_v43 = vpop.f32.mrb[55].mxu0  ;;  %11875 = vmatmul.mubr.msk.bf16.gmra.mrb[72].mxu1 %vm1539_vm2, %v1461_v34  ;;  %v1362_v45 = vmax.f32 %v1014_v38, 0.0 }
 0x1a1   :  { %v1009_v44 = vadd.f32 %v13176_v22, %v1008_v43  ;;  %v1360_v50 = vmax.f32 %v1006_v40, 0.0 }
 0x1a2   :  { %v1363_v48 = vmax.f32 %v1017_v42, 0.0 }
 0x1a3   :  { %v1361_v51 = vmax.f32 %v1009_v44, 0.0 }
 0x1a4   :  { %v1463_v54 = vpack.c.bf16 %v1363_v48, %v1362_v45 }
 0x1a5   :  { %v1462_v57 = vpack.c.bf16 %v1361_v51, %v1360_v50  ;;  %v11748_v60 = vpop.f32.mrb[56].mxu0 }
 0x1a6   :  { %v1030_v63 = vadd.f32 %v11748_v60, %v13176_v22  ;;  %v1021_v0 = vpop.f32.mrb[57].mxu0 }
 0x1a7   :  { %v1022_v46 = vadd.f32 %v13176_v22, %v1021_v0  ;;  %v11749_v47 = vpop.f32.mrb[58].mxu0  ;;  %11878 = vmatprep.mubr.msk.bf16.mxu1 %vm1539_vm2, %v1462_v57 }
 0x1a8   :  { %v1033_v49 = vadd.f32 %v11749_v47, %v13176_v22  ;;  %v1024_v1 = vpop.f32.mrb[59].mxu0  ;;  %11879 = vmatmul.mubr.msk.bf16.gmra.mrb[76].mxu1 %vm1539_vm2, %v1463_v54  ;;  %v1366_v5 = vmax.f32 %v1030_v63, 0.0  ;;  %v13411_v47 = vld [vmem:[%s15765_s5 + $0x10] sm:$0xff] }
 0x1a9   :  { %v1025_v3 = vadd.f32 %v13176_v22, %v1024_v1  ;;  %v1364_v7 = vmax.f32 %v1022_v46, 0.0  ;;  %v13421_v1 = vld [vmem:[%s15765_s5 + $0x18] sm:$0xff] }
 0x1aa   :  { %v1367_v6 = vmax.f32 %v1033_v49, 0.0  ;;  %v13416_v49 = vld [vmem:[%s15765_s5 + $0x30] sm:$0xff] }
 0x1ab   :  { %v1365_v8 = vmax.f32 %v1025_v3, 0.0 }
 0x1ac   :  { %v1465_v9 = vpack.c.bf16 %v1367_v6, %v1366_v5  ;;  %v11143_v5 = vcombine.low %v13411_v47, %v13416_v49  ;;  %v11144_v6 = vcombine.high %v13411_v47, %v13416_v49 }
 0x1ad   :  { %v1464_v10 = vpack.c.bf16 %v1365_v8, %v1364_v7  ;;  %v11752_v11 = vpop.f32.mrb[60].mxu0  ;;  %v13430_v7 = vld [vmem:[%s15765_s5 + $0x38] sm:$0xff] }
 0x1ae   :  { %v1046_v12 = vadd.f32 %v11752_v11, %v13176_v22  ;;  %v1037_v13 = vpop.f32.mrb[61].mxu0  ;;  %v11179_v11 = vcombine.high %v13421_v1, %v13430_v7  ;;  %5456 = vmatprep.subr.bf16.mxu0 %v11144_v6 }
 0x1af   :  { %v1038_v14 = vadd.f32 %v13176_v22, %v1037_v13  ;;  %v11753_v15 = vpop.f32.mrb[62].mxu0  ;;  %11882 = vmatprep.mubr.msk.bf16.mxu1 %vm1539_vm2, %v1464_v10  ;;  %v11178_v10 = vcombine.low %v13421_v1, %v13430_v7  ;;  %v11166_v1 = vld [vmem:[%s15765_s5 + $0x98] sm:$0xff] }
 0x1b0   :  { %v1049_v16 = vadd.f32 %v11753_v15, %v13176_v22  ;;  %v1040_v17 = vpop.f32.mrb[63].mxu0  ;;  %11883 = vmatmul.mubr.msk.bf16.gmra.mrb[80].mxu1 %vm1539_vm2, %v1465_v9  ;;  %v1370_v19 = vmax.f32 %v1046_v12, 0.0  ;;  %6901 = vmatprep.subr.bf16.mxu1 %v11179_v11 }
 0x1b1   :  { %v1041_v18 = vadd.f32 %v13176_v22, %v1040_v17  ;;  %v1368_v21 = vmax.f32 %v1038_v14, 0.0 }
 0x1b2   :  { %v1371_v20 = vmax.f32 %v1049_v16, 0.0 }
 0x1b3   :  { %v1369_v23 = vmax.f32 %v1041_v18, 0.0 }
 0x1b4   :  { %v1467_v24 = vpack.c.bf16 %v1371_v20, %v1370_v19 }
 0x1b5   :  { %v1466_v25 = vpack.c.bf16 %v1369_v23, %v1368_v21  ;;  %v11756_v30 = vpop.f32.mrb[64].mxu0 }
 0x1b6   :  { %v1062_v32 = vadd.f32 %v11756_v30, %v13176_v22  ;;  %v1053_v34 = vpop.f32.mrb[65].mxu0 }
 0x1b7   :  { %v1054_v36 = vadd.f32 %v13176_v22, %v1053_v34  ;;  %v11757_v37 = vpop.f32.mrb[66].mxu0  ;;  %11886 = vmatprep.mubr.msk.bf16.mxu1 %vm1539_vm2, %v1466_v25 }
 0x1b8   :  { %v1065_v38 = vadd.f32 %v11757_v37, %v13176_v22  ;;  %v1056_v39 = vpop.f32.mrb[67].mxu0  ;;  %11887 = vmatmul.mubr.msk.bf16.gmra.mrb[84].mxu1 %vm1539_vm2, %v1467_v24  ;;  %v1374_v41 = vmax.f32 %v1062_v32, 0.0 }
 0x1b9   :  { %v1057_v40 = vadd.f32 %v13176_v22, %v1056_v39  ;;  %v1372_v43 = vmax.f32 %v1054_v36, 0.0 }
 0x1ba   :  { %v1375_v42 = vmax.f32 %v1065_v38, 0.0 }
 0x1bb   :  { %v1373_v44 = vmax.f32 %v1057_v40, 0.0 }
 0x1bc   :  { %v1469_v45 = vpack.c.bf16 %v1375_v42, %v1374_v41 }
 0x1bd   :  { %v1468_v48 = vpack.c.bf16 %v1373_v44, %v1372_v43  ;;  %v11760_v50 = vpop.f32.mrb[68].mxu0 }
 0x1be   :  { %v1078_v51 = vadd.f32 %v11760_v50, %v13176_v22  ;;  %v1069_v52 = vpop.f32.mrb[69].mxu0 }
 0x1bf   :  { %v1070_v53 = vadd.f32 %v13176_v22, %v1069_v52  ;;  %v11761_v54 = vpop.f32.mrb[70].mxu0  ;;  %11890 = vmatprep.mubr.msk.bf16.mxu1 %vm1539_vm2, %v1468_v48 }
 0x1c0   :  { %v1081_v55 = vadd.f32 %v11761_v54, %v13176_v22  ;;  %v1072_v56 = vpop.f32.mrb[71].mxu0  ;;  %11891 = vmatmul.mubr.msk.bf16.gmra.mrb[88].mxu1 %vm1539_vm2, %v1469_v45  ;;  %v1378_v60 = vmax.f32 %v1078_v51, 0.0 }
 0x1c1   :  { %v1073_v57 = vadd.f32 %v13176_v22, %v1072_v56  ;;  %v1376_v0 = vmax.f32 %v1070_v53, 0.0 }
 0x1c2   :  { %v1379_v63 = vmax.f32 %v1081_v55, 0.0 }
 0x1c3   :  { %v1377_v46 = vmax.f32 %v1073_v57, 0.0 }
 0x1c4   :  { %v1471_v3 = vpack.c.bf16 %v1379_v63, %v1378_v60 }
 0x1c5   :  { %v1470_v8 = vpack.c.bf16 %v1377_v46, %v1376_v0  ;;  %v11764_v9 = vpop.f32.mrb[72].mxu0 }
 0x1c6   :  { %v1094_v12 = vadd.f32 %v11764_v9, %v13176_v22  ;;  %v1085_v13 = vpop.f32.mrb[73].mxu0 }
 0x1c7   :  { %v1086_v14 = vadd.f32 %v13176_v22, %v1085_v13  ;;  %v11765_v15 = vpop.f32.mrb[74].mxu0  ;;  %11894 = vmatprep.mubr.msk.bf16.mxu1 %vm1539_vm2, %v1470_v8 }
 0x1c8   :  { %v1097_v16 = vadd.f32 %v11765_v15, %v13176_v22  ;;  %v1088_v17 = vpop.f32.mrb[75].mxu0  ;;  %11895 = vmatmul.mubr.msk.bf16.gmra.mrb[92].mxu1 %vm1539_vm2, %v1471_v3  ;;  %v1382_v19 = vmax.f32 %v1094_v12, 0.0 }
 0x1c9   :  { %v1089_v18 = vadd.f32 %v13176_v22, %v1088_v17  ;;  %v1380_v21 = vmax.f32 %v1086_v14, 0.0 }
 0x1ca   :  { %v1383_v20 = vmax.f32 %v1097_v16, 0.0  ;;  %v13459_v16 = vld [vmem:[#allocation3] ss:$0 sm:$0xff] }
 0x1cb   :  { %v1381_v23 = vmax.f32 %v1089_v18, 0.0 }
 0x1cc   :  { %v1473_v24 = vpack.c.bf16 %v1383_v20, %v1382_v19 }
 0x1cd   :  { %v1472_v25 = vpack.c.bf16 %v1381_v23, %v1380_v21  ;;  %v11768_v30 = vpop.f32.mrb[76].mxu0 }
 0x1ce   :  { %v1110_v32 = vadd.f32 %v11768_v30, %v13176_v22  ;;  %v1101_v34 = vpop.f32.mrb[77].mxu0 }
 0x1cf   :  { %v1102_v36 = vadd.f32 %v13176_v22, %v1101_v34  ;;  %v11769_v37 = vpop.f32.mrb[78].mxu0  ;;  %11898 = vmatprep.mubr.msk.bf16.mxu1 %vm1539_vm2, %v1472_v25 }
 0x1d0   :  { %v1113_v38 = vadd.f32 %v11769_v37, %v13176_v22  ;;  %v1104_v39 = vpop.f32.mrb[79].mxu0  ;;  %11899 = vmatmul.mubr.msk.bf16.gmra.mrb[96].mxu1 %vm1539_vm2, %v1473_v24  ;;  %v1386_v41 = vmax.f32 %v1110_v32, 0.0 }
 0x1d1   :  { %v1105_v40 = vadd.f32 %v13176_v22, %v1104_v39  ;;  %v1384_v43 = vmax.f32 %v1102_v36, 0.0 }
 0x1d2   :  { %v1387_v42 = vmax.f32 %v1113_v38, 0.0 }
 0x1d3   :  { %v1385_v44 = vmax.f32 %v1105_v40, 0.0 }
 0x1d4   :  { %v1475_v45 = vpack.c.bf16 %v1387_v42, %v1386_v41 }
 0x1d5   :  { %v1474_v48 = vpack.c.bf16 %v1385_v44, %v1384_v43  ;;  %v11772_v50 = vpop.f32.mrb[80].mxu0 }
 0x1d6   :  { %v1126_v51 = vadd.f32 %v11772_v50, %v13176_v22  ;;  %v1117_v52 = vpop.f32.mrb[81].mxu0 }
 0x1d7   :  { %v1118_v53 = vadd.f32 %v13176_v22, %v1117_v52  ;;  %v11773_v54 = vpop.f32.mrb[82].mxu0  ;;  %11902 = vmatprep.mubr.msk.bf16.mxu1 %vm1539_vm2, %v1474_v48 }
 0x1d8   :  { %v1129_v55 = vadd.f32 %v11773_v54, %v13176_v22  ;;  %v1120_v56 = vpop.f32.mrb[83].mxu0  ;;  %11903 = vmatmul.mubr.msk.bf16.gmra.mrb[100].mxu1 %vm1539_vm2, %v1475_v45  ;;  %v1390_v60 = vmax.f32 %v1126_v51, 0.0 }
 0x1d9   :  { %v1121_v57 = vadd.f32 %v13176_v22, %v1120_v56  ;;  %v1388_v0 = vmax.f32 %v1118_v53, 0.0 }
 0x1da   :  { %v1391_v63 = vmax.f32 %v1129_v55, 0.0 }
 0x1db   :  { %v1389_v46 = vmax.f32 %v1121_v57, 0.0 }
 0x1dc   :  { %v1477_v3 = vpack.c.bf16 %v1391_v63, %v1390_v60 }
 0x1dd   :  { %v1476_v6 = vpack.c.bf16 %v1389_v46, %v1388_v0  ;;  %v11776_v8 = vpop.f32.mrb[84].mxu0 }
 0x1de   :  { %v1142_v9 = vadd.f32 %v11776_v8, %v13176_v22  ;;  %v1133_v11 = vpop.f32.mrb[85].mxu0 }
 0x1df   :  { %v1134_v12 = vadd.f32 %v13176_v22, %v1133_v11  ;;  %v11777_v13 = vpop.f32.mrb[86].mxu0  ;;  %11906 = vmatprep.mubr.msk.bf16.mxu1 %vm1539_vm2, %v1476_v6 }
 0x1e0   :  { %v1145_v14 = vadd.f32 %v11777_v13, %v13176_v22  ;;  %v1136_v15 = vpop.f32.mrb[87].mxu0  ;;  %11907 = vmatmul.mubr.msk.bf16.gmra.mrb[104].mxu1 %vm1539_vm2, %v1477_v3  ;;  %v1394_v18 = vmax.f32 %v1142_v9, 0.0 }
 0x1e1   :  { %v1137_v17 = vadd.f32 %v13459_v16, %v1136_v15  ;;  %v1392_v20 = vmax.f32 %v1134_v12, 0.0 }
 0x1e2   :  { %v1395_v19 = vmax.f32 %v1145_v14, 0.0 }
 0x1e3   :  { %v1393_v21 = vmax.f32 %v1137_v17, 0.0 }
 0x1e4   :  { %v1479_v23 = vpack.c.bf16 %v1395_v19, %v1394_v18 }
 0x1e5   :  { %v1478_v24 = vpack.c.bf16 %v1393_v21, %v1392_v20  ;;  %v11780_v25 = vpop.f32.mrb[88].mxu0 }
 0x1e6   :  { %v1158_v30 = vadd.f32 %v13459_v16, %v11780_v25  ;;  %v1149_v32 = vpop.f32.mrb[89].mxu0 }
 0x1e7   :  { %v1150_v34 = vadd.f32 %v13459_v16, %v1149_v32  ;;  %v11781_v22 = vpop.f32.mrb[90].mxu0  ;;  %11910 = vmatprep.mubr.msk.bf16.mxu1 %vm1539_vm2, %v1478_v24 }
 0x1e8   :  { %v1161_v36 = vadd.f32 %v13459_v16, %v11781_v22  ;;  %v1152_v37 = vpop.f32.mrb[91].mxu0  ;;  %11911 = vmatmul.mubr.msk.bf16.gmra.mrb[108].mxu1 %vm1539_vm2, %v1479_v23  ;;  %v1398_v39 = vmax.f32 %v1158_v30, 0.0 }
 0x1e9   :  { %v1153_v38 = vadd.f32 %v13459_v16, %v1152_v37  ;;  %v1396_v41 = vmax.f32 %v1150_v34, 0.0 }
 0x1ea   :  { %v1399_v40 = vmax.f32 %v1161_v36, 0.0 }
 0x1eb   :  { %v1397_v42 = vmax.f32 %v1153_v38, 0.0 }
 0x1ec   :  { %v1481_v43 = vpack.c.bf16 %v1399_v40, %v1398_v39 }
 0x1ed   :  { %v1480_v44 = vpack.c.bf16 %v1397_v42, %v1396_v41  ;;  %v11784_v45 = vpop.f32.mrb[92].mxu0 }
 0x1ee   :  { %v1174_v48 = vadd.f32 %v13459_v16, %v11784_v45  ;;  %v1165_v50 = vpop.f32.mrb[93].mxu0 }
 0x1ef   :  { %v1166_v51 = vadd.f32 %v13459_v16, %v1165_v50  ;;  %v11785_v52 = vpop.f32.mrb[94].mxu0  ;;  %11914 = vmatprep.mubr.msk.bf16.mxu1 %vm1539_vm2, %v1480_v44 }
 0x1f0   :  { %v1177_v53 = vadd.f32 %v13459_v16, %v11785_v52  ;;  %v1168_v54 = vpop.f32.mrb[95].mxu0  ;;  %11915 = vmatmul.mubr.msk.bf16.gmra.mrb[112].mxu1 %vm1539_vm2, %v1481_v43  ;;  %v1402_v56 = vmax.f32 %v1174_v48, 0.0 }
 0x1f1   :  { %v1169_v55 = vadd.f32 %v13459_v16, %v1168_v54  ;;  %v1400_v60 = vmax.f32 %v1166_v51, 0.0 }
 0x1f2   :  { %v1403_v57 = vmax.f32 %v1177_v53, 0.0 }
 0x1f3   :  { %v1401_v63 = vmax.f32 %v1169_v55, 0.0 }
 0x1f4   :  { %v1483_v0 = vpack.c.bf16 %v1403_v57, %v1402_v56 }
 0x1f5   :  { %v1482_v46 = vpack.c.bf16 %v1401_v63, %v1400_v60  ;;  %v11788_v3 = vpop.f32.mrb[96].mxu0 }
 0x1f6   :  { %v1190_v6 = vadd.f32 %v13459_v16, %v11788_v3  ;;  %v1181_v8 = vpop.f32.mrb[97].mxu0 }
 0x1f7   :  { %v1182_v9 = vadd.f32 %v13459_v16, %v1181_v8  ;;  %v11789_v11 = vpop.f32.mrb[98].mxu0  ;;  %11918 = vmatprep.mubr.msk.bf16.mxu1 %vm1539_vm2, %v1482_v46 }
 0x1f8   :  { %v1193_v12 = vadd.f32 %v13459_v16, %v11789_v11  ;;  %v1184_v13 = vpop.f32.mrb[99].mxu0  ;;  %11919 = vmatmul.mubr.msk.bf16.gmra.mrb[116].mxu1 %vm1539_vm2, %v1483_v0  ;;  %v1406_v15 = vmax.f32 %v1190_v6, 0.0 }
 0x1f9   :  { %v1185_v14 = vadd.f32 %v13459_v16, %v1184_v13  ;;  %v1404_v18 = vmax.f32 %v1182_v9, 0.0 }
 0x1fa   :  { %v1407_v17 = vmax.f32 %v1193_v12, 0.0 }
 0x1fb   :  { %v1405_v19 = vmax.f32 %v1185_v14, 0.0 }
 0x1fc   :  { %v1485_v20 = vpack.c.bf16 %v1407_v17, %v1406_v15 }
 0x1fd   :  { %v1484_v21 = vpack.c.bf16 %v1405_v19, %v1404_v18  ;;  %v11792_v23 = vpop.f32.mrb[100].mxu0 }
 0x1fe   :  { %v1206_v24 = vadd.f32 %v13459_v16, %v11792_v23  ;;  %v1197_v25 = vpop.f32.mrb[101].mxu0 }
 0x1ff   :  { %v1198_v30 = vadd.f32 %v13459_v16, %v1197_v25  ;;  %v11793_v32 = vpop.f32.mrb[102].mxu0  ;;  %11922 = vmatprep.mubr.msk.bf16.mxu1 %vm1539_vm2, %v1484_v21 }
 0x200   :  { %v1209_v34 = vadd.f32 %v13459_v16, %v11793_v32  ;;  %v1200_v22 = vpop.f32.mrb[103].mxu0  ;;  %11923 = vmatmul.mubr.msk.bf16.gmra.mrb[120].mxu1 %vm1539_vm2, %v1485_v20  ;;  %v1410_v37 = vmax.f32 %v1206_v24, 0.0 }
 0x201   :  { %v1201_v36 = vadd.f32 %v13459_v16, %v1200_v22  ;;  %v1408_v39 = vmax.f32 %v1198_v30, 0.0  ;;  %v13494_v16 = vld [vmem:[#allocation6] ss:$0 sm:$0xff] }
 0x202   :  { %v1411_v38 = vmax.f32 %v1209_v34, 0.0 }
 0x203   :  { %v1409_v40 = vmax.f32 %v1201_v36, 0.0 }
 0x204   :  { %v1487_v41 = vpack.c.bf16 %v1411_v38, %v1410_v37 }
 0x205   :  { %v1486_v42 = vpack.c.bf16 %v1409_v40, %v1408_v39 }
 0x207   :  { %11926 = vmatprep.mubr.msk.bf16.mxu1 %vm1539_vm2, %v1486_v42 }
 0x208   :  { %11927 = vmatmul.mubr.msk.bf16.gmra.mrb[124].mxu1 %vm1539_vm2, %v1487_v41 }
 0x209   :  { %11930 = vmatprep.mubr.msk.bf16.mxu1 %vm1539_vm2, %v13269_v31 }
 0x210   :  { %11931 = vmatmul.mubr.msk.bf16.gmra.mrb[128].mxu1 %vm1539_vm2, %v13266_v28  ;;  %v11129_v28 = vld [vmem:[%s15765_s5 + $0x50] sm:$0xff] }
 0x211   :  { %11934 = vmatprep.mubr.msk.bf16.mxu1 %vm1539_vm2, %v13283_v61  ;;  %v11130_v61 = vld [vmem:[%s15765_s5 + $0x70] sm:$0xff] }
 0x212   :  { %v11146_v0 = vcombine.high %v11129_v28, %v11130_v61 }
 0x213   :  { %v11828_v43 = vpop.f32.mrb[24].mxu1 }
 0x214   :  { %v1775_v44 = vadd.f32 %v11828_v43, %v13494_v16  ;;  %v1766_v45 = vpop.f32.mrb[25].mxu1 }
 0x215   :  { %v1767_v48 = vadd.f32 %v13494_v16, %v1766_v45  ;;  %v11829_v50 = vpop.f32.mrb[26].mxu1 }
 0x216   :  { %v1778_v51 = vadd.f32 %v11829_v50, %v13494_v16  ;;  %v1769_v52 = vpop.f32.mrb[27].mxu1  ;;  %v2279_v53 = vmax.f32 %v1775_v44, 0.0 }
 0x217   :  { %v1770_v31 = vadd.f32 %v13494_v16, %v1769_v52  ;;  %v2277_v55 = vmax.f32 %v1767_v48, 0.0 }
 0x218   :  { %v2280_v54 = vmax.f32 %v1778_v51, 0.0  ;;  %11935 = vmatmul.mubr.msk.bf16.gmra.mrb[132].mxu1 %vm1539_vm2, %v13280_v59 }
 0x219   :  { %v2278_v56 = vmax.f32 %v1770_v31, 0.0  ;;  %11938 = vmatprep.mubr.msk.bf16.mxu1 %vm1539_vm2, %v13303_v27  ;;  %v11145_v27 = vcombine.low %v11129_v28, %v11130_v61 }
 0x21a   :  { %v13510_v57 = vpack.c.bf16 %v2280_v54, %v2279_v53 }
 0x21b   :  { %v13512_v60 = vpack.c.bf16 %v2278_v56, %v2277_v55  ;;  %v11832_v63 = vpop.f32.mrb[28].mxu1 }
 0x21c   :  { %15858 = vst [vmem:[#allocation17_spill] sm:$0xff] %v13510_v57  ;;  %v1791_v59 = vadd.f32 %v11832_v63, %v13494_v16  ;;  %v1782_v46 = vpop.f32.mrb[29].mxu1 }
 0x21d   :  { %15859 = vst [vmem:[#allocation18_spill] sm:$0xff] %v13512_v60  ;;  %v1783_v3 = vadd.f32 %v13494_v16, %v1782_v46  ;;  %v11833_v6 = vpop.f32.mrb[30].mxu1  ;;  %2599 = vmatmul.mubr.bf16.vlgmr.msra.gmra.mrb[104].mxu0 %v13512_v60  ;;  %v11164_v46 = vld [vmem:[%s15765_s5 + $0x58] sm:$0xff] }
 0x21e   :  { %v1794_v8 = vadd.f32 %v11833_v6, %v13494_v16  ;;  %v1785_v9 = vpop.f32.mrb[31].mxu1  ;;  %2608 = vmatprep.mubr.bf16.mxu0 %v15786_v35  ;;  %5457 = vmatpush1.bf16.msra.mxu0 %v11143_v5  ;;  %v2283_v12 = vmax.f32 %v1791_v59, 0.0 }
 0x21f   :  { %v1786_v11 = vadd.f32 %v13494_v16, %v1785_v9  ;;  %5458 = vmatprep.subr.bf16.mxu0 %v11146_v0  ;;  %v2281_v14 = vmax.f32 %v1783_v3, 0.0  ;;  %v11165_v3 = vld [vmem:[%s15765_s5 + $0x78] sm:$0xff] }
 0x220   :  { %v2284_v13 = vmax.f32 %v1794_v8, 0.0  ;;  %11939 = vmatmul.mubr.msk.bf16.gmra.mrb[136].mxu1 %vm1539_vm2, %v13301_v26 }
 0x221   :  { %v2282_v15 = vmax.f32 %v1786_v11, 0.0  ;;  %11942 = vmatprep.mubr.msk.bf16.mxu1 %vm1539_vm2, %v13317_v62 }
 0x222   :  { %v13527_v17 = vpack.c.bf16 %v2284_v13, %v2283_v12  ;;  %5459 = vmatpush1.bf16.msra.mxu0 %v11145_v27  ;;  %v11181_v12 = vcombine.high %v11164_v46, %v11165_v3 }
 0x223   :  { %v13529_v18 = vpack.c.bf16 %v2282_v15, %v2281_v14  ;;  %v11836_v47 = vpop.f32.mrb[32].mxu1 }
 0x224   :  { %15860 = vst [vmem:[#allocation19_spill] sm:$0xff] %v13527_v17  ;;  %v1807_v49 = vadd.f32 %v11836_v47, %v13494_v16  ;;  %v1798_v5 = vpop.f32.mrb[33].mxu1 }
 0x225   :  { %15861 = vst [vmem:[#allocation20_spill] sm:$0xff] %v13529_v18  ;;  %v1799_v19 = vadd.f32 %v13494_v16, %v1798_v5  ;;  %v11837_v20 = vpop.f32.mrb[34].mxu1  ;;  %2609 = vmatmul.mubr.bf16.gmra.mrb[108].mxu0 %v13510_v57  ;;  %v11180_v5 = vcombine.low %v11164_v46, %v11165_v3 }
 0x226   :  { %v1810_v26 = vadd.f32 %v11837_v20, %v13494_v16  ;;  %v1801_v21 = vpop.f32.mrb[35].mxu1  ;;  %2618 = vmatprep.mubr.bf16.mxu0 %v15786_v35  ;;  %v2287_v23 = vmax.f32 %v1807_v49, 0.0 }
 0x227   :  { %v1802_v62 = vadd.f32 %v13494_v16, %v1801_v21  ;;  %v2285_v25 = vmax.f32 %v1799_v19, 0.0  ;;  %v11131_v21 = vld [vmem:[%s15765_s5 + $0x90] sm:$0xff] }
 0x228   :  { %v2288_v24 = vmax.f32 %v1810_v26, 0.0  ;;  %11943 = vmatmul.mubr.msk.bf16.gmra.mrb[140].mxu1 %vm1539_vm2, %v13314_v58 }
 0x229   :  { %v2286_v30 = vmax.f32 %v1802_v62, 0.0  ;;  %11946 = vmatprep.mubr.msk.bf16.mxu1 %vm1539_vm2, %v13337_v33  ;;  %v11132_v62 = vld [vmem:[%s15765_s5 + $0xb0] sm:$0xff] }
 0x22a   :  { %v13541_v32 = vpack.c.bf16 %v2288_v24, %v2287_v23  ;;  %v11147_v23 = vcombine.low %v11131_v21, %v11132_v62  ;;  %v11148_v24 = vcombine.high %v11131_v21, %v11132_v62 }
 0x22b   :  { %v13543_v34 = vpack.c.bf16 %v2286_v30, %v2285_v25  ;;  %v11840_v22 = vpop.f32.mrb[36].mxu1  ;;  %v11167_v25 = vld [vmem:[%s15765_s5 + $0xb8] sm:$0xff] }
 0x22c   :  { %15862 = vst [vmem:[#allocation21_spill] sm:$0xff] %v13541_v32  ;;  %v1823_v36 = vadd.f32 %v11840_v22, %v13494_v16  ;;  %v1814_v37 = vpop.f32.mrb[37].mxu1  ;;  %5460 = vmatprep.subr.bf16.mxu0 %v11148_v24 }
 0x22d   :  { %15863 = vst [vmem:[#allocation22_spill] sm:$0xff] %v13543_v34  ;;  %v1815_v38 = vadd.f32 %v13494_v16, %v1814_v37  ;;  %v11841_v39 = vpop.f32.mrb[38].mxu1  ;;  %2619 = vmatmul.mubr.bf16.gmra.mrb[112].mxu0 %v13529_v18  ;;  %v11183_v37 = vcombine.high %v11166_v1, %v11167_v25 }
 0x22e   :  { %v1826_v58 = vadd.f32 %v11841_v39, %v13494_v16  ;;  %v1817_v40 = vpop.f32.mrb[39].mxu1  ;;  %2628 = vmatprep.mubr.bf16.mxu0 %v15786_v35  ;;  %v2291_v41 = vmax.f32 %v1823_v36, 0.0  ;;  %v11182_v36 = vcombine.low %v11166_v1, %v11167_v25  ;;  %5461 = vmatpush1.bf16.msra.mxu0 %v11147_v23 }
 0x22f   :  { %v1818_v33 = vadd.f32 %v13494_v16, %v1817_v40  ;;  %v2289_v43 = vmax.f32 %v1815_v38, 0.0 }
 0x230   :  { %v2292_v42 = vmax.f32 %v1826_v58, 0.0  ;;  %11947 = vmatmul.mubr.msk.bf16.gmra.mrb[144].mxu1 %vm1539_vm2, %v13334_v29 }
 0x231   :  { %v2290_v44 = vmax.f32 %v1818_v33, 0.0  ;;  %11950 = vmatprep.mubr.msk.bf16.mxu1 %vm1539_vm2, %v13357_v4 }
 0x232   :  { %v13555_v45 = vpack.c.bf16 %v2292_v42, %v2291_v41 }
 0x233   :  { %v13557_v48 = vpack.c.bf16 %v2290_v44, %v2289_v43  ;;  %v11844_v50 = vpop.f32.mrb[40].mxu1 }
 0x234   :  { %15864 = vst [vmem:[#allocation23_spill] sm:$0xff] %v13555_v45  ;;  %v1839_v51 = vadd.f32 %v11844_v50, %v13494_v16  ;;  %v1830_v52 = vpop.f32.mrb[41].mxu1 }
 0x235   :  { %15865 = vst [vmem:[#allocation24_spill] sm:$0xff] %v13557_v48  ;;  %v1831_v31 = vadd.f32 %v13494_v16, %v1830_v52  ;;  %v11845_v53 = vpop.f32.mrb[42].mxu1  ;;  %2629 = vmatmul.mubr.bf16.gmra.mrb[116].mxu0 %v13527_v17 }
 0x236   :  { %v1842_v29 = vadd.f32 %v11845_v53, %v13494_v16  ;;  %v1833_v54 = vpop.f32.mrb[43].mxu1  ;;  %2638 = vmatprep.mubr.bf16.mxu0 %v15786_v35  ;;  %v2295_v28 = vmax.f32 %v1839_v51, 0.0 }
 0x237   :  { %v1834_v4 = vadd.f32 %v13494_v16, %v1833_v54  ;;  %v2293_v55 = vmax.f32 %v1831_v31, 0.0 }
 0x238   :  { %v2296_v61 = vmax.f32 %v1842_v29, 0.0  ;;  %11951 = vmatmul.mubr.msk.bf16.gmra.mrb[148].mxu1 %vm1539_vm2, %v13354_v2 }
 0x239   :  { %v2294_v56 = vmax.f32 %v1834_v4, 0.0  ;;  %4043 = vmatprep.mubr.bf16.mxu1 %v15786_v35 }
 0x23a   :  { %v13568_v63 = vpack.c.bf16 %v2296_v61, %v2295_v28 }
 0x23b   :  { %v13570_v0 = vpack.c.bf16 %v2294_v56, %v2293_v55  ;;  %v11848_v59 = vpop.f32.mrb[44].mxu1 }
 0x23c   :  { %15866 = vst [vmem:[#allocation25_spill] sm:$0xff] %v13568_v63  ;;  %v1855_v6 = vadd.f32 %v11848_v59, %v13494_v16  ;;  %v1846_v2 = vpop.f32.mrb[45].mxu1 }
 0x23d   :  { %15867 = vst [vmem:[#allocation26_spill] sm:$0xff] %v13570_v0  ;;  %v1847_v8 = vadd.f32 %v13494_v16, %v1846_v2  ;;  %v11849_v9 = vpop.f32.mrb[46].mxu1  ;;  %2639 = vmatmul.mubr.bf16.gmra.mrb[120].mxu0 %v13543_v34 }
 0x23e   :  { %v1858_v27 = vadd.f32 %v11849_v9, %v13494_v16  ;;  %v1849_v11 = vpop.f32.mrb[47].mxu1  ;;  %2648 = vmatprep.mubr.bf16.mxu0 %v15786_v35  ;;  %v2299_v14 = vmax.f32 %v1855_v6, 0.0 }
 0x23f   :  { %v1850_v13 = vadd.f32 %v13494_v16, %v1849_v11  ;;  %v2297_v47 = vmax.f32 %v1847_v8, 0.0 }
 0x240   :  { %v2300_v15 = vmax.f32 %v1858_v27, 0.0  ;;  %4044 = vmatmul.mubr.bf16.vlgmr.msra.gmra.mrb[152].mxu1 %v13512_v60 }
 0x241   :  { %v2298_v49 = vmax.f32 %v1850_v13, 0.0  ;;  %6902 = vmatpush1.bf16.msra.mxu1 %v11178_v10  ;;  %4053 = vmatprep.mubr.bf16.mxu1 %v15786_v35 }
 0x242   :  { %v13589_v19 = vpack.c.bf16 %v2300_v15, %v2299_v14  ;;  %6903 = vmatprep.subr.bf16.mxu1 %v11181_v12 }
 0x243   :  { %v13591_v20 = vpack.c.bf16 %v2298_v49, %v2297_v47  ;;  %v11852_v26 = vpop.f32.mrb[48].mxu1 }
 0x244   :  { %15868 = vst [vmem:[#allocation27_spill] sm:$0xff] %v13589_v19  ;;  %v1871_v7 = vadd.f32 %v11852_v26, %v13494_v16  ;;  %v1862_v10 = vpop.f32.mrb[49].mxu1 }
 0x245   :  { %15869 = vst [vmem:[#allocation28_spill] sm:$0xff] %v13591_v20  ;;  %v1863_v30 = vadd.f32 %v13494_v16, %v1862_v10  ;;  %v11853_v22 = vpop.f32.mrb[50].mxu1  ;;  %2649 = vmatmul.mubr.bf16.gmra.mrb[124].mxu0 %v13541_v32  ;;  %6904 = vmatpush1.bf16.msra.mxu1 %v11180_v5 }
 0x246   :  { %v1874_v38 = vadd.f32 %v11853_v22, %v13494_v16  ;;  %v1865_v39 = vpop.f32.mrb[51].mxu1  ;;  %2658 = vmatprep.mubr.bf16.mxu0 %v15786_v35  ;;  %6905 = vmatprep.subr.bf16.mxu1 %v11183_v37  ;;  %v2303_v40 = vmax.f32 %v1871_v7, 0.0 }
 0x247   :  { %v1866_v58 = vadd.f32 %v13494_v16, %v1865_v39  ;;  %v2301_v41 = vmax.f32 %v1863_v30, 0.0 }
 0x248   :  { %v2304_v33 = vmax.f32 %v1874_v38, 0.0  ;;  %4054 = vmatmul.mubr.bf16.gmra.mrb[156].mxu1 %v13510_v57 }
 0x249   :  { %v2302_v42 = vmax.f32 %v1866_v58, 0.0  ;;  %4063 = vmatprep.mubr.bf16.mxu1 %v15786_v35  ;;  %6906 = vmatpush1.bf16.msra.mxu1 %v11182_v36 }
 0x24a   :  { %v13613_v43 = vpack.c.bf16 %v2304_v33, %v2303_v40 }
 0x24b   :  { %v13615_v44 = vpack.c.bf16 %v2302_v42, %v2301_v41  ;;  %v11856_v50 = vpop.f32.mrb[52].mxu1 }
 0x24c   :  { %15870 = vst [vmem:[#allocation29_spill] sm:$0xff] %v13613_v43  ;;  %v1887_v51 = vadd.f32 %v11856_v50, %v13494_v16  ;;  %v1878_v52 = vpop.f32.mrb[53].mxu1 }
 0x24d   :  { %15871 = vst [vmem:[#allocation30_spill] sm:$0xff] %v13615_v44  ;;  %v1879_v31 = vadd.f32 %v13494_v16, %v1878_v52  ;;  %v11857_v53 = vpop.f32.mrb[54].mxu1  ;;  %2659 = vmatmul.mubr.bf16.gmra.mrb[128].mxu0 %v13557_v48 }
 0x24e   :  { %v1890_v29 = vadd.f32 %v11857_v53, %v13494_v16  ;;  %v1881_v54 = vpop.f32.mrb[55].mxu1  ;;  %2668 = vmatprep.mubr.bf16.mxu0 %v15786_v35  ;;  %v2307_v28 = vmax.f32 %v1887_v51, 0.0 }
 0x24f   :  { %v1882_v4 = vadd.f32 %v13494_v16, %v1881_v54  ;;  %v2305_v55 = vmax.f32 %v1879_v31, 0.0 }
 0x250   :  { %v2308_v61 = vmax.f32 %v1890_v29, 0.0  ;;  %4064 = vmatmul.mubr.bf16.gmra.mrb[160].mxu1 %v13529_v18 }
 0x251   :  { %v2306_v56 = vmax.f32 %v1882_v4, 0.0  ;;  %4073 = vmatprep.mubr.bf16.mxu1 %v15786_v35 }
 0x252   :  { %v13625_v59 = vpack.c.bf16 %v2308_v61, %v2307_v28 }
 0x253   :  { %v13627_v46 = vpack.c.bf16 %v2306_v56, %v2305_v55  ;;  %v11860_v3 = vpop.f32.mrb[56].mxu1 }
 0x254   :  { %15872 = vst [vmem:[#allocation31_spill] sm:$0xff] %v13625_v59  ;;  %v1903_v6 = vadd.f32 %v11860_v3, %v13494_v16  ;;  %v1894_v2 = vpop.f32.mrb[57].mxu1 }
 0x255   :  { %15873 = vst [vmem:[#allocation32_spill] sm:$0xff] %v13627_v46  ;;  %v1895_v8 = vadd.f32 %v13494_v16, %v1894_v2  ;;  %v11861_v9 = vpop.f32.mrb[58].mxu1  ;;  %2669 = vmatmul.mubr.bf16.gmra.mrb[132].mxu0 %v13555_v45 }
 0x256   :  { %v1906_v27 = vadd.f32 %v11861_v9, %v13494_v16  ;;  %v1897_v11 = vpop.f32.mrb[59].mxu1  ;;  %2678 = vmatprep.mubr.bf16.mxu0 %v15786_v35  ;;  %v2311_v13 = vmax.f32 %v1903_v6, 0.0 }
 0x257   :  { %v1898_v12 = vadd.f32 %v13494_v16, %v1897_v11  ;;  %v2309_v15 = vmax.f32 %v1895_v8, 0.0 }
 0x258   :  { %v2312_v14 = vmax.f32 %v1906_v27, 0.0  ;;  %4074 = vmatmul.mubr.bf16.gmra.mrb[164].mxu1 %v13527_v17 }
 0x259   :  { %v2310_v47 = vmax.f32 %v1898_v12, 0.0  ;;  %4083 = vmatprep.mubr.bf16.mxu1 %v15786_v35 }
 0x25a   :  { %v13637_v49 = vpack.c.bf16 %v2312_v14, %v2311_v13 }
 0x25b   :  { %v13639_v5 = vpack.c.bf16 %v2310_v47, %v2309_v15  ;;  %v11864_v26 = vpop.f32.mrb[60].mxu1 }
 0x25c   :  { %15874 = vst [vmem:[#allocation33_spill] sm:$0xff] %v13637_v49  ;;  %v1919_v21 = vadd.f32 %v11864_v26, %v13494_v16  ;;  %v1910_v62 = vpop.f32.mrb[61].mxu1 }
 0x25d   :  { %15875 = vst [vmem:[#allocation34_spill] sm:$0xff] %v13639_v5  ;;  %v1911_v1 = vadd.f32 %v13494_v16, %v1910_v62  ;;  %v11865_v7 = vpop.f32.mrb[62].mxu1  ;;  %2679 = vmatmul.mubr.bf16.gmra.mrb[136].mxu0 %v13570_v0 }
 0x25e   :  { %v1922_v10 = vadd.f32 %v11865_v7, %v13494_v16  ;;  %v1913_v23 = vpop.f32.mrb[63].mxu1  ;;  %2688 = vmatprep.mubr.bf16.mxu0 %v15786_v35  ;;  %v2315_v25 = vmax.f32 %v1919_v21, 0.0 }
 0x25f   :  { %v1914_v24 = vadd.f32 %v13494_v16, %v1913_v23  ;;  %v2313_v22 = vmax.f32 %v1911_v1, 0.0 }
 0x260   :  { %v2316_v30 = vmax.f32 %v1922_v10, 0.0  ;;  %4084 = vmatmul.mubr.bf16.gmra.mrb[168].mxu1 %v13543_v34 }
 0x261   :  { %v2314_v36 = vmax.f32 %v1914_v24, 0.0  ;;  %4093 = vmatprep.mubr.bf16.mxu1 %v15786_v35 }
 0x262   :  { %v13649_v37 = vpack.c.bf16 %v2316_v30, %v2315_v25 }
 0x263   :  { %v13651_v38 = vpack.c.bf16 %v2314_v36, %v2313_v22  ;;  %v11868_v39 = vpop.f32.mrb[64].mxu1 }
 0x264   :  { %15876 = vst [vmem:[#allocation35_spill] sm:$0xff] %v13649_v37  ;;  %v1935_v58 = vadd.f32 %v11868_v39, %v13494_v16  ;;  %v1926_v40 = vpop.f32.mrb[65].mxu1 }
 0x265   :  { %15877 = vst [vmem:[#allocation36_spill] sm:$0xff] %v13651_v38  ;;  %v1927_v33 = vadd.f32 %v13494_v16, %v1926_v40  ;;  %v11869_v41 = vpop.f32.mrb[66].mxu1  ;;  %2689 = vmatmul.mubr.bf16.gmra.mrb[140].mxu0 %v13568_v63 }
 0x266   :  { %v1938_v42 = vadd.f32 %v11869_v41, %v13494_v16  ;;  %v1929_v50 = vpop.f32.mrb[67].mxu1  ;;  %2698 = vmatprep.mubr.bf16.mxu0 %v15786_v35  ;;  %v2319_v52 = vmax.f32 %v1935_v58, 0.0 }
 0x267   :  { %v1930_v51 = vadd.f32 %v13494_v16, %v1929_v50  ;;  %v2317_v53 = vmax.f32 %v1927_v33, 0.0 }
 0x268   :  { %v2320_v31 = vmax.f32 %v1938_v42, 0.0  ;;  %4094 = vmatmul.mubr.bf16.gmra.mrb[172].mxu1 %v13541_v32 }
 0x269   :  { %v2318_v29 = vmax.f32 %v1930_v51, 0.0  ;;  %4103 = vmatprep.mubr.bf16.mxu1 %v15786_v35 }
 0x26a   :  { %v13661_v54 = vpack.c.bf16 %v2320_v31, %v2319_v52 }
 0x26b   :  { %v13663_v4 = vpack.c.bf16 %v2318_v29, %v2317_v53  ;;  %v11872_v28 = vpop.f32.mrb[68].mxu1 }
 0x26c   :  { %15878 = vst [vmem:[#allocation37_spill] sm:$0xff] %v13661_v54  ;;  %v1951_v61 = vadd.f32 %v11872_v28, %v13494_v16  ;;  %v1942_v55 = vpop.f32.mrb[69].mxu1 }
 0x26d   :  { %15879 = vst [vmem:[#allocation38_spill] sm:$0xff] %v13663_v4  ;;  %v1943_v56 = vadd.f32 %v13494_v16, %v1942_v55  ;;  %v11873_v3 = vpop.f32.mrb[70].mxu1  ;;  %2699 = vmatmul.mubr.bf16.gmra.mrb[144].mxu0 %v13591_v20 }
 0x26e   :  { %v1954_v6 = vadd.f32 %v11873_v3, %v13494_v16  ;;  %v1945_v2 = vpop.f32.mrb[71].mxu1  ;;  %2708 = vmatprep.mubr.bf16.mxu0 %v15786_v35  ;;  %v2323_v9 = vmax.f32 %v1951_v61, 0.0  ;;  %v11134_v3 = vld [vmem:[%s15765_s5 + $0xf0] sm:$0xff] }
 0x26f   :  { %v1946_v8 = vadd.f32 %v13494_v16, %v1945_v2  ;;  %v2321_v11 = vmax.f32 %v1943_v56, 0.0  ;;  %v11133_v56 = vld [vmem:[%s15765_s5 + $0xd0] sm:$0xff] }
 0x270   :  { %v2324_v27 = vmax.f32 %v1954_v6, 0.0  ;;  %4104 = vmatmul.mubr.bf16.gmra.mrb[176].mxu1 %v13557_v48  ;;  %v11168_v6 = vld [vmem:[%s15765_s5 + $0xd8] sm:$0xff] }
 0x271   :  { %v2322_v12 = vmax.f32 %v1946_v8, 0.0  ;;  %4113 = vmatprep.mubr.bf16.mxu1 %v15786_v35 }
 0x272   :  { %v13673_v13 = vpack.c.bf16 %v2324_v27, %v2323_v9  ;;  %v11149_v9 = vcombine.low %v11133_v56, %v11134_v3  ;;  %v11150_v27 = vcombine.high %v11133_v56, %v11134_v3 }
 0x273   :  { %v13675_v14 = vpack.c.bf16 %v2322_v12, %v2321_v11  ;;  %v11876_v15 = vpop.f32.mrb[72].mxu1  ;;  %v11169_v11 = vld [vmem:[%s15765_s5 + $0xf8] sm:$0xff] }
 0x274   :  { %15880 = vst [vmem:[#allocation39_spill] sm:$0xff] %v13673_v13  ;;  %v1967_v47 = vadd.f32 %v11876_v15, %v13494_v16  ;;  %v1958_v26 = vpop.f32.mrb[73].mxu1  ;;  %5462 = vmatprep.subr.bf16.mxu0 %v11150_v27 }
 0x275   :  { %15881 = vst [vmem:[#allocation40_spill] sm:$0xff] %v13675_v14  ;;  %v1959_v21 = vadd.f32 %v13494_v16, %v1958_v26  ;;  %v11877_v62 = vpop.f32.mrb[74].mxu1  ;;  %2709 = vmatmul.mubr.bf16.gmra.mrb[148].mxu0 %v13589_v19  ;;  %v11185_v26 = vcombine.high %v11168_v6, %v11169_v11 }
 0x276   :  { %v1970_v1 = vadd.f32 %v11877_v62, %v13494_v16  ;;  %v1961_v7 = vpop.f32.mrb[75].mxu1  ;;  %2718 = vmatprep.mubr.bf16.mxu0 %v15786_v35  ;;  %v2327_v23 = vmax.f32 %v1967_v47, 0.0  ;;  %v11184_v47 = vcombine.low %v11168_v6, %v11169_v11  ;;  %5463 = vmatpush1.bf16.msra.mxu0 %v11149_v9 }
 0x277   :  { %v1962_v10 = vadd.f32 %v13494_v16, %v1961_v7  ;;  %v2325_v25 = vmax.f32 %v1959_v21, 0.0  ;;  %6907 = vmatprep.subr.bf16.mxu1 %v11185_v26 }
 0x278   :  { %v2328_v24 = vmax.f32 %v1970_v1, 0.0  ;;  %4114 = vmatmul.mubr.bf16.gmra.mrb[180].mxu1 %v13555_v45 }
 0x279   :  { %v2326_v30 = vmax.f32 %v1962_v10, 0.0  ;;  %4123 = vmatprep.mubr.bf16.mxu1 %v15786_v35  ;;  %6908 = vmatpush1.bf16.msra.mxu1 %v11184_v47 }
 0x27a   :  { %v13685_v22 = vpack.c.bf16 %v2328_v24, %v2327_v23 }
 0x27b   :  { %v13687_v36 = vpack.c.bf16 %v2326_v30, %v2325_v25  ;;  %v11880_v39 = vpop.f32.mrb[76].mxu1 }
 0x27c   :  { %v1983_v58 = vadd.f32 %v11880_v39, %v13494_v16  ;;  %v1974_v40 = vpop.f32.mrb[77].mxu1 }
 0x27d   :  { %15882 = vst [vmem:[#allocation41_spill] sm:$0xff] %v13687_v36  ;;  %v1975_v33 = vadd.f32 %v13494_v16, %v1974_v40  ;;  %v11881_v41 = vpop.f32.mrb[78].mxu1  ;;  %2719 = vmatmul.mubr.bf16.gmra.mrb[152].mxu0 %v13615_v44 }
 0x27e   :  { %v1986_v42 = vadd.f32 %v11881_v41, %v13494_v16  ;;  %v1977_v50 = vpop.f32.mrb[79].mxu1  ;;  %2728 = vmatprep.mubr.bf16.mxu0 %v15786_v35  ;;  %v2331_v52 = vmax.f32 %v1983_v58, 0.0 }
 0x27f   :  { %v1978_v51 = vadd.f32 %v13494_v16, %v1977_v50  ;;  %v2329_v53 = vmax.f32 %v1975_v33, 0.0 }
 0x280   :  { %v2332_v31 = vmax.f32 %v1986_v42, 0.0  ;;  %4124 = vmatmul.mubr.bf16.gmra.mrb[184].mxu1 %v13570_v0 }
 0x281   :  { %v2330_v29 = vmax.f32 %v1978_v51, 0.0  ;;  %4133 = vmatprep.mubr.bf16.mxu1 %v15786_v35 }
 0x282   :  { %v13697_v28 = vpack.c.bf16 %v2332_v31, %v2331_v52 }
 0x283   :  { %v13699_v61 = vpack.c.bf16 %v2330_v29, %v2329_v53  ;;  %v11884_v55 = vpop.f32.mrb[80].mxu1 }
 0x284   :  { %v1999_v2 = vadd.f32 %v11884_v55, %v13494_v16  ;;  %v1990_v8 = vpop.f32.mrb[81].mxu1 }
 0x285   :  { %v1991_v12 = vadd.f32 %v13494_v16, %v1990_v8  ;;  %v11885_v15 = vpop.f32.mrb[82].mxu1  ;;  %2729 = vmatmul.mubr.bf16.gmra.mrb[156].mxu0 %v13613_v43 }
 0x286   :  { %v2002_v21 = vadd.f32 %v11885_v15, %v13494_v16  ;;  %v1993_v62 = vpop.f32.mrb[83].mxu1  ;;  %2738 = vmatprep.mubr.bf16.mxu0 %v15786_v35  ;;  %v2335_v7 = vmax.f32 %v1999_v2, 0.0 }
 0x287   :  { %v1994_v1 = vadd.f32 %v13494_v16, %v1993_v62  ;;  %v2333_v23 = vmax.f32 %v1991_v12, 0.0 }
 0x288   :  { %v2336_v10 = vmax.f32 %v2002_v21, 0.0  ;;  %4134 = vmatmul.mubr.bf16.gmra.mrb[188].mxu1 %v13568_v63 }
 0x289   :  { %v2334_v24 = vmax.f32 %v1994_v1, 0.0  ;;  %4143 = vmatprep.mubr.bf16.mxu1 %v15786_v35 }
 0x28a   :  { %v13721_v25 = vpack.c.bf16 %v2336_v10, %v2335_v7 }
 0x28b   :  { %v13723_v30 = vpack.c.bf16 %v2334_v24, %v2333_v23  ;;  %v11888_v39 = vpop.f32.mrb[84].mxu1 }
 0x28c   :  { %v2015_v58 = vadd.f32 %v11888_v39, %v13494_v16  ;;  %v2006_v40 = vpop.f32.mrb[85].mxu1 }
 0x28d   :  { %15883 = vst [vmem:[#allocation42_spill] sm:$0xff] %v13723_v30  ;;  %v2007_v33 = vadd.f32 %v13494_v16, %v2006_v40  ;;  %v11889_v41 = vpop.f32.mrb[86].mxu1  ;;  %2739 = vmatmul.mubr.bf16.gmra.mrb[160].mxu0 %v13627_v46 }
 0x28e   :  { %v2018_v42 = vadd.f32 %v11889_v41, %v13494_v16  ;;  %v2009_v50 = vpop.f32.mrb[87].mxu1  ;;  %2748 = vmatprep.mubr.bf16.mxu0 %v15786_v35  ;;  %v2339_v52 = vmax.f32 %v2015_v58, 0.0 }
 0x28f   :  { %v2010_v51 = vadd.f32 %v13494_v16, %v2009_v50  ;;  %v2337_v53 = vmax.f32 %v2007_v33, 0.0 }
 0x290   :  { %v2340_v31 = vmax.f32 %v2018_v42, 0.0  ;;  %4144 = vmatmul.mubr.bf16.gmra.mrb[192].mxu1 %v13591_v20 }
 0x291   :  { %v2338_v29 = vmax.f32 %v2010_v51, 0.0  ;;  %4153 = vmatprep.mubr.bf16.mxu1 %v15786_v35 }
 0x292   :  { %v13733_v55 = vpack.c.bf16 %v2340_v31, %v2339_v52 }
 0x293   :  { %v13735_v56 = vpack.c.bf16 %v2338_v29, %v2337_v53  ;;  %v11892_v3 = vpop.f32.mrb[88].mxu1 }
 0x294   :  { %v2031_v6 = vadd.f32 %v11892_v3, %v13494_v16  ;;  %v2022_v2 = vpop.f32.mrb[89].mxu1 }
 0x295   :  { %v2023_v8 = vadd.f32 %v13494_v16, %v2022_v2  ;;  %v11893_v9 = vpop.f32.mrb[90].mxu1  ;;  %2749 = vmatmul.mubr.bf16.gmra.mrb[164].mxu0 %v13625_v59 }
 0x296   :  { %v2034_v27 = vadd.f32 %v11893_v9, %v13494_v16  ;;  %v2025_v11 = vpop.f32.mrb[91].mxu1  ;;  %2758 = vmatprep.mubr.bf16.mxu0 %v15786_v35  ;;  %v2343_v15 = vmax.f32 %v2031_v6, 0.0 }
 0x297   :  { %v2026_v12 = vadd.f32 %v13494_v16, %v2025_v11  ;;  %v2341_v26 = vmax.f32 %v2023_v8, 0.0 }
 0x298   :  { %v2344_v47 = vmax.f32 %v2034_v27, 0.0  ;;  %4154 = vmatmul.mubr.bf16.gmra.mrb[196].mxu1 %v13589_v19 }
 0x299   :  { %v2342_v21 = vmax.f32 %v2026_v12, 0.0  ;;  %4163 = vmatprep.mubr.bf16.mxu1 %v15786_v35 }
 0x29a   :  { %v13745_v62 = vpack.c.bf16 %v2344_v47, %v2343_v15 }
 0x29b   :  { %v13747_v1 = vpack.c.bf16 %v2342_v21, %v2341_v26  ;;  %v11896_v7 = vpop.f32.mrb[92].mxu1 }
 0x29c   :  { %v2047_v10 = vadd.f32 %v11896_v7, %v13494_v16  ;;  %v2038_v23 = vpop.f32.mrb[93].mxu1 }
 0x29d   :  { %15884 = vst [vmem:[#allocation43_spill] sm:$0xff] %v13747_v1  ;;  %v2039_v24 = vadd.f32 %v13494_v16, %v2038_v23  ;;  %v11897_v39 = vpop.f32.mrb[94].mxu1  ;;  %2759 = vmatmul.mubr.bf16.gmra.mrb[168].mxu0 %v13639_v5 }
 0x29e   :  { %v2050_v58 = vadd.f32 %v11897_v39, %v13494_v16  ;;  %v2041_v40 = vpop.f32.mrb[95].mxu1  ;;  %2768 = vmatprep.mubr.bf16.mxu0 %v15786_v35  ;;  %v2347_v41 = vmax.f32 %v2047_v10, 0.0 }
 0x29f   :  { %v2042_v33 = vadd.f32 %v13494_v16, %v2041_v40  ;;  %v2345_v50 = vmax.f32 %v2039_v24, 0.0 }
 0x2a0   :  { %v2348_v42 = vmax.f32 %v2050_v58, 0.0  ;;  %4164 = vmatmul.mubr.bf16.gmra.mrb[200].mxu1 %v13615_v44 }
 0x2a1   :  { %v2346_v51 = vmax.f32 %v2042_v33, 0.0  ;;  %4173 = vmatprep.mubr.bf16.mxu1 %v15786_v35 }
 0x2a2   :  { %v13757_v52 = vpack.c.bf16 %v2348_v42, %v2347_v41 }
 0x2a3   :  { %v13759_v31 = vpack.c.bf16 %v2346_v51, %v2345_v50  ;;  %v11900_v53 = vpop.f32.mrb[96].mxu1 }
 0x2a4   :  { %v2063_v29 = vadd.f32 %v11900_v53, %v13494_v16  ;;  %v2054_v3 = vpop.f32.mrb[97].mxu1 }
 0x2a5   :  { %v2055_v6 = vadd.f32 %v13494_v16, %v2054_v3  ;;  %v11901_v2 = vpop.f32.mrb[98].mxu1  ;;  %2769 = vmatmul.mubr.bf16.gmra.mrb[172].mxu0 %v13637_v49 }
 0x2a6   :  { %v2066_v8 = vadd.f32 %v11901_v2, %v13494_v16  ;;  %v2057_v9 = vpop.f32.mrb[99].mxu1  ;;  %2778 = vmatprep.mubr.bf16.mxu0 %v15786_v35  ;;  %v2351_v11 = vmax.f32 %v2063_v29, 0.0 }
 0x2a7   :  { %v2058_v27 = vadd.f32 %v13494_v16, %v2057_v9  ;;  %v2349_v15 = vmax.f32 %v2055_v6, 0.0 }
 0x2a8   :  { %v2352_v12 = vmax.f32 %v2066_v8, 0.0  ;;  %4174 = vmatmul.mubr.bf16.gmra.mrb[204].mxu1 %v13613_v43 }
 0x2a9   :  { %v2350_v47 = vmax.f32 %v2058_v27, 0.0  ;;  %4183 = vmatprep.mubr.bf16.mxu1 %v15786_v35 }
 0x2aa   :  { %v13769_v26 = vpack.c.bf16 %v2352_v12, %v2351_v11 }
 0x2ab   :  { %v13771_v21 = vpack.c.bf16 %v2350_v47, %v2349_v15  ;;  %v11904_v7 = vpop.f32.mrb[100].mxu1 }
 0x2ac   :  { %v2079_v10 = vadd.f32 %v11904_v7, %v13494_v16  ;;  %v2070_v23 = vpop.f32.mrb[101].mxu1 }
 0x2ad   :  { %v2071_v24 = vadd.f32 %v13494_v16, %v2070_v23  ;;  %v11905_v39 = vpop.f32.mrb[102].mxu1  ;;  %2779 = vmatmul.mubr.bf16.gmra.mrb[176].mxu0 %v13651_v38 }
 0x2ae   :  { %v2082_v58 = vadd.f32 %v11905_v39, %v13494_v16  ;;  %v2073_v40 = vpop.f32.mrb[103].mxu1  ;;  %2788 = vmatprep.mubr.bf16.mxu0 %v15786_v35  ;;  %v2355_v41 = vmax.f32 %v2079_v10, 0.0 }
 0x2af   :  { %v2074_v33 = vadd.f32 %v13494_v16, %v2073_v40  ;;  %v2353_v50 = vmax.f32 %v2071_v24, 0.0 }
 0x2b0   :  { %v2356_v42 = vmax.f32 %v2082_v58, 0.0  ;;  %4184 = vmatmul.mubr.bf16.gmra.mrb[208].mxu1 %v13627_v46 }
 0x2b1   :  { %v2354_v51 = vmax.f32 %v2074_v33, 0.0  ;;  %4193 = vmatprep.mubr.bf16.mxu1 %v15786_v35 }
 0x2b2   :  { %v13781_v53 = vpack.c.bf16 %v2356_v42, %v2355_v41 }
 0x2b3   :  { %v13783_v29 = vpack.c.bf16 %v2354_v51, %v2353_v50  ;;  %v11908_v3 = vpop.f32.mrb[104].mxu1 }
 0x2b4   :  { %v2095_v6 = vadd.f32 %v11908_v3, %v13494_v16  ;;  %v2086_v2 = vpop.f32.mrb[105].mxu1 }
 0x2b5   :  { %v2087_v8 = vadd.f32 %v13494_v16, %v2086_v2  ;;  %v11909_v9 = vpop.f32.mrb[106].mxu1  ;;  %2789 = vmatmul.mubr.bf16.gmra.mrb[180].mxu0 %v13649_v37 }
 0x2b6   :  { %v2098_v27 = vadd.f32 %v11909_v9, %v13494_v16  ;;  %v2089_v11 = vpop.f32.mrb[107].mxu1  ;;  %2798 = vmatprep.mubr.bf16.mxu0 %v15786_v35  ;;  %v2359_v15 = vmax.f32 %v2095_v6, 0.0 }
 0x2b7   :  { %v2090_v12 = vadd.f32 %v13494_v16, %v2089_v11  ;;  %v2357_v7 = vmax.f32 %v2087_v8, 0.0 }
 0x2b8   :  { %v2360_v47 = vmax.f32 %v2098_v27, 0.0  ;;  %4194 = vmatmul.mubr.bf16.gmra.mrb[212].mxu1 %v13625_v59 }
 0x2b9   :  { %v2358_v10 = vmax.f32 %v2090_v12, 0.0  ;;  %4203 = vmatprep.mubr.bf16.mxu1 %v15786_v35 }
 0x2ba   :  { %v13793_v23 = vpack.c.bf16 %v2360_v47, %v2359_v15 }
 0x2bb   :  { %v13795_v24 = vpack.c.bf16 %v2358_v10, %v2357_v7  ;;  %v11912_v39 = vpop.f32.mrb[108].mxu1  ;;  %v11135_v10 = vld [vmem:[%s15765_s5 + $0x110] sm:$0xff] }
 0x2bc   :  { %15885 = vst [vmem:[#allocation44_spill] sm:$0xff] %v13793_v23  ;;  %v2111_v58 = vadd.f32 %v11912_v39, %v13494_v16  ;;  %v2102_v40 = vpop.f32.mrb[109].mxu1  ;;  %v11136_v39 = vld [vmem:[%s15765_s5 + $0x130] sm:$0xff] }
 0x2bd   :  { %v2103_v33 = vadd.f32 %v13494_v16, %v2102_v40  ;;  %v11913_v41 = vpop.f32.mrb[110].mxu1  ;;  %2799 = vmatmul.mubr.bf16.gmra.mrb[184].mxu0 %v13663_v4 }
 0x2be   :  { %v2114_v42 = vadd.f32 %v11913_v41, %v13494_v16  ;;  %v2105_v50 = vpop.f32.mrb[111].mxu1  ;;  %2808 = vmatprep.mubr.bf16.mxu0 %v15786_v35  ;;  %v2363_v3 = vmax.f32 %v2111_v58, 0.0  ;;  %v11170_v58 = vld [vmem:[%s15765_s5 + $0x118] sm:$0xff]  ;;  %v11151_v41 = vcombine.low %v11135_v10, %v11136_v39 }
 0x2bf   :  { %v2106_v51 = vadd.f32 %v13494_v16, %v2105_v50  ;;  %v2361_v2 = vmax.f32 %v2103_v33, 0.0  ;;  %v11171_v50 = vld [vmem:[%s15765_s5 + $0x138] sm:$0xff] }
 0x2c0   :  { %v2364_v6 = vmax.f32 %v2114_v42, 0.0  ;;  %4204 = vmatmul.mubr.bf16.gmra.mrb[216].mxu1 %v13639_v5  ;;  %v11152_v42 = vcombine.high %v11135_v10, %v11136_v39  ;;  %v13869_v5 = vld [vmem:[#allocation6] ss:$0 sm:$0xff] }
 0x2c1   :  { %v2362_v8 = vmax.f32 %v2106_v51, 0.0  ;;  %4213 = vmatprep.mubr.bf16.mxu1 %v15786_v35 }
 0x2c2   :  { %v13805_v9 = vpack.c.bf16 %v2364_v6, %v2363_v3  ;;  %v11186_v3 = vcombine.low %v11170_v58, %v11171_v50  ;;  %v11187_v6 = vcombine.high %v11170_v58, %v11171_v50  ;;  %5464 = vmatprep.subr.bf16.mxu0 %v11152_v42 }
 0x2c3   :  { %v13807_v27 = vpack.c.bf16 %v2362_v8, %v2361_v2  ;;  %v11916_v11 = vpop.f32.mrb[112].mxu1  ;;  %5465 = vmatpush1.bf16.msra.mxu0 %v11151_v41 }
 0x2c4   :  { %15886 = vst [vmem:[#allocation45_spill] sm:$0xff] %v13805_v9  ;;  %v2127_v12 = vadd.f32 %v11916_v11, %v13494_v16  ;;  %v2118_v15 = vpop.f32.mrb[113].mxu1  ;;  %6909 = vmatprep.subr.bf16.mxu1 %v11187_v6 }
 0x2c5   :  { %15887 = vst [vmem:[#allocation46_spill] sm:$0xff] %v13807_v27  ;;  %v2119_v47 = vadd.f32 %v13494_v16, %v2118_v15  ;;  %v11917_v7 = vpop.f32.mrb[114].mxu1  ;;  %2809 = vmatmul.mubr.bf16.gmra.mrb[188].mxu0 %v13661_v54  ;;  %6910 = vmatpush1.bf16.msra.mxu1 %v11186_v3 }
 0x2c6   :  { %v2130_v40 = vadd.f32 %v11917_v7, %v13494_v16  ;;  %v2121_v33 = vpop.f32.mrb[115].mxu1  ;;  %2818 = vmatprep.mubr.bf16.mxu0 %v15786_v35  ;;  %v2367_v2 = vmax.f32 %v2127_v12, 0.0 }
 0x2c7   :  { %v2122_v51 = vadd.f32 %v13494_v16, %v2121_v33  ;;  %v2365_v11 = vmax.f32 %v2119_v47, 0.0 }
 0x2c8   :  { %v2368_v8 = vmax.f32 %v2130_v40, 0.0  ;;  %4214 = vmatmul.mubr.bf16.gmra.mrb[220].mxu1 %v13637_v49 }
 0x2c9   :  { %v2366_v15 = vmax.f32 %v2122_v51, 0.0  ;;  %4223 = vmatprep.mubr.bf16.mxu1 %v15786_v35 }
 0x2ca   :  { %v13829_v7 = vpack.c.bf16 %v2368_v8, %v2367_v2 }
 0x2cb   :  { %v13831_v10 = vpack.c.bf16 %v2366_v15, %v2365_v11  ;;  %v11920_v39 = vpop.f32.mrb[116].mxu1 }
 0x2cc   :  { %v2143_v33 = vadd.f32 %v11920_v39, %v13494_v16  ;;  %v2134_v58 = vpop.f32.mrb[117].mxu1 }
 0x2cd   :  { %v2135_v12 = vadd.f32 %v13494_v16, %v2134_v58  ;;  %v11921_v40 = vpop.f32.mrb[118].mxu1  ;;  %2819 = vmatmul.mubr.bf16.gmra.mrb[192].mxu0 %v13675_v14 }
 0x2ce   :  { %v2146_v47 = vadd.f32 %v11921_v40, %v13494_v16  ;;  %v2137_v42 = vpop.f32.mrb[119].mxu1  ;;  %2828 = vmatprep.mubr.bf16.mxu0 %v15786_v35  ;;  %v2371_v41 = vmax.f32 %v2143_v33, 0.0 }
 0x2cf   :  { %v2138_v50 = vadd.f32 %v13494_v16, %v2137_v42  ;;  %v2369_v3 = vmax.f32 %v2135_v12, 0.0 }
 0x2d0   :  { %v2372_v51 = vmax.f32 %v2146_v47, 0.0  ;;  %4224 = vmatmul.mubr.bf16.gmra.mrb[224].mxu1 %v13651_v38 }
 0x2d1   :  { %v2370_v6 = vmax.f32 %v2138_v50, 0.0  ;;  %4233 = vmatprep.mubr.bf16.mxu1 %v15786_v35 }
 0x2d2   :  { %v13841_v2 = vpack.c.bf16 %v2372_v51, %v2371_v41 }
 0x2d3   :  { %v13843_v8 = vpack.c.bf16 %v2370_v6, %v2369_v3  ;;  %v11924_v11 = vpop.f32.mrb[120].mxu1 }
 0x2d4   :  { %v2159_v15 = vadd.f32 %v11924_v11, %v13494_v16  ;;  %v2150_v39 = vpop.f32.mrb[121].mxu1 }
 0x2d5   :  { %v2151_v58 = vadd.f32 %v13494_v16, %v2150_v39  ;;  %v11925_v40 = vpop.f32.mrb[122].mxu1  ;;  %2829 = vmatmul.mubr.bf16.gmra.mrb[196].mxu0 %v13673_v13 }
 0x2d6   :  { %v2162_v33 = vadd.f32 %v11925_v40, %v13494_v16  ;;  %v2153_v47 = vpop.f32.mrb[123].mxu1  ;;  %2838 = vmatprep.mubr.bf16.mxu0 %v15786_v35  ;;  %v2375_v42 = vmax.f32 %v2159_v15, 0.0 }
 0x2d7   :  { %v2154_v12 = vadd.f32 %v13494_v16, %v2153_v47  ;;  %v2373_v41 = vmax.f32 %v2151_v58, 0.0 }
 0x2d8   :  { %v2376_v50 = vmax.f32 %v2162_v33, 0.0  ;;  %4234 = vmatmul.mubr.bf16.gmra.mrb[228].mxu1 %v13649_v37  ;;  %v3379_v37 = vlaneseq }
 0x2d9   :  { %v2374_v51 = vmax.f32 %v2154_v12, 0.0  ;;  %4243 = vmatprep.mubr.bf16.mxu1 %v15786_v35 }
 0x2da   :  { %v13853_v3 = vpack.c.bf16 %v2376_v50, %v2375_v42 }
 0x2db   :  { %v13855_v6 = vpack.c.bf16 %v2374_v51, %v2373_v41  ;;  %v11928_v11 = vpop.f32.mrb[124].mxu1 }
 0x2dc   :  { %v2175_v39 = vadd.f32 %v11928_v11, %v13494_v16  ;;  %v2166_v40 = vpop.f32.mrb[125].mxu1 }
 0x2dd   :  { %v2167_v38 = vadd.f32 %v13494_v16, %v2166_v40  ;;  %v11929_v49 = vpop.f32.mrb[126].mxu1  ;;  %2839 = vmatmul.mubr.bf16.gmra.mrb[200].mxu0 %v13687_v36  ;;  %v12726_v40 = vmov 1966171168  }
 0x2de   :  { %v2178_v15 = vadd.f32 %v11929_v49, %v13494_v16  ;;  %v2169_v33 = vpop.f32.mrb[127].mxu1  ;;  %2848 = vmatprep.mubr.bf16.mxu0 %v15786_v35  ;;  %v2379_v47 = vmax.f32 %v2175_v39, 0.0  ;;  %v3377_v49 = vunpack.c.l.s4 %v12726_v40 }
 0x2df   :  { %v2170_v58 = vadd.f32 %v13494_v16, %v2169_v33  ;;  %v2377_v42 = vmax.f32 %v2167_v38, 0.0 }
 0x2e0   :  { %v2380_v12 = vmax.f32 %v2178_v15, 0.0  ;;  %4244 = vmatmul.mubr.bf16.gmra.mrb[232].mxu1 %v13663_v4 }
 0x2e1   :  { %v2378_v50 = vmax.f32 %v2170_v58, 0.0  ;;  %4253 = vmatprep.mubr.bf16.mxu1 %v15786_v35 }
 0x2e2   :  { %v13865_v41 = vpack.c.bf16 %v2380_v12, %v2379_v47  ;;  %v3378_v12 = vunpack.c.0.s8 %v3377_v49 }
 0x2e3   :  { %v13867_v51 = vpack.c.bf16 %v2378_v50, %v2377_v42  ;;  %v11932_v11 = vpop.f32.mrb[128].mxu1  ;;  %v13877_v42 = vshrl.u32 %v3379_v37, 7 }
 0x2e4   :  { %v2191_v16 = vadd.f32 %v13869_v5, %v11932_v11  ;;  %v2182_v39 = vpop.f32.mrb[129].mxu1 }
 0x2e5   :  { %v2183_v15 = vadd.f32 %v13869_v5, %v2182_v39  ;;  %v11933_v33 = vpop.f32.mrb[130].mxu1  ;;  %2849 = vmatmul.mubr.bf16.gmra.mrb[204].mxu0 %v13685_v22  ;;  %15888 = vst [vmem:[#allocation47_spill] sm:$0xff] %v13877_v42  ;;  %v11089_v39 = vld.sshfl [vmem:[%s15766_s6] sm:$0x11 pattern:$0x75316420]  ;;  %v13889_v37 = vsub.s32 %v3378_v12, %v13877_v42 }
 0x2e6   :  { %v2194_v38 = vadd.f32 %v13869_v5, %v11933_v33  ;;  %v2185_v58 = vpop.f32.mrb[131].mxu1  ;;  %2858 = vmatprep.mubr.bf16.mxu0 %v15786_v35  ;;  %v2383_v50 = vmax.f32 %v2191_v16, 0.0 }
 0x2e7   :  { %v2186_v47 = vadd.f32 %v13869_v5, %v2185_v58  ;;  %v2381_v11 = vmax.f32 %v2183_v15, 0.0 }
 0x2e8   :  { %v2384_v40 = vmax.f32 %v2194_v38, 0.0  ;;  %4254 = vmatmul.mubr.bf16.gmra.mrb[236].mxu1 %v13661_v54  ;;  %v3375_v38 = vcombine.high %v11089_v39, %v11089_v39 }
 0x2e9   :  { %v2382_v4 = vmax.f32 %v2186_v47, 0.0  ;;  %4263 = vmatprep.mubr.bf16.mxu1 %v15786_v35 }
 0x2ea   :  { %v13884_v33 = vpack.c.bf16 %v2384_v40, %v2383_v50  ;;  %v15890_v50 = vmov 0   ;;  %v3382_v40 = vrot.slane %v11089_v39, %v13889_v37  ;;  %v13906_v39 = vsub.s32 0, %v13877_v42 }
 0x2eb   :  { %v13886_v59 = vpack.c.bf16 %v2382_v4, %v2381_v11  ;;  %v11936_v58 = vpop.f32.mrb[132].mxu1 }
 0x2ec   :  { %15889 = vst [vmem:[#allocation48_spill] sm:$0xff] %v13884_v33  ;;  %v2207_v49 = vadd.f32 %v13869_v5, %v11936_v58  ;;  %v2198_v16 = vpop.f32.mrb[133].mxu1  ;;  %v3389_v58 = vrot.slane %v3375_v38, %v13889_v37  ;;  %v3391_v63 = vpack.i.b16 %v3382_v40, %v3382_v40  ;;  %15893 = vst [vmem:[#allocation51_spill] sm:$0xff] %v13906_v39 }
 0x2ed   :  { %v2199_v15 = vadd.f32 %v13869_v5, %v2198_v16  ;;  %v11937_v47 = vpop.f32.mrb[134].mxu1  ;;  %2859 = vmatmul.mubr.bf16.gmra.mrb[208].mxu0 %v13699_v61 }
 0x2ee   :  { %v2210_v35 = vadd.f32 %v13869_v5, %v11937_v47  ;;  %v2201_v54 = vpop.f32.mrb[135].mxu1  ;;  %2868 = vmatprep.mubr.bf16.mxu0 %v15890_v50  ;;  %v2387_v12 = vmax.f32 %v2207_v49, 0.0 }
 0x2ef   :  { %v2202_v4 = vadd.f32 %v13869_v5, %v2201_v54  ;;  %v2385_v16 = vmax.f32 %v2199_v15, 0.0  ;;  %v3398_v15 = vpack.i.b16 %v3389_v58, %v3389_v58 }
 0x2f0   :  { %v2388_v11 = vmax.f32 %v2210_v35, 0.0  ;;  %v2600_v46 = vpop.f32.mrb[104].mxu0  ;;  %4264 = vmatmul.mubr.bf16.gmra.mrb[240].mxu1 %v13675_v14 }
 0x2f1   :  { %v2386_v43 = vmax.f32 %v2202_v4, 0.0  ;;  %v2602_v44 = vpop.f32.mrb[105].mxu0  ;;  %4273 = vmatprep.mubr.bf16.mxu1 %v15890_v50 }
 0x2f2   :  { %v13901_v47 = vpack.c.bf16 %v2388_v11, %v2387_v12  ;;  %v2604_v19 = vpop.f32.mrb[106].mxu0 }
 0x2f3   :  { %v13903_v20 = vpack.c.bf16 %v2386_v43, %v2385_v16  ;;  %v3239_v54 = vpack.c.bf16 %v2604_v19, %v2600_v46  ;;  %v11940_v35 = vpop.f32.mrb[136].mxu1  ;;  %v2606_v49 = vpop.f32.mrb[107].mxu0  ;;  %v13914_v19 = vrot.slane %v3391_v63, %v13906_v39 }
 0x2f4   :  { %15891 = vst [vmem:[#allocation49_spill] sm:$0xff] %v13901_v47  ;;  %v2223_v14 = vadd.f32 %v13869_v5, %v11940_v35  ;;  %v3240_v38 = vpack.c.bf16 %v2606_v49, %v2602_v44  ;;  %v2214_v4 = vpop.f32.mrb[137].mxu1  ;;  %v13918_v44 = vrot.slane %v3398_v15, %v13906_v39 }
 0x2f5   :  { %15892 = vst [vmem:[#allocation50_spill] sm:$0xff] %v13903_v20  ;;  %v2215_v0 = vadd.f32 %v13869_v5, %v2214_v4  ;;  %v11941_v45 = vpop.f32.mrb[138].mxu1  ;;  %2869 = vmatmul.mubr.bf16.gmra.mrb[212].mxu0 %v13697_v28  ;;  %v3404_v63 = vadd.bf16 %v13914_v19, %v3239_v54 }
 0x2f6   :  { %v2226_v43 = vadd.f32 %v13869_v5, %v11941_v45  ;;  %v2217_v12 = vpop.f32.mrb[139].mxu1  ;;  %2878 = vmatprep.mubr.bf16.mxu0 %v15890_v50  ;;  %v2391_v40 = vmax.f32 %v2223_v14, 0.0 }
 0x2f7   :  { %v2218_v46 = vadd.f32 %v13869_v5, %v2217_v12  ;;  %v2389_v16 = vmax.f32 %v2215_v0, 0.0 }
 0x2f8   :  { %v2392_v11 = vmax.f32 %v2226_v43, 0.0  ;;  %v2610_v58 = vpop.f32.mrb[108].mxu0  ;;  %4274 = vmatmul.mubr.bf16.gmra.mrb[244].mxu1 %v13673_v13  ;;  %v3405_v43 = vadd.bf16 %v13918_v44, %v3240_v38  ;;  %v3532_v38 = vmax.bf16 %v15890_v50, %v3404_v63 }
 0x2f9   :  { %v2390_v35 = vmax.f32 %v2218_v46, 0.0  ;;  %v2612_v49 = vpop.f32.mrb[109].mxu0  ;;  %4283 = vmatprep.mubr.bf16.mxu1 %v15890_v50 }
 0x2fa   :  { %v13922_v45 = vpack.c.bf16 %v2392_v11, %v2391_v40  ;;  %v2614_v4 = vpop.f32.mrb[110].mxu0 }
 0x2fb   :  { %v13925_v42 = vpack.c.bf16 %v2390_v35, %v2389_v16  ;;  %v3241_v14 = vpack.c.bf16 %v2614_v4, %v2610_v58  ;;  %v11944_v12 = vpop.f32.mrb[140].mxu1  ;;  %v2616_v15 = vpop.f32.mrb[111].mxu0 }
 0x2fc   :  { %15894 = vst [vmem:[#allocation52_spill] sm:$0xff] %v13922_v45  ;;  %v2239_v48 = vadd.f32 %v13869_v5, %v11944_v12  ;;  %v3242_v13 = vpack.c.bf16 %v2616_v15, %v2612_v49  ;;  %v2230_v0 = vpop.f32.mrb[141].mxu1  ;;  %v3533_v49 = vmax.bf16 %v15890_v50, %v3405_v43 }
 0x2fd   :  { %15895 = vst [vmem:[#allocation53_spill] sm:$0xff] %v13925_v42  ;;  %v3406_v46 = vadd.bf16 %v13914_v19, %v3241_v14  ;;  %v2231_v32 = vadd.f32 %v13869_v5, %v2230_v0  ;;  %v11945_v40 = vpop.f32.mrb[142].mxu1  ;;  %2879 = vmatmul.mubr.bf16.gmra.mrb[216].mxu0 %v13723_v30 }
 0x2fe   :  { %v3407_v54 = vadd.bf16 %v13918_v44, %v3242_v13  ;;  %v2242_v11 = vadd.f32 %v13869_v5, %v11945_v40  ;;  %v2233_v58 = vpop.f32.mrb[143].mxu1  ;;  %2888 = vmatprep.mubr.bf16.mxu0 %v15890_v50  ;;  %v2395_v4 = vmax.f32 %v2239_v48, 0.0 }
 0x2ff   :  { %v3534_v16 = vmax.bf16 %v15890_v50, %v3406_v46  ;;  %v2234_v35 = vadd.f32 %v13869_v5, %v2233_v58  ;;  %v2393_v0 = vmax.f32 %v2231_v32, 0.0 }
 0x300   :  { %v3535_v14 = vmax.bf16 %v15890_v50, %v3407_v54  ;;  %v2396_v12 = vmax.f32 %v2242_v11, 0.0  ;;  %v2620_v15 = vpop.f32.mrb[112].mxu0  ;;  %4284 = vmatmul.mubr.bf16.gmra.mrb[248].mxu1 %v13687_v36 }
 0x301   :  { %v3660_v13 = vmax.bf16 %v3534_v16, %v3532_v38  ;;  %v2394_v40 = vmax.f32 %v2234_v35, 0.0  ;;  %v2622_v34 = vpop.f32.mrb[113].mxu0  ;;  %4293 = vmatprep.mubr.bf16.mxu1 %v15890_v50  ;;  %v11137_v35 = vld [vmem:[%s15765_s5 + $0x150] sm:$0xff] }
 0x302   :  { %v3701_v63 = vmax.bf16 %v3535_v14, %v3533_v49  ;;  %v13942_v17 = vpack.c.bf16 %v2396_v12, %v2395_v4  ;;  %v2624_v46 = vpop.f32.mrb[114].mxu0  ;;  %v11138_v49 = vld [vmem:[%s15765_s5 + $0x170] sm:$0xff]  ;;  %v11173_v12 = vld [vmem:[%s15765_s5 + $0x178] sm:$0xff] }
 0x303   :  { %v13944_v58 = vpack.c.bf16 %v2394_v40, %v2393_v0  ;;  %v3243_v43 = vpack.c.bf16 %v2624_v46, %v2620_v15  ;;  %v11948_v48 = vpop.f32.mrb[144].mxu1  ;;  %v2626_v18 = vpop.f32.mrb[115].mxu0  ;;  %v11153_v14 = vcombine.low %v11137_v35, %v11138_v49  ;;  %v11154_v46 = vcombine.high %v11137_v35, %v11138_v49 }
 0x304   :  { %15896 = vst [vmem:[#allocation54_spill] sm:$0xff] %v13942_v17  ;;  %v2255_v54 = vadd.f32 %v13869_v5, %v11948_v48  ;;  %v3244_v11 = vpack.c.bf16 %v2626_v18, %v2622_v34  ;;  %v2246_v57 = vpop.f32.mrb[145].mxu1  ;;  %v11172_v18 = vld [vmem:[%s15765_s5 + $0x158] sm:$0xff] }
 0x305   :  { %15897 = vst [vmem:[#allocation55_spill] sm:$0xff] %v13944_v58  ;;  %v3408_v38 = vadd.bf16 %v13914_v19, %v3243_v43  ;;  %v2247_v32 = vadd.f32 %v13869_v5, %v2246_v57  ;;  %v11949_v16 = vpop.f32.mrb[146].mxu1  ;;  %2889 = vmatmul.mubr.bf16.gmra.mrb[220].mxu0 %v13721_v25  ;;  %v11189_v36 = vcombine.high %v11172_v18, %v11173_v12 }
 0x306   :  { %v3409_v34 = vadd.bf16 %v13918_v44, %v3244_v11  ;;  %v2258_v4 = vadd.f32 %v13869_v5, %v11949_v16  ;;  %v2249_v57 = vpop.f32.mrb[147].mxu1  ;;  %2898 = vmatprep.mubr.bf16.mxu0 %v15890_v50  ;;  %v2399_v0 = vmax.f32 %v2255_v54, 0.0  ;;  %v11188_v16 = vcombine.low %v11172_v18, %v11173_v12  ;;  %5466 = vmatprep.subr.bf16.mxu0 %v11154_v46 }
 0x307   :  { %v3536_v15 = vmax.bf16 %v15890_v50, %v3408_v38  ;;  %v2250_v40 = vadd.f32 %v13869_v5, %v2249_v57  ;;  %v2397_v17 = vmax.f32 %v2247_v32, 0.0  ;;  %6911 = vmatprep.subr.bf16.mxu1 %v11189_v36  ;;  %5467 = vmatpush1.bf16.msra.mxu0 %v11153_v14 }
 0x308   :  { %v3537_v43 = vmax.bf16 %v15890_v50, %v3409_v34  ;;  %v2400_v48 = vmax.f32 %v2258_v4, 0.0  ;;  %v2630_v11 = vpop.f32.mrb[116].mxu0  ;;  %4294 = vmatmul.mubr.bf16.gmra.mrb[252].mxu1 %v13685_v22 }
 0x309   :  { %v13969_v60 = vmax.bf16 %v3660_v13, %v3536_v15  ;;  %v2398_v58 = vmax.f32 %v2250_v40, 0.0  ;;  %v2632_v45 = vpop.f32.mrb[117].mxu0  ;;  %4303 = vmatprep.mubr.bf16.mxu1 %v15890_v50  ;;  %6912 = vmatpush1.bf16.msra.mxu1 %v11188_v16 }
 0x30a   :  { %v13972_v54 = vmax.bf16 %v3701_v63, %v3537_v43  ;;  %v13974_v38 = vpack.c.bf16 %v2400_v48, %v2399_v0  ;;  %v2634_v35 = vpop.f32.mrb[118].mxu0  ;;  %v11124_v63 = vld.sshfl [vmem:[%s15766_s6 + $0x2] sm:$0x11 pattern:$0x75316420] }
 0x30b   :  { %v13976_v49 = vpack.c.bf16 %v2398_v58, %v2397_v17  ;;  %v3245_v34 = vpack.c.bf16 %v2634_v35, %v2630_v11  ;;  %v11952_v4 = vpop.f32.mrb[148].mxu1  ;;  %v2636_v18 = vpop.f32.mrb[119].mxu0  ;;  %v4820_v40 = vcombine.high %v11124_v63, %v11124_v63 }
 0x30c   :  { %v2271_v13 = vadd.f32 %v13869_v5, %v11952_v4  ;;  %v3246_v32 = vpack.c.bf16 %v2636_v18, %v2632_v45  ;;  %v2262_v57 = vpop.f32.mrb[149].mxu1 }
 0x30d   :  { %15898 = vst [vmem:[#allocation56_spill] sm:$0xff] %v13976_v49  ;;  %v3410_v12 = vadd.bf16 %v13914_v19, %v3245_v34  ;;  %v2263_v15 = vadd.f32 %v13869_v5, %v2262_v57  ;;  %v11953_v36 = vpop.f32.mrb[150].mxu1  ;;  %2899 = vmatmul.mubr.bf16.gmra.mrb[224].mxu0 %v13735_v56 }
 0x30e   :  { %v3411_v17 = vadd.bf16 %v13918_v44, %v3246_v32  ;;  %v2274_v58 = vadd.f32 %v13869_v5, %v11953_v36  ;;  %v2265_v14 = vpop.f32.mrb[151].mxu1  ;;  %2908 = vmatprep.mubr.bf16.mxu0 %v15890_v50  ;;  %v2403_v46 = vmax.f32 %v2271_v13, 0.0  ;;  %v4827_v13 = vrot.slane %v11124_v63, %v13889_v37 }
 0x30f   :  { %v3538_v45 = vmax.bf16 %v15890_v50, %v3410_v12  ;;  %v2266_v0 = vadd.f32 %v13869_v5, %v2265_v14  ;;  %v2401_v35 = vmax.f32 %v2263_v15, 0.0 }
 0x310   :  { %v3539_v43 = vmax.bf16 %v15890_v50, %v3411_v17  ;;  %v2404_v48 = vmax.f32 %v2274_v58, 0.0  ;;  %v2640_v11 = vpop.f32.mrb[120].mxu0  ;;  %4304 = vmatmul.mubr.bf16.gmra.mrb[0].mxu1 %v13699_v61  ;;  %v4834_v58 = vrot.slane %v4820_v40, %v13889_v37 }
 0x311   :  { %v3662_v16 = vmax.bf16 %v13969_v60, %v3538_v45  ;;  %v2402_v34 = vmax.f32 %v2266_v0, 0.0  ;;  %v2642_v4 = vpop.f32.mrb[121].mxu0  ;;  %4313 = vmatprep.mubr.bf16.mxu1 %v15890_v50 }
 0x312   :  { %v3703_v18 = vmax.bf16 %v13972_v54, %v3539_v43  ;;  %v13995_v32 = vpack.c.bf16 %v2404_v48, %v2403_v46  ;;  %v2644_v5 = vpop.f32.mrb[122].mxu0  ;;  %v4836_v46 = vpack.i.b16 %v4827_v13, %v4827_v13 }
 0x313   :  { %v13998_v57 = vpack.c.bf16 %v2402_v34, %v2401_v35  ;;  %v3247_v12 = vpack.c.bf16 %v2644_v5, %v2640_v11  ;;  %v2646_v36 = vpop.f32.mrb[123].mxu0  ;;  %v4045_v17 = vpop.f32.mrb[152].mxu1  ;;  %v4843_v11 = vpack.i.b16 %v4834_v58, %v4834_v58 }
 0x314   :  { %15899 = vst [vmem:[#allocation57_spill] sm:$0xff] %v13995_v32  ;;  %v3248_v60 = vpack.c.bf16 %v2646_v36, %v2642_v4  ;;  %v4047_v15 = vpop.f32.mrb[153].mxu1 }
 0x315   :  { %v3412_v14 = vadd.bf16 %v13914_v19, %v3247_v12  ;;  %2909 = vmatmul.mubr.bf16.gmra.mrb[228].mxu0 %v13733_v55  ;;  %v4049_v45 = vpop.f32.mrb[154].mxu1  ;;  %v14010_v12 = vrot.slane %v4836_v46, %v13906_v39  ;;  %v14013_v36 = vrot.slane %v4843_v11, %v13906_v39 }
 0x316   :  { %v3413_v54 = vadd.bf16 %v13918_v44, %v3248_v60  ;;  %v4684_v0 = vpack.c.bf16 %v4049_v45, %v4045_v17  ;;  %v4051_v43 = vpop.f32.mrb[155].mxu1  ;;  %2918 = vmatprep.mubr.bf16.mxu0 %v15890_v50 }
 0x317   :  { %v3540_v63 = vmax.bf16 %v15890_v50, %v3412_v14  ;;  %v4685_v48 = vpack.c.bf16 %v4051_v43, %v4047_v15 }
 0x318   :  { %v3541_v40 = vmax.bf16 %v15890_v50, %v3413_v54  ;;  %v2650_v35 = vpop.f32.mrb[124].mxu0  ;;  %4314 = vmatmul.mubr.bf16.gmra.mrb[4].mxu1 %v13697_v28  ;;  %v4849_v54 = vadd.bf16 %v14010_v12, %v4684_v0 }
 0x319   :  { %v3663_v34 = vmax.bf16 %v3662_v16, %v3540_v63  ;;  %v2652_v4 = vpop.f32.mrb[125].mxu0  ;;  %4323 = vmatprep.mubr.bf16.mxu1 %v15890_v50  ;;  %v4850_v63 = vadd.bf16 %v14013_v36, %v4685_v48 }
 0x31a   :  { %v3704_v5 = vmax.bf16 %v3703_v18, %v3541_v40  ;;  %v2654_v13 = vpop.f32.mrb[126].mxu0 }
 0x31b   :  { %v3249_v17 = vpack.c.bf16 %v2654_v13, %v2650_v35  ;;  %v2656_v60 = vpop.f32.mrb[127].mxu0  ;;  %v4055_v58 = vpop.f32.mrb[156].mxu1 }
 0x31c   :  { %v3250_v15 = vpack.c.bf16 %v2656_v60, %v2652_v4  ;;  %v4057_v14 = vpop.f32.mrb[157].mxu1 }
 0x31d   :  { %v3414_v45 = vadd.bf16 %v13914_v19, %v3249_v17  ;;  %2919 = vmatmul.mubr.bf16.gmra.mrb[232].mxu0 %v13747_v1  ;;  %v4059_v16 = vpop.f32.mrb[158].mxu1 }
 0x31e   :  { %v3415_v18 = vadd.bf16 %v13918_v44, %v3250_v15  ;;  %v4686_v46 = vpack.c.bf16 %v4059_v16, %v4055_v58  ;;  %v4061_v43 = vpop.f32.mrb[159].mxu1  ;;  %2928 = vmatprep.mubr.bf16.mxu0 %v15890_v50  ;;  %v4977_v58 = vmax.bf16 %v15890_v50, %v4849_v54 }
 0x31f   :  { %v3542_v11 = vmax.bf16 %v15890_v50, %v3414_v45  ;;  %v4687_v40 = vpack.c.bf16 %v4061_v43, %v4057_v14  ;;  %v4978_v14 = vmax.bf16 %v15890_v50, %v4850_v63 }
 0x320   :  { %v3543_v35 = vmax.bf16 %v15890_v50, %v3415_v18  ;;  %v4851_v4 = vadd.bf16 %v14010_v12, %v4686_v46  ;;  %v2660_v13 = vpop.f32.mrb[128].mxu0  ;;  %4324 = vmatmul.mubr.bf16.gmra.mrb[8].mxu1 %v13723_v30 }
 0x321   :  { %v3664_v17 = vmax.bf16 %v3663_v34, %v3542_v11  ;;  %v4852_v0 = vadd.bf16 %v14013_v36, %v4687_v40  ;;  %v2662_v60 = vpop.f32.mrb[129].mxu0  ;;  %4333 = vmatprep.mubr.bf16.mxu1 %v15890_v50 }
 0x322   :  { %v3705_v15 = vmax.bf16 %v3704_v5, %v3543_v35  ;;  %v4979_v48 = vmax.bf16 %v15890_v50, %v4851_v4  ;;  %v2664_v45 = vpop.f32.mrb[130].mxu0 }
 0x323   :  { %v4980_v16 = vmax.bf16 %v15890_v50, %v4852_v0  ;;  %v3251_v18 = vpack.c.bf16 %v2664_v45, %v2660_v13  ;;  %v2666_v46 = vpop.f32.mrb[131].mxu0  ;;  %v4065_v43 = vpop.f32.mrb[160].mxu1 }
 0x324   :  { %v5105_v30 = vmax.bf16 %v4979_v48, %v4977_v58  ;;  %v3252_v34 = vpack.c.bf16 %v2666_v46, %v2662_v60  ;;  %v4067_v11 = vpop.f32.mrb[161].mxu1 }
 0x325   :  { %v5146_v40 = vmax.bf16 %v4980_v16, %v4978_v14  ;;  %v3416_v39 = vadd.bf16 %v13914_v19, %v3251_v18  ;;  %2929 = vmatmul.mubr.bf16.gmra.mrb[236].mxu0 %v13745_v62  ;;  %v4069_v54 = vpop.f32.mrb[162].mxu1 }
 0x326   :  { %v3417_v5 = vadd.bf16 %v13918_v44, %v3252_v34  ;;  %v4688_v35 = vpack.c.bf16 %v4069_v54, %v4065_v43  ;;  %v4071_v4 = vpop.f32.mrb[163].mxu1  ;;  %2938 = vmatprep.mubr.bf16.mxu0 %v15890_v50 }
 0x327   :  { %v3544_v63 = vmax.bf16 %v15890_v50, %v3416_v39  ;;  %v4689_v13 = vpack.c.bf16 %v4071_v4, %v4067_v11 }
 0x328   :  { %v3545_v0 = vmax.bf16 %v15890_v50, %v3417_v5  ;;  %v4853_v60 = vadd.bf16 %v14010_v12, %v4688_v35  ;;  %v2670_v58 = vpop.f32.mrb[132].mxu0  ;;  %4334 = vmatmul.mubr.bf16.gmra.mrb[12].mxu1 %v13721_v25 }
 0x329   :  { %v3665_v48 = vmax.bf16 %v3664_v17, %v3544_v63  ;;  %v4854_v45 = vadd.bf16 %v14013_v36, %v4689_v13  ;;  %v2672_v14 = vpop.f32.mrb[133].mxu0  ;;  %4343 = vmatprep.mubr.bf16.mxu1 %v15890_v50 }
 0x32a   :  { %v3706_v16 = vmax.bf16 %v3705_v15, %v3545_v0  ;;  %v4981_v18 = vmax.bf16 %v15890_v50, %v4853_v60  ;;  %v2674_v46 = vpop.f32.mrb[134].mxu0 }
 0x32b   :  { %v4982_v39 = vmax.bf16 %v15890_v50, %v4854_v45  ;;  %v3253_v43 = vpack.c.bf16 %v2674_v46, %v2670_v58  ;;  %v2676_v34 = vpop.f32.mrb[135].mxu0  ;;  %v4075_v11 = vpop.f32.mrb[164].mxu1 }
 0x32c   :  { %v5106_v54 = vmax.bf16 %v5105_v30, %v4981_v18  ;;  %v3254_v5 = vpack.c.bf16 %v2676_v34, %v2672_v14  ;;  %v4077_v35 = vpop.f32.mrb[165].mxu1 }
 0x32d   :  { %v5147_v4 = vmax.bf16 %v5146_v40, %v4982_v39  ;;  %v3418_v17 = vadd.bf16 %v13914_v19, %v3253_v43  ;;  %2939 = vmatmul.mubr.bf16.gmra.mrb[240].mxu0 %v13759_v31  ;;  %v4079_v63 = vpop.f32.mrb[166].mxu1 }
 0x32e   :  { %v3419_v13 = vadd.bf16 %v13918_v44, %v3254_v5  ;;  %v4690_v15 = vpack.c.bf16 %v4079_v63, %v4075_v11  ;;  %v4081_v0 = vpop.f32.mrb[167].mxu1  ;;  %2948 = vmatprep.mubr.bf16.mxu0 %v15890_v50 }
 0x32f   :  { %v3546_v60 = vmax.bf16 %v15890_v50, %v3418_v17  ;;  %v4691_v58 = vpack.c.bf16 %v4081_v0, %v4077_v35 }
 0x330   :  { %v3547_v45 = vmax.bf16 %v15890_v50, %v3419_v13  ;;  %v4855_v30 = vadd.bf16 %v14010_v12, %v4690_v15  ;;  %v2680_v14 = vpop.f32.mrb[136].mxu0  ;;  %4344 = vmatmul.mubr.bf16.gmra.mrb[16].mxu1 %v13735_v56 }
 0x331   :  { %v3666_v40 = vmax.bf16 %v3665_v48, %v3546_v60  ;;  %v4856_v18 = vadd.bf16 %v14013_v36, %v4691_v58  ;;  %v2682_v46 = vpop.f32.mrb[137].mxu0  ;;  %4353 = vmatprep.mubr.bf16.mxu1 %v15890_v50 }
 0x332   :  { %v3707_v39 = vmax.bf16 %v3706_v16, %v3547_v45  ;;  %v4983_v43 = vmax.bf16 %v15890_v50, %v4855_v30  ;;  %v2684_v34 = vpop.f32.mrb[138].mxu0 }
 0x333   :  { %v4984_v11 = vmax.bf16 %v15890_v50, %v4856_v18  ;;  %v3255_v5 = vpack.c.bf16 %v2684_v34, %v2680_v14  ;;  %v2686_v35 = vpop.f32.mrb[139].mxu0  ;;  %v4085_v17 = vpop.f32.mrb[168].mxu1 }
 0x334   :  { %v5107_v63 = vmax.bf16 %v5106_v54, %v4983_v43  ;;  %v3256_v13 = vpack.c.bf16 %v2686_v35, %v2682_v46  ;;  %v4087_v15 = vpop.f32.mrb[169].mxu1 }
 0x335   :  { %v5148_v0 = vmax.bf16 %v5147_v4, %v4984_v11  ;;  %v3420_v48 = vadd.bf16 %v13914_v19, %v3255_v5  ;;  %2949 = vmatmul.mubr.bf16.gmra.mrb[244].mxu0 %v13757_v52  ;;  %v4089_v60 = vpop.f32.mrb[170].mxu1 }
 0x336   :  { %v3421_v58 = vadd.bf16 %v13918_v44, %v3256_v13  ;;  %v4692_v16 = vpack.c.bf16 %v4089_v60, %v4085_v17  ;;  %v4091_v45 = vpop.f32.mrb[171].mxu1  ;;  %2958 = vmatprep.mubr.bf16.mxu0 %v15890_v50 }
 0x337   :  { %v3548_v30 = vmax.bf16 %v15890_v50, %v3420_v48  ;;  %v4693_v14 = vpack.c.bf16 %v4091_v45, %v4087_v15 }
 0x338   :  { %v3549_v18 = vmax.bf16 %v15890_v50, %v3421_v58  ;;  %v4857_v54 = vadd.bf16 %v14010_v12, %v4692_v16  ;;  %v2690_v46 = vpop.f32.mrb[140].mxu0  ;;  %4354 = vmatmul.mubr.bf16.gmra.mrb[20].mxu1 %v13733_v55 }
 0x339   :  { %v14063_v4 = vmax.bf16 %v3666_v40, %v3548_v30  ;;  %v4858_v43 = vadd.bf16 %v14013_v36, %v4693_v14  ;;  %v2692_v34 = vpop.f32.mrb[141].mxu0  ;;  %4363 = vmatprep.mubr.bf16.mxu1 %v15890_v50 }
 0x33a   :  { %v14067_v11 = vmax.bf16 %v3707_v39, %v3549_v18  ;;  %v4985_v5 = vmax.bf16 %v15890_v50, %v4857_v54  ;;  %v2694_v35 = vpop.f32.mrb[142].mxu0 }
 0x33b   :  { %v4986_v17 = vmax.bf16 %v15890_v50, %v4858_v43  ;;  %v3257_v13 = vpack.c.bf16 %v2694_v35, %v2690_v46  ;;  %v2696_v15 = vpop.f32.mrb[143].mxu0  ;;  %v4095_v48 = vpop.f32.mrb[172].mxu1 }
 0x33c   :  { %v14071_v60 = vmax.bf16 %v5107_v63, %v4985_v5  ;;  %v3258_v58 = vpack.c.bf16 %v2696_v15, %v2692_v34  ;;  %v4097_v40 = vpop.f32.mrb[173].mxu1 }
 0x33d   :  { %v14073_v16 = vmax.bf16 %v5148_v0, %v4986_v17  ;;  %v3422_v45 = vadd.bf16 %v13914_v19, %v3257_v13  ;;  %2959 = vmatmul.mubr.bf16.gmra.mrb[248].mxu0 %v13771_v21  ;;  %v4099_v39 = vpop.f32.mrb[174].mxu1 }
 0x33e   :  { %v3423_v30 = vadd.bf16 %v13918_v44, %v3258_v58  ;;  %v4694_v14 = vpack.c.bf16 %v4099_v39, %v4095_v48  ;;  %v4101_v18 = vpop.f32.mrb[175].mxu1  ;;  %2968 = vmatprep.mubr.bf16.mxu0 %v15890_v50 }
 0x33f   :  { %v3550_v54 = vmax.bf16 %v15890_v50, %v3422_v45  ;;  %v4695_v46 = vpack.c.bf16 %v4101_v18, %v4097_v40 }
 0x340   :  { %v3551_v63 = vmax.bf16 %v15890_v50, %v3423_v30  ;;  %v4859_v43 = vadd.bf16 %v14010_v12, %v4694_v14  ;;  %v2700_v0 = vpop.f32.mrb[144].mxu0  ;;  %4364 = vmatmul.mubr.bf16.gmra.mrb[24].mxu1 %v13747_v1 }
 0x341   :  { %v3668_v34 = vmax.bf16 %v14063_v4, %v3550_v54  ;;  %v4860_v5 = vadd.bf16 %v14013_v36, %v4695_v46  ;;  %v2702_v35 = vpop.f32.mrb[145].mxu0  ;;  %4373 = vmatprep.mubr.bf16.mxu1 %v15890_v50  ;;  %v11140_v46 = vld [vmem:[%s15765_s5 + $0x1b0] sm:$0xff] }
 0x342   :  { %v3709_v17 = vmax.bf16 %v14067_v11, %v3551_v63  ;;  %v4987_v13 = vmax.bf16 %v15890_v50, %v4859_v43  ;;  %v2704_v15 = vpop.f32.mrb[146].mxu0  ;;  %v11139_v11 = vld [vmem:[%s15765_s5 + $0x190] sm:$0xff] }
 0x343   :  { %v4988_v48 = vmax.bf16 %v15890_v50, %v4860_v5  ;;  %v3259_v58 = vpack.c.bf16 %v2704_v15, %v2700_v0  ;;  %v2706_v40 = vpop.f32.mrb[147].mxu0  ;;  %v4105_v45 = vpop.f32.mrb[176].mxu1  ;;  %v11155_v0 = vcombine.low %v11139_v11, %v11140_v46  ;;  %v11156_v5 = vcombine.high %v11139_v11, %v11140_v46 }
 0x344   :  { %v5109_v39 = vmax.bf16 %v14071_v60, %v4987_v13  ;;  %v3260_v30 = vpack.c.bf16 %v2706_v40, %v2702_v35  ;;  %v4107_v14 = vpop.f32.mrb[177].mxu1  ;;  %v11174_v60 = vld [vmem:[%s15765_s5 + $0x198] sm:$0xff] }
 0x345   :  { %v5150_v4 = vmax.bf16 %v14073_v16, %v4988_v48  ;;  %v3424_v18 = vadd.bf16 %v13914_v19, %v3259_v58  ;;  %2969 = vmatmul.mubr.bf16.gmra.mrb[252].mxu0 %v13769_v26  ;;  %v4109_v54 = vpop.f32.mrb[178].mxu1  ;;  %v11175_v35 = vld [vmem:[%s15765_s5 + $0x1b8] sm:$0xff]  ;;  %5468 = vmatprep.subr.bf16.mxu0 %v11156_v5 }
 0x346   :  { %v3425_v63 = vadd.bf16 %v13918_v44, %v3260_v30  ;;  %v4696_v16 = vpack.c.bf16 %v4109_v54, %v4105_v45  ;;  %v4111_v43 = vpop.f32.mrb[179].mxu1  ;;  %2978 = vmatprep.mubr.bf16.mxu0 %v15890_v50  ;;  %v11190_v48 = vcombine.low %v11174_v60, %v11175_v35  ;;  %v11191_v58 = vcombine.high %v11174_v60, %v11175_v35 }
 0x347   :  { %v3552_v13 = vmax.bf16 %v15890_v50, %v3424_v18  ;;  %v4697_v15 = vpack.c.bf16 %v4111_v43, %v4107_v14  ;;  %5469 = vmatpush1.bf16.msra.mxu0 %v11155_v0 }
 0x348   :  { %v3553_v40 = vmax.bf16 %v15890_v50, %v3425_v63  ;;  %v4861_v1 = vadd.bf16 %v14010_v12, %v4696_v16  ;;  %v2710_v30 = vpop.f32.mrb[148].mxu0  ;;  %4374 = vmatmul.mubr.bf16.gmra.mrb[28].mxu1 %v13745_v62  ;;  %6913 = vmatprep.subr.bf16.mxu1 %v11191_v58 }
 0x349   :  { %v3669_v45 = vmax.bf16 %v3668_v34, %v3552_v13  ;;  %v4862_v54 = vadd.bf16 %v14013_v36, %v4697_v15  ;;  %v2712_v11 = vpop.f32.mrb[149].mxu0  ;;  %4383 = vmatprep.mubr.bf16.mxu1 %v15890_v50  ;;  %6914 = vmatpush1.bf16.msra.mxu1 %v11190_v48 }
 0x34a   :  { %v3710_v46 = vmax.bf16 %v3709_v17, %v3553_v40  ;;  %v4989_v14 = vmax.bf16 %v15890_v50, %v4861_v1  ;;  %v2714_v18 = vpop.f32.mrb[150].mxu0 }
 0x34b   :  { %v4990_v60 = vmax.bf16 %v15890_v50, %v4862_v54  ;;  %v3261_v63 = vpack.c.bf16 %v2714_v18, %v2710_v30  ;;  %v2716_v16 = vpop.f32.mrb[151].mxu0  ;;  %v4115_v43 = vpop.f32.mrb[180].mxu1 }
 0x34c   :  { %v5110_v35 = vmax.bf16 %v5109_v39, %v4989_v14  ;;  %v3262_v5 = vpack.c.bf16 %v2716_v16, %v2712_v11  ;;  %v4117_v34 = vpop.f32.mrb[181].mxu1 }
 0x34d   :  { %v5151_v13 = vmax.bf16 %v5150_v4, %v4990_v60  ;;  %v3426_v15 = vadd.bf16 %v13914_v19, %v3261_v63  ;;  %2979 = vmatmul.mubr.bf16.gmra.mrb[0].mxu0 %v13783_v29  ;;  %v4119_v58 = vpop.f32.mrb[182].mxu1 }
 0x34e   :  { %v3427_v17 = vadd.bf16 %v13918_v44, %v3262_v5  ;;  %v4698_v1 = vpack.c.bf16 %v4119_v58, %v4115_v43  ;;  %v4121_v40 = vpop.f32.mrb[183].mxu1  ;;  %2988 = vmatprep.mubr.bf16.mxu0 %v15890_v50 }
 0x34f   :  { %v3554_v0 = vmax.bf16 %v15890_v50, %v3426_v15  ;;  %v4699_v48 = vpack.c.bf16 %v4121_v40, %v4117_v34 }
 0x350   :  { %v3555_v30 = vmax.bf16 %v15890_v50, %v3427_v17  ;;  %v4863_v39 = vadd.bf16 %v14010_v12, %v4698_v1  ;;  %v2720_v54 = vpop.f32.mrb[152].mxu0  ;;  %4384 = vmatmul.mubr.bf16.gmra.mrb[32].mxu1 %v13759_v31 }
 0x351   :  { %v3670_v4 = vmax.bf16 %v3669_v45, %v3554_v0  ;;  %v4864_v11 = vadd.bf16 %v14013_v36, %v4699_v48  ;;  %v2722_v14 = vpop.f32.mrb[153].mxu0  ;;  %4393 = vmatprep.mubr.bf16.mxu1 %v15890_v50 }
 0x352   :  { %v3711_v18 = vmax.bf16 %v3710_v46, %v3555_v30  ;;  %v4991_v60 = vmax.bf16 %v15890_v50, %v4863_v39  ;;  %v2724_v63 = vpop.f32.mrb[154].mxu0 }
 0x353   :  { %v4992_v16 = vmax.bf16 %v15890_v50, %v4864_v11  ;;  %v3263_v43 = vpack.c.bf16 %v2724_v63, %v2720_v54  ;;  %v2726_v5 = vpop.f32.mrb[155].mxu0  ;;  %v4125_v34 = vpop.f32.mrb[184].mxu1 }
 0x354   :  { %v5111_v15 = vmax.bf16 %v5110_v35, %v4991_v60  ;;  %v3264_v58 = vpack.c.bf16 %v2726_v5, %v2722_v14  ;;  %v4127_v17 = vpop.f32.mrb[185].mxu1 }
 0x355   :  { %v5152_v1 = vmax.bf16 %v5151_v13, %v4992_v16  ;;  %v3428_v45 = vadd.bf16 %v13914_v19, %v3263_v43  ;;  %2989 = vmatmul.mubr.bf16.gmra.mrb[4].mxu0 %v13781_v53  ;;  %v4129_v40 = vpop.f32.mrb[186].mxu1 }
 0x356   :  { %v3429_v0 = vadd.bf16 %v13918_v44, %v3264_v58  ;;  %v4700_v46 = vpack.c.bf16 %v4129_v40, %v4125_v34  ;;  %v4131_v48 = vpop.f32.mrb[187].mxu1  ;;  %2998 = vmatprep.mubr.bf16.mxu0 %v15890_v50 }
 0x357   :  { %v3556_v30 = vmax.bf16 %v15890_v50, %v3428_v45  ;;  %v4701_v39 = vpack.c.bf16 %v4131_v48, %v4127_v17 }
 0x358   :  { %v3557_v54 = vmax.bf16 %v15890_v50, %v3429_v0  ;;  %v4865_v35 = vadd.bf16 %v14010_v12, %v4700_v46  ;;  %v2730_v11 = vpop.f32.mrb[156].mxu0  ;;  %4394 = vmatmul.mubr.bf16.gmra.mrb[36].mxu1 %v13757_v52 }
 0x359   :  { %v3671_v13 = vmax.bf16 %v3670_v4, %v3556_v30  ;;  %v4866_v14 = vadd.bf16 %v14013_v36, %v4701_v39  ;;  %v2732_v60 = vpop.f32.mrb[157].mxu0  ;;  %4403 = vmatprep.mubr.bf16.mxu1 %v15890_v50 }
 0x35a   :  { %v3712_v63 = vmax.bf16 %v3711_v18, %v3557_v54  ;;  %v4993_v16 = vmax.bf16 %v15890_v50, %v4865_v35  ;;  %v2734_v43 = vpop.f32.mrb[158].mxu0 }
 0x35b   :  { %v4994_v5 = vmax.bf16 %v15890_v50, %v4866_v14  ;;  %v3265_v34 = vpack.c.bf16 %v2734_v43, %v2730_v11  ;;  %v2736_v58 = vpop.f32.mrb[159].mxu0  ;;  %v4135_v17 = vpop.f32.mrb[188].mxu1 }
 0x35c   :  { %v5112_v45 = vmax.bf16 %v5111_v15, %v4993_v16  ;;  %v3266_v40 = vpack.c.bf16 %v2736_v58, %v2732_v60  ;;  %v4137_v0 = vpop.f32.mrb[189].mxu1 }
 0x35d   :  { %v5153_v46 = vmax.bf16 %v5152_v1, %v4994_v5  ;;  %v3430_v4 = vadd.bf16 %v13914_v19, %v3265_v34  ;;  %2999 = vmatmul.mubr.bf16.gmra.mrb[8].mxu0 %v13795_v24  ;;  %v4139_v48 = vpop.f32.mrb[190].mxu1 }
 0x35e   :  { %v3431_v30 = vadd.bf16 %v13918_v44, %v3266_v40  ;;  %v4702_v18 = vpack.c.bf16 %v4139_v48, %v4135_v17  ;;  %v4141_v39 = vpop.f32.mrb[191].mxu1  ;;  %3008 = vmatprep.mubr.bf16.mxu0 %v15890_v50 }
 0x35f   :  { %v3558_v54 = vmax.bf16 %v15890_v50, %v3430_v4  ;;  %v4703_v35 = vpack.c.bf16 %v4141_v39, %v4137_v0 }
 0x360   :  { %v3559_v11 = vmax.bf16 %v15890_v50, %v3431_v30  ;;  %v4867_v15 = vadd.bf16 %v14010_v12, %v4702_v18  ;;  %v2740_v14 = vpop.f32.mrb[160].mxu0  ;;  %4404 = vmatmul.mubr.bf16.gmra.mrb[40].mxu1 %v13771_v21 }
 0x361   :  { %v3672_v1 = vmax.bf16 %v3671_v13, %v3558_v54  ;;  %v4868_v60 = vadd.bf16 %v14013_v36, %v4703_v35  ;;  %v2742_v16 = vpop.f32.mrb[161].mxu0  ;;  %4413 = vmatprep.mubr.bf16.mxu1 %v15890_v50 }
 0x362   :  { %v3713_v43 = vmax.bf16 %v3712_v63, %v3559_v11  ;;  %v4995_v5 = vmax.bf16 %v15890_v50, %v4867_v15  ;;  %v2744_v34 = vpop.f32.mrb[162].mxu0 }
 0x363   :  { %v4996_v58 = vmax.bf16 %v15890_v50, %v4868_v60  ;;  %v3267_v17 = vpack.c.bf16 %v2744_v34, %v2740_v14  ;;  %v2746_v40 = vpop.f32.mrb[163].mxu0  ;;  %v4145_v0 = vpop.f32.mrb[192].mxu1 }
 0x364   :  { %v5113_v4 = vmax.bf16 %v5112_v45, %v4995_v5  ;;  %v3268_v48 = vpack.c.bf16 %v2746_v40, %v2742_v16  ;;  %v4147_v30 = vpop.f32.mrb[193].mxu1 }
 0x365   :  { %v5154_v18 = vmax.bf16 %v5153_v46, %v4996_v58  ;;  %v3432_v13 = vadd.bf16 %v13914_v19, %v3267_v17  ;;  %3009 = vmatmul.mubr.bf16.gmra.mrb[12].mxu0 %v13793_v23  ;;  %v4149_v39 = vpop.f32.mrb[194].mxu1 }
 0x366   :  { %v3433_v54 = vadd.bf16 %v13918_v44, %v3268_v48  ;;  %v4704_v63 = vpack.c.bf16 %v4149_v39, %v4145_v0  ;;  %v4151_v35 = vpop.f32.mrb[195].mxu1  ;;  %3018 = vmatprep.mubr.bf16.mxu0 %v15890_v50 }
 0x367   :  { %v3560_v11 = vmax.bf16 %v15890_v50, %v3432_v13  ;;  %v4705_v15 = vpack.c.bf16 %v4151_v35, %v4147_v30 }
 0x368   :  { %v3561_v14 = vmax.bf16 %v15890_v50, %v3433_v54  ;;  %v4869_v45 = vadd.bf16 %v14010_v12, %v4704_v63  ;;  %v2750_v60 = vpop.f32.mrb[164].mxu0  ;;  %4414 = vmatmul.mubr.bf16.gmra.mrb[44].mxu1 %v13769_v26 }
 0x369   :  { %v3673_v46 = vmax.bf16 %v3672_v1, %v3560_v11  ;;  %v4870_v16 = vadd.bf16 %v14013_v36, %v4705_v15  ;;  %v2752_v5 = vpop.f32.mrb[165].mxu0  ;;  %4423 = vmatprep.mubr.bf16.mxu1 %v15890_v50 }
 0x36a   :  { %v3714_v34 = vmax.bf16 %v3713_v43, %v3561_v14  ;;  %v4997_v58 = vmax.bf16 %v15890_v50, %v4869_v45  ;;  %v2754_v17 = vpop.f32.mrb[166].mxu0 }
 0x36b   :  { %v4998_v40 = vmax.bf16 %v15890_v50, %v4870_v16  ;;  %v3269_v0 = vpack.c.bf16 %v2754_v17, %v2750_v60  ;;  %v2756_v48 = vpop.f32.mrb[167].mxu0  ;;  %v4155_v30 = vpop.f32.mrb[196].mxu1 }
 0x36c   :  { %v5114_v13 = vmax.bf16 %v5113_v4, %v4997_v58  ;;  %v3270_v39 = vpack.c.bf16 %v2756_v48, %v2752_v5  ;;  %v4157_v54 = vpop.f32.mrb[197].mxu1 }
 0x36d   :  { %v5155_v63 = vmax.bf16 %v5154_v18, %v4998_v40  ;;  %v3434_v1 = vadd.bf16 %v13914_v19, %v3269_v0  ;;  %3019 = vmatmul.mubr.bf16.gmra.mrb[16].mxu0 %v13807_v27  ;;  %v4159_v35 = vpop.f32.mrb[198].mxu1 }
 0x36e   :  { %v3435_v11 = vadd.bf16 %v13918_v44, %v3270_v39  ;;  %v4706_v43 = vpack.c.bf16 %v4159_v35, %v4155_v30  ;;  %v4161_v15 = vpop.f32.mrb[199].mxu1  ;;  %3028 = vmatprep.mubr.bf16.mxu0 %v15890_v50 }
 0x36f   :  { %v3562_v14 = vmax.bf16 %v15890_v50, %v3434_v1  ;;  %v4707_v45 = vpack.c.bf16 %v4161_v15, %v4157_v54 }
 0x370   :  { %v3563_v60 = vmax.bf16 %v15890_v50, %v3435_v11  ;;  %v4871_v4 = vadd.bf16 %v14010_v12, %v4706_v43  ;;  %v2760_v16 = vpop.f32.mrb[168].mxu0  ;;  %4424 = vmatmul.mubr.bf16.gmra.mrb[48].mxu1 %v13783_v29 }
 0x371   :  { %v3674_v18 = vmax.bf16 %v3673_v46, %v3562_v14  ;;  %v4872_v5 = vadd.bf16 %v14013_v36, %v4707_v45  ;;  %v2762_v58 = vpop.f32.mrb[169].mxu0  ;;  %4433 = vmatprep.mubr.bf16.mxu1 %v15890_v50 }
 0x372   :  { %v3715_v17 = vmax.bf16 %v3714_v34, %v3563_v60  ;;  %v4999_v40 = vmax.bf16 %v15890_v50, %v4871_v4  ;;  %v2764_v0 = vpop.f32.mrb[170].mxu0 }
 0x373   :  { %v5000_v48 = vmax.bf16 %v15890_v50, %v4872_v5  ;;  %v3271_v30 = vpack.c.bf16 %v2764_v0, %v2760_v16  ;;  %v2766_v39 = vpop.f32.mrb[171].mxu0  ;;  %v4165_v54 = vpop.f32.mrb[200].mxu1 }
 0x374   :  { %v5115_v1 = vmax.bf16 %v5114_v13, %v4999_v40  ;;  %v3272_v35 = vpack.c.bf16 %v2766_v39, %v2762_v58  ;;  %v4167_v11 = vpop.f32.mrb[201].mxu1 }
 0x375   :  { %v5156_v43 = vmax.bf16 %v5155_v63, %v5000_v48  ;;  %v3436_v46 = vadd.bf16 %v13914_v19, %v3271_v30  ;;  %3029 = vmatmul.mubr.bf16.gmra.mrb[20].mxu0 %v13805_v9  ;;  %v4169_v15 = vpop.f32.mrb[202].mxu1 }
 0x376   :  { %v3437_v14 = vadd.bf16 %v13918_v44, %v3272_v35  ;;  %v4708_v34 = vpack.c.bf16 %v4169_v15, %v4165_v54  ;;  %v4171_v45 = vpop.f32.mrb[203].mxu1  ;;  %3038 = vmatprep.mubr.bf16.mxu0 %v15890_v50 }
 0x377   :  { %v3564_v60 = vmax.bf16 %v15890_v50, %v3436_v46  ;;  %v4709_v4 = vpack.c.bf16 %v4171_v45, %v4167_v11 }
 0x378   :  { %v3565_v16 = vmax.bf16 %v15890_v50, %v3437_v14  ;;  %v4873_v13 = vadd.bf16 %v14010_v12, %v4708_v34  ;;  %v2770_v5 = vpop.f32.mrb[172].mxu0  ;;  %4434 = vmatmul.mubr.bf16.gmra.mrb[52].mxu1 %v13781_v53 }
 0x379   :  { %v3675_v63 = vmax.bf16 %v3674_v18, %v3564_v60  ;;  %v4874_v58 = vadd.bf16 %v14013_v36, %v4709_v4  ;;  %v2772_v40 = vpop.f32.mrb[173].mxu0  ;;  %4443 = vmatprep.mubr.bf16.mxu1 %v15890_v50 }
 0x37a   :  { %v3716_v0 = vmax.bf16 %v3715_v17, %v3565_v16  ;;  %v5001_v48 = vmax.bf16 %v15890_v50, %v4873_v13  ;;  %v2774_v30 = vpop.f32.mrb[174].mxu0 }
 0x37b   :  { %v5002_v39 = vmax.bf16 %v15890_v50, %v4874_v58  ;;  %v3273_v54 = vpack.c.bf16 %v2774_v30, %v2770_v5  ;;  %v2776_v35 = vpop.f32.mrb[175].mxu0  ;;  %v4175_v11 = vpop.f32.mrb[204].mxu1 }
 0x37c   :  { %v5116_v46 = vmax.bf16 %v5115_v1, %v5001_v48  ;;  %v3274_v15 = vpack.c.bf16 %v2776_v35, %v2772_v40  ;;  %v4177_v14 = vpop.f32.mrb[205].mxu1 }
 0x37d   :  { %v5157_v34 = vmax.bf16 %v5156_v43, %v5002_v39  ;;  %v3438_v18 = vadd.bf16 %v13914_v19, %v3273_v54  ;;  %3039 = vmatmul.mubr.bf16.gmra.mrb[24].mxu0 %v13831_v10  ;;  %v4179_v45 = vpop.f32.mrb[206].mxu1 }
 0x37e   :  { %v3439_v60 = vadd.bf16 %v13918_v44, %v3274_v15  ;;  %v4710_v17 = vpack.c.bf16 %v4179_v45, %v4175_v11  ;;  %v4181_v4 = vpop.f32.mrb[207].mxu1  ;;  %3048 = vmatprep.mubr.bf16.mxu0 %v15890_v50 }
 0x37f   :  { %v3566_v16 = vmax.bf16 %v15890_v50, %v3438_v18  ;;  %v4711_v13 = vpack.c.bf16 %v4181_v4, %v4177_v14 }
 0x380   :  { %v3567_v5 = vmax.bf16 %v15890_v50, %v3439_v60  ;;  %v4875_v1 = vadd.bf16 %v14010_v12, %v4710_v17  ;;  %v2780_v58 = vpop.f32.mrb[176].mxu0  ;;  %4444 = vmatmul.mubr.bf16.gmra.mrb[56].mxu1 %v13795_v24 }
 0x381   :  { %v3676_v43 = vmax.bf16 %v3675_v63, %v3566_v16  ;;  %v4876_v40 = vadd.bf16 %v14013_v36, %v4711_v13  ;;  %v2782_v48 = vpop.f32.mrb[177].mxu0  ;;  %4453 = vmatprep.mubr.bf16.mxu1 %v15890_v50 }
 0x382   :  { %v3717_v30 = vmax.bf16 %v3716_v0, %v3567_v5  ;;  %v5003_v39 = vmax.bf16 %v15890_v50, %v4875_v1  ;;  %v2784_v54 = vpop.f32.mrb[178].mxu0 }
 0x383   :  { %v5004_v35 = vmax.bf16 %v15890_v50, %v4876_v40  ;;  %v3275_v11 = vpack.c.bf16 %v2784_v54, %v2780_v58  ;;  %v2786_v15 = vpop.f32.mrb[179].mxu0  ;;  %v4185_v14 = vpop.f32.mrb[208].mxu1 }
 0x384   :  { %v5117_v18 = vmax.bf16 %v5116_v46, %v5003_v39  ;;  %v3276_v45 = vpack.c.bf16 %v2786_v15, %v2782_v48  ;;  %v4187_v60 = vpop.f32.mrb[209].mxu1 }
 0x385   :  { %v5158_v17 = vmax.bf16 %v5157_v34, %v5004_v35  ;;  %v3440_v63 = vadd.bf16 %v13914_v19, %v3275_v11  ;;  %3049 = vmatmul.mubr.bf16.gmra.mrb[28].mxu0 %v13829_v7  ;;  %v4189_v4 = vpop.f32.mrb[210].mxu1 }
 0x386   :  { %v3441_v16 = vadd.bf16 %v13918_v44, %v3276_v45  ;;  %v4712_v0 = vpack.c.bf16 %v4189_v4, %v4185_v14  ;;  %v4191_v13 = vpop.f32.mrb[211].mxu1  ;;  %3058 = vmatprep.mubr.bf16.mxu0 %v15890_v50 }
 0x387   :  { %v3568_v5 = vmax.bf16 %v15890_v50, %v3440_v63  ;;  %v4713_v1 = vpack.c.bf16 %v4191_v13, %v4187_v60 }
 0x388   :  { %v3569_v58 = vmax.bf16 %v15890_v50, %v3441_v16  ;;  %v4877_v46 = vadd.bf16 %v14010_v12, %v4712_v0  ;;  %v2790_v40 = vpop.f32.mrb[180].mxu0  ;;  %4454 = vmatmul.mubr.bf16.gmra.mrb[60].mxu1 %v13793_v23 }
 0x389   :  { %v14207_v34 = vmax.bf16 %v3676_v43, %v3568_v5  ;;  %v4878_v48 = vadd.bf16 %v14013_v36, %v4713_v1  ;;  %v2792_v39 = vpop.f32.mrb[181].mxu0  ;;  %4463 = vmatprep.mubr.bf16.mxu1 %v15890_v50 }
 0x38a   :  { %v14211_v54 = vmax.bf16 %v3717_v30, %v3569_v58  ;;  %v5005_v35 = vmax.bf16 %v15890_v50, %v4877_v46  ;;  %v2794_v11 = vpop.f32.mrb[182].mxu0 }
 0x38b   :  { %v5006_v15 = vmax.bf16 %v15890_v50, %v4878_v48  ;;  %v3277_v14 = vpack.c.bf16 %v2794_v11, %v2790_v40  ;;  %v2796_v45 = vpop.f32.mrb[183].mxu0  ;;  %v4195_v60 = vpop.f32.mrb[212].mxu1 }
 0x38c   :  { %v14215_v63 = vmax.bf16 %v5117_v18, %v5005_v35  ;;  %v3278_v4 = vpack.c.bf16 %v2796_v45, %v2792_v39  ;;  %v4197_v43 = vpop.f32.mrb[213].mxu1 }
 0x38d   :  { %v14217_v16 = vmax.bf16 %v5158_v17, %v5006_v15  ;;  %v3442_v0 = vadd.bf16 %v13914_v19, %v3277_v14  ;;  %3059 = vmatmul.mubr.bf16.gmra.mrb[32].mxu0 %v13843_v8  ;;  %v4199_v30 = vpop.f32.mrb[214].mxu1 }
 0x38e   :  { %v3443_v13 = vadd.bf16 %v13918_v44, %v3278_v4  ;;  %v4714_v5 = vpack.c.bf16 %v4199_v30, %v4195_v60  ;;  %v4201_v1 = vpop.f32.mrb[215].mxu1  ;;  %3068 = vmatprep.mubr.bf16.mxu0 %v15890_v50 }
 0x38f   :  { %v3570_v58 = vmax.bf16 %v15890_v50, %v3442_v0  ;;  %v4715_v46 = vpack.c.bf16 %v4201_v1, %v4197_v43 }
 0x390   :  { %v3571_v18 = vmax.bf16 %v15890_v50, %v3443_v13  ;;  %v4879_v40 = vadd.bf16 %v14010_v12, %v4714_v5  ;;  %v2800_v17 = vpop.f32.mrb[184].mxu0  ;;  %4464 = vmatmul.mubr.bf16.gmra.mrb[64].mxu1 %v13807_v27 }
 0x391   :  { %v3678_v48 = vmax.bf16 %v14207_v34, %v3570_v58  ;;  %v4880_v39 = vadd.bf16 %v14013_v36, %v4715_v46  ;;  %v2802_v35 = vpop.f32.mrb[185].mxu0  ;;  %4473 = vmatprep.mubr.bf16.mxu1 %v15890_v50  ;;  %v11141_v34 = vld [vmem:[%s15765_s5 + $0x1d0] sm:$0xff] }
 0x392   :  { %v3719_v11 = vmax.bf16 %v14211_v54, %v3571_v18  ;;  %v5007_v15 = vmax.bf16 %v15890_v50, %v4879_v40  ;;  %v2804_v14 = vpop.f32.mrb[186].mxu0  ;;  %v11142_v54 = vld [vmem:[%s15765_s5 + $0x1f0] sm:$0xff]  ;;  %v11176_v40 = vld [vmem:[%s15765_s5 + $0x1d8] sm:$0xff] }
 0x393   :  { %v5008_v45 = vmax.bf16 %v15890_v50, %v4880_v39  ;;  %v3279_v60 = vpack.c.bf16 %v2804_v14, %v2800_v17  ;;  %v2806_v4 = vpop.f32.mrb[187].mxu0  ;;  %v4205_v43 = vpop.f32.mrb[216].mxu1  ;;  %v11177_v17 = vld [vmem:[%s15765_s5 + $0x1f8] sm:$0xff] }
 0x394   :  { %v5119_v0 = vmax.bf16 %v14215_v63, %v5007_v15  ;;  %v3280_v30 = vpack.c.bf16 %v2806_v4, %v2802_v35  ;;  %v4207_v13 = vpop.f32.mrb[217].mxu1  ;;  %v11157_v35 = vcombine.low %v11141_v34, %v11142_v54  ;;  %v11193_v27 = vcombine.high %v11176_v40, %v11177_v17 }
 0x395   :  { %v5160_v5 = vmax.bf16 %v14217_v16, %v5008_v45  ;;  %v3444_v1 = vadd.bf16 %v13914_v19, %v3279_v60  ;;  %3069 = vmatmul.mubr.bf16.gmra.mrb[36].mxu0 %v13841_v2  ;;  %v4209_v58 = vpop.f32.mrb[218].mxu1  ;;  %v11158_v60 = vcombine.high %v11141_v34, %v11142_v54 }
 0x396   :  { %v3445_v46 = vadd.bf16 %v13918_v44, %v3280_v30  ;;  %v4716_v63 = vpack.c.bf16 %v4209_v58, %v4205_v43  ;;  %v4211_v18 = vpop.f32.mrb[219].mxu1  ;;  %3078 = vmatprep.mubr.bf16.mxu0 %v15890_v50  ;;  %v11192_v58 = vcombine.low %v11176_v40, %v11177_v17  ;;  %6915 = vmatprep.subr.bf16.mxu1 %v11193_v27 }
 0x397   :  { %v3572_v16 = vmax.bf16 %v15890_v50, %v3444_v1  ;;  %v4717_v39 = vpack.c.bf16 %v4211_v18, %v4207_v13  ;;  %5470 = vmatprep.subr.bf16.mxu0 %v11158_v60 }
 0x398   :  { %v3573_v15 = vmax.bf16 %v15890_v50, %v3445_v46  ;;  %v4881_v14 = vadd.bf16 %v14010_v12, %v4716_v63  ;;  %v2810_v45 = vpop.f32.mrb[188].mxu0  ;;  %4474 = vmatmul.mubr.bf16.gmra.mrb[68].mxu1 %v13805_v9  ;;  %5471 = vmatpush1.bf16.msra.mxu0 %v11157_v35 }
 0x399   :  { %v14255_v4 = vmax.bf16 %v3678_v48, %v3572_v16  ;;  %v4882_v43 = vadd.bf16 %v14013_v36, %v4717_v39  ;;  %v2812_v30 = vpop.f32.mrb[189].mxu0  ;;  %4483 = vmatprep.mubr.bf16.mxu1 %v15890_v50  ;;  %6916 = vmatpush1.bf16.msra.mxu1 %v11192_v58 }
 0x39a   :  { %v3720_v1 = vmax.bf16 %v3719_v11, %v3573_v15  ;;  %v5009_v13 = vmax.bf16 %v15890_v50, %v4881_v14  ;;  %v2814_v18 = vpop.f32.mrb[190].mxu0 }
 0x39b   :  { %v5010_v46 = vmax.bf16 %v15890_v50, %v4882_v43  ;;  %v3281_v63 = vpack.c.bf16 %v2814_v18, %v2810_v45  ;;  %v2816_v23 = vpop.f32.mrb[191].mxu0  ;;  %v4215_v9 = vpop.f32.mrb[220].mxu1 }
 0x39c   :  { %v5120_v48 = vmax.bf16 %v5119_v0, %v5009_v13  ;;  %v3282_v34 = vpack.c.bf16 %v2816_v23, %v2812_v30  ;;  %v4217_v54 = vpop.f32.mrb[221].mxu1 }
 0x39d   :  { %v5161_v16 = vmax.bf16 %v5160_v5, %v5010_v46  ;;  %v3446_v39 = vadd.bf16 %v13914_v19, %v3281_v63  ;;  %3079 = vmatmul.mubr.bf16.gmra.mrb[40].mxu0 %v13855_v6  ;;  %v4219_v11 = vpop.f32.mrb[222].mxu1 }
 0x39e   :  { %v3447_v40 = vadd.bf16 %v13918_v44, %v3282_v34  ;;  %v4718_v17 = vpack.c.bf16 %v4219_v11, %v4215_v9  ;;  %v4221_v15 = vpop.f32.mrb[223].mxu1  ;;  %3088 = vmatprep.mubr.bf16.mxu0 %v15890_v50 }
 0x39f   :  { %v3574_v14 = vmax.bf16 %v15890_v50, %v3446_v39  ;;  %v4719_v27 = vpack.c.bf16 %v4221_v15, %v4217_v54 }
 0x3a0   :  { %v3575_v0 = vmax.bf16 %v15890_v50, %v3447_v40  ;;  %v4883_v23 = vadd.bf16 %v14010_v12, %v4718_v17  ;;  %v2820_v35 = vpop.f32.mrb[192].mxu0  ;;  %4484 = vmatmul.mubr.bf16.gmra.mrb[72].mxu1 %v13831_v10 }
 0x3a1   :  { %v3680_v5 = vmax.bf16 %v14255_v4, %v3574_v14  ;;  %v4884_v45 = vadd.bf16 %v14013_v36, %v4719_v27  ;;  %v2822_v60 = vpop.f32.mrb[193].mxu0  ;;  %4493 = vmatprep.mubr.bf16.mxu1 %v15890_v50 }
 0x3a2   :  { %v3721_v9 = vmax.bf16 %v3720_v1, %v3575_v0  ;;  %v5011_v43 = vmax.bf16 %v15890_v50, %v4883_v23  ;;  %v2824_v30 = vpop.f32.mrb[194].mxu0 }
 0x3a3   :  { %v5012_v58 = vmax.bf16 %v15890_v50, %v4884_v45  ;;  %v3283_v13 = vpack.c.bf16 %v2824_v30, %v2820_v35  ;;  %v2826_v18 = vpop.f32.mrb[195].mxu0  ;;  %v4225_v46 = vpop.f32.mrb[224].mxu1 }
 0x3a4   :  { %v5121_v63 = vmax.bf16 %v5120_v48, %v5011_v43  ;;  %v3284_v34 = vpack.c.bf16 %v2826_v18, %v2822_v60  ;;  %v4227_v54 = vpop.f32.mrb[225].mxu1 }
 0x3a5   :  { %v5162_v39 = vmax.bf16 %v5161_v16, %v5012_v58  ;;  %v3448_v4 = vadd.bf16 %v13914_v19, %v3283_v13  ;;  %3089 = vmatmul.mubr.bf16.gmra.mrb[44].mxu0 %v13853_v3  ;;  %v4229_v11 = vpop.f32.mrb[226].mxu1 }
 0x3a6   :  { %v3449_v40 = vadd.bf16 %v13918_v44, %v3284_v34  ;;  %v4720_v1 = vpack.c.bf16 %v4229_v11, %v4225_v46  ;;  %v4231_v17 = vpop.f32.mrb[227].mxu1  ;;  %3098 = vmatprep.mubr.bf16.mxu0 %v15890_v50 }
 0x3a7   :  { %v3576_v15 = vmax.bf16 %v15890_v50, %v3448_v4  ;;  %v4721_v14 = vpack.c.bf16 %v4231_v17, %v4227_v54 }
 0x3a8   :  { %v3577_v27 = vmax.bf16 %v15890_v50, %v3449_v40  ;;  %v4885_v48 = vadd.bf16 %v14010_v12, %v4720_v1  ;;  %v2830_v0 = vpop.f32.mrb[196].mxu0  ;;  %4494 = vmatmul.mubr.bf16.gmra.mrb[76].mxu1 %v13829_v7 }
 0x3a9   :  { %v3681_v16 = vmax.bf16 %v3680_v5, %v3576_v15  ;;  %v4886_v23 = vadd.bf16 %v14013_v36, %v4721_v14  ;;  %v2832_v35 = vpop.f32.mrb[197].mxu0  ;;  %4503 = vmatprep.mubr.bf16.mxu1 %v15890_v50 }
 0x3aa   :  { %v3722_v45 = vmax.bf16 %v3721_v9, %v3577_v27  ;;  %v5013_v60 = vmax.bf16 %v15890_v50, %v4885_v48  ;;  %v2834_v43 = vpop.f32.mrb[198].mxu0 }
 0x3ab   :  { %v5014_v30 = vmax.bf16 %v15890_v50, %v4886_v23  ;;  %v3285_v58 = vpack.c.bf16 %v2834_v43, %v2830_v0  ;;  %v2836_v13 = vpop.f32.mrb[199].mxu0  ;;  %v4235_v18 = vpop.f32.mrb[228].mxu1 }
 0x3ac   :  { %v5122_v46 = vmax.bf16 %v5121_v63, %v5013_v60  ;;  %v3286_v34 = vpack.c.bf16 %v2836_v13, %v2832_v35  ;;  %v4237_v54 = vpop.f32.mrb[229].mxu1 }
 0x3ad   :  { %v5163_v4 = vmax.bf16 %v5162_v39, %v5014_v30  ;;  %v3450_v5 = vadd.bf16 %v13914_v19, %v3285_v58  ;;  %3099 = vmatmul.mubr.bf16.gmra.mrb[48].mxu0 %v13867_v51  ;;  %v4239_v11 = vpop.f32.mrb[230].mxu1 }
 0x3ae   :  { %v3451_v40 = vadd.bf16 %v13918_v44, %v3286_v34  ;;  %v4722_v9 = vpack.c.bf16 %v4239_v11, %v4235_v18  ;;  %v4241_v1 = vpop.f32.mrb[231].mxu1  ;;  %3108 = vmatprep.mubr.bf16.mxu0 %v15890_v50 }
 0x3af   :  { %v3578_v17 = vmax.bf16 %v15890_v50, %v3450_v5  ;;  %v4723_v15 = vpack.c.bf16 %v4241_v1, %v4237_v54 }
 0x3b0   :  { %v3579_v14 = vmax.bf16 %v15890_v50, %v3451_v40  ;;  %v4887_v63 = vadd.bf16 %v14010_v12, %v4722_v9  ;;  %v2840_v27 = vpop.f32.mrb[200].mxu0  ;;  %4504 = vmatmul.mubr.bf16.gmra.mrb[80].mxu1 %v13843_v8 }
 0x3b1   :  { %v3682_v39 = vmax.bf16 %v3681_v16, %v3578_v17  ;;  %v4888_v48 = vadd.bf16 %v14013_v36, %v4723_v15  ;;  %v2842_v0 = vpop.f32.mrb[201].mxu0  ;;  %4513 = vmatprep.mubr.bf16.mxu1 %v15890_v50 }
 0x3b2   :  { %v3723_v23 = vmax.bf16 %v3722_v45, %v3579_v14  ;;  %v5015_v35 = vmax.bf16 %v15890_v50, %v4887_v63  ;;  %v2844_v60 = vpop.f32.mrb[202].mxu0 }
 0x3b3   :  { %v5016_v43 = vmax.bf16 %v15890_v50, %v4888_v48  ;;  %v3287_v30 = vpack.c.bf16 %v2844_v60, %v2840_v27  ;;  %v2846_v58 = vpop.f32.mrb[203].mxu0  ;;  %v4245_v13 = vpop.f32.mrb[232].mxu1 }
 0x3b4   :  { %v5123_v18 = vmax.bf16 %v5122_v46, %v5015_v35  ;;  %v3288_v34 = vpack.c.bf16 %v2846_v58, %v2842_v0  ;;  %v4247_v54 = vpop.f32.mrb[233].mxu1 }
 0x3b5   :  { %v5164_v5 = vmax.bf16 %v5163_v4, %v5016_v43  ;;  %v3452_v16 = vadd.bf16 %v13914_v19, %v3287_v30  ;;  %3109 = vmatmul.mubr.bf16.gmra.mrb[52].mxu0 %v13865_v41  ;;  %v4249_v11 = vpop.f32.mrb[234].mxu1 }
 0x3b6   :  { %v3453_v40 = vadd.bf16 %v13918_v44, %v3288_v34  ;;  %v4724_v45 = vpack.c.bf16 %v4249_v11, %v4245_v13  ;;  %v4251_v9 = vpop.f32.mrb[235].mxu1  ;;  %3118 = vmatprep.mubr.bf16.mxu0 %v15890_v50 }
 0x3b7   :  { %v3580_v1 = vmax.bf16 %v15890_v50, %v3452_v16  ;;  %v4725_v17 = vpack.c.bf16 %v4251_v9, %v4247_v54 }
 0x3b8   :  { %v3581_v15 = vmax.bf16 %v15890_v50, %v3453_v40  ;;  %v4889_v46 = vadd.bf16 %v14010_v12, %v4724_v45  ;;  %v2850_v14 = vpop.f32.mrb[204].mxu0  ;;  %4514 = vmatmul.mubr.bf16.gmra.mrb[84].mxu1 %v13841_v2 }
 0x3b9   :  { %v3683_v4 = vmax.bf16 %v3682_v39, %v3580_v1  ;;  %v4890_v63 = vadd.bf16 %v14013_v36, %v4725_v17  ;;  %v2852_v27 = vpop.f32.mrb[205].mxu0  ;;  %4523 = vmatprep.mubr.bf16.mxu1 %v15890_v50 }
 0x3ba   :  { %v3724_v48 = vmax.bf16 %v3723_v23, %v3581_v15  ;;  %v5017_v0 = vmax.bf16 %v15890_v50, %v4889_v46  ;;  %v2854_v35 = vpop.f32.mrb[206].mxu0 }
 0x3bb   :  { %v5018_v60 = vmax.bf16 %v15890_v50, %v4890_v63  ;;  %v3289_v43 = vpack.c.bf16 %v2854_v35, %v2850_v14  ;;  %v2856_v30 = vpop.f32.mrb[207].mxu0  ;;  %v4255_v58 = vpop.f32.mrb[236].mxu1 }
 0x3bc   :  { %v5124_v13 = vmax.bf16 %v5123_v18, %v5017_v0  ;;  %v3290_v34 = vpack.c.bf16 %v2856_v30, %v2852_v27  ;;  %v4257_v54 = vpop.f32.mrb[237].mxu1 }
 0x3bd   :  { %v5165_v16 = vmax.bf16 %v5164_v5, %v5018_v60  ;;  %v3454_v39 = vadd.bf16 %v13914_v19, %v3289_v43  ;;  %3119 = vmatmul.mubr.bf16.gmra.mrb[56].mxu0 %v13886_v59  ;;  %v4259_v11 = vpop.f32.mrb[238].mxu1 }
 0x3be   :  { %v3455_v40 = vadd.bf16 %v13918_v44, %v3290_v34  ;;  %v4726_v23 = vpack.c.bf16 %v4259_v11, %v4255_v58  ;;  %v4261_v45 = vpop.f32.mrb[239].mxu1  ;;  %3128 = vmatprep.mubr.bf16.mxu0 %v15890_v50 }
 0x3bf   :  { %v3582_v9 = vmax.bf16 %v15890_v50, %v3454_v39  ;;  %v4727_v1 = vpack.c.bf16 %v4261_v45, %v4257_v54 }
 0x3c0   :  { %v3583_v17 = vmax.bf16 %v15890_v50, %v3455_v40  ;;  %v4891_v18 = vadd.bf16 %v14010_v12, %v4726_v23  ;;  %v2860_v15 = vpop.f32.mrb[208].mxu0  ;;  %4524 = vmatmul.mubr.bf16.gmra.mrb[88].mxu1 %v13855_v6 }
 0x3c1   :  { %v3684_v5 = vmax.bf16 %v3683_v4, %v3582_v9  ;;  %v4892_v46 = vadd.bf16 %v14013_v36, %v4727_v1  ;;  %v2862_v14 = vpop.f32.mrb[209].mxu0  ;;  %4533 = vmatprep.mubr.bf16.mxu1 %v15890_v50 }
 0x3c2   :  { %v3725_v63 = vmax.bf16 %v3724_v48, %v3583_v17  ;;  %v5019_v27 = vmax.bf16 %v15890_v50, %v4891_v18  ;;  %v2864_v0 = vpop.f32.mrb[210].mxu0 }
 0x3c3   :  { %v5020_v35 = vmax.bf16 %v15890_v50, %v4892_v46  ;;  %v3291_v60 = vpack.c.bf16 %v2864_v0, %v2860_v15  ;;  %v2866_v43 = vpop.f32.mrb[211].mxu0  ;;  %v4265_v30 = vpop.f32.mrb[240].mxu1 }
 0x3c4   :  { %v5125_v58 = vmax.bf16 %v5124_v13, %v5019_v27  ;;  %v3292_v34 = vpack.c.bf16 %v2866_v43, %v2862_v14  ;;  %v4267_v54 = vpop.f32.mrb[241].mxu1 }
 0x3c5   :  { %v5166_v39 = vmax.bf16 %v5165_v16, %v5020_v35  ;;  %v3456_v4 = vadd.bf16 %v13914_v19, %v3291_v60  ;;  %3129 = vmatmul.mubr.bf16.gmra.mrb[60].mxu0 %v13884_v33  ;;  %v4269_v11 = vpop.f32.mrb[242].mxu1 }
 0x3c6   :  { %v3457_v40 = vadd.bf16 %v13918_v44, %v3292_v34  ;;  %v4728_v48 = vpack.c.bf16 %v4269_v11, %v4265_v30  ;;  %v4271_v23 = vpop.f32.mrb[243].mxu1  ;;  %3138 = vmatprep.mubr.bf16.mxu0 %v15890_v50 }
 0x3c7   :  { %v3584_v45 = vmax.bf16 %v15890_v50, %v3456_v4  ;;  %v4729_v9 = vpack.c.bf16 %v4271_v23, %v4267_v54 }
 0x3c8   :  { %v3585_v1 = vmax.bf16 %v15890_v50, %v3457_v40  ;;  %v4893_v13 = vadd.bf16 %v14010_v12, %v4728_v48  ;;  %v2870_v17 = vpop.f32.mrb[212].mxu0  ;;  %4534 = vmatmul.mubr.bf16.gmra.mrb[92].mxu1 %v13853_v3 }
 0x3c9   :  { %v3685_v16 = vmax.bf16 %v3684_v5, %v3584_v45  ;;  %v4894_v18 = vadd.bf16 %v14013_v36, %v4729_v9  ;;  %v2872_v15 = vpop.f32.mrb[213].mxu0  ;;  %4543 = vmatprep.mubr.bf16.mxu1 %v15890_v50 }
 0x3ca   :  { %v3726_v46 = vmax.bf16 %v3725_v63, %v3585_v1  ;;  %v5021_v14 = vmax.bf16 %v15890_v50, %v4893_v13  ;;  %v2874_v27 = vpop.f32.mrb[214].mxu0 }
 0x3cb   :  { %v5022_v0 = vmax.bf16 %v15890_v50, %v4894_v18  ;;  %v3293_v35 = vpack.c.bf16 %v2874_v27, %v2870_v17  ;;  %v2876_v60 = vpop.f32.mrb[215].mxu0  ;;  %v4275_v43 = vpop.f32.mrb[244].mxu1 }
 0x3cc   :  { %v5126_v30 = vmax.bf16 %v5125_v58, %v5021_v14  ;;  %v3294_v34 = vpack.c.bf16 %v2876_v60, %v2872_v15  ;;  %v4277_v54 = vpop.f32.mrb[245].mxu1 }
 0x3cd   :  { %v5167_v4 = vmax.bf16 %v5166_v39, %v5022_v0  ;;  %v3458_v5 = vadd.bf16 %v13914_v19, %v3293_v35  ;;  %3139 = vmatmul.mubr.bf16.gmra.mrb[64].mxu0 %v13903_v20  ;;  %v4279_v11 = vpop.f32.mrb[246].mxu1 }
 0x3ce   :  { %v3459_v40 = vadd.bf16 %v13918_v44, %v3294_v34  ;;  %v4730_v63 = vpack.c.bf16 %v4279_v11, %v4275_v43  ;;  %v4281_v48 = vpop.f32.mrb[247].mxu1  ;;  %3148 = vmatprep.mubr.bf16.mxu0 %v15890_v50 }
 0x3cf   :  { %v3586_v23 = vmax.bf16 %v15890_v50, %v3458_v5  ;;  %v4731_v45 = vpack.c.bf16 %v4281_v48, %v4277_v54 }
 0x3d0   :  { %v3587_v9 = vmax.bf16 %v15890_v50, %v3459_v40  ;;  %v4895_v58 = vadd.bf16 %v14010_v12, %v4730_v63  ;;  %v2880_v1 = vpop.f32.mrb[216].mxu0  ;;  %4544 = vmatmul.mubr.bf16.gmra.mrb[96].mxu1 %v13867_v51 }
 0x3d1   :  { %v3686_v39 = vmax.bf16 %v3685_v16, %v3586_v23  ;;  %v4896_v13 = vadd.bf16 %v14013_v36, %v4731_v45  ;;  %v2882_v17 = vpop.f32.mrb[217].mxu0  ;;  %4553 = vmatprep.mubr.bf16.mxu1 %v15890_v50 }
 0x3d2   :  { %v3727_v18 = vmax.bf16 %v3726_v46, %v3587_v9  ;;  %v5023_v15 = vmax.bf16 %v15890_v50, %v4895_v58  ;;  %v2884_v14 = vpop.f32.mrb[218].mxu0 }
 0x3d3   :  { %v5024_v27 = vmax.bf16 %v15890_v50, %v4896_v13  ;;  %v3295_v0 = vpack.c.bf16 %v2884_v14, %v2880_v1  ;;  %v2886_v35 = vpop.f32.mrb[219].mxu0  ;;  %v4285_v60 = vpop.f32.mrb[248].mxu1 }
 0x3d4   :  { %v5127_v43 = vmax.bf16 %v5126_v30, %v5023_v15  ;;  %v3296_v34 = vpack.c.bf16 %v2886_v35, %v2882_v17  ;;  %v4287_v54 = vpop.f32.mrb[249].mxu1 }
 0x3d5   :  { %v5168_v5 = vmax.bf16 %v5167_v4, %v5024_v27  ;;  %v3460_v16 = vadd.bf16 %v13914_v19, %v3295_v0  ;;  %3149 = vmatmul.mubr.bf16.gmra.mrb[68].mxu0 %v13901_v47  ;;  %v4289_v11 = vpop.f32.mrb[250].mxu1 }
 0x3d6   :  { %v3461_v40 = vadd.bf16 %v13918_v44, %v3296_v34  ;;  %v4732_v46 = vpack.c.bf16 %v4289_v11, %v4285_v60  ;;  %v4291_v63 = vpop.f32.mrb[251].mxu1  ;;  %3158 = vmatprep.mubr.bf16.mxu0 %v15890_v50 }
 0x3d7   :  { %v3588_v48 = vmax.bf16 %v15890_v50, %v3460_v16  ;;  %v4733_v23 = vpack.c.bf16 %v4291_v63, %v4287_v54 }
 0x3d8   :  { %v3589_v45 = vmax.bf16 %v15890_v50, %v3461_v40  ;;  %v4897_v30 = vadd.bf16 %v14010_v12, %v4732_v46  ;;  %v2890_v9 = vpop.f32.mrb[220].mxu0  ;;  %4554 = vmatmul.mubr.bf16.gmra.mrb[100].mxu1 %v13865_v41 }
 0x3d9   :  { %v3687_v4 = vmax.bf16 %v3686_v39, %v3588_v48  ;;  %v4898_v58 = vadd.bf16 %v14013_v36, %v4733_v23  ;;  %v2892_v1 = vpop.f32.mrb[221].mxu0  ;;  %4563 = vmatprep.mubr.bf16.mxu1 %v15890_v50 }
 0x3da   :  { %v3728_v13 = vmax.bf16 %v3727_v18, %v3589_v45  ;;  %v5025_v17 = vmax.bf16 %v15890_v50, %v4897_v30  ;;  %v2894_v15 = vpop.f32.mrb[222].mxu0 }
 0x3db   :  { %v5026_v14 = vmax.bf16 %v15890_v50, %v4898_v58  ;;  %v3297_v27 = vpack.c.bf16 %v2894_v15, %v2890_v9  ;;  %v2896_v0 = vpop.f32.mrb[223].mxu0  ;;  %v4295_v35 = vpop.f32.mrb[252].mxu1 }
 0x3dc   :  { %v5128_v60 = vmax.bf16 %v5127_v43, %v5025_v17  ;;  %v3298_v34 = vpack.c.bf16 %v2896_v0, %v2892_v1  ;;  %v4297_v54 = vpop.f32.mrb[253].mxu1 }
 0x3dd   :  { %v5169_v16 = vmax.bf16 %v5168_v5, %v5026_v14  ;;  %v3462_v39 = vadd.bf16 %v13914_v19, %v3297_v27  ;;  %3159 = vmatmul.mubr.bf16.gmra.mrb[72].mxu0 %v13925_v42  ;;  %v4299_v11 = vpop.f32.mrb[254].mxu1 }
 0x3de   :  { %v3463_v40 = vadd.bf16 %v13918_v44, %v3298_v34  ;;  %v4734_v18 = vpack.c.bf16 %v4299_v11, %v4295_v35  ;;  %v4301_v46 = vpop.f32.mrb[255].mxu1  ;;  %3168 = vmatprep.mubr.bf16.mxu0 %v15890_v50  ;;  %v15900_v11 = vld [vmem:[#allocation52_spill] sm:$0xff] }
 0x3df   :  { %v3590_v63 = vmax.bf16 %v15890_v50, %v3462_v39  ;;  %v4735_v48 = vpack.c.bf16 %v4301_v46, %v4297_v54 }
 0x3e0   :  { %v3591_v23 = vmax.bf16 %v15890_v50, %v3463_v40  ;;  %v4899_v43 = vadd.bf16 %v14010_v12, %v4734_v18  ;;  %v2900_v45 = vpop.f32.mrb[224].mxu0  ;;  %4564 = vmatmul.mubr.bf16.gmra.mrb[104].mxu1 %v13886_v59 }
 0x3e1   :  { %v3688_v5 = vmax.bf16 %v3687_v4, %v3590_v63  ;;  %v4900_v30 = vadd.bf16 %v14013_v36, %v4735_v48  ;;  %v2902_v9 = vpop.f32.mrb[225].mxu0  ;;  %4573 = vmatprep.mubr.bf16.mxu1 %v15890_v50 }
 0x3e2   :  { %v3729_v58 = vmax.bf16 %v3728_v13, %v3591_v23  ;;  %v5027_v1 = vmax.bf16 %v15890_v50, %v4899_v43  ;;  %v2904_v17 = vpop.f32.mrb[226].mxu0 }
 0x3e3   :  { %v5028_v15 = vmax.bf16 %v15890_v50, %v4900_v30  ;;  %v3299_v14 = vpack.c.bf16 %v2904_v17, %v2900_v45  ;;  %v2906_v27 = vpop.f32.mrb[227].mxu0  ;;  %v4305_v0 = vpop.f32.mrb[0].mxu1 }
 0x3e4   :  { %v5129_v35 = vmax.bf16 %v5128_v60, %v5027_v1  ;;  %v3300_v34 = vpack.c.bf16 %v2906_v27, %v2902_v9  ;;  %v4307_v54 = vpop.f32.mrb[1].mxu1 }
 0x3e5   :  { %v5170_v39 = vmax.bf16 %v5169_v16, %v5028_v15  ;;  %v3464_v4 = vadd.bf16 %v13914_v19, %v3299_v14  ;;  %3169 = vmatmul.mubr.bf16.gmra.mrb[76].mxu0 %v15900_v11  ;;  %v4309_v40 = vpop.f32.mrb[2].mxu1 }
 0x3e6   :  { %v3465_v18 = vadd.bf16 %v13918_v44, %v3300_v34  ;;  %v4736_v13 = vpack.c.bf16 %v4309_v40, %v4305_v0  ;;  %v4311_v46 = vpop.f32.mrb[3].mxu1  ;;  %3178 = vmatprep.mubr.bf16.mxu0 %v15890_v50 }
 0x3e7   :  { %v3592_v63 = vmax.bf16 %v15890_v50, %v3464_v4  ;;  %v4737_v48 = vpack.c.bf16 %v4311_v46, %v4307_v54 }
 0x3e8   :  { %v3593_v23 = vmax.bf16 %v15890_v50, %v3465_v18  ;;  %v4901_v60 = vadd.bf16 %v14010_v12, %v4736_v13  ;;  %v2910_v43 = vpop.f32.mrb[228].mxu0  ;;  %4574 = vmatmul.mubr.bf16.gmra.mrb[108].mxu1 %v13884_v33  ;;  %v15901_v18 = vld [vmem:[#allocation55_spill] sm:$0xff] }
 0x3e9   :  { %v3689_v16 = vmax.bf16 %v3688_v5, %v3592_v63  ;;  %v4902_v45 = vadd.bf16 %v14013_v36, %v4737_v48  ;;  %v2912_v30 = vpop.f32.mrb[229].mxu0  ;;  %4583 = vmatprep.mubr.bf16.mxu1 %v15890_v50 }
 0x3ea   :  { %v3730_v9 = vmax.bf16 %v3729_v58, %v3593_v23  ;;  %v5029_v1 = vmax.bf16 %v15890_v50, %v4901_v60  ;;  %v2914_v17 = vpop.f32.mrb[230].mxu0 }
 0x3eb   :  { %v5030_v15 = vmax.bf16 %v15890_v50, %v4902_v45  ;;  %v3301_v14 = vpack.c.bf16 %v2914_v17, %v2910_v43  ;;  %v2916_v27 = vpop.f32.mrb[231].mxu0  ;;  %v4315_v0 = vpop.f32.mrb[4].mxu1 }
 0x3ec   :  { %v14382_v34 = vmax.bf16 %v5129_v35, %v5029_v1  ;;  %v3302_v54 = vpack.c.bf16 %v2916_v27, %v2912_v30  ;;  %v4317_v4 = vpop.f32.mrb[5].mxu1 }
 0x3ed   :  { %v14384_v40 = vmax.bf16 %v5170_v39, %v5030_v15  ;;  %v3466_v5 = vadd.bf16 %v13914_v19, %v3301_v14  ;;  %3179 = vmatmul.mubr.bf16.gmra.mrb[80].mxu0 %v15901_v18  ;;  %v4319_v13 = vpop.f32.mrb[6].mxu1 }
 0x3ee   :  { %v3467_v58 = vadd.bf16 %v13918_v44, %v3302_v54  ;;  %v4738_v46 = vpack.c.bf16 %v4319_v13, %v4315_v0  ;;  %v4321_v63 = vpop.f32.mrb[7].mxu1  ;;  %3188 = vmatprep.mubr.bf16.mxu0 %v15890_v50 }
 0x3ef   :  { %v3594_v48 = vmax.bf16 %v15890_v50, %v3466_v5  ;;  %v4739_v23 = vpack.c.bf16 %v4321_v63, %v4317_v4 }
 0x3f0   :  { %v3595_v35 = vmax.bf16 %v15890_v50, %v3467_v58  ;;  %v4903_v60 = vadd.bf16 %v14010_v12, %v4738_v46  ;;  %v2920_v39 = vpop.f32.mrb[232].mxu0  ;;  %4584 = vmatmul.mubr.bf16.gmra.mrb[112].mxu1 %v13903_v20 }
 0x3f1   :  { %v3690_v43 = vmax.bf16 %v3689_v16, %v3594_v48  ;;  %v4904_v45 = vadd.bf16 %v14013_v36, %v4739_v23  ;;  %v2922_v30 = vpop.f32.mrb[233].mxu0  ;;  %4593 = vmatprep.mubr.bf16.mxu1 %v15890_v50 }
 0x3f2   :  { %v3731_v1 = vmax.bf16 %v3730_v9, %v3595_v35  ;;  %v5031_v17 = vmax.bf16 %v15890_v50, %v4903_v60  ;;  %v2924_v15 = vpop.f32.mrb[234].mxu0  ;;  %v15902_v9 = vld [vmem:[#allocation54_spill] sm:$0xff] }
 0x3f3   :  { %v3691_v14 = vunpack.i.l.bf16 %v3690_v43  ;;  %v3692_v27 = vunpack.i.h.bf16 %v3690_v43  ;;  %v5032_v0 = vmax.bf16 %v15890_v50, %v4904_v45  ;;  %v3303_v54 = vpack.c.bf16 %v2924_v15, %v2920_v39  ;;  %v2926_v4 = vpop.f32.mrb[235].mxu0  ;;  %v4325_v5 = vpop.f32.mrb[8].mxu1 }
 0x3f4   :  { %v3732_v13 = vunpack.i.l.bf16 %v3731_v1  ;;  %v3733_v58 = vunpack.i.h.bf16 %v3731_v1  ;;  %v5131_v16 = vmax.bf16 %v14382_v34, %v5031_v17  ;;  %v3304_v46 = vpack.c.bf16 %v2926_v4, %v2922_v30  ;;  %v4327_v63 = vpop.f32.mrb[9].mxu1 }
 0x3f5   :  { %v3693_v48 = vmax.f32 %v3691_v14, %v3692_v27  ;;  %v5172_v23 = vmax.bf16 %v14384_v40, %v5032_v0  ;;  %3189 = vmatmul.mubr.bf16.gmra.mrb[84].mxu0 %v15902_v9  ;;  %v4329_v35 = vpop.f32.mrb[10].mxu1  ;;  %v3468_v4 = vadd.bf16 %v13914_v19, %v3303_v54 }
 0x3f6   :  { %v3734_v60 = vmax.f32 %v3732_v13, %v3733_v58  ;;  %v4740_v20 = vpack.c.bf16 %v4329_v35, %v4325_v5  ;;  %v4331_v43 = vpop.f32.mrb[11].mxu1  ;;  %3198 = vmatprep.mubr.bf16.mxu0 %v15890_v50 }
 0x3f7   :  { %v3694_v39 = vrot.slane %v3693_v48, 4  ;;  %v4741_v45 = vpack.c.bf16 %v4331_v43, %v4327_v63 }
 0x3f8   :  { %v3735_v15 = vrot.slane %v3734_v60, 4  ;;  %v4905_v1 = vadd.bf16 %v14010_v12, %v4740_v20  ;;  %v2930_v33 = vpop.f32.mrb[236].mxu0  ;;  %4594 = vmatmul.mubr.bf16.gmra.mrb[116].mxu1 %v13901_v47 }
 0x3f9   :  { %v3695_v34 = vmax.f32 %v3693_v48, %v3694_v39  ;;  %v4906_v30 = vadd.bf16 %v14013_v36, %v4741_v45  ;;  %v2932_v40 = vpop.f32.mrb[237].mxu0  ;;  %4603 = vmatprep.mubr.bf16.mxu1 %v15890_v50  ;;  %v3469_v48 = vadd.bf16 %v13918_v44, %v3304_v46 }
 0x3fa   :  { %v3736_v17 = vmax.f32 %v3734_v60, %v3735_v15  ;;  %v5033_v14 = vmax.bf16 %v15890_v50, %v4905_v1  ;;  %v2934_v27 = vpop.f32.mrb[238].mxu0 }
 0x3fb   :  { %v3696_v0 = vrot.slane %v3695_v34, 2  ;;  %v5034_v5 = vmax.bf16 %v15890_v50, %v4906_v30  ;;  %v3305_v13 = vpack.c.bf16 %v2934_v27, %v2930_v33  ;;  %v2936_v20 = vpop.f32.mrb[239].mxu0  ;;  %v4335_v58 = vpop.f32.mrb[12].mxu1 }
 0x3fc   :  { %v3737_v63 = vrot.slane %v3736_v17, 2  ;;  %v14410_v35 = vmax.bf16 %v5131_v16, %v5033_v14  ;;  %v3306_v43 = vpack.c.bf16 %v2936_v20, %v2932_v40  ;;  %v4337_v39 = vpop.f32.mrb[13].mxu1  ;;  %v3596_v16 = vmax.bf16 %v15890_v50, %v3468_v4 }
 0x3fd   :  { %v3697_v45 = vmax.f32 %v3695_v34, %v3696_v0  ;;  %v14412_v60 = vmax.bf16 %v5172_v23, %v5034_v5  ;;  %v3470_v15 = vadd.bf16 %v13914_v19, %v3305_v13  ;;  %3199 = vmatmul.mubr.bf16.gmra.mrb[88].mxu0 %v13976_v49  ;;  %v4339_v54 = vpop.f32.mrb[14].mxu1  ;;  %v3597_v14 = vmax.bf16 %v15890_v50, %v3469_v48 }
 0x3fe   :  { %v3738_v1 = vmax.f32 %v3736_v17, %v3737_v63  ;;  %v3471_v33 = vadd.bf16 %v13918_v44, %v3306_v43  ;;  %v4742_v30 = vpack.c.bf16 %v4339_v54, %v4335_v58  ;;  %v4341_v27 = vpop.f32.mrb[15].mxu1  ;;  %3208 = vmatprep.mubr.bf16.mxu0 %v15890_v50 }
 0x3ff   :  { %v3698_v46 = vrot.slane %v3697_v45, 1  ;;  %v3598_v40 = vmax.bf16 %v15890_v50, %v3470_v15  ;;  %v4743_v34 = vpack.c.bf16 %v4341_v27, %v4337_v39 }
 0x400   :  { %v3739_v23 = vrot.slane %v3738_v1, 1  ;;  %v3599_v0 = vmax.bf16 %v15890_v50, %v3471_v33  ;;  %v4907_v5 = vadd.bf16 %v14010_v12, %v4742_v30  ;;  %v2940_v17 = vpop.f32.mrb[240].mxu0  ;;  %4604 = vmatmul.mubr.bf16.gmra.mrb[120].mxu1 %v13925_v42 }
 0x401   :  { %v3699_v13 = vmax.f32 %v3697_v45, %v3698_v46  ;;  %v3742_v20 = vmax.bf16 %v3598_v40, %v3596_v16  ;;  %v4908_v58 = vadd.bf16 %v14013_v36, %v4743_v34  ;;  %v2942_v63 = vpop.f32.mrb[241].mxu0  ;;  %4613 = vmatprep.mubr.bf16.mxu1 %v15890_v50 }
 0x402   :  { %v3740_v4 = vmax.f32 %v3738_v1, %v3739_v23  ;;  %v3783_v43 = vmax.bf16 %v3599_v0, %v3597_v14  ;;  %v5035_v39 = vmax.bf16 %v15890_v50, %v4907_v5  ;;  %v2944_v15 = vpop.f32.mrb[242].mxu0 }
 0x403   :  { %v3700_v48 = vpack.i.bf16 %v3699_v13, %v3699_v13  ;;  %v5036_v54 = vmax.bf16 %v15890_v50, %v4908_v58  ;;  %v3307_v33 = vpack.c.bf16 %v2944_v15, %v2940_v17  ;;  %v2946_v30 = vpop.f32.mrb[243].mxu0  ;;  %v4345_v27 = vpop.f32.mrb[16].mxu1 }
 0x404   :  { %v3741_v47 = vpack.i.bf16 %v3740_v4, %v3740_v4  ;;  %v5133_v45 = vmax.bf16 %v14410_v35, %v5035_v39  ;;  %v3308_v46 = vpack.c.bf16 %v2946_v30, %v2942_v63  ;;  %v4347_v16 = vpop.f32.mrb[17].mxu1 }
 0x405   :  { %v5174_v40 = vmax.bf16 %v14412_v60, %v5036_v54  ;;  %v3472_v34 = vadd.bf16 %v13914_v19, %v3307_v33  ;;  %3209 = vmatmul.mubr.bf16.gmra.mrb[92].mxu0 %v13974_v38  ;;  %v4349_v1 = vpop.f32.mrb[18].mxu1 }
 0x406   :  { %v14432_v23 = vcombine.low %v3700_v48, %v3741_v47  ;;  %v3473_v14 = vadd.bf16 %v13918_v44, %v3308_v46  ;;  %v4744_v0 = vpack.c.bf16 %v4349_v1, %v4345_v27  ;;  %v4351_v5 = vpop.f32.mrb[19].mxu1  ;;  %3218 = vmatprep.mubr.bf16.mxu0 %v15890_v50 }
 0x407   :  { %v3600_v17 = vmax.bf16 %v15890_v50, %v3472_v34  ;;  %v4745_v35 = vpack.c.bf16 %v4351_v5, %v4347_v16 }
 0x408   :  { %v3601_v13 = vmax.bf16 %v15890_v50, %v3473_v14  ;;  %v4909_v60 = vadd.bf16 %v14010_v12, %v4744_v0  ;;  %v2950_v58 = vpop.f32.mrb[244].mxu0  ;;  %4614 = vmatmul.mubr.bf16.gmra.mrb[124].mxu1 %v15900_v11 }
 0x409   :  { %v3743_v63 = vmax.bf16 %v3742_v20, %v3600_v17  ;;  %v4910_v47 = vadd.bf16 %v14013_v36, %v4745_v35  ;;  %v2952_v4 = vpop.f32.mrb[245].mxu0  ;;  %4623 = vmatprep.mubr.bf16.mxu1 %v15890_v50 }
 0x40a   :  { %v3784_v39 = vmax.bf16 %v3783_v43, %v3601_v13  ;;  %v5037_v15 = vmax.bf16 %v15890_v50, %v4909_v60  ;;  %v2954_v48 = vpop.f32.mrb[246].mxu0 }
 0x40b   :  { %v5038_v54 = vmax.bf16 %v15890_v50, %v4910_v47  ;;  %v3309_v33 = vpack.c.bf16 %v2954_v48, %v2950_v58  ;;  %v2956_v30 = vpop.f32.mrb[247].mxu0  ;;  %v4355_v27 = vpop.f32.mrb[20].mxu1 }
 0x40c   :  { %v5134_v46 = vmax.bf16 %v5133_v45, %v5037_v15  ;;  %v3310_v16 = vpack.c.bf16 %v2956_v30, %v2952_v4  ;;  %v4357_v34 = vpop.f32.mrb[21].mxu1 }
 0x40d   :  { %v5175_v1 = vmax.bf16 %v5174_v40, %v5038_v54  ;;  %v3474_v20 = vadd.bf16 %v13914_v19, %v3309_v33  ;;  %3219 = vmatmul.mubr.bf16.gmra.mrb[96].mxu0 %v13998_v57  ;;  %v4359_v14 = vpop.f32.mrb[22].mxu1 }
 0x40e   :  { %v3475_v0 = vadd.bf16 %v13918_v44, %v3310_v16  ;;  %v4746_v43 = vpack.c.bf16 %v4359_v14, %v4355_v27  ;;  %v4361_v5 = vpop.f32.mrb[23].mxu1  ;;  %3228 = vmatprep.mubr.bf16.mxu0 %v15890_v50 }
 0x40f   :  { %v3602_v17 = vmax.bf16 %v15890_v50, %v3474_v20  ;;  %v4747_v35 = vpack.c.bf16 %v4361_v5, %v4357_v34 }
 0x410   :  { %v3603_v13 = vmax.bf16 %v15890_v50, %v3475_v0  ;;  %v4911_v45 = vadd.bf16 %v14010_v12, %v4746_v43  ;;  %v2960_v60 = vpop.f32.mrb[248].mxu0  ;;  %4624 = vmatmul.mubr.bf16.gmra.mrb[128].mxu1 %v15901_v18 }
 0x411   :  { %v3744_v40 = vmax.bf16 %v3743_v63, %v3602_v17  ;;  %v4912_v58 = vadd.bf16 %v14013_v36, %v4747_v35  ;;  %v2962_v47 = vpop.f32.mrb[249].mxu0  ;;  %4633 = vmatprep.mubr.bf16.mxu1 %v15890_v50 }
 0x412   :  { %v3785_v4 = vmax.bf16 %v3784_v39, %v3603_v13  ;;  %v5039_v15 = vmax.bf16 %v15890_v50, %v4911_v45  ;;  %v2964_v48 = vpop.f32.mrb[250].mxu0 }
 0x413   :  { %v5040_v54 = vmax.bf16 %v15890_v50, %v4912_v58  ;;  %v3311_v33 = vpack.c.bf16 %v2964_v48, %v2960_v60  ;;  %v2966_v30 = vpop.f32.mrb[251].mxu0  ;;  %v4365_v27 = vpop.f32.mrb[24].mxu1 }
 0x414   :  { %v5135_v16 = vmax.bf16 %v5134_v46, %v5039_v15  ;;  %v3312_v34 = vpack.c.bf16 %v2966_v30, %v2962_v47  ;;  %v4367_v20 = vpop.f32.mrb[25].mxu1 }
 0x415   :  { %v5176_v14 = vmax.bf16 %v5175_v1, %v5040_v54  ;;  %v3476_v63 = vadd.bf16 %v13914_v19, %v3311_v33  ;;  %3229 = vmatmul.mubr.bf16.gmra.mrb[100].mxu0 %v13995_v32  ;;  %v4369_v0 = vpop.f32.mrb[26].mxu1 }
 0x416   :  { %v5136_v43 = vunpack.i.l.bf16 %v5135_v16  ;;  %v5137_v5 = vunpack.i.h.bf16 %v5135_v16  ;;  %v3477_v39 = vadd.bf16 %v13918_v44, %v3312_v34  ;;  %v4748_v17 = vpack.c.bf16 %v4369_v0, %v4365_v27  ;;  %v4371_v35 = vpop.f32.mrb[27].mxu1  ;;  %5488 = vmatprep.mubr.bf16.mxu0 %v15890_v50 }
 0x417   :  { %v5177_v13 = vunpack.i.l.bf16 %v5176_v14  ;;  %v5178_v45 = vunpack.i.h.bf16 %v5176_v14  ;;  %v3604_v46 = vmax.bf16 %v15890_v50, %v3476_v63  ;;  %v4749_v60 = vpack.c.bf16 %v4371_v35, %v4367_v20 }
 0x418   :  { %v5138_v58 = vmax.f32 %v5136_v43, %v5137_v5  ;;  %v3605_v1 = vmax.bf16 %v15890_v50, %v3477_v39  ;;  %v2970_v47 = vpop.f32.mrb[252].mxu0  ;;  %4634 = vmatmul.mubr.bf16.gmra.mrb[132].mxu1 %v15902_v9 }
 0x419   :  { %v5179_v15 = vmax.f32 %v5177_v13, %v5178_v45  ;;  %v14463_v48 = vmax.bf16 %v3744_v40, %v3604_v46  ;;  %v2972_v54 = vpop.f32.mrb[253].mxu0  ;;  %4643 = vmatprep.mubr.bf16.mxu1 %v15890_v50  ;;  %v15903_v40 = vld [vmem:[#allocation18_spill] sm:$0xff]  ;;  %v4913_v45 = vadd.bf16 %v14010_v12, %v4748_v17 }
 0x41a   :  { %v5139_v33 = vrot.slane %v5138_v58, 4  ;;  %v14466_v30 = vmax.bf16 %v3785_v4, %v3605_v1  ;;  %v2974_v27 = vpop.f32.mrb[254].mxu0 }
 0x41b   :  { %v5180_v16 = vrot.slane %v5179_v15, 4  ;;  %v3313_v34 = vpack.c.bf16 %v2974_v27, %v2970_v47  ;;  %v2976_v14 = vpop.f32.mrb[255].mxu0  ;;  %v4375_v20 = vpop.f32.mrb[28].mxu1 }
 0x41c   :  { %v5140_v63 = vmax.f32 %v5138_v58, %v5139_v33  ;;  %v3314_v0 = vpack.c.bf16 %v2976_v14, %v2972_v54  ;;  %v4377_v43 = vpop.f32.mrb[29].mxu1  ;;  %v4914_v58 = vadd.bf16 %v14013_v36, %v4749_v60 }
 0x41d   :  { %v5181_v5 = vmax.f32 %v5179_v15, %v5180_v16  ;;  %v3478_v39 = vadd.bf16 %v13914_v19, %v3313_v34  ;;  %v4379_v35 = vpop.f32.mrb[30].mxu1  ;;  %5489 = vmatmul.mubr.bf16.vlgmr.msra.gmra.mrb[104].mxu0 %v15903_v40 }
 0x41e   :  { %v5141_v13 = vrot.slane %v5140_v63, 2  ;;  %v3479_v4 = vadd.bf16 %v13918_v44, %v3314_v0  ;;  %v4750_v46 = vpack.c.bf16 %v4379_v35, %v4375_v20  ;;  %v4381_v1 = vpop.f32.mrb[31].mxu1  ;;  %5498 = vmatprep.mubr.bf16.mxu0 %v15890_v50 }
 0x41f   :  { %v5182_v47 = vrot.slane %v5181_v5, 2  ;;  %v3606_v54 = vmax.bf16 %v15890_v50, %v3478_v39  ;;  %v4751_v15 = vpack.c.bf16 %v4381_v1, %v4377_v43  ;;  %v5041_v39 = vmax.bf16 %v15890_v50, %v4913_v45 }
 0x420   :  { %v5142_v33 = vmax.f32 %v5140_v63, %v5141_v13  ;;  %v3607_v27 = vmax.bf16 %v15890_v50, %v3479_v4  ;;  %v4915_v16 = vadd.bf16 %v14010_v12, %v4750_v46  ;;  %v2980_v34 = vpop.f32.mrb[0].mxu0  ;;  %4644 = vmatmul.mubr.bf16.gmra.mrb[136].mxu1 %v13976_v49  ;;  %v5042_v4 = vmax.bf16 %v15890_v50, %v4914_v58 }
 0x421   :  { %v5183_v17 = vmax.f32 %v5181_v5, %v5182_v47  ;;  %v3746_v14 = vmax.bf16 %v14463_v48, %v3606_v54  ;;  %v4916_v20 = vadd.bf16 %v14013_v36, %v4751_v15  ;;  %v2982_v0 = vpop.f32.mrb[1].mxu0  ;;  %4653 = vmatprep.mubr.bf16.mxu1 %v15890_v50 }
 0x422   :  { %v5143_v60 = vrot.slane %v5142_v33, 1  ;;  %v3787_v63 = vmax.bf16 %v14466_v30, %v3607_v27  ;;  %v5043_v43 = vmax.bf16 %v15890_v50, %v4915_v16  ;;  %v2984_v35 = vpop.f32.mrb[2].mxu0  ;;  %v15904_v27 = vld [vmem:[#allocation17_spill] sm:$0xff] }
 0x423   :  { %v5184_v13 = vrot.slane %v5183_v17, 1  ;;  %v5044_v5 = vmax.bf16 %v15890_v50, %v4916_v20  ;;  %v3315_v46 = vpack.c.bf16 %v2984_v35, %v2980_v34  ;;  %v2986_v48 = vpop.f32.mrb[3].mxu0  ;;  %v4385_v1 = vpop.f32.mrb[32].mxu1 }
 0x424   :  { %v5144_v47 = vmax.f32 %v5142_v33, %v5143_v60  ;;  %v5187_v54 = vmax.bf16 %v5043_v43, %v5041_v39  ;;  %v3316_v15 = vpack.c.bf16 %v2986_v48, %v2982_v0  ;;  %v4387_v49 = vpop.f32.mrb[33].mxu1 }
 0x425   :  { %v5185_v9 = vmax.f32 %v5183_v17, %v5184_v13  ;;  %v5228_v18 = vmax.bf16 %v5044_v5, %v5042_v4  ;;  %v3480_v45 = vadd.bf16 %v13914_v19, %v3315_v46  ;;  %v4389_v30 = vpop.f32.mrb[34].mxu1  ;;  %5499 = vmatmul.mubr.bf16.gmra.mrb[108].mxu0 %v15904_v27 }
 0x426   :  { %v5145_v16 = vpack.i.bf16 %v5144_v47, %v5144_v47  ;;  %v3481_v11 = vadd.bf16 %v13918_v44, %v3316_v15  ;;  %v4752_v58 = vpack.c.bf16 %v4389_v30, %v4385_v1  ;;  %v4391_v42 = vpop.f32.mrb[35].mxu1  ;;  %5508 = vmatprep.mubr.bf16.mxu0 %v15890_v50  ;;  %v15905_v30 = vld [vmem:[#allocation20_spill] sm:$0xff] }
 0x427   :  { %v5186_v34 = vpack.i.bf16 %v5185_v9, %v5185_v9  ;;  %v3608_v33 = vmax.bf16 %v15890_v50, %v3480_v45  ;;  %v4753_v20 = vpack.c.bf16 %v4391_v42, %v4387_v49 }
 0x428   :  { %v3609_v0 = vmax.bf16 %v15890_v50, %v3481_v11  ;;  %v4917_v17 = vadd.bf16 %v14010_v12, %v4752_v58  ;;  %v2990_v60 = vpop.f32.mrb[4].mxu0  ;;  %4654 = vmatmul.mubr.bf16.gmra.mrb[140].mxu1 %v13974_v38 }
 0x429   :  { %v14494_v39 = vcombine.low %v5145_v16, %v5186_v34  ;;  %v3747_v43 = vmax.bf16 %v3746_v14, %v3608_v33  ;;  %v4918_v35 = vadd.bf16 %v14013_v36, %v4753_v20  ;;  %v2992_v13 = vpop.f32.mrb[5].mxu0  ;;  %4663 = vmatprep.mubr.bf16.mxu1 %v15890_v50 }
 0x42a   :  { %v3788_v4 = vmax.bf16 %v3787_v63, %v3609_v0  ;;  %v5045_v9 = vmax.bf16 %v15890_v50, %v4917_v17  ;;  %v2994_v5 = vpop.f32.mrb[6].mxu0 }
 0x42b   :  { %v5046_v42 = vmax.bf16 %v15890_v50, %v4918_v35  ;;  %v3317_v49 = vpack.c.bf16 %v2994_v5, %v2990_v60  ;;  %v2996_v11 = vpop.f32.mrb[7].mxu0  ;;  %v4395_v46 = vpop.f32.mrb[36].mxu1 }
 0x42c   :  { %v5188_v48 = vmax.bf16 %v5187_v54, %v5045_v9  ;;  %v3318_v1 = vpack.c.bf16 %v2996_v11, %v2992_v13  ;;  %v4397_v47 = vpop.f32.mrb[37].mxu1 }
 0x42d   :  { %v5229_v15 = vmax.bf16 %v5228_v18, %v5046_v42  ;;  %v3482_v14 = vadd.bf16 %v13914_v19, %v3317_v49  ;;  %v4399_v45 = vpop.f32.mrb[38].mxu1  ;;  %5509 = vmatmul.mubr.bf16.gmra.mrb[112].mxu0 %v15905_v30 }
 0x42e   :  { %v3483_v16 = vadd.bf16 %v13918_v44, %v3318_v1  ;;  %v4754_v63 = vpack.c.bf16 %v4399_v45, %v4395_v46  ;;  %v4401_v58 = vpop.f32.mrb[39].mxu1  ;;  %5518 = vmatprep.mubr.bf16.mxu0 %v15890_v50 }
 0x42f   :  { %v3610_v34 = vmax.bf16 %v15890_v50, %v3482_v14  ;;  %v4755_v33 = vpack.c.bf16 %v4401_v58, %v4397_v47 }
 0x430   :  { %v3611_v20 = vmax.bf16 %v15890_v50, %v3483_v16  ;;  %v4919_v54 = vadd.bf16 %v14010_v12, %v4754_v63  ;;  %v3000_v0 = vpop.f32.mrb[8].mxu0  ;;  %4664 = vmatmul.mubr.bf16.gmra.mrb[144].mxu1 %v13998_v57  ;;  %v15906_v16 = vld [vmem:[#allocation19_spill] sm:$0xff] }
 0x431   :  { %v3748_v18 = vmax.bf16 %v3747_v43, %v3610_v34  ;;  %v4920_v17 = vadd.bf16 %v14013_v36, %v4755_v33  ;;  %v3002_v60 = vpop.f32.mrb[9].mxu0  ;;  %4673 = vmatprep.mubr.bf16.mxu1 %v15890_v50 }
 0x432   :  { %v3789_v35 = vmax.bf16 %v3788_v4, %v3611_v20  ;;  %v5047_v13 = vmax.bf16 %v15890_v50, %v4919_v54  ;;  %v3004_v9 = vpop.f32.mrb[10].mxu0 }
 0x433   :  { %v5048_v5 = vmax.bf16 %v15890_v50, %v4920_v17  ;;  %v3319_v42 = vpack.c.bf16 %v3004_v9, %v3000_v0  ;;  %v3006_v49 = vpop.f32.mrb[11].mxu0  ;;  %v4405_v11 = vpop.f32.mrb[40].mxu1 }
 0x434   :  { %v5189_v46 = vmax.bf16 %v5188_v48, %v5047_v13  ;;  %v3320_v1 = vpack.c.bf16 %v3006_v49, %v3002_v60  ;;  %v4407_v47 = vpop.f32.mrb[41].mxu1 }
 0x435   :  { %v5230_v14 = vmax.bf16 %v5229_v15, %v5048_v5  ;;  %v3484_v43 = vadd.bf16 %v13914_v19, %v3319_v42  ;;  %v4409_v45 = vpop.f32.mrb[42].mxu1  ;;  %5519 = vmatmul.mubr.bf16.gmra.mrb[116].mxu0 %v15906_v16 }
 0x436   :  { %v3485_v63 = vadd.bf16 %v13918_v44, %v3320_v1  ;;  %v4756_v4 = vpack.c.bf16 %v4409_v45, %v4405_v11  ;;  %v4411_v58 = vpop.f32.mrb[43].mxu1  ;;  %5528 = vmatprep.mubr.bf16.mxu0 %v15890_v50 }
 0x437   :  { %v3612_v34 = vmax.bf16 %v15890_v50, %v3484_v43  ;;  %v4757_v33 = vpack.c.bf16 %v4411_v58, %v4407_v47 }
 0x438   :  { %v3613_v20 = vmax.bf16 %v15890_v50, %v3485_v63  ;;  %v4921_v48 = vadd.bf16 %v14010_v12, %v4756_v4  ;;  %v3010_v54 = vpop.f32.mrb[12].mxu0  ;;  %4674 = vmatmul.mubr.bf16.gmra.mrb[148].mxu1 %v13995_v32  ;;  %v15907_v4 = vld [vmem:[#allocation22_spill] sm:$0xff] }
 0x439   :  { %v3749_v15 = vmax.bf16 %v3748_v18, %v3612_v34  ;;  %v4922_v0 = vadd.bf16 %v14013_v36, %v4757_v33  ;;  %v3012_v17 = vpop.f32.mrb[13].mxu0  ;;  %6933 = vmatprep.mubr.bf16.mxu1 %v15890_v50 }
 0x43a   :  { %v3790_v60 = vmax.bf16 %v3789_v35, %v3613_v20  ;;  %v5049_v13 = vmax.bf16 %v15890_v50, %v4921_v48  ;;  %v3014_v9 = vpop.f32.mrb[14].mxu0 }
 0x43b   :  { %v5050_v5 = vmax.bf16 %v15890_v50, %v4922_v0  ;;  %v3321_v42 = vpack.c.bf16 %v3014_v9, %v3010_v54  ;;  %v3016_v49 = vpop.f32.mrb[15].mxu0  ;;  %v4415_v11 = vpop.f32.mrb[44].mxu1 }
 0x43c   :  { %v5190_v1 = vmax.bf16 %v5189_v46, %v5049_v13  ;;  %v3322_v47 = vpack.c.bf16 %v3016_v49, %v3012_v17  ;;  %v4417_v43 = vpop.f32.mrb[45].mxu1 }
 0x43d   :  { %v5231_v45 = vmax.bf16 %v5230_v14, %v5050_v5  ;;  %v3486_v18 = vadd.bf16 %v13914_v19, %v3321_v42  ;;  %v4419_v63 = vpop.f32.mrb[46].mxu1  ;;  %5529 = vmatmul.mubr.bf16.gmra.mrb[120].mxu0 %v15907_v4 }
 0x43e   :  { %v3487_v58 = vadd.bf16 %v13918_v44, %v3322_v47  ;;  %v4758_v35 = vpack.c.bf16 %v4419_v63, %v4415_v11  ;;  %v4421_v34 = vpop.f32.mrb[47].mxu1  ;;  %5538 = vmatprep.mubr.bf16.mxu0 %v15890_v50 }
 0x43f   :  { %v3614_v33 = vmax.bf16 %v15890_v50, %v3486_v18  ;;  %v4759_v20 = vpack.c.bf16 %v4421_v34, %v4417_v43 }
 0x440   :  { %v3615_v48 = vmax.bf16 %v15890_v50, %v3487_v58  ;;  %v4923_v46 = vadd.bf16 %v14010_v12, %v4758_v35  ;;  %v3020_v54 = vpop.f32.mrb[16].mxu0  ;;  %6934 = vmatmul.mubr.bf16.vlgmr.msra.gmra.mrb[152].mxu1 %v15903_v40  ;;  %v15908_v35 = vld [vmem:[#allocation21_spill] sm:$0xff] }
 0x441   :  { %v3750_v14 = vmax.bf16 %v3749_v15, %v3614_v33  ;;  %v4924_v0 = vadd.bf16 %v14013_v36, %v4759_v20  ;;  %v3022_v17 = vpop.f32.mrb[17].mxu0  ;;  %6943 = vmatprep.mubr.bf16.mxu1 %v15890_v50 }
 0x442   :  { %v3791_v13 = vmax.bf16 %v3790_v60, %v3615_v48  ;;  %v5051_v9 = vmax.bf16 %v15890_v50, %v4923_v46  ;;  %v3024_v5 = vpop.f32.mrb[18].mxu0 }
 0x443   :  { %v5052_v42 = vmax.bf16 %v15890_v50, %v4924_v0  ;;  %v3323_v49 = vpack.c.bf16 %v3024_v5, %v3020_v54  ;;  %v3026_v11 = vpop.f32.mrb[19].mxu0  ;;  %v4425_v47 = vpop.f32.mrb[48].mxu1 }
 0x444   :  { %v5191_v43 = vmax.bf16 %v5190_v1, %v5051_v9  ;;  %v3324_v18 = vpack.c.bf16 %v3026_v11, %v3022_v17  ;;  %v4427_v63 = vpop.f32.mrb[49].mxu1 }
 0x445   :  { %v5232_v58 = vmax.bf16 %v5231_v45, %v5052_v42  ;;  %v3488_v40 = vadd.bf16 %v13914_v19, %v3323_v49  ;;  %v4429_v15 = vpop.f32.mrb[50].mxu1  ;;  %5539 = vmatmul.mubr.bf16.gmra.mrb[124].mxu0 %v15908_v35 }
 0x446   :  { %v3489_v34 = vadd.bf16 %v13918_v44, %v3324_v18  ;;  %v4760_v60 = vpack.c.bf16 %v4429_v15, %v4425_v47  ;;  %v4431_v33 = vpop.f32.mrb[51].mxu1  ;;  %5548 = vmatprep.mubr.bf16.mxu0 %v15890_v50 }
 0x447   :  { %v3616_v20 = vmax.bf16 %v15890_v50, %v3488_v40  ;;  %v4761_v48 = vpack.c.bf16 %v4431_v33, %v4427_v63 }
 0x448   :  { %v3617_v46 = vmax.bf16 %v15890_v50, %v3489_v34  ;;  %v4925_v1 = vadd.bf16 %v14010_v12, %v4760_v60  ;;  %v3030_v54 = vpop.f32.mrb[20].mxu0  ;;  %6944 = vmatmul.mubr.bf16.gmra.mrb[156].mxu1 %v15904_v27  ;;  %v15909_v60 = vld [vmem:[#allocation24_spill] sm:$0xff] }
 0x449   :  { %v3751_v45 = vmax.bf16 %v3750_v14, %v3616_v20  ;;  %v4926_v0 = vadd.bf16 %v14013_v36, %v4761_v48  ;;  %v3032_v17 = vpop.f32.mrb[21].mxu0  ;;  %6953 = vmatprep.mubr.bf16.mxu1 %v15890_v50 }
 0x44a   :  { %v3792_v9 = vmax.bf16 %v3791_v13, %v3617_v46  ;;  %v5053_v5 = vmax.bf16 %v15890_v50, %v4925_v1  ;;  %v3034_v42 = vpop.f32.mrb[22].mxu0 }
 0x44b   :  { %v5054_v49 = vmax.bf16 %v15890_v50, %v4926_v0  ;;  %v3325_v11 = vpack.c.bf16 %v3034_v42, %v3030_v54  ;;  %v3036_v47 = vpop.f32.mrb[23].mxu0  ;;  %v4435_v18 = vpop.f32.mrb[52].mxu1 }
 0x44c   :  { %v5192_v63 = vmax.bf16 %v5191_v43, %v5053_v5  ;;  %v3326_v40 = vpack.c.bf16 %v3036_v47, %v3032_v17  ;;  %v4437_v15 = vpop.f32.mrb[53].mxu1 }
 0x44d   :  { %v5233_v34 = vmax.bf16 %v5232_v58, %v5054_v49  ;;  %v3490_v27 = vadd.bf16 %v13914_v19, %v3325_v11  ;;  %v4439_v14 = vpop.f32.mrb[54].mxu1  ;;  %5549 = vmatmul.mubr.bf16.gmra.mrb[128].mxu0 %v15909_v60 }
 0x44e   :  { %v3491_v33 = vadd.bf16 %v13918_v44, %v3326_v40  ;;  %v4762_v13 = vpack.c.bf16 %v4439_v14, %v4435_v18  ;;  %v4441_v20 = vpop.f32.mrb[55].mxu1  ;;  %5558 = vmatprep.mubr.bf16.mxu0 %v15890_v50 }
 0x44f   :  { %v3618_v48 = vmax.bf16 %v15890_v50, %v3490_v27  ;;  %v4763_v46 = vpack.c.bf16 %v4441_v20, %v4437_v15 }
 0x450   :  { %v3619_v1 = vmax.bf16 %v15890_v50, %v3491_v33  ;;  %v4927_v43 = vadd.bf16 %v14010_v12, %v4762_v13  ;;  %v3040_v54 = vpop.f32.mrb[24].mxu0  ;;  %6954 = vmatmul.mubr.bf16.gmra.mrb[160].mxu1 %v15905_v30  ;;  %v15910_v13 = vld [vmem:[#allocation23_spill] sm:$0xff] }
 0x451   :  { %v3752_v58 = vmax.bf16 %v3751_v45, %v3618_v48  ;;  %v4928_v0 = vadd.bf16 %v14013_v36, %v4763_v46  ;;  %v3042_v17 = vpop.f32.mrb[25].mxu0  ;;  %6963 = vmatprep.mubr.bf16.mxu1 %v15890_v50 }
 0x452   :  { %v3793_v5 = vmax.bf16 %v3792_v9, %v3619_v1  ;;  %v5055_v42 = vmax.bf16 %v15890_v50, %v4927_v43  ;;  %v3044_v49 = vpop.f32.mrb[26].mxu0 }
 0x453   :  { %v5056_v11 = vmax.bf16 %v15890_v50, %v4928_v0  ;;  %v3327_v47 = vpack.c.bf16 %v3044_v49, %v3040_v54  ;;  %v3046_v18 = vpop.f32.mrb[27].mxu0  ;;  %v4445_v40 = vpop.f32.mrb[56].mxu1 }
 0x454   :  { %v5193_v15 = vmax.bf16 %v5192_v63, %v5055_v42  ;;  %v3328_v27 = vpack.c.bf16 %v3046_v18, %v3042_v17  ;;  %v4447_v14 = vpop.f32.mrb[57].mxu1 }
 0x455   :  { %v5234_v33 = vmax.bf16 %v5233_v34, %v5056_v11  ;;  %v3492_v30 = vadd.bf16 %v13914_v19, %v3327_v47  ;;  %v4449_v45 = vpop.f32.mrb[58].mxu1  ;;  %5559 = vmatmul.mubr.bf16.gmra.mrb[132].mxu0 %v15910_v13 }
 0x456   :  { %v3493_v20 = vadd.bf16 %v13918_v44, %v3328_v27  ;;  %v4764_v9 = vpack.c.bf16 %v4449_v45, %v4445_v40  ;;  %v4451_v48 = vpop.f32.mrb[59].mxu1  ;;  %5568 = vmatprep.mubr.bf16.mxu0 %v15890_v50 }
 0x457   :  { %v3620_v46 = vmax.bf16 %v15890_v50, %v3492_v30  ;;  %v4765_v1 = vpack.c.bf16 %v4451_v48, %v4447_v14 }
 0x458   :  { %v3621_v43 = vmax.bf16 %v15890_v50, %v3493_v20  ;;  %v4929_v63 = vadd.bf16 %v14010_v12, %v4764_v9  ;;  %v3050_v54 = vpop.f32.mrb[28].mxu0  ;;  %6964 = vmatmul.mubr.bf16.gmra.mrb[164].mxu1 %v15906_v16  ;;  %v15911_v9 = vld [vmem:[#allocation26_spill] sm:$0xff] }
 0x459   :  { %v3753_v34 = vmax.bf16 %v3752_v58, %v3620_v46  ;;  %v4930_v0 = vadd.bf16 %v14013_v36, %v4765_v1  ;;  %v3052_v17 = vpop.f32.mrb[29].mxu0  ;;  %6973 = vmatprep.mubr.bf16.mxu1 %v15890_v50 }
 0x45a   :  { %v3794_v42 = vmax.bf16 %v3793_v5, %v3621_v43  ;;  %v5057_v49 = vmax.bf16 %v15890_v50, %v4929_v63  ;;  %v3054_v11 = vpop.f32.mrb[30].mxu0 }
 0x45b   :  { %v5058_v47 = vmax.bf16 %v15890_v50, %v4930_v0  ;;  %v3329_v18 = vpack.c.bf16 %v3054_v11, %v3050_v54  ;;  %v3056_v40 = vpop.f32.mrb[31].mxu0  ;;  %v4455_v27 = vpop.f32.mrb[60].mxu1 }
 0x45c   :  { %v5194_v14 = vmax.bf16 %v5193_v15, %v5057_v49  ;;  %v3330_v30 = vpack.c.bf16 %v3056_v40, %v3052_v17  ;;  %v4457_v45 = vpop.f32.mrb[61].mxu1 }
 0x45d   :  { %v5235_v20 = vmax.bf16 %v5234_v33, %v5058_v47  ;;  %v3494_v16 = vadd.bf16 %v13914_v19, %v3329_v18  ;;  %v4459_v58 = vpop.f32.mrb[62].mxu1  ;;  %5569 = vmatmul.mubr.bf16.gmra.mrb[136].mxu0 %v15911_v9 }
 0x45e   :  { %v3495_v48 = vadd.bf16 %v13918_v44, %v3330_v30  ;;  %v4766_v5 = vpack.c.bf16 %v4459_v58, %v4455_v27  ;;  %v4461_v46 = vpop.f32.mrb[63].mxu1  ;;  %5578 = vmatprep.mubr.bf16.mxu0 %v15890_v50 }
 0x45f   :  { %v3622_v1 = vmax.bf16 %v15890_v50, %v3494_v16  ;;  %v4767_v43 = vpack.c.bf16 %v4461_v46, %v4457_v45 }
 0x460   :  { %v3623_v63 = vmax.bf16 %v15890_v50, %v3495_v48  ;;  %v4931_v15 = vadd.bf16 %v14010_v12, %v4766_v5  ;;  %v3060_v54 = vpop.f32.mrb[32].mxu0  ;;  %6974 = vmatmul.mubr.bf16.gmra.mrb[168].mxu1 %v15907_v4  ;;  %v15912_v5 = vld [vmem:[#allocation25_spill] sm:$0xff] }
 0x461   :  { %v3754_v33 = vmax.bf16 %v3753_v34, %v3622_v1  ;;  %v4932_v0 = vadd.bf16 %v14013_v36, %v4767_v43  ;;  %v3062_v17 = vpop.f32.mrb[33].mxu0  ;;  %6983 = vmatprep.mubr.bf16.mxu1 %v15890_v50 }
 0x462   :  { %v3795_v49 = vmax.bf16 %v3794_v42, %v3623_v63  ;;  %v5059_v11 = vmax.bf16 %v15890_v50, %v4931_v15  ;;  %v3064_v47 = vpop.f32.mrb[34].mxu0 }
 0x463   :  { %v5060_v18 = vmax.bf16 %v15890_v50, %v4932_v0  ;;  %v3331_v40 = vpack.c.bf16 %v3064_v47, %v3060_v54  ;;  %v3066_v27 = vpop.f32.mrb[35].mxu0  ;;  %v4465_v30 = vpop.f32.mrb[64].mxu1 }
 0x464   :  { %v5195_v45 = vmax.bf16 %v5194_v14, %v5059_v11  ;;  %v3332_v16 = vpack.c.bf16 %v3066_v27, %v3062_v17  ;;  %v4467_v58 = vpop.f32.mrb[65].mxu1 }
 0x465   :  { %v5236_v48 = vmax.bf16 %v5235_v20, %v5060_v18  ;;  %v3496_v4 = vadd.bf16 %v13914_v19, %v3331_v40  ;;  %v4469_v34 = vpop.f32.mrb[66].mxu1  ;;  %5579 = vmatmul.mubr.bf16.gmra.mrb[140].mxu0 %v15912_v5 }
 0x466   :  { %v3497_v46 = vadd.bf16 %v13918_v44, %v3332_v16  ;;  %v4768_v42 = vpack.c.bf16 %v4469_v34, %v4465_v30  ;;  %v4471_v1 = vpop.f32.mrb[67].mxu1  ;;  %5588 = vmatprep.mubr.bf16.mxu0 %v15890_v50 }
 0x467   :  { %v3624_v43 = vmax.bf16 %v15890_v50, %v3496_v4  ;;  %v4769_v63 = vpack.c.bf16 %v4471_v1, %v4467_v58 }
 0x468   :  { %v3625_v15 = vmax.bf16 %v15890_v50, %v3497_v46  ;;  %v4933_v14 = vadd.bf16 %v14010_v12, %v4768_v42  ;;  %v3070_v54 = vpop.f32.mrb[36].mxu0  ;;  %6984 = vmatmul.mubr.bf16.gmra.mrb[172].mxu1 %v15908_v35  ;;  %v15913_v42 = vld [vmem:[#allocation28_spill] sm:$0xff] }
 0x469   :  { %v3755_v20 = vmax.bf16 %v3754_v33, %v3624_v43  ;;  %v4934_v0 = vadd.bf16 %v14013_v36, %v4769_v63  ;;  %v3072_v17 = vpop.f32.mrb[37].mxu0  ;;  %6993 = vmatprep.mubr.bf16.mxu1 %v15890_v50 }
 0x46a   :  { %v3796_v11 = vmax.bf16 %v3795_v49, %v3625_v15  ;;  %v5061_v47 = vmax.bf16 %v15890_v50, %v4933_v14  ;;  %v3074_v18 = vpop.f32.mrb[38].mxu0 }
 0x46b   :  { %v5062_v40 = vmax.bf16 %v15890_v50, %v4934_v0  ;;  %v3333_v27 = vpack.c.bf16 %v3074_v18, %v3070_v54  ;;  %v3076_v30 = vpop.f32.mrb[39].mxu0  ;;  %v4475_v16 = vpop.f32.mrb[68].mxu1 }
 0x46c   :  { %v5196_v58 = vmax.bf16 %v5195_v45, %v5061_v47  ;;  %v3334_v4 = vpack.c.bf16 %v3076_v30, %v3072_v17  ;;  %v4477_v34 = vpop.f32.mrb[69].mxu1 }
 0x46d   :  { %v5237_v46 = vmax.bf16 %v5236_v48, %v5062_v40  ;;  %v3498_v35 = vadd.bf16 %v13914_v19, %v3333_v27  ;;  %v4479_v33 = vpop.f32.mrb[70].mxu1  ;;  %5589 = vmatmul.mubr.bf16.gmra.mrb[144].mxu0 %v15913_v42 }
 0x46e   :  { %v3499_v1 = vadd.bf16 %v13918_v44, %v3334_v4  ;;  %v4770_v49 = vpack.c.bf16 %v4479_v33, %v4475_v16  ;;  %v4481_v43 = vpop.f32.mrb[71].mxu1  ;;  %5598 = vmatprep.mubr.bf16.mxu0 %v15890_v50 }
 0x46f   :  { %v3626_v63 = vmax.bf16 %v15890_v50, %v3498_v35  ;;  %v4771_v15 = vpack.c.bf16 %v4481_v43, %v4477_v34 }
 0x470   :  { %v3627_v14 = vmax.bf16 %v15890_v50, %v3499_v1  ;;  %v4935_v45 = vadd.bf16 %v14010_v12, %v4770_v49  ;;  %v3080_v54 = vpop.f32.mrb[40].mxu0  ;;  %6994 = vmatmul.mubr.bf16.gmra.mrb[176].mxu1 %v15909_v60  ;;  %v15914_v49 = vld [vmem:[#allocation27_spill] sm:$0xff] }
 0x471   :  { %v3756_v48 = vmax.bf16 %v3755_v20, %v3626_v63  ;;  %v4936_v0 = vadd.bf16 %v14013_v36, %v4771_v15  ;;  %v3082_v17 = vpop.f32.mrb[41].mxu0  ;;  %7003 = vmatprep.mubr.bf16.mxu1 %v15890_v50 }
 0x472   :  { %v3797_v47 = vmax.bf16 %v3796_v11, %v3627_v14  ;;  %v5063_v18 = vmax.bf16 %v15890_v50, %v4935_v45  ;;  %v3084_v40 = vpop.f32.mrb[42].mxu0 }
 0x473   :  { %v5064_v27 = vmax.bf16 %v15890_v50, %v4936_v0  ;;  %v3335_v30 = vpack.c.bf16 %v3084_v40, %v3080_v54  ;;  %v3086_v16 = vpop.f32.mrb[43].mxu0  ;;  %v4485_v4 = vpop.f32.mrb[72].mxu1 }
 0x474   :  { %v5197_v34 = vmax.bf16 %v5196_v58, %v5063_v18  ;;  %v3336_v35 = vpack.c.bf16 %v3086_v16, %v3082_v17  ;;  %v4487_v33 = vpop.f32.mrb[73].mxu1 }
 0x475   :  { %v5238_v1 = vmax.bf16 %v5237_v46, %v5064_v27  ;;  %v3500_v60 = vadd.bf16 %v13914_v19, %v3335_v30  ;;  %v4489_v20 = vpop.f32.mrb[74].mxu1  ;;  %5599 = vmatmul.mubr.bf16.gmra.mrb[148].mxu0 %v15914_v49 }
 0x476   :  { %v3501_v43 = vadd.bf16 %v13918_v44, %v3336_v35  ;;  %v4772_v11 = vpack.c.bf16 %v4489_v20, %v4485_v4  ;;  %v4491_v63 = vpop.f32.mrb[75].mxu1  ;;  %5608 = vmatprep.mubr.bf16.mxu0 %v15890_v50 }
 0x477   :  { %v3628_v15 = vmax.bf16 %v15890_v50, %v3500_v60  ;;  %v4773_v14 = vpack.c.bf16 %v4491_v63, %v4487_v33 }
 0x478   :  { %v3629_v45 = vmax.bf16 %v15890_v50, %v3501_v43  ;;  %v4937_v58 = vadd.bf16 %v14010_v12, %v4772_v11  ;;  %v3090_v54 = vpop.f32.mrb[44].mxu0  ;;  %7004 = vmatmul.mubr.bf16.gmra.mrb[180].mxu1 %v15910_v13  ;;  %v15915_v11 = vld [vmem:[#allocation30_spill] sm:$0xff] }
 0x479   :  { %v3757_v46 = vmax.bf16 %v3756_v48, %v3628_v15  ;;  %v4938_v0 = vadd.bf16 %v14013_v36, %v4773_v14  ;;  %v3092_v17 = vpop.f32.mrb[45].mxu0  ;;  %7013 = vmatprep.mubr.bf16.mxu1 %v15890_v50 }
 0x47a   :  { %v3798_v18 = vmax.bf16 %v3797_v47, %v3629_v45  ;;  %v5065_v40 = vmax.bf16 %v15890_v50, %v4937_v58  ;;  %v3094_v27 = vpop.f32.mrb[46].mxu0 }
 0x47b   :  { %v5066_v30 = vmax.bf16 %v15890_v50, %v4938_v0  ;;  %v3337_v16 = vpack.c.bf16 %v3094_v27, %v3090_v54  ;;  %v3096_v4 = vpop.f32.mrb[47].mxu0  ;;  %v4495_v35 = vpop.f32.mrb[76].mxu1 }
 0x47c   :  { %v5198_v33 = vmax.bf16 %v5197_v34, %v5065_v40  ;;  %v3338_v60 = vpack.c.bf16 %v3096_v4, %v3092_v17  ;;  %v4497_v20 = vpop.f32.mrb[77].mxu1 }
 0x47d   :  { %v5239_v43 = vmax.bf16 %v5238_v1, %v5066_v30  ;;  %v3502_v13 = vadd.bf16 %v13914_v19, %v3337_v16  ;;  %v4499_v48 = vpop.f32.mrb[78].mxu1  ;;  %5609 = vmatmul.mubr.bf16.gmra.mrb[152].mxu0 %v15915_v11 }
 0x47e   :  { %v3503_v63 = vadd.bf16 %v13918_v44, %v3338_v60  ;;  %v4774_v47 = vpack.c.bf16 %v4499_v48, %v4495_v35  ;;  %v4501_v15 = vpop.f32.mrb[79].mxu1  ;;  %5618 = vmatprep.mubr.bf16.mxu0 %v15890_v50 }
 0x47f   :  { %v3630_v14 = vmax.bf16 %v15890_v50, %v3502_v13  ;;  %v4775_v45 = vpack.c.bf16 %v4501_v15, %v4497_v20 }
 0x480   :  { %v3631_v58 = vmax.bf16 %v15890_v50, %v3503_v63  ;;  %v4939_v34 = vadd.bf16 %v14010_v12, %v4774_v47  ;;  %v3100_v54 = vpop.f32.mrb[48].mxu0  ;;  %7014 = vmatmul.mubr.bf16.gmra.mrb[184].mxu1 %v15911_v9  ;;  %v15916_v47 = vld [vmem:[#allocation29_spill] sm:$0xff] }
 0x481   :  { %v3758_v1 = vmax.bf16 %v3757_v46, %v3630_v14  ;;  %v4940_v0 = vadd.bf16 %v14013_v36, %v4775_v45  ;;  %v3102_v17 = vpop.f32.mrb[49].mxu0  ;;  %7023 = vmatprep.mubr.bf16.mxu1 %v15890_v50 }
 0x482   :  { %v3799_v40 = vmax.bf16 %v3798_v18, %v3631_v58  ;;  %v5067_v27 = vmax.bf16 %v15890_v50, %v4939_v34  ;;  %v3104_v30 = vpop.f32.mrb[50].mxu0 }
 0x483   :  { %v5068_v16 = vmax.bf16 %v15890_v50, %v4940_v0  ;;  %v3339_v4 = vpack.c.bf16 %v3104_v30, %v3100_v54  ;;  %v3106_v35 = vpop.f32.mrb[51].mxu0  ;;  %v4505_v60 = vpop.f32.mrb[80].mxu1 }
 0x484   :  { %v5199_v20 = vmax.bf16 %v5198_v33, %v5067_v27  ;;  %v3340_v13 = vpack.c.bf16 %v3106_v35, %v3102_v17  ;;  %v4507_v48 = vpop.f32.mrb[81].mxu1 }
 0x485   :  { %v5240_v63 = vmax.bf16 %v5239_v43, %v5068_v16  ;;  %v3504_v9 = vadd.bf16 %v13914_v19, %v3339_v4  ;;  %v4509_v46 = vpop.f32.mrb[82].mxu1  ;;  %5619 = vmatmul.mubr.bf16.gmra.mrb[156].mxu0 %v15916_v47 }
 0x486   :  { %v3505_v15 = vadd.bf16 %v13918_v44, %v3340_v13  ;;  %v4776_v18 = vpack.c.bf16 %v4509_v46, %v4505_v60  ;;  %v4511_v14 = vpop.f32.mrb[83].mxu1  ;;  %5628 = vmatprep.mubr.bf16.mxu0 %v15890_v50 }
 0x487   :  { %v3632_v45 = vmax.bf16 %v15890_v50, %v3504_v9  ;;  %v4777_v58 = vpack.c.bf16 %v4511_v14, %v4507_v48 }
 0x488   :  { %v3633_v34 = vmax.bf16 %v15890_v50, %v3505_v15  ;;  %v4941_v33 = vadd.bf16 %v14010_v12, %v4776_v18  ;;  %v3110_v54 = vpop.f32.mrb[52].mxu0  ;;  %7024 = vmatmul.mubr.bf16.gmra.mrb[188].mxu1 %v15912_v5  ;;  %v15917_v18 = vld [vmem:[#allocation32_spill] sm:$0xff] }
 0x489   :  { %v3759_v43 = vmax.bf16 %v3758_v1, %v3632_v45  ;;  %v4942_v0 = vadd.bf16 %v14013_v36, %v4777_v58  ;;  %v3112_v17 = vpop.f32.mrb[53].mxu0  ;;  %7033 = vmatprep.mubr.bf16.mxu1 %v15890_v50 }
 0x48a   :  { %v3800_v27 = vmax.bf16 %v3799_v40, %v3633_v34  ;;  %v5069_v30 = vmax.bf16 %v15890_v50, %v4941_v33  ;;  %v3114_v16 = vpop.f32.mrb[54].mxu0 }
 0x48b   :  { %v5070_v4 = vmax.bf16 %v15890_v50, %v4942_v0  ;;  %v3341_v35 = vpack.c.bf16 %v3114_v16, %v3110_v54  ;;  %v3116_v60 = vpop.f32.mrb[55].mxu0  ;;  %v4515_v13 = vpop.f32.mrb[84].mxu1 }
 0x48c   :  { %v5200_v48 = vmax.bf16 %v5199_v20, %v5069_v30  ;;  %v3342_v9 = vpack.c.bf16 %v3116_v60, %v3112_v17  ;;  %v4517_v46 = vpop.f32.mrb[85].mxu1 }
 0x48d   :  { %v5241_v15 = vmax.bf16 %v5240_v63, %v5070_v4  ;;  %v3506_v5 = vadd.bf16 %v13914_v19, %v3341_v35  ;;  %v4519_v1 = vpop.f32.mrb[86].mxu1  ;;  %5629 = vmatmul.mubr.bf16.gmra.mrb[160].mxu0 %v15917_v18 }
 0x48e   :  { %v3507_v14 = vadd.bf16 %v13918_v44, %v3342_v9  ;;  %v4778_v40 = vpack.c.bf16 %v4519_v1, %v4515_v13  ;;  %v4521_v45 = vpop.f32.mrb[87].mxu1  ;;  %5638 = vmatprep.mubr.bf16.mxu0 %v15890_v50 }
 0x48f   :  { %v3634_v58 = vmax.bf16 %v15890_v50, %v3506_v5  ;;  %v4779_v34 = vpack.c.bf16 %v4521_v45, %v4517_v46 }
 0x490   :  { %v3635_v33 = vmax.bf16 %v15890_v50, %v3507_v14  ;;  %v4943_v20 = vadd.bf16 %v14010_v12, %v4778_v40  ;;  %v3120_v54 = vpop.f32.mrb[56].mxu0  ;;  %7034 = vmatmul.mubr.bf16.gmra.mrb[192].mxu1 %v15913_v42  ;;  %v15918_v40 = vld [vmem:[#allocation31_spill] sm:$0xff] }
 0x491   :  { %v3760_v63 = vmax.bf16 %v3759_v43, %v3634_v58  ;;  %v4944_v0 = vadd.bf16 %v14013_v36, %v4779_v34  ;;  %v3122_v17 = vpop.f32.mrb[57].mxu0  ;;  %7043 = vmatprep.mubr.bf16.mxu1 %v15890_v50 }
 0x492   :  { %v3801_v30 = vmax.bf16 %v3800_v27, %v3635_v33  ;;  %v5071_v16 = vmax.bf16 %v15890_v50, %v4943_v20  ;;  %v3124_v4 = vpop.f32.mrb[58].mxu0 }
 0x493   :  { %v5072_v35 = vmax.bf16 %v15890_v50, %v4944_v0  ;;  %v3343_v60 = vpack.c.bf16 %v3124_v4, %v3120_v54  ;;  %v3126_v13 = vpop.f32.mrb[59].mxu0  ;;  %v4525_v9 = vpop.f32.mrb[88].mxu1 }
 0x494   :  { %v5201_v46 = vmax.bf16 %v5200_v48, %v5071_v16  ;;  %v3344_v5 = vpack.c.bf16 %v3126_v13, %v3122_v17  ;;  %v4527_v1 = vpop.f32.mrb[89].mxu1 }
 0x495   :  { %v5242_v14 = vmax.bf16 %v5241_v15, %v5072_v35  ;;  %v3508_v42 = vadd.bf16 %v13914_v19, %v3343_v60  ;;  %v4529_v43 = vpop.f32.mrb[90].mxu1  ;;  %5639 = vmatmul.mubr.bf16.gmra.mrb[164].mxu0 %v15918_v40 }
 0x496   :  { %v3509_v45 = vadd.bf16 %v13918_v44, %v3344_v5  ;;  %v4780_v27 = vpack.c.bf16 %v4529_v43, %v4525_v9  ;;  %v4531_v58 = vpop.f32.mrb[91].mxu1  ;;  %5648 = vmatprep.mubr.bf16.mxu0 %v15890_v50 }
 0x497   :  { %v3636_v34 = vmax.bf16 %v15890_v50, %v3508_v42  ;;  %v4781_v33 = vpack.c.bf16 %v4531_v58, %v4527_v1 }
 0x498   :  { %v3637_v20 = vmax.bf16 %v15890_v50, %v3509_v45  ;;  %v4945_v48 = vadd.bf16 %v14010_v12, %v4780_v27  ;;  %v3130_v54 = vpop.f32.mrb[60].mxu0  ;;  %7044 = vmatmul.mubr.bf16.gmra.mrb[196].mxu1 %v15914_v49  ;;  %v15919_v27 = vld [vmem:[#allocation34_spill] sm:$0xff] }
 0x499   :  { %v3761_v15 = vmax.bf16 %v3760_v63, %v3636_v34  ;;  %v4946_v0 = vadd.bf16 %v14013_v36, %v4781_v33  ;;  %v3132_v17 = vpop.f32.mrb[61].mxu0  ;;  %7053 = vmatprep.mubr.bf16.mxu1 %v15890_v50 }
 0x49a   :  { %v3802_v16 = vmax.bf16 %v3801_v30, %v3637_v20  ;;  %v5073_v4 = vmax.bf16 %v15890_v50, %v4945_v48  ;;  %v3134_v35 = vpop.f32.mrb[62].mxu0 }
 0x49b   :  { %v5074_v60 = vmax.bf16 %v15890_v50, %v4946_v0  ;;  %v3345_v13 = vpack.c.bf16 %v3134_v35, %v3130_v54  ;;  %v3136_v9 = vpop.f32.mrb[63].mxu0  ;;  %v4535_v5 = vpop.f32.mrb[92].mxu1 }
 0x49c   :  { %v5202_v1 = vmax.bf16 %v5201_v46, %v5073_v4  ;;  %v3346_v42 = vpack.c.bf16 %v3136_v9, %v3132_v17  ;;  %v4537_v43 = vpop.f32.mrb[93].mxu1 }
 0x49d   :  { %v5243_v45 = vmax.bf16 %v5242_v14, %v5074_v60  ;;  %v3510_v49 = vadd.bf16 %v13914_v19, %v3345_v13  ;;  %v4539_v63 = vpop.f32.mrb[94].mxu1  ;;  %5649 = vmatmul.mubr.bf16.gmra.mrb[168].mxu0 %v15919_v27 }
 0x49e   :  { %v3511_v58 = vadd.bf16 %v13918_v44, %v3346_v42  ;;  %v4782_v30 = vpack.c.bf16 %v4539_v63, %v4535_v5  ;;  %v4541_v34 = vpop.f32.mrb[95].mxu1  ;;  %5658 = vmatprep.mubr.bf16.mxu0 %v15890_v50 }
 0x49f   :  { %v3638_v33 = vmax.bf16 %v15890_v50, %v3510_v49  ;;  %v4783_v20 = vpack.c.bf16 %v4541_v34, %v4537_v43 }
 0x4a0   :  { %v3639_v48 = vmax.bf16 %v15890_v50, %v3511_v58  ;;  %v4947_v46 = vadd.bf16 %v14010_v12, %v4782_v30  ;;  %v3140_v54 = vpop.f32.mrb[64].mxu0  ;;  %7054 = vmatmul.mubr.bf16.gmra.mrb[200].mxu1 %v15915_v11  ;;  %v15920_v30 = vld [vmem:[#allocation33_spill] sm:$0xff] }
 0x4a1   :  { %v3762_v14 = vmax.bf16 %v3761_v15, %v3638_v33  ;;  %v4948_v0 = vadd.bf16 %v14013_v36, %v4783_v20  ;;  %v3142_v17 = vpop.f32.mrb[65].mxu0  ;;  %7063 = vmatprep.mubr.bf16.mxu1 %v15890_v50 }
 0x4a2   :  { %v3803_v4 = vmax.bf16 %v3802_v16, %v3639_v48  ;;  %v5075_v35 = vmax.bf16 %v15890_v50, %v4947_v46  ;;  %v3144_v60 = vpop.f32.mrb[66].mxu0 }
 0x4a3   :  { %v5076_v13 = vmax.bf16 %v15890_v50, %v4948_v0  ;;  %v3347_v9 = vpack.c.bf16 %v3144_v60, %v3140_v54  ;;  %v3146_v5 = vpop.f32.mrb[67].mxu0  ;;  %v4545_v42 = vpop.f32.mrb[96].mxu1 }
 0x4a4   :  { %v5203_v43 = vmax.bf16 %v5202_v1, %v5075_v35  ;;  %v3348_v49 = vpack.c.bf16 %v3146_v5, %v3142_v17  ;;  %v4547_v63 = vpop.f32.mrb[97].mxu1 }
 0x4a5   :  { %v5244_v58 = vmax.bf16 %v5243_v45, %v5076_v13  ;;  %v3512_v11 = vadd.bf16 %v13914_v19, %v3347_v9  ;;  %v4549_v15 = vpop.f32.mrb[98].mxu1  ;;  %5659 = vmatmul.mubr.bf16.gmra.mrb[172].mxu0 %v15920_v30 }
 0x4a6   :  { %v3513_v34 = vadd.bf16 %v13918_v44, %v3348_v49  ;;  %v4784_v16 = vpack.c.bf16 %v4549_v15, %v4545_v42  ;;  %v4551_v33 = vpop.f32.mrb[99].mxu1  ;;  %5668 = vmatprep.mubr.bf16.mxu0 %v15890_v50 }
 0x4a7   :  { %v3640_v20 = vmax.bf16 %v15890_v50, %v3512_v11  ;;  %v4785_v48 = vpack.c.bf16 %v4551_v33, %v4547_v63 }
 0x4a8   :  { %v3641_v46 = vmax.bf16 %v15890_v50, %v3513_v34  ;;  %v4949_v1 = vadd.bf16 %v14010_v12, %v4784_v16  ;;  %v3150_v54 = vpop.f32.mrb[68].mxu0  ;;  %7064 = vmatmul.mubr.bf16.gmra.mrb[204].mxu1 %v15916_v47  ;;  %v15921_v16 = vld [vmem:[#allocation36_spill] sm:$0xff] }
 0x4a9   :  { %v3763_v45 = vmax.bf16 %v3762_v14, %v3640_v20  ;;  %v4950_v0 = vadd.bf16 %v14013_v36, %v4785_v48  ;;  %v3152_v17 = vpop.f32.mrb[69].mxu0  ;;  %7073 = vmatprep.mubr.bf16.mxu1 %v15890_v50 }
 0x4aa   :  { %v3804_v35 = vmax.bf16 %v3803_v4, %v3641_v46  ;;  %v5077_v60 = vmax.bf16 %v15890_v50, %v4949_v1  ;;  %v3154_v13 = vpop.f32.mrb[70].mxu0 }
 0x4ab   :  { %v5078_v9 = vmax.bf16 %v15890_v50, %v4950_v0  ;;  %v3349_v5 = vpack.c.bf16 %v3154_v13, %v3150_v54  ;;  %v3156_v42 = vpop.f32.mrb[71].mxu0  ;;  %v4555_v49 = vpop.f32.mrb[100].mxu1 }
 0x4ac   :  { %v5204_v63 = vmax.bf16 %v5203_v43, %v5077_v60  ;;  %v3350_v11 = vpack.c.bf16 %v3156_v42, %v3152_v17  ;;  %v4557_v15 = vpop.f32.mrb[101].mxu1 }
 0x4ad   :  { %v5245_v34 = vmax.bf16 %v5244_v58, %v5078_v9  ;;  %v3514_v47 = vadd.bf16 %v13914_v19, %v3349_v5  ;;  %v4559_v14 = vpop.f32.mrb[102].mxu1  ;;  %5669 = vmatmul.mubr.bf16.gmra.mrb[176].mxu0 %v15921_v16 }
 0x4ae   :  { %v3515_v33 = vadd.bf16 %v13918_v44, %v3350_v11  ;;  %v4786_v4 = vpack.c.bf16 %v4559_v14, %v4555_v49  ;;  %v4561_v20 = vpop.f32.mrb[103].mxu1  ;;  %5678 = vmatprep.mubr.bf16.mxu0 %v15890_v50 }
 0x4af   :  { %v3642_v48 = vmax.bf16 %v15890_v50, %v3514_v47  ;;  %v4787_v46 = vpack.c.bf16 %v4561_v20, %v4557_v15 }
 0x4b0   :  { %v3643_v1 = vmax.bf16 %v15890_v50, %v3515_v33  ;;  %v4951_v43 = vadd.bf16 %v14010_v12, %v4786_v4  ;;  %v3160_v54 = vpop.f32.mrb[72].mxu0  ;;  %7074 = vmatmul.mubr.bf16.gmra.mrb[208].mxu1 %v15917_v18  ;;  %v15922_v4 = vld [vmem:[#allocation35_spill] sm:$0xff] }
 0x4b1   :  { %v3764_v58 = vmax.bf16 %v3763_v45, %v3642_v48  ;;  %v4952_v0 = vadd.bf16 %v14013_v36, %v4787_v46  ;;  %v3162_v17 = vpop.f32.mrb[73].mxu0  ;;  %7083 = vmatprep.mubr.bf16.mxu1 %v15890_v50 }
 0x4b2   :  { %v3805_v60 = vmax.bf16 %v3804_v35, %v3643_v1  ;;  %v5079_v13 = vmax.bf16 %v15890_v50, %v4951_v43  ;;  %v3164_v9 = vpop.f32.mrb[74].mxu0 }
 0x4b3   :  { %v5080_v5 = vmax.bf16 %v15890_v50, %v4952_v0  ;;  %v3351_v42 = vpack.c.bf16 %v3164_v9, %v3160_v54  ;;  %v3166_v49 = vpop.f32.mrb[75].mxu0  ;;  %v4565_v11 = vpop.f32.mrb[104].mxu1 }
 0x4b4   :  { %v5205_v15 = vmax.bf16 %v5204_v63, %v5079_v13  ;;  %v3352_v47 = vpack.c.bf16 %v3166_v49, %v3162_v17  ;;  %v4567_v14 = vpop.f32.mrb[105].mxu1 }
 0x4b5   :  { %v5246_v33 = vmax.bf16 %v5245_v34, %v5080_v5  ;;  %v3516_v18 = vadd.bf16 %v13914_v19, %v3351_v42  ;;  %v4569_v45 = vpop.f32.mrb[106].mxu1  ;;  %5679 = vmatmul.mubr.bf16.gmra.mrb[180].mxu0 %v15922_v4 }
 0x4b6   :  { %v3517_v20 = vadd.bf16 %v13918_v44, %v3352_v47  ;;  %v4788_v35 = vpack.c.bf16 %v4569_v45, %v4565_v11  ;;  %v4571_v48 = vpop.f32.mrb[107].mxu1  ;;  %5688 = vmatprep.mubr.bf16.mxu0 %v15890_v50 }
 0x4b7   :  { %v3644_v46 = vmax.bf16 %v15890_v50, %v3516_v18  ;;  %v4789_v1 = vpack.c.bf16 %v4571_v48, %v4567_v14 }
 0x4b8   :  { %v3645_v43 = vmax.bf16 %v15890_v50, %v3517_v20  ;;  %v4953_v63 = vadd.bf16 %v14010_v12, %v4788_v35  ;;  %v3170_v54 = vpop.f32.mrb[76].mxu0  ;;  %7084 = vmatmul.mubr.bf16.gmra.mrb[212].mxu1 %v15918_v40  ;;  %v15923_v35 = vld [vmem:[#allocation38_spill] sm:$0xff] }
 0x4b9   :  { %v3765_v34 = vmax.bf16 %v3764_v58, %v3644_v46  ;;  %v4954_v0 = vadd.bf16 %v14013_v36, %v4789_v1  ;;  %v3172_v17 = vpop.f32.mrb[77].mxu0  ;;  %7093 = vmatprep.mubr.bf16.mxu1 %v15890_v50 }
 0x4ba   :  { %v3806_v13 = vmax.bf16 %v3805_v60, %v3645_v43  ;;  %v5081_v9 = vmax.bf16 %v15890_v50, %v4953_v63  ;;  %v3174_v5 = vpop.f32.mrb[78].mxu0 }
 0x4bb   :  { %v5082_v42 = vmax.bf16 %v15890_v50, %v4954_v0  ;;  %v3353_v49 = vpack.c.bf16 %v3174_v5, %v3170_v54  ;;  %v3176_v11 = vpop.f32.mrb[79].mxu0  ;;  %v4575_v47 = vpop.f32.mrb[108].mxu1 }
 0x4bc   :  { %v5206_v14 = vmax.bf16 %v5205_v15, %v5081_v9  ;;  %v3354_v18 = vpack.c.bf16 %v3176_v11, %v3172_v17  ;;  %v4577_v45 = vpop.f32.mrb[109].mxu1 }
 0x4bd   :  { %v5247_v20 = vmax.bf16 %v5246_v33, %v5082_v42  ;;  %v3518_v40 = vadd.bf16 %v13914_v19, %v3353_v49  ;;  %v4579_v58 = vpop.f32.mrb[110].mxu1  ;;  %5689 = vmatmul.mubr.bf16.gmra.mrb[184].mxu0 %v15923_v35 }
 0x4be   :  { %v3519_v48 = vadd.bf16 %v13918_v44, %v3354_v18  ;;  %v4790_v60 = vpack.c.bf16 %v4579_v58, %v4575_v47  ;;  %v4581_v46 = vpop.f32.mrb[111].mxu1  ;;  %5698 = vmatprep.mubr.bf16.mxu0 %v15890_v50 }
 0x4bf   :  { %v3646_v1 = vmax.bf16 %v15890_v50, %v3518_v40  ;;  %v4791_v43 = vpack.c.bf16 %v4581_v46, %v4577_v45 }
 0x4c0   :  { %v3647_v63 = vmax.bf16 %v15890_v50, %v3519_v48  ;;  %v4955_v15 = vadd.bf16 %v14010_v12, %v4790_v60  ;;  %v3180_v54 = vpop.f32.mrb[80].mxu0  ;;  %7094 = vmatmul.mubr.bf16.gmra.mrb[216].mxu1 %v15919_v27  ;;  %v15924_v60 = vld [vmem:[#allocation37_spill] sm:$0xff] }
 0x4c1   :  { %v3766_v33 = vmax.bf16 %v3765_v34, %v3646_v1  ;;  %v4956_v0 = vadd.bf16 %v14013_v36, %v4791_v43  ;;  %v3182_v17 = vpop.f32.mrb[81].mxu0  ;;  %7103 = vmatprep.mubr.bf16.mxu1 %v15890_v50 }
 0x4c2   :  { %v3807_v9 = vmax.bf16 %v3806_v13, %v3647_v63  ;;  %v5083_v5 = vmax.bf16 %v15890_v50, %v4955_v15  ;;  %v3184_v42 = vpop.f32.mrb[82].mxu0 }
 0x4c3   :  { %v5084_v49 = vmax.bf16 %v15890_v50, %v4956_v0  ;;  %v3355_v11 = vpack.c.bf16 %v3184_v42, %v3180_v54  ;;  %v3186_v47 = vpop.f32.mrb[83].mxu0  ;;  %v4585_v18 = vpop.f32.mrb[112].mxu1 }
 0x4c4   :  { %v5207_v45 = vmax.bf16 %v5206_v14, %v5083_v5  ;;  %v3356_v40 = vpack.c.bf16 %v3186_v47, %v3182_v17  ;;  %v4587_v58 = vpop.f32.mrb[113].mxu1 }
 0x4c5   :  { %v5248_v48 = vmax.bf16 %v5247_v20, %v5084_v49  ;;  %v3520_v27 = vadd.bf16 %v13914_v19, %v3355_v11  ;;  %v4589_v34 = vpop.f32.mrb[114].mxu1  ;;  %5699 = vmatmul.mubr.bf16.gmra.mrb[188].mxu0 %v15924_v60 }
 0x4c6   :  { %v3521_v46 = vadd.bf16 %v13918_v44, %v3356_v40  ;;  %v4792_v13 = vpack.c.bf16 %v4589_v34, %v4585_v18  ;;  %v4591_v1 = vpop.f32.mrb[115].mxu1  ;;  %5708 = vmatprep.mubr.bf16.mxu0 %v15890_v50 }
 0x4c7   :  { %v3648_v43 = vmax.bf16 %v15890_v50, %v3520_v27  ;;  %v4793_v63 = vpack.c.bf16 %v4591_v1, %v4587_v58 }
 0x4c8   :  { %v3649_v15 = vmax.bf16 %v15890_v50, %v3521_v46  ;;  %v4957_v14 = vadd.bf16 %v14010_v12, %v4792_v13  ;;  %v3190_v54 = vpop.f32.mrb[84].mxu0  ;;  %7104 = vmatmul.mubr.bf16.gmra.mrb[220].mxu1 %v15920_v30  ;;  %v15925_v13 = vld [vmem:[#allocation40_spill] sm:$0xff] }
 0x4c9   :  { %v3767_v20 = vmax.bf16 %v3766_v33, %v3648_v43  ;;  %v4958_v0 = vadd.bf16 %v14013_v36, %v4793_v63  ;;  %v3192_v17 = vpop.f32.mrb[85].mxu0  ;;  %7113 = vmatprep.mubr.bf16.mxu1 %v15890_v50 }
 0x4ca   :  { %v3808_v5 = vmax.bf16 %v3807_v9, %v3649_v15  ;;  %v5085_v42 = vmax.bf16 %v15890_v50, %v4957_v14  ;;  %v3194_v49 = vpop.f32.mrb[86].mxu0 }
 0x4cb   :  { %v5086_v11 = vmax.bf16 %v15890_v50, %v4958_v0  ;;  %v3357_v47 = vpack.c.bf16 %v3194_v49, %v3190_v54  ;;  %v3196_v18 = vpop.f32.mrb[87].mxu0  ;;  %v4595_v40 = vpop.f32.mrb[116].mxu1  ;;  %v12077_v49 = vld [vmem:[#allocation8 + $0x4] ss:$16 sps:$4 sm:$0xff]  }
 0x4cc   :  { %v5208_v58 = vmax.bf16 %v5207_v45, %v5085_v42  ;;  %v3358_v27 = vpack.c.bf16 %v3196_v18, %v3192_v17  ;;  %v4597_v34 = vpop.f32.mrb[117].mxu1  ;;  %v12075_v42 = vld [vmem:[#allocation8] ss:$16 sps:$4 sm:$0xff]   ;;  %9864 = vmatprep.subr.bf16.mxu0 %v12077_v49 }
 0x4cd   :  { %v5249_v46 = vmax.bf16 %v5248_v48, %v5086_v11  ;;  %v3522_v30 = vadd.bf16 %v13914_v19, %v3357_v47  ;;  %v4599_v33 = vpop.f32.mrb[118].mxu1  ;;  %5709 = vmatmul.mubr.bf16.gmra.mrb[192].mxu0 %v15925_v13 }
 0x4ce   :  { %v3523_v1 = vadd.bf16 %v13918_v44, %v3358_v27  ;;  %v4794_v9 = vpack.c.bf16 %v4599_v33, %v4595_v40  ;;  %v4601_v43 = vpop.f32.mrb[119].mxu1  ;;  %5718 = vmatprep.mubr.bf16.mxu0 %v15890_v50  ;;  %9865 = vmatpush1.bf16.msra.mxu0 %v12075_v42 }
 0x4cf   :  { %v3650_v63 = vmax.bf16 %v15890_v50, %v3522_v30  ;;  %v4795_v15 = vpack.c.bf16 %v4601_v43, %v4597_v34 }
 0x4d0   :  { %v3651_v14 = vmax.bf16 %v15890_v50, %v3523_v1  ;;  %v4959_v45 = vadd.bf16 %v14010_v12, %v4794_v9  ;;  %v3200_v54 = vpop.f32.mrb[88].mxu0  ;;  %7114 = vmatmul.mubr.bf16.gmra.mrb[224].mxu1 %v15921_v16 }
 0x4d1   :  { %v3768_v48 = vmax.bf16 %v3767_v20, %v3650_v63  ;;  %v4960_v0 = vadd.bf16 %v14013_v36, %v4795_v15  ;;  %v3202_v17 = vpop.f32.mrb[89].mxu0  ;;  %7123 = vmatprep.mubr.bf16.mxu1 %v15890_v50  ;;  %v15926_v63 = vld [vmem:[#allocation39_spill] sm:$0xff] }
 0x4d2   :  { %v3809_v11 = vmax.bf16 %v3808_v5, %v3651_v14  ;;  %v5087_v47 = vmax.bf16 %v15890_v50, %v4959_v45  ;;  %v3204_v18 = vpop.f32.mrb[90].mxu0 }
 0x4d3   :  { %v5088_v40 = vmax.bf16 %v15890_v50, %v4960_v0  ;;  %v3359_v27 = vpack.c.bf16 %v3204_v18, %v3200_v54  ;;  %v3206_v34 = vpop.f32.mrb[91].mxu0  ;;  %v4605_v30 = vpop.f32.mrb[120].mxu1 }
 0x4d4   :  { %v5209_v33 = vmax.bf16 %v5208_v58, %v5087_v47  ;;  %v3360_v16 = vpack.c.bf16 %v3206_v34, %v3202_v17  ;;  %v4607_v20 = vpop.f32.mrb[121].mxu1 }
 0x4d5   :  { %v5250_v1 = vmax.bf16 %v5249_v46, %v5088_v40  ;;  %v3524_v9 = vadd.bf16 %v13914_v19, %v3359_v27  ;;  %v4609_v43 = vpop.f32.mrb[122].mxu1  ;;  %5719 = vmatmul.mubr.bf16.gmra.mrb[196].mxu0 %v15926_v63 }
 0x4d6   :  { %v3525_v5 = vadd.bf16 %v13918_v44, %v3360_v16  ;;  %v4796_v15 = vpack.c.bf16 %v4609_v43, %v4605_v30  ;;  %v4611_v14 = vpop.f32.mrb[123].mxu1  ;;  %5728 = vmatprep.mubr.bf16.mxu0 %v15890_v50 }
 0x4d7   :  { %v3652_v45 = vmax.bf16 %v15890_v50, %v3524_v9  ;;  %v4797_v54 = vpack.c.bf16 %v4611_v14, %v4607_v20 }
 0x4d8   :  { %v3653_v58 = vmax.bf16 %v15890_v50, %v3525_v5  ;;  %v4961_v0 = vadd.bf16 %v14010_v12, %v4796_v15  ;;  %v3210_v17 = vpop.f32.mrb[92].mxu0  ;;  %7124 = vmatmul.mubr.bf16.gmra.mrb[228].mxu1 %v15922_v4  ;;  %v15927_v15 = vld [vmem:[#allocation41_spill] sm:$0xff] }
 0x4d9   :  { %v3769_v46 = vmax.bf16 %v3768_v48, %v3652_v45  ;;  %v4962_v42 = vadd.bf16 %v14013_v36, %v4797_v54  ;;  %v3212_v49 = vpop.f32.mrb[93].mxu0  ;;  %7133 = vmatprep.mubr.bf16.mxu1 %v15890_v50 }
 0x4da   :  { %v3810_v47 = vmax.bf16 %v3809_v11, %v3653_v58  ;;  %v5089_v18 = vmax.bf16 %v15890_v50, %v4961_v0  ;;  %v3214_v40 = vpop.f32.mrb[94].mxu0 }
 0x4db   :  { %v5090_v27 = vmax.bf16 %v15890_v50, %v4962_v42  ;;  %v3361_v34 = vpack.c.bf16 %v3214_v40, %v3210_v17  ;;  %v3216_v30 = vpop.f32.mrb[95].mxu0  ;;  %v4615_v16 = vpop.f32.mrb[124].mxu1 }
 0x4dc   :  { %v5210_v20 = vmax.bf16 %v5209_v33, %v5089_v18  ;;  %v3362_v9 = vpack.c.bf16 %v3216_v30, %v3212_v49  ;;  %v4617_v43 = vpop.f32.mrb[125].mxu1 }
 0x4dd   :  { %v5251_v5 = vmax.bf16 %v5250_v1, %v5090_v27  ;;  %v3526_v4 = vadd.bf16 %v13914_v19, %v3361_v34  ;;  %v4619_v48 = vpop.f32.mrb[126].mxu1  ;;  %5729 = vmatmul.mubr.bf16.gmra.mrb[200].mxu0 %v15927_v15 }
 0x4de   :  { %v3527_v14 = vadd.bf16 %v13918_v44, %v3362_v9  ;;  %v4798_v11 = vpack.c.bf16 %v4619_v48, %v4615_v16  ;;  %v4621_v45 = vpop.f32.mrb[127].mxu1  ;;  %5738 = vmatprep.mubr.bf16.mxu0 %v15890_v50 }
 0x4df   :  { %v3654_v54 = vmax.bf16 %v15890_v50, %v3526_v4  ;;  %v4799_v58 = vpack.c.bf16 %v4621_v45, %v4617_v43 }
 0x4e0   :  { %v3655_v0 = vmax.bf16 %v15890_v50, %v3527_v14  ;;  %v4963_v33 = vadd.bf16 %v14010_v12, %v4798_v11  ;;  %v3220_v17 = vpop.f32.mrb[96].mxu0  ;;  %7134 = vmatmul.mubr.bf16.gmra.mrb[232].mxu1 %v15923_v35 }
 0x4e1   :  { %v3770_v1 = vmax.bf16 %v3769_v46, %v3654_v54  ;;  %v4964_v42 = vadd.bf16 %v14013_v36, %v4799_v58  ;;  %v3222_v49 = vpop.f32.mrb[97].mxu0  ;;  %7143 = vmatprep.mubr.bf16.mxu1 %v15890_v50  ;;  %v11159_v54 = vld.sshfl [vmem:[%s15766_s6 + $0x4] sm:$0x11 pattern:$0x75316420] }
 0x4e2   :  { %v3811_v18 = vmax.bf16 %v3810_v47, %v3655_v0  ;;  %v5091_v40 = vmax.bf16 %v15890_v50, %v4963_v33  ;;  %v3224_v27 = vpop.f32.mrb[98].mxu0 }
 0x4e3   :  { %v5092_v34 = vmax.bf16 %v15890_v50, %v4964_v42  ;;  %v3363_v30 = vpack.c.bf16 %v3224_v27, %v3220_v17  ;;  %v3226_v16 = vpop.f32.mrb[99].mxu0  ;;  %v4625_v9 = vpop.f32.mrb[128].mxu1 }
 0x4e4   :  { %v5211_v43 = vmax.bf16 %v5210_v20, %v5091_v40  ;;  %v3364_v4 = vpack.c.bf16 %v3226_v16, %v3222_v49  ;;  %v4627_v48 = vpop.f32.mrb[129].mxu1  ;;  %v6265_v40 = vcombine.high %v11159_v54, %v11159_v54 }
 0x4e5   :  { %v5252_v14 = vmax.bf16 %v5251_v5, %v5092_v34  ;;  %v3528_v35 = vadd.bf16 %v13914_v19, %v3363_v30  ;;  %v4629_v46 = vpop.f32.mrb[130].mxu1  ;;  %5739 = vmatmul.mubr.bf16.gmra.mrb[204].mxu0 %v13685_v22 }
 0x4e6   :  { %v3529_v11 = vadd.bf16 %v13918_v44, %v3364_v4  ;;  %v4800_v47 = vpack.c.bf16 %v4629_v46, %v4625_v9  ;;  %v4631_v45 = vpop.f32.mrb[131].mxu1  ;;  %5748 = vmatprep.mubr.bf16.mxu0 %v15890_v50 }
 0x4e7   :  { %v3656_v20 = vmax.bf16 %v15890_v50, %v3528_v35  ;;  %v4801_v58 = vpack.c.bf16 %v4631_v45, %v4627_v48  ;;  %v6279_v45 = vrot.slane %v6265_v40, %v13889_v37  ;;  %v12080_v40 = vld [vmem:[#allocation8 + $0x24] ss:$16 sps:$4 sm:$0xff]  }
 0x4e8   :  { %v3657_v5 = vmax.bf16 %v15890_v50, %v3529_v11  ;;  %v4965_v0 = vadd.bf16 %v14010_v12, %v4800_v47  ;;  %v3230_v33 = vpop.f32.mrb[100].mxu0  ;;  %7144 = vmatmul.mubr.bf16.gmra.mrb[236].mxu1 %v15924_v60  ;;  %9866 = vmatprep.subr.bf16.mxu0 %v12080_v40 }
 0x4e9   :  { %v3771_v17 = vmax.bf16 %v3770_v1, %v3656_v20  ;;  %v4966_v42 = vadd.bf16 %v14013_v36, %v4801_v58  ;;  %v3232_v49 = vpop.f32.mrb[101].mxu0  ;;  %7153 = vmatprep.mubr.bf16.mxu1 %v15890_v50 }
 0x4ea   :  { %v3812_v27 = vmax.bf16 %v3811_v18, %v3657_v5  ;;  %v5093_v34 = vmax.bf16 %v15890_v50, %v4965_v0  ;;  %v3234_v30 = vpop.f32.mrb[102].mxu0  ;;  %v6272_v18 = vrot.slane %v11159_v54, %v13889_v37 }
 0x4eb   :  { %v5094_v16 = vmax.bf16 %v15890_v50, %v4966_v42  ;;  %v3365_v9 = vpack.c.bf16 %v3234_v30, %v3230_v33  ;;  %v3236_v4 = vpop.f32.mrb[103].mxu0  ;;  %v4635_v48 = vpop.f32.mrb[132].mxu1  ;;  %v6288_v30 = vpack.i.b16 %v6279_v45, %v6279_v45 }
 0x4ec   :  { %v14791_v35 = vmax.bf16 %v5211_v43, %v5093_v34  ;;  %v3366_v46 = vpack.c.bf16 %v3236_v4, %v3232_v49  ;;  %v4637_v60 = vpop.f32.mrb[133].mxu1  ;;  %v6281_v34 = vpack.i.b16 %v6272_v18, %v6272_v18 }
 0x4ed   :  { %v14793_v1 = vmax.bf16 %v5252_v14, %v5094_v16  ;;  %v3530_v11 = vadd.bf16 %v13914_v19, %v3365_v9  ;;  %v4639_v47 = vpop.f32.mrb[134].mxu1  ;;  %5749 = vmatmul.mubr.bf16.gmra.mrb[208].mxu0 %v13699_v61 }
 0x4ee   :  { %v3531_v20 = vadd.bf16 %v13918_v44, %v3366_v46  ;;  %v4802_v58 = vpack.c.bf16 %v4639_v47, %v4635_v48  ;;  %v4641_v5 = vpop.f32.mrb[135].mxu1  ;;  %5758 = vmatprep.mubr.bf16.mxu0 %v15890_v50  ;;  %v12078_v44 = vld [vmem:[#allocation8 + $0x20] ss:$16 sps:$4 sm:$0xff]  }
 0x4ef   :  { %v3658_v43 = vmax.bf16 %v15890_v50, %v3530_v11  ;;  %v4803_v0 = vpack.c.bf16 %v4641_v5, %v4637_v60  ;;  %9867 = vmatpush1.bf16.msra.mxu0 %v12078_v44 }
 0x4f0   :  { %v3659_v14 = vmax.bf16 %v15890_v50, %v3531_v20  ;;  %v4967_v19 = vadd.bf16 %v14010_v12, %v4802_v58  ;;  %v5490_v33 = vpop.f32.mrb[104].mxu0  ;;  %7154 = vmatmul.mubr.bf16.gmra.mrb[240].mxu1 %v15925_v13 }
 0x4f1   :  { %v3772_v42 = vmax.bf16 %v3771_v17, %v3658_v43  ;;  %v4968_v54 = vadd.bf16 %v14013_v36, %v4803_v0  ;;  %v5492_v49 = vpop.f32.mrb[105].mxu0  ;;  %7163 = vmatprep.mubr.bf16.mxu1 %v15890_v50 }
 0x4f2   :  { %v3813_v16 = vmax.bf16 %v3812_v27, %v3659_v14  ;;  %v5095_v9 = vmax.bf16 %v15890_v50, %v4967_v19  ;;  %v5494_v4 = vpop.f32.mrb[106].mxu0 }
 0x4f3   :  { %v3773_v48 = vunpack.i.l.bf16 %v3772_v42  ;;  %v3774_v46 = vunpack.i.h.bf16 %v3772_v42  ;;  %v5096_v60 = vmax.bf16 %v15890_v50, %v4968_v54  ;;  %v6129_v11 = vpack.c.bf16 %v5494_v4, %v5490_v33  ;;  %v4645_v13 = vpop.f32.mrb[136].mxu1  ;;  %v5496_v17 = vpop.f32.mrb[107].mxu0  ;;  %v15928_v33 = vld [vmem:[#allocation51_spill] sm:$0xff] }
 0x4f4   :  { %v3814_v47 = vunpack.i.l.bf16 %v3813_v16  ;;  %v3815_v20 = vunpack.i.h.bf16 %v3813_v16  ;;  %v5213_v58 = vmax.bf16 %v14791_v35, %v5095_v9  ;;  %v6130_v5 = vpack.c.bf16 %v5496_v17, %v5492_v49  ;;  %v4647_v43 = vpop.f32.mrb[137].mxu1 }
 0x4f5   :  { %v3775_v18 = vmax.f32 %v3773_v48, %v3774_v46  ;;  %v5254_v27 = vmax.bf16 %v14793_v1, %v5096_v60  ;;  %v4649_v45 = vpop.f32.mrb[138].mxu1  ;;  %5759 = vmatmul.mubr.bf16.gmra.mrb[212].mxu0 %v13697_v28  ;;  %v14814_v42 = vrot.slane %v6281_v34, %v15928_v33  ;;  %v14817_v35 = vrot.slane %v6288_v30, %v15928_v33 }
 0x4f6   :  { %v3816_v0 = vmax.f32 %v3814_v47, %v3815_v20  ;;  %v4804_v14 = vpack.c.bf16 %v4649_v45, %v4645_v13  ;;  %v4651_v19 = vpop.f32.mrb[139].mxu1  ;;  %5768 = vmatprep.mubr.bf16.mxu0 %v15890_v50  ;;  %v12727_v16 = vmov 1935823168  }
 0x4f7   :  { %v3776_v54 = vrot.slane %v3775_v18, 4  ;;  %v4805_v40 = vpack.c.bf16 %v4651_v19, %v4647_v43  ;;  %v3859_v9 = vunpack.c.l.s4 %v12727_v16  ;;  %v6294_v17 = vadd.bf16 %v14814_v42, %v6129_v11  ;;  %v15929_v11 = vld [vmem:[#allocation42_spill] sm:$0xff] }
 0x4f8   :  { %v3817_v49 = vrot.slane %v3816_v0, 4  ;;  %v4969_v44 = vadd.bf16 %v14010_v12, %v4804_v14  ;;  %v5500_v1 = vpop.f32.mrb[108].mxu0  ;;  %7164 = vmatmul.mubr.bf16.gmra.mrb[244].mxu1 %v15926_v63 }
 0x4f9   :  { %v3777_v4 = vmax.f32 %v3775_v18, %v3776_v54  ;;  %v4970_v48 = vadd.bf16 %v14013_v36, %v4805_v40  ;;  %v5502_v46 = vpop.f32.mrb[109].mxu0  ;;  %7173 = vmatprep.mubr.bf16.mxu1 %v15890_v50  ;;  %v6295_v18 = vadd.bf16 %v14817_v35, %v6130_v5  ;;  %v3860_v40 = vunpack.c.0.s8 %v3859_v9 }
 0x4fa   :  { %v3818_v34 = vmax.f32 %v3816_v0, %v3817_v49  ;;  %v5097_v60 = vmax.bf16 %v15890_v50, %v4969_v44  ;;  %v5504_v13 = vpop.f32.mrb[110].mxu0 }
 0x4fb   :  { %v3778_v30 = vrot.slane %v3777_v4, 2  ;;  %v5098_v47 = vmax.bf16 %v15890_v50, %v4970_v48  ;;  %v6131_v20 = vpack.c.bf16 %v5504_v13, %v5500_v1  ;;  %v4655_v43 = vpop.f32.mrb[140].mxu1  ;;  %v5506_v63 = vpop.f32.mrb[111].mxu0  ;;  %v3835_v1 = vrot.slane %v14432_v23, %v13889_v37 }
 0x4fc   :  { %v3819_v45 = vrot.slane %v3818_v34, 2  ;;  %v14827_v14 = vmax.bf16 %v5213_v58, %v5097_v60  ;;  %v6132_v19 = vpack.c.bf16 %v5506_v63, %v5502_v46  ;;  %v4657_v54 = vpop.f32.mrb[141].mxu1  ;;  %v6423_v23 = vmax.bf16 %v15890_v50, %v6295_v18 }
 0x4fd   :  { %v3779_v0 = vmax.f32 %v3777_v4, %v3778_v30  ;;  %v14829_v49 = vmax.bf16 %v5254_v27, %v5098_v47  ;;  %v6296_v44 = vadd.bf16 %v14814_v42, %v6131_v20  ;;  %v4659_v16 = vpop.f32.mrb[142].mxu1  ;;  %5769 = vmatmul.mubr.bf16.gmra.mrb[216].mxu0 %v15929_v11  ;;  %v6422_v4 = vmax.bf16 %v15890_v50, %v6294_v17 }
 0x4fe   :  { %v3820_v48 = vmax.f32 %v3818_v34, %v3819_v45  ;;  %v6297_v13 = vadd.bf16 %v14817_v35, %v6132_v19  ;;  %v4806_v5 = vpack.c.bf16 %v4659_v16, %v4655_v43  ;;  %v4661_v58 = vpop.f32.mrb[143].mxu1  ;;  %5778 = vmatprep.mubr.bf16.mxu0 %v15890_v50  ;;  %v15930_v19 = vld [vmem:[#allocation47_spill] sm:$0xff] }
 0x4ff   :  { %v3780_v46 = vrot.slane %v3779_v0, 1  ;;  %v6424_v9 = vmax.bf16 %v15890_v50, %v6296_v44  ;;  %v4807_v27 = vpack.c.bf16 %v4661_v58, %v4657_v54  ;;  %v14846_v54 = vsub.s32 %v3860_v40, %v15930_v19 }
 0x500   :  { %v3821_v60 = vrot.slane %v3820_v48, 1  ;;  %v6425_v30 = vmax.bf16 %v15890_v50, %v6297_v13  ;;  %v4971_v47 = vadd.bf16 %v14010_v12, %v4806_v5  ;;  %v5510_v20 = vpop.f32.mrb[112].mxu0  ;;  %7174 = vmatmul.mubr.bf16.gmra.mrb[248].mxu1 %v15927_v15  ;;  %v3842_v5 = vrot.slane %v3835_v1, %v13889_v37 }
 0x501   :  { %v3781_v34 = vmax.f32 %v3779_v0, %v3780_v46  ;;  %v4972_v43 = vadd.bf16 %v14013_v36, %v4807_v27  ;;  %v5512_v63 = vpop.f32.mrb[113].mxu0  ;;  %v6550_v45 = vmax.bf16 %v6424_v9, %v6422_v4  ;;  %7183 = vmatprep.mubr.bf16.mxu1 %v15890_v50 }
 0x502   :  { %v3822_v17 = vmax.f32 %v3820_v48, %v3821_v60  ;;  %v5099_v44 = vmax.bf16 %v15890_v50, %v4971_v47  ;;  %v5514_v16 = vpop.f32.mrb[114].mxu0  ;;  %v6591_v13 = vmax.bf16 %v6425_v30, %v6423_v23 }
 0x503   :  { %v3782_v15 = vpack.i.bf16 %v3781_v34, %v3781_v34  ;;  %v5100_v18 = vmax.bf16 %v15890_v50, %v4972_v43  ;;  %v6133_v0 = vpack.c.bf16 %v5514_v16, %v5510_v20  ;;  %v4665_v58 = vpop.f32.mrb[144].mxu1  ;;  %v5516_v46 = vpop.f32.mrb[115].mxu0  ;;  %v3864_v20 = vrot.slane %v3842_v5, %v14846_v54 }
 0x504   :  { %v3823_v27 = vpack.i.bf16 %v3822_v17, %v3822_v17  ;;  %v5215_v9 = vmax.bf16 %v14827_v14, %v5099_v44  ;;  %v6134_v4 = vpack.c.bf16 %v5516_v46, %v5512_v63  ;;  %v4667_v32 = vpop.f32.mrb[145].mxu1 }
 0x505   :  { %v5256_v40 = vmax.bf16 %v14829_v49, %v5100_v18  ;;  %v6298_v48 = vadd.bf16 %v14814_v42, %v6133_v0  ;;  %v4669_v60 = vpop.f32.mrb[146].mxu1  ;;  %5779 = vmatmul.mubr.bf16.gmra.mrb[220].mxu0 %v13721_v25  ;;  %v11194_v49 = vld.sshfl [vmem:[%s15766_s6 + $0x6] sm:$0x11 pattern:$0x75316420]  ;;  %v3871_v46 = vrot.slane %v3864_v20, %v14846_v54 }
 0x506   :  { %v3843_v30 = vcombine.low %v3782_v15, %v3823_v27  ;;  %v6299_v1 = vadd.bf16 %v14817_v35, %v6134_v4  ;;  %v4808_v47 = vpack.c.bf16 %v4669_v60, %v4665_v58  ;;  %v4671_v23 = vpop.f32.mrb[147].mxu1  ;;  %5788 = vmatprep.mubr.bf16.mxu0 %v15890_v50  ;;  %v7710_v27 = vcombine.high %v11194_v49, %v11194_v49 }
 0x507   :  { %v6426_v14 = vmax.bf16 %v15890_v50, %v6298_v48  ;;  %v4809_v34 = vpack.c.bf16 %v4671_v23, %v4667_v32  ;;  %v14880_v20 = vrot.slane %v11194_v49, %v13889_v37 }
 0x508   :  { %v3850_v43 = vrot.slane %v3843_v30, %v13889_v37  ;;  %v6427_v63 = vmax.bf16 %v15890_v50, %v6299_v1  ;;  %v4973_v17 = vadd.bf16 %v14010_v12, %v4808_v47  ;;  %v5520_v44 = vpop.f32.mrb[116].mxu0  ;;  %7184 = vmatmul.mubr.bf16.gmra.mrb[252].mxu1 %v13685_v22 }
 0x509   :  { %v14866_v16 = vmax.bf16 %v6550_v45, %v6426_v14  ;;  %v4974_v5 = vadd.bf16 %v14013_v36, %v4809_v34  ;;  %v5522_v15 = vpop.f32.mrb[117].mxu0  ;;  %7193 = vmatprep.mubr.bf16.mxu1 %v15890_v50  ;;  %v12081_v34 = vld [vmem:[#allocation8 + $0x8] ss:$16 sps:$4 sm:$0xff]  }
 0x50a   :  { %v3857_v32 = vrot.slane %v3850_v43, %v13889_v37  ;;  %v14871_v18 = vmax.bf16 %v6591_v13, %v6427_v63  ;;  %v5101_v0 = vmax.bf16 %v15890_v50, %v4973_v17  ;;  %v5524_v58 = vpop.f32.mrb[118].mxu0  ;;  %v12083_v43 = vld [vmem:[#allocation8 + $0xc] ss:$16 sps:$4 sm:$0xff]  }
 0x50b   :  { %v5102_v4 = vmax.bf16 %v15890_v50, %v4974_v5  ;;  %v6135_v22 = vpack.c.bf16 %v5524_v58, %v5520_v44  ;;  %v4675_v45 = vpop.f32.mrb[148].mxu1  ;;  %v5526_v48 = vpop.f32.mrb[119].mxu0  ;;  %10028 = vmatprep.subr.bf16.mxu1 %v12083_v43 }
 0x50c   :  { %v3878_v60 = vrot.slane %v3857_v32, %v14846_v54  ;;  %v5216_v30 = vmax.bf16 %v5215_v9, %v5101_v0  ;;  %v6136_v1 = vpack.c.bf16 %v5526_v48, %v5522_v15  ;;  %v4677_v47 = vpop.f32.mrb[149].mxu1  ;;  %v3886_v9 = vunpack.c.l.b16 %v3871_v46  ;;  %10029 = vmatpush1.bf16.msra.mxu1 %v12081_v34 }
 0x50d   :  { %v5257_v23 = vmax.bf16 %v5256_v40, %v5102_v4  ;;  %v6300_v13 = vadd.bf16 %v14814_v42, %v6135_v22  ;;  %v4679_v14 = vpop.f32.mrb[150].mxu1  ;;  %5789 = vmatmul.mubr.bf16.gmra.mrb[224].mxu0 %v13735_v56  ;;  %v14886_v40 = vrot.slane %v7710_v27, %v13889_v37 }
 0x50e   :  { %v3885_v63 = vrot.slane %v3878_v60, %v14846_v54  ;;  %v6301_v17 = vadd.bf16 %v14817_v35, %v6136_v1  ;;  %v4810_v44 = vpack.c.bf16 %v4679_v14, %v4675_v45  ;;  %v4681_v5 = vpop.f32.mrb[151].mxu1  ;;  %5798 = vmatprep.mubr.bf16.mxu0 %v15890_v50  ;;  %v3887_v45 = vunpack.c.h.b16 %v3871_v46  ;;  %v12084_v1 = vld [vmem:[#allocation8 + $0x40] ss:$16 sps:$4 sm:$0xff]  }
 0x50f   :  { %v6428_v15 = vmax.bf16 %v15890_v50, %v6300_v13  ;;  %v4811_v32 = vpack.c.bf16 %v4681_v5, %v4677_v47  ;;  %v12086_v47 = vld [vmem:[#allocation8 + $0x44] ss:$16 sps:$4 sm:$0xff]  }
 0x510   :  { %v3888_v0 = vunpack.c.l.b16 %v3885_v63  ;;  %v3889_v58 = vunpack.c.h.b16 %v3885_v63  ;;  %v6429_v49 = vmax.bf16 %v15890_v50, %v6301_v17  ;;  %v4975_v4 = vadd.bf16 %v14010_v12, %v4810_v44  ;;  %v5530_v22 = vpop.f32.mrb[120].mxu0  ;;  %7194 = vmatmul.mubr.bf16.gmra.mrb[0].mxu1 %v13699_v61  ;;  %9868 = vmatprep.subr.bf16.mxu0 %v12086_v47 }
 0x511   :  { %v6552_v48 = vmax.bf16 %v14866_v16, %v6428_v15  ;;  %v4976_v27 = vadd.bf16 %v14013_v36, %v4811_v32  ;;  %v5532_v60 = vpop.f32.mrb[121].mxu0  ;;  %7203 = vmatprep.mubr.bf16.mxu1 %v15890_v50  ;;  %v7726_v61 = vpack.i.b16 %v14880_v20, %v14880_v20  ;;  %9869 = vmatpush1.bf16.msra.mxu0 %v12084_v1 }
 0x512   :  { %v3890_v13 = vrot.slane %v3888_v0, 7  ;;  %v3893_v14 = vrot.slane %v3889_v58, 7  ;;  %v6593_v43 = vmax.bf16 %v14871_v18, %v6429_v49  ;;  %v5103_v12 = vmax.bf16 %v15890_v50, %v4975_v4  ;;  %v5534_v63 = vpop.f32.mrb[122].mxu0 }
 0x513   :  { %v5104_v16 = vmax.bf16 %v15890_v50, %v4976_v27  ;;  %v6137_v46 = vpack.c.bf16 %v5534_v63, %v5530_v22  ;;  %v5536_v36 = vpop.f32.mrb[123].mxu0  ;;  %v6935_v17 = vpop.f32.mrb[152].mxu1  ;;  %v7733_v18 = vpack.i.b16 %v14886_v40, %v14886_v40 }
 0x514   :  { %v3892_v44 = vsel %vm3891_vm3, %v3890_v13, %v3886_v9  ;;  %v3894_v34 = vsel %vm3891_vm3, %v3893_v14, %v3887_v45  ;;  %v5217_v5 = vmax.bf16 %v5216_v30, %v5103_v12  ;;  %v6138_v15 = vpack.c.bf16 %v5536_v36, %v5532_v60  ;;  %v6937_v32 = vpop.f32.mrb[153].mxu1 }
 0x515   :  { %v3895_v0 = vpack.c.b16 %v3894_v34, %v3892_v44  ;;  %v5258_v58 = vmax.bf16 %v5257_v23, %v5104_v16  ;;  %v6302_v20 = vadd.bf16 %v14814_v42, %v6137_v46  ;;  %5799 = vmatmul.mubr.bf16.gmra.mrb[228].mxu0 %v13733_v55  ;;  %v6939_v49 = vpop.f32.mrb[154].mxu1  ;;  %v14916_v46 = vrot.slane %v7726_v61, %v15928_v33 }
 0x516   :  { %v5218_v4 = vunpack.i.l.bf16 %v5217_v5  ;;  %v5219_v22 = vunpack.i.h.bf16 %v5217_v5  ;;  %v6303_v9 = vadd.bf16 %v14817_v35, %v6138_v15  ;;  %v7574_v27 = vpack.c.bf16 %v6939_v49, %v6935_v17  ;;  %v6941_v45 = vpop.f32.mrb[155].mxu1  ;;  %5808 = vmatprep.mubr.bf16.mxu0 %v15890_v50 }
 0x517   :  { %v3902_v30 = vrot.slane %v3895_v0, %v13889_v37  ;;  %v5259_v60 = vunpack.i.l.bf16 %v5258_v58  ;;  %v5260_v1 = vunpack.i.h.bf16 %v5258_v58  ;;  %v6430_v40 = vmax.bf16 %v15890_v50, %v6302_v20 }
 0x518   :  { %v5220_v23 = vmax.f32 %v5218_v4, %v5219_v22  ;;  %v6431_v47 = vmax.bf16 %v15890_v50, %v6303_v9  ;;  %v7575_v13 = vpack.c.bf16 %v6941_v45, %v6937_v32  ;;  %v5540_v14 = vpop.f32.mrb[124].mxu0  ;;  %7204 = vmatmul.mubr.bf16.gmra.mrb[4].mxu1 %v13697_v28  ;;  %v14921_v34 = vrot.slane %v7733_v18, %v15928_v33  ;;  %v15931_v4 = vld [vmem:[#allocation43_spill] sm:$0xff] }
 0x519   :  { %11090 = vst.sshfl [vmem:[#allocation2] sm:$0x5 pattern:$0x73625140] %v3902_v30  ;;  %v5261_v12 = vmax.f32 %v5259_v60, %v5260_v1  ;;  %v14912_v63 = vmax.bf16 %v6552_v48, %v6430_v40  ;;  %v5542_v16 = vpop.f32.mrb[125].mxu0  ;;  %7213 = vmatprep.mubr.bf16.mxu1 %v15890_v50 }
 0x51a   :  { %v5221_v36 = vrot.slane %v5220_v23, 4  ;;  %v14918_v17 = vmax.bf16 %v6593_v43, %v6431_v47  ;;  %v5544_v44 = vpop.f32.mrb[126].mxu0  ;;  %v7739_v43 = vadd.bf16 %v14916_v46, %v7574_v27  ;;  %v7740_v60 = vadd.bf16 %v14921_v34, %v7575_v13 }
 0x51b   :  { %v5262_v5 = vrot.slane %v5261_v12, 4  ;;  %v6139_v15 = vpack.c.bf16 %v5544_v44, %v5540_v14  ;;  %v5546_v28 = vpop.f32.mrb[127].mxu0  ;;  %v6945_v32 = vpop.f32.mrb[156].mxu1 }
 0x51c   :  { %v5222_v0 = vmax.f32 %v5220_v23, %v5221_v36  ;;  %v6140_v48 = vpack.c.bf16 %v5546_v28, %v5542_v16  ;;  %v6947_v58 = vpop.f32.mrb[157].mxu1 }
 0x51d   :  { %v5263_v20 = vmax.f32 %v5261_v12, %v5262_v5  ;;  %v6304_v49 = vadd.bf16 %v14814_v42, %v6139_v15  ;;  %5809 = vmatmul.mubr.bf16.gmra.mrb[232].mxu0 %v15931_v4  ;;  %v6949_v61 = vpop.f32.mrb[158].mxu1  ;;  %v7867_v15 = vmax.bf16 %v15890_v50, %v7739_v43 }
 0x51e   :  { %v5223_v22 = vrot.slane %v5222_v0, 2  ;;  %v6305_v9 = vadd.bf16 %v14817_v35, %v6140_v48  ;;  %v7576_v18 = vpack.c.bf16 %v6949_v61, %v6945_v32  ;;  %v6951_v45 = vpop.f32.mrb[159].mxu1  ;;  %5818 = vmatprep.mubr.bf16.mxu0 %v15890_v50  ;;  %v7868_v48 = vmax.bf16 %v15890_v50, %v7740_v60 }
 0x51f   :  { %v5264_v30 = vrot.slane %v5263_v20, 2  ;;  %v6432_v1 = vmax.bf16 %v15890_v50, %v6304_v49  ;;  %v7577_v40 = vpack.c.bf16 %v6951_v45, %v6947_v58  ;;  %v5280_v49 = vrot.slane %v14494_v39, %v13889_v37 }
 0x520   :  { %v5224_v23 = vmax.f32 %v5222_v0, %v5223_v22  ;;  %v6433_v47 = vmax.bf16 %v15890_v50, %v6305_v9  ;;  %v7741_v14 = vadd.bf16 %v14916_v46, %v7576_v18  ;;  %v5550_v12 = vpop.f32.mrb[128].mxu0  ;;  %7214 = vmatmul.mubr.bf16.gmra.mrb[8].mxu1 %v15929_v11 }
 0x521   :  { %v5265_v27 = vmax.f32 %v5263_v20, %v5264_v30  ;;  %v6554_v16 = vmax.bf16 %v14912_v63, %v6432_v1  ;;  %v7742_v36 = vadd.bf16 %v14921_v34, %v7577_v40  ;;  %v5552_v44 = vpop.f32.mrb[129].mxu0  ;;  %7223 = vmatprep.mubr.bf16.mxu1 %v15890_v50 }
 0x522   :  { %v5225_v13 = vrot.slane %v5224_v23, 1  ;;  %v6595_v5 = vmax.bf16 %v14918_v17, %v6433_v47  ;;  %v7869_v28 = vmax.bf16 %v15890_v50, %v7741_v14  ;;  %v5554_v32 = vpop.f32.mrb[130].mxu0 }
 0x523   :  { %v5266_v0 = vrot.slane %v5265_v27, 1  ;;  %v7870_v11 = vmax.bf16 %v15890_v50, %v7742_v36  ;;  %v6141_v58 = vpack.c.bf16 %v5554_v32, %v5550_v12  ;;  %v5556_v63 = vpop.f32.mrb[131].mxu0  ;;  %v6955_v20 = vpop.f32.mrb[160].mxu1  ;;  %v5287_v12 = vrot.slane %v5280_v49, %v13889_v37 }
 0x524   :  { %v5226_v61 = vmax.f32 %v5224_v23, %v5225_v13  ;;  %v7995_v22 = vmax.bf16 %v7869_v28, %v7867_v15  ;;  %v6142_v9 = vpack.c.bf16 %v5556_v63, %v5552_v44  ;;  %v6957_v17 = vpop.f32.mrb[161].mxu1 }
 0x525   :  { %v5267_v18 = vmax.f32 %v5265_v27, %v5266_v0  ;;  %v8036_v43 = vmax.bf16 %v7870_v11, %v7868_v48  ;;  %v6306_v45 = vadd.bf16 %v14814_v42, %v6141_v58  ;;  %5819 = vmatmul.mubr.bf16.gmra.mrb[236].mxu0 %v13745_v62  ;;  %v6959_v30 = vpop.f32.mrb[162].mxu1 }
 0x526   :  { %v5227_v60 = vpack.i.bf16 %v5226_v61, %v5226_v61  ;;  %v6307_v1 = vadd.bf16 %v14817_v35, %v6142_v9  ;;  %v7578_v40 = vpack.c.bf16 %v6959_v30, %v6955_v20  ;;  %v6961_v47 = vpop.f32.mrb[163].mxu1  ;;  %5828 = vmatprep.mubr.bf16.mxu0 %v15890_v50 }
 0x527   :  { %v5268_v14 = vpack.i.bf16 %v5267_v18, %v5267_v18  ;;  %v6434_v39 = vmax.bf16 %v15890_v50, %v6306_v45  ;;  %v7579_v23 = vpack.c.bf16 %v6961_v47, %v6957_v17 }
 0x528   :  { %v6435_v27 = vmax.bf16 %v15890_v50, %v6307_v1  ;;  %v7743_v36 = vadd.bf16 %v14916_v46, %v7578_v40  ;;  %v5560_v44 = vpop.f32.mrb[132].mxu0  ;;  %7224 = vmatmul.mubr.bf16.gmra.mrb[12].mxu1 %v13721_v25  ;;  %v12089_v1 = vld [vmem:[#allocation8 + $0x2c] ss:$16 sps:$4 sm:$0xff]  }
 0x529   :  { %v5288_v13 = vcombine.low %v5227_v60, %v5268_v14  ;;  %v14952_v15 = vmax.bf16 %v6554_v16, %v6434_v39  ;;  %v7744_v28 = vadd.bf16 %v14921_v34, %v7579_v23  ;;  %v5562_v32 = vpop.f32.mrb[133].mxu0  ;;  %7233 = vmatprep.mubr.bf16.mxu1 %v15890_v50  ;;  %v5309_v16 = vrot.slane %v5287_v12, %v14846_v54  ;;  %v12087_v60 = vld [vmem:[#allocation8 + $0x28] ss:$16 sps:$4 sm:$0xff]  }
 0x52a   :  { %v14956_v0 = vmax.bf16 %v6595_v5, %v6435_v27  ;;  %v7871_v48 = vmax.bf16 %v15890_v50, %v7743_v36  ;;  %v5564_v11 = vpop.f32.mrb[134].mxu0  ;;  %10030 = vmatprep.subr.bf16.mxu1 %v12089_v1 }
 0x52b   :  { %v5295_v58 = vrot.slane %v5288_v13, %v13889_v37  ;;  %v7872_v63 = vmax.bf16 %v15890_v50, %v7744_v28  ;;  %v6143_v20 = vpack.c.bf16 %v5564_v11, %v5560_v44  ;;  %v5566_v49 = vpop.f32.mrb[135].mxu0  ;;  %v6965_v25 = vpop.f32.mrb[164].mxu1  ;;  %v12092_v11 = vld [vmem:[#allocation8 + $0x64] ss:$16 sps:$4 sm:$0xff]   ;;  %10031 = vmatpush1.bf16.msra.mxu1 %v12087_v60 }
 0x52c   :  { %v14962_v61 = vmax.bf16 %v7995_v22, %v7871_v48  ;;  %v6144_v9 = vpack.c.bf16 %v5566_v49, %v5562_v32  ;;  %v6967_v17 = vpop.f32.mrb[165].mxu1  ;;  %v12090_v48 = vld [vmem:[#allocation8 + $0x60] ss:$16 sps:$4 sm:$0xff]   ;;  %9870 = vmatprep.subr.bf16.mxu0 %v12092_v11 }
 0x52d   :  { %v5302_v18 = vrot.slane %v5295_v58, %v13889_v37  ;;  %v14965_v5 = vmax.bf16 %v8036_v43, %v7872_v63  ;;  %v6308_v45 = vadd.bf16 %v14814_v42, %v6143_v20  ;;  %5829 = vmatmul.mubr.bf16.gmra.mrb[240].mxu0 %v13759_v31  ;;  %v6969_v30 = vpop.f32.mrb[166].mxu1  ;;  %v5316_v43 = vrot.slane %v5309_v16, %v14846_v54 }
 0x52e   :  { %v6309_v40 = vadd.bf16 %v14817_v35, %v6144_v9  ;;  %v7580_v47 = vpack.c.bf16 %v6969_v30, %v6965_v25  ;;  %v6971_v14 = vpop.f32.mrb[167].mxu1  ;;  %5838 = vmatprep.mubr.bf16.mxu0 %v15890_v50  ;;  %9871 = vmatpush1.bf16.msra.mxu0 %v12090_v48 }
 0x52f   :  { %v5323_v22 = vrot.slane %v5302_v18, %v14846_v54  ;;  %v6436_v39 = vmax.bf16 %v15890_v50, %v6308_v45  ;;  %v7581_v23 = vpack.c.bf16 %v6971_v14, %v6967_v17  ;;  %v5331_v17 = vunpack.c.l.b16 %v5316_v43 }
 0x530   :  { %v6437_v12 = vmax.bf16 %v15890_v50, %v6309_v40  ;;  %v7745_v27 = vadd.bf16 %v14916_v46, %v7580_v47  ;;  %v5570_v36 = vpop.f32.mrb[136].mxu0  ;;  %7234 = vmatmul.mubr.bf16.gmra.mrb[16].mxu1 %v13735_v56  ;;  %v5332_v18 = vunpack.c.h.b16 %v5316_v43 }
 0x531   :  { %v5330_v44 = vrot.slane %v5323_v22, %v14846_v54  ;;  %v6556_v13 = vmax.bf16 %v14952_v15, %v6436_v39  ;;  %v7746_v28 = vadd.bf16 %v14921_v34, %v7581_v23  ;;  %v5572_v32 = vpop.f32.mrb[137].mxu0  ;;  %7243 = vmatprep.mubr.bf16.mxu1 %v15890_v50 }
 0x532   :  { %v6597_v58 = vmax.bf16 %v14956_v0, %v6437_v12  ;;  %v7873_v63 = vmax.bf16 %v15890_v50, %v7745_v27  ;;  %v5574_v20 = vpop.f32.mrb[138].mxu0 }
 0x533   :  { %v5333_v49 = vunpack.c.l.b16 %v5330_v44  ;;  %v5334_v25 = vunpack.c.h.b16 %v5330_v44  ;;  %v7874_v56 = vmax.bf16 %v15890_v50, %v7746_v28  ;;  %v6145_v16 = vpack.c.bf16 %v5574_v20, %v5570_v36  ;;  %v5576_v9 = vpop.f32.mrb[139].mxu0  ;;  %v6975_v15 = vpop.f32.mrb[168].mxu1 }
 0x534   :  { %v7997_v45 = vmax.bf16 %v14962_v61, %v7873_v63  ;;  %v6146_v30 = vpack.c.bf16 %v5576_v9, %v5572_v32  ;;  %v6977_v1 = vpop.f32.mrb[169].mxu1 }
 0x535   :  { %v5335_v60 = vrot.slane %v5333_v49, 7  ;;  %v5337_v0 = vrot.slane %v5334_v25, 7  ;;  %v8038_v40 = vmax.bf16 %v14965_v5, %v7874_v56  ;;  %v6310_v47 = vadd.bf16 %v14814_v42, %v6145_v16  ;;  %5839 = vmatmul.mubr.bf16.gmra.mrb[244].mxu0 %v13757_v52  ;;  %v6979_v14 = vpop.f32.mrb[170].mxu1 }
 0x536   :  { %v6311_v22 = vadd.bf16 %v14817_v35, %v6146_v30  ;;  %v7582_v39 = vpack.c.bf16 %v6979_v14, %v6975_v15  ;;  %v6981_v23 = vpop.f32.mrb[171].mxu1  ;;  %5848 = vmatprep.mubr.bf16.mxu0 %v15890_v50 }
 0x537   :  { %v5336_v61 = vsel %vm3891_vm3, %v5335_v60, %v5331_v17  ;;  %v5338_v43 = vsel %vm3891_vm3, %v5337_v0, %v5332_v18  ;;  %v6438_v12 = vmax.bf16 %v15890_v50, %v6310_v47  ;;  %v7583_v27 = vpack.c.bf16 %v6981_v23, %v6977_v1 }
 0x538   :  { %v5339_v36 = vpack.c.b16 %v5338_v43, %v5336_v61  ;;  %v6439_v5 = vmax.bf16 %v15890_v50, %v6311_v22  ;;  %v7747_v44 = vadd.bf16 %v14916_v46, %v7582_v39  ;;  %v5580_v28 = vpop.f32.mrb[140].mxu0  ;;  %7244 = vmatmul.mubr.bf16.gmra.mrb[20].mxu1 %v13733_v55 }
 0x539   :  { %v6557_v32 = vmax.bf16 %v6556_v13, %v6438_v12  ;;  %v7748_v48 = vadd.bf16 %v14921_v34, %v7583_v27  ;;  %v5582_v11 = vpop.f32.mrb[141].mxu0  ;;  %7253 = vmatprep.mubr.bf16.mxu1 %v15890_v50 }
 0x53a   :  { %v5346_v63 = vrot.slane %v5339_v36, %v13889_v37  ;;  %v6598_v20 = vmax.bf16 %v6597_v58, %v6439_v5  ;;  %v7875_v49 = vmax.bf16 %v15890_v50, %v7747_v44  ;;  %v5584_v25 = vpop.f32.mrb[142].mxu0 }
 0x53b   :  { %v7876_v56 = vmax.bf16 %v15890_v50, %v7748_v48  ;;  %v6147_v16 = vpack.c.bf16 %v5584_v25, %v5580_v28  ;;  %v5586_v9 = vpop.f32.mrb[143].mxu0  ;;  %v6985_v15 = vpop.f32.mrb[172].mxu1 }
 0x53c   :  { %11125 = vst.sshfl [vmem:[#allocation2 + $0x2] sm:$0x5 pattern:$0x73625140] %v5346_v63  ;;  %v7998_v17 = vmax.bf16 %v7997_v45, %v7875_v49  ;;  %v6148_v55 = vpack.c.bf16 %v5586_v9, %v5582_v11  ;;  %v6987_v13 = vpop.f32.mrb[173].mxu1 }
 0x53d   :  { %v8039_v18 = vmax.bf16 %v8038_v40, %v7876_v56  ;;  %v6312_v30 = vadd.bf16 %v14814_v42, %v6147_v16  ;;  %5849 = vmatmul.mubr.bf16.gmra.mrb[248].mxu0 %v13771_v21  ;;  %v6989_v1 = vpop.f32.mrb[174].mxu1 }
 0x53e   :  { %v6313_v58 = vadd.bf16 %v14817_v35, %v6148_v55  ;;  %v7584_v60 = vpack.c.bf16 %v6989_v1, %v6985_v15  ;;  %v6991_v0 = vpop.f32.mrb[175].mxu1  ;;  %5858 = vmatprep.mubr.bf16.mxu0 %v15890_v50 }
 0x53f   :  { %v6440_v47 = vmax.bf16 %v15890_v50, %v6312_v30  ;;  %v7585_v14 = vpack.c.bf16 %v6991_v0, %v6987_v13 }
 0x540   :  { %v6441_v22 = vmax.bf16 %v15890_v50, %v6313_v58  ;;  %v7749_v45 = vadd.bf16 %v14916_v46, %v7584_v60  ;;  %v5590_v39 = vpop.f32.mrb[144].mxu0  ;;  %7254 = vmatmul.mubr.bf16.gmra.mrb[24].mxu1 %v15931_v4 }
 0x541   :  { %v6558_v40 = vmax.bf16 %v6557_v32, %v6440_v47  ;;  %v7750_v23 = vadd.bf16 %v14921_v34, %v7585_v14  ;;  %v5592_v61 = vpop.f32.mrb[145].mxu0  ;;  %7263 = vmatprep.mubr.bf16.mxu1 %v15890_v50 }
 0x542   :  { %v6599_v43 = vmax.bf16 %v6598_v20, %v6441_v22  ;;  %v7877_v12 = vmax.bf16 %v15890_v50, %v7749_v45  ;;  %v5594_v27 = vpop.f32.mrb[146].mxu0 }
 0x543   :  { %v7878_v36 = vmax.bf16 %v15890_v50, %v7750_v23  ;;  %v6149_v5 = vpack.c.bf16 %v5594_v27, %v5590_v39  ;;  %v5596_v44 = vpop.f32.mrb[147].mxu0  ;;  %v6995_v28 = vpop.f32.mrb[176].mxu1 }
 0x544   :  { %v7999_v48 = vmax.bf16 %v7998_v17, %v7877_v12  ;;  %v6150_v11 = vpack.c.bf16 %v5596_v44, %v5592_v61  ;;  %v6997_v63 = vpop.f32.mrb[177].mxu1  ;;  %v12095_v12 = vld [vmem:[#allocation8 + $0x4c] ss:$16 sps:$4 sm:$0xff]  }
 0x545   :  { %v8040_v49 = vmax.bf16 %v8039_v18, %v7878_v36  ;;  %v6314_v4 = vadd.bf16 %v14814_v42, %v6149_v5  ;;  %5859 = vmatmul.mubr.bf16.gmra.mrb[252].mxu0 %v13769_v26  ;;  %v6999_v32 = vpop.f32.mrb[178].mxu1  ;;  %10032 = vmatprep.subr.bf16.mxu1 %v12095_v12 }
 0x546   :  { %v6315_v25 = vadd.bf16 %v14817_v35, %v6150_v11  ;;  %v7586_v20 = vpack.c.bf16 %v6999_v32, %v6995_v28  ;;  %v7001_v56 = vpop.f32.mrb[179].mxu1  ;;  %5868 = vmatprep.mubr.bf16.mxu0 %v15890_v50 }
 0x547   :  { %v6442_v16 = vmax.bf16 %v15890_v50, %v6314_v4  ;;  %v7587_v9 = vpack.c.bf16 %v7001_v56, %v6997_v63 }
 0x548   :  { %v6443_v15 = vmax.bf16 %v15890_v50, %v6315_v25  ;;  %v7751_v17 = vadd.bf16 %v14916_v46, %v7586_v20  ;;  %v5600_v55 = vpop.f32.mrb[148].mxu0  ;;  %7264 = vmatmul.mubr.bf16.gmra.mrb[28].mxu1 %v13745_v62  ;;  %v12096_v25 = vld [vmem:[#allocation8 + $0x80] ss:$16 sps:$4 sm:$0xff]   ;;  %v12098_v20 = vld [vmem:[#allocation8 + $0x84] ss:$16 sps:$4 sm:$0xff]  }
 0x549   :  { %v15021_v13 = vmax.bf16 %v6558_v40, %v6442_v16  ;;  %v7752_v18 = vadd.bf16 %v14921_v34, %v7587_v9  ;;  %v5602_v30 = vpop.f32.mrb[149].mxu0  ;;  %7273 = vmatprep.mubr.bf16.mxu1 %v15890_v50  ;;  %9872 = vmatprep.subr.bf16.mxu0 %v12098_v20 }
 0x54a   :  { %v15025_v1 = vmax.bf16 %v6599_v43, %v6443_v15  ;;  %v7879_v58 = vmax.bf16 %v15890_v50, %v7751_v17  ;;  %v5604_v60 = vpop.f32.mrb[150].mxu0  ;;  %v12093_v43 = vld [vmem:[#allocation8 + $0x48] ss:$16 sps:$4 sm:$0xff]   ;;  %9873 = vmatpush1.bf16.msra.mxu0 %v12096_v25 }
 0x54b   :  { %v7880_v0 = vmax.bf16 %v15890_v50, %v7752_v18  ;;  %v6151_v47 = vpack.c.bf16 %v5604_v60, %v5600_v55  ;;  %v5606_v14 = vpop.f32.mrb[151].mxu0  ;;  %v7005_v22 = vpop.f32.mrb[180].mxu1  ;;  %10033 = vmatpush1.bf16.msra.mxu1 %v12093_v43 }
 0x54c   :  { %v15029_v45 = vmax.bf16 %v7999_v48, %v7879_v58  ;;  %v6152_v62 = vpack.c.bf16 %v5606_v14, %v5602_v30  ;;  %v7007_v39 = vpop.f32.mrb[181].mxu1 }
 0x54d   :  { %v15031_v40 = vmax.bf16 %v8040_v49, %v7880_v0  ;;  %v6316_v23 = vadd.bf16 %v14814_v42, %v6151_v47  ;;  %5869 = vmatmul.mubr.bf16.gmra.mrb[0].mxu0 %v13783_v29  ;;  %v7009_v61 = vpop.f32.mrb[182].mxu1 }
 0x54e   :  { %v6317_v27 = vadd.bf16 %v14817_v35, %v6152_v62  ;;  %v7588_v36 = vpack.c.bf16 %v7009_v61, %v7005_v22  ;;  %v7011_v5 = vpop.f32.mrb[183].mxu1  ;;  %5878 = vmatprep.mubr.bf16.mxu0 %v15890_v50 }
 0x54f   :  { %v6444_v44 = vmax.bf16 %v15890_v50, %v6316_v23  ;;  %v7589_v28 = vpack.c.bf16 %v7011_v5, %v7007_v39 }
 0x550   :  { %v6445_v48 = vmax.bf16 %v15890_v50, %v6317_v27  ;;  %v7753_v11 = vadd.bf16 %v14916_v46, %v7588_v36  ;;  %v5610_v63 = vpop.f32.mrb[152].mxu0  ;;  %7274 = vmatmul.mubr.bf16.gmra.mrb[32].mxu1 %v13759_v31 }
 0x551   :  { %v6560_v49 = vmax.bf16 %v15021_v13, %v6444_v44  ;;  %v7754_v4 = vadd.bf16 %v14921_v34, %v7589_v28  ;;  %v5612_v32 = vpop.f32.mrb[153].mxu0  ;;  %7283 = vmatprep.mubr.bf16.mxu1 %v15890_v50 }
 0x552   :  { %v6601_v56 = vmax.bf16 %v15025_v1, %v6445_v48  ;;  %v7881_v16 = vmax.bf16 %v15890_v50, %v7753_v11  ;;  %v5614_v9 = vpop.f32.mrb[154].mxu0 }
 0x553   :  { %v7882_v15 = vmax.bf16 %v15890_v50, %v7754_v4  ;;  %v6153_v17 = vpack.c.bf16 %v5614_v9, %v5610_v63  ;;  %v5616_v55 = vpop.f32.mrb[155].mxu0  ;;  %v7015_v31 = vpop.f32.mrb[184].mxu1 }
 0x554   :  { %v8001_v13 = vmax.bf16 %v15029_v45, %v7881_v16  ;;  %v6154_v18 = vpack.c.bf16 %v5616_v55, %v5612_v32  ;;  %v7017_v30 = vpop.f32.mrb[185].mxu1 }
 0x555   :  { %v8042_v58 = vmax.bf16 %v15031_v40, %v7882_v15  ;;  %v6318_v60 = vadd.bf16 %v14814_v42, %v6153_v17  ;;  %5879 = vmatmul.mubr.bf16.gmra.mrb[4].mxu0 %v13781_v53  ;;  %v7019_v1 = vpop.f32.mrb[186].mxu1 }
 0x556   :  { %v6319_v0 = vadd.bf16 %v14817_v35, %v6154_v18  ;;  %v7590_v47 = vpack.c.bf16 %v7019_v1, %v7015_v31  ;;  %v7021_v14 = vpop.f32.mrb[187].mxu1  ;;  %5888 = vmatprep.mubr.bf16.mxu0 %v15890_v50 }
 0x557   :  { %v6446_v22 = vmax.bf16 %v15890_v50, %v6318_v60  ;;  %v7591_v62 = vpack.c.bf16 %v7021_v14, %v7017_v30 }
 0x558   :  { %v6447_v45 = vmax.bf16 %v15890_v50, %v6319_v0  ;;  %v7755_v39 = vadd.bf16 %v14916_v46, %v7590_v47  ;;  %v5620_v23 = vpop.f32.mrb[156].mxu0  ;;  %7284 = vmatmul.mubr.bf16.gmra.mrb[36].mxu1 %v13757_v52 }
 0x559   :  { %v6561_v40 = vmax.bf16 %v6560_v49, %v6446_v22  ;;  %v7756_v61 = vadd.bf16 %v14921_v34, %v7591_v62  ;;  %v5622_v43 = vpop.f32.mrb[157].mxu0  ;;  %7293 = vmatprep.mubr.bf16.mxu1 %v15890_v50 }
 0x55a   :  { %v6602_v12 = vmax.bf16 %v6601_v56, %v6447_v45  ;;  %v7883_v27 = vmax.bf16 %v15890_v50, %v7755_v39  ;;  %v5624_v36 = vpop.f32.mrb[158].mxu0 }
 0x55b   :  { %v7884_v5 = vmax.bf16 %v15890_v50, %v7756_v61  ;;  %v6155_v44 = vpack.c.bf16 %v5624_v36, %v5620_v23  ;;  %v5626_v28 = vpop.f32.mrb[159].mxu0  ;;  %v7025_v48 = vpop.f32.mrb[188].mxu1  ;;  %v15932_v23 = vld [vmem:[#allocation44_spill] sm:$0xff] }
 0x55c   :  { %v8002_v11 = vmax.bf16 %v8001_v13, %v7883_v27  ;;  %v6156_v63 = vpack.c.bf16 %v5626_v28, %v5622_v43  ;;  %v7027_v4 = vpop.f32.mrb[189].mxu1 }
 0x55d   :  { %v8043_v32 = vmax.bf16 %v8042_v58, %v7884_v5  ;;  %v6320_v52 = vadd.bf16 %v14814_v42, %v6155_v44  ;;  %5889 = vmatmul.mubr.bf16.gmra.mrb[8].mxu0 %v13795_v24  ;;  %v7029_v49 = vpop.f32.mrb[190].mxu1 }
 0x55e   :  { %v6321_v25 = vadd.bf16 %v14817_v35, %v6156_v63  ;;  %v7592_v20 = vpack.c.bf16 %v7029_v49, %v7025_v48  ;;  %v7031_v56 = vpop.f32.mrb[191].mxu1  ;;  %5898 = vmatprep.mubr.bf16.mxu0 %v15890_v50 }
 0x55f   :  { %v6448_v16 = vmax.bf16 %v15890_v50, %v6320_v52  ;;  %v7593_v9 = vpack.c.bf16 %v7031_v56, %v7027_v4 }
 0x560   :  { %v6449_v15 = vmax.bf16 %v15890_v50, %v6321_v25  ;;  %v7757_v17 = vadd.bf16 %v14916_v46, %v7592_v20  ;;  %v5630_v55 = vpop.f32.mrb[160].mxu0  ;;  %7294 = vmatmul.mubr.bf16.gmra.mrb[40].mxu1 %v13771_v21 }
 0x561   :  { %v6562_v31 = vmax.bf16 %v6561_v40, %v6448_v16  ;;  %v7758_v13 = vadd.bf16 %v14921_v34, %v7593_v9  ;;  %v5632_v18 = vpop.f32.mrb[161].mxu0  ;;  %7303 = vmatprep.mubr.bf16.mxu1 %v15890_v50 }
 0x562   :  { %v6603_v30 = vmax.bf16 %v6602_v12, %v6449_v15  ;;  %v7885_v58 = vmax.bf16 %v15890_v50, %v7757_v17  ;;  %v5634_v60 = vpop.f32.mrb[162].mxu0 }
 0x563   :  { %v7886_v1 = vmax.bf16 %v15890_v50, %v7758_v13  ;;  %v6157_v0 = vpack.c.bf16 %v5634_v60, %v5630_v55  ;;  %v5636_v47 = vpop.f32.mrb[163].mxu0  ;;  %v7035_v14 = vpop.f32.mrb[192].mxu1  ;;  %v15933_v55 = vld [vmem:[#allocation46_spill] sm:$0xff] }
 0x564   :  { %v8003_v22 = vmax.bf16 %v8002_v11, %v7885_v58  ;;  %v6158_v62 = vpack.c.bf16 %v5636_v47, %v5632_v18  ;;  %v7037_v45 = vpop.f32.mrb[193].mxu1  ;;  %v12099_v13 = vld [vmem:[#allocation8 + $0x68] ss:$16 sps:$4 sm:$0xff]   ;;  %v12101_v18 = vld [vmem:[#allocation8 + $0x6c] ss:$16 sps:$4 sm:$0xff]  }
 0x565   :  { %v8044_v39 = vmax.bf16 %v8043_v32, %v7886_v1  ;;  %v6322_v21 = vadd.bf16 %v14814_v42, %v6157_v0  ;;  %5899 = vmatmul.mubr.bf16.gmra.mrb[12].mxu0 %v15932_v23  ;;  %v7039_v40 = vpop.f32.mrb[194].mxu1  ;;  %10034 = vmatprep.subr.bf16.mxu1 %v12101_v18 }
 0x566   :  { %v6323_v61 = vadd.bf16 %v14817_v35, %v6158_v62  ;;  %v7594_v43 = vpack.c.bf16 %v7039_v40, %v7035_v14  ;;  %v7041_v12 = vpop.f32.mrb[195].mxu1  ;;  %5908 = vmatprep.mubr.bf16.mxu0 %v15890_v50  ;;  %10035 = vmatpush1.bf16.msra.mxu1 %v12099_v13 }
 0x567   :  { %v6450_v27 = vmax.bf16 %v15890_v50, %v6322_v21  ;;  %v7595_v36 = vpack.c.bf16 %v7041_v12, %v7037_v45 }
 0x568   :  { %v6451_v5 = vmax.bf16 %v15890_v50, %v6323_v61  ;;  %v7759_v44 = vadd.bf16 %v14916_v46, %v7594_v43  ;;  %v5640_v28 = vpop.f32.mrb[164].mxu0  ;;  %7304 = vmatmul.mubr.bf16.gmra.mrb[44].mxu1 %v13769_v26 }
 0x569   :  { %v6563_v48 = vmax.bf16 %v6562_v31, %v6450_v27  ;;  %v7760_v11 = vadd.bf16 %v14921_v34, %v7595_v36  ;;  %v5642_v63 = vpop.f32.mrb[165].mxu0  ;;  %7313 = vmatprep.mubr.bf16.mxu1 %v15890_v50 }
 0x56a   :  { %v6604_v4 = vmax.bf16 %v6603_v30, %v6451_v5  ;;  %v7887_v32 = vmax.bf16 %v15890_v50, %v7759_v44  ;;  %v5644_v52 = vpop.f32.mrb[166].mxu0 }
 0x56b   :  { %v7888_v49 = vmax.bf16 %v15890_v50, %v7760_v11  ;;  %v6159_v25 = vpack.c.bf16 %v5644_v52, %v5640_v28  ;;  %v5646_v20 = vpop.f32.mrb[167].mxu0  ;;  %v7045_v56 = vpop.f32.mrb[196].mxu1  ;;  %v15934_v11 = vld [vmem:[#allocation45_spill] sm:$0xff] }
 0x56c   :  { %v8004_v16 = vmax.bf16 %v8003_v22, %v7887_v32  ;;  %v6160_v9 = vpack.c.bf16 %v5646_v20, %v5642_v63  ;;  %v7047_v15 = vpop.f32.mrb[197].mxu1 }
 0x56d   :  { %v8045_v17 = vmax.bf16 %v8044_v39, %v7888_v49  ;;  %v6324_v26 = vadd.bf16 %v14814_v42, %v6159_v25  ;;  %5909 = vmatmul.mubr.bf16.gmra.mrb[16].mxu0 %v15933_v55  ;;  %v7049_v31 = vpop.f32.mrb[198].mxu1 }
 0x56e   :  { %v6325_v30 = vadd.bf16 %v14817_v35, %v6160_v9  ;;  %v7596_v58 = vpack.c.bf16 %v7049_v31, %v7045_v56  ;;  %v7051_v60 = vpop.f32.mrb[199].mxu1  ;;  %5918 = vmatprep.mubr.bf16.mxu0 %v15890_v50 }
 0x56f   :  { %v6452_v1 = vmax.bf16 %v15890_v50, %v6324_v26  ;;  %v7597_v0 = vpack.c.bf16 %v7051_v60, %v7047_v15 }
 0x570   :  { %v6453_v47 = vmax.bf16 %v15890_v50, %v6325_v30  ;;  %v7761_v14 = vadd.bf16 %v14916_v46, %v7596_v58  ;;  %v5650_v22 = vpop.f32.mrb[168].mxu0  ;;  %7314 = vmatmul.mubr.bf16.gmra.mrb[48].mxu1 %v13783_v29 }
 0x571   :  { %v6564_v62 = vmax.bf16 %v6563_v48, %v6452_v1  ;;  %v7762_v45 = vadd.bf16 %v14921_v34, %v7597_v0  ;;  %v5652_v39 = vpop.f32.mrb[169].mxu0  ;;  %7323 = vmatprep.mubr.bf16.mxu1 %v15890_v50 }
 0x572   :  { %v6605_v21 = vmax.bf16 %v6604_v4, %v6453_v47  ;;  %v7889_v40 = vmax.bf16 %v15890_v50, %v7761_v14  ;;  %v5654_v61 = vpop.f32.mrb[170].mxu0 }
 0x573   :  { %v7890_v43 = vmax.bf16 %v15890_v50, %v7762_v45  ;;  %v6161_v12 = vpack.c.bf16 %v5654_v61, %v5650_v22  ;;  %v5656_v27 = vpop.f32.mrb[171].mxu0  ;;  %v7055_v36 = vpop.f32.mrb[200].mxu1 }
 0x574   :  { %v8005_v5 = vmax.bf16 %v8004_v16, %v7889_v40  ;;  %v6162_v44 = vpack.c.bf16 %v5656_v27, %v5652_v39  ;;  %v7057_v28 = vpop.f32.mrb[201].mxu1 }
 0x575   :  { %v8046_v29 = vmax.bf16 %v8045_v17, %v7890_v43  ;;  %v6326_v48 = vadd.bf16 %v14814_v42, %v6161_v12  ;;  %5919 = vmatmul.mubr.bf16.gmra.mrb[20].mxu0 %v15934_v11  ;;  %v7059_v63 = vpop.f32.mrb[202].mxu1 }
 0x576   :  { %v6327_v32 = vadd.bf16 %v14817_v35, %v6162_v44  ;;  %v7598_v4 = vpack.c.bf16 %v7059_v63, %v7055_v36  ;;  %v7061_v52 = vpop.f32.mrb[203].mxu1  ;;  %5928 = vmatprep.mubr.bf16.mxu0 %v15890_v50 }
 0x577   :  { %v6454_v49 = vmax.bf16 %v15890_v50, %v6326_v48  ;;  %v7599_v25 = vpack.c.bf16 %v7061_v52, %v7057_v28  ;;  %v12102_v52 = vld [vmem:[#allocation8 + $0xa0] ss:$16 sps:$4 sm:$0xff]  }
 0x578   :  { %v6455_v20 = vmax.bf16 %v15890_v50, %v6327_v32  ;;  %v7763_v56 = vadd.bf16 %v14916_v46, %v7598_v4  ;;  %v5660_v16 = vpop.f32.mrb[172].mxu0  ;;  %7324 = vmatmul.mubr.bf16.gmra.mrb[52].mxu1 %v13781_v53 }
 0x579   :  { %v6565_v9 = vmax.bf16 %v6564_v62, %v6454_v49  ;;  %v7764_v15 = vadd.bf16 %v14921_v34, %v7599_v25  ;;  %v5662_v17 = vpop.f32.mrb[173].mxu0  ;;  %7333 = vmatprep.mubr.bf16.mxu1 %v15890_v50  ;;  %v12104_v49 = vld [vmem:[#allocation8 + $0xa4] ss:$16 sps:$4 sm:$0xff]  }
 0x57a   :  { %v6606_v26 = vmax.bf16 %v6605_v21, %v6455_v20  ;;  %v7891_v31 = vmax.bf16 %v15890_v50, %v7763_v56  ;;  %v5664_v13 = vpop.f32.mrb[174].mxu0  ;;  %9874 = vmatprep.subr.bf16.mxu0 %v12104_v49 }
 0x57b   :  { %v7892_v18 = vmax.bf16 %v15890_v50, %v7764_v15  ;;  %v6163_v30 = vpack.c.bf16 %v5664_v13, %v5660_v16  ;;  %v5666_v58 = vpop.f32.mrb[175].mxu0  ;;  %v7065_v60 = vpop.f32.mrb[204].mxu1  ;;  %9875 = vmatpush1.bf16.msra.mxu0 %v12102_v52 }
 0x57c   :  { %v8006_v1 = vmax.bf16 %v8005_v5, %v7891_v31  ;;  %v6164_v0 = vpack.c.bf16 %v5666_v58, %v5662_v17  ;;  %v7067_v47 = vpop.f32.mrb[205].mxu1 }
 0x57d   :  { %v8047_v14 = vmax.bf16 %v8046_v29, %v7892_v18  ;;  %v6328_v53 = vadd.bf16 %v14814_v42, %v6163_v30  ;;  %5929 = vmatmul.mubr.bf16.gmra.mrb[24].mxu0 %v13831_v10  ;;  %v7069_v22 = vpop.f32.mrb[206].mxu1 }
 0x57e   :  { %v6329_v62 = vadd.bf16 %v14817_v35, %v6164_v0  ;;  %v7600_v45 = vpack.c.bf16 %v7069_v22, %v7065_v60  ;;  %v7071_v39 = vpop.f32.mrb[207].mxu1  ;;  %5938 = vmatprep.mubr.bf16.mxu0 %v15890_v50 }
 0x57f   :  { %v6456_v21 = vmax.bf16 %v15890_v50, %v6328_v53  ;;  %v7601_v40 = vpack.c.bf16 %v7071_v39, %v7067_v47 }
 0x580   :  { %v6457_v61 = vmax.bf16 %v15890_v50, %v6329_v62  ;;  %v7765_v43 = vadd.bf16 %v14916_v46, %v7600_v45  ;;  %v5670_v12 = vpop.f32.mrb[176].mxu0  ;;  %7334 = vmatmul.mubr.bf16.gmra.mrb[56].mxu1 %v13795_v24 }
 0x581   :  { %v6566_v27 = vmax.bf16 %v6565_v9, %v6456_v21  ;;  %v7766_v36 = vadd.bf16 %v14921_v34, %v7601_v40  ;;  %v5672_v5 = vpop.f32.mrb[177].mxu0  ;;  %7343 = vmatprep.mubr.bf16.mxu1 %v15890_v50 }
 0x582   :  { %v6607_v44 = vmax.bf16 %v6606_v26, %v6457_v61  ;;  %v7893_v28 = vmax.bf16 %v15890_v50, %v7765_v43  ;;  %v5674_v29 = vpop.f32.mrb[178].mxu0 }
 0x583   :  { %v7894_v48 = vmax.bf16 %v15890_v50, %v7766_v36  ;;  %v6165_v63 = vpack.c.bf16 %v5674_v29, %v5670_v12  ;;  %v5676_v32 = vpop.f32.mrb[179].mxu0  ;;  %v7075_v4 = vpop.f32.mrb[208].mxu1 }
 0x584   :  { %v8007_v25 = vmax.bf16 %v8006_v1, %v7893_v28  ;;  %v6166_v20 = vpack.c.bf16 %v5676_v32, %v5672_v5  ;;  %v7077_v24 = vpop.f32.mrb[209].mxu1  ;;  %v12105_v32 = vld [vmem:[#allocation8 + $0x88] ss:$16 sps:$4 sm:$0xff]  }
 0x585   :  { %v8048_v56 = vmax.bf16 %v8047_v14, %v7894_v48  ;;  %v6330_v16 = vadd.bf16 %v14814_v42, %v6165_v63  ;;  %5939 = vmatmul.mubr.bf16.gmra.mrb[28].mxu0 %v13829_v7  ;;  %v7079_v9 = vpop.f32.mrb[210].mxu1 }
 0x586   :  { %v6331_v15 = vadd.bf16 %v14817_v35, %v6166_v20  ;;  %v7602_v17 = vpack.c.bf16 %v7079_v9, %v7075_v4  ;;  %v7081_v26 = vpop.f32.mrb[211].mxu1  ;;  %5948 = vmatprep.mubr.bf16.mxu0 %v15890_v50  ;;  %v12107_v4 = vld [vmem:[#allocation8 + $0x8c] ss:$16 sps:$4 sm:$0xff]   ;;  %v12108_v20 = vld [vmem:[#allocation8 + $0xc0] ss:$16 sps:$4 sm:$0xff]  }
 0x587   :  { %v6458_v31 = vmax.bf16 %v15890_v50, %v6330_v16  ;;  %v7603_v13 = vpack.c.bf16 %v7081_v26, %v7077_v24  ;;  %v12110_v24 = vld [vmem:[#allocation8 + $0xc4] ss:$16 sps:$4 sm:$0xff]   ;;  %10036 = vmatprep.subr.bf16.mxu1 %v12107_v4 }
 0x588   :  { %v6459_v18 = vmax.bf16 %v15890_v50, %v6331_v15  ;;  %v7767_v30 = vadd.bf16 %v14916_v46, %v7602_v17  ;;  %v5680_v58 = vpop.f32.mrb[180].mxu0  ;;  %7344 = vmatmul.mubr.bf16.gmra.mrb[60].mxu1 %v15932_v23  ;;  %9876 = vmatprep.subr.bf16.mxu0 %v12110_v24 }
 0x589   :  { %v15129_v60 = vmax.bf16 %v6566_v27, %v6458_v31  ;;  %v7768_v1 = vadd.bf16 %v14921_v34, %v7603_v13  ;;  %v5682_v0 = vpop.f32.mrb[181].mxu0  ;;  %7353 = vmatprep.mubr.bf16.mxu1 %v15890_v50  ;;  %10037 = vmatpush1.bf16.msra.mxu1 %v12105_v32 }
 0x58a   :  { %v15133_v47 = vmax.bf16 %v6607_v44, %v6459_v18  ;;  %v7895_v14 = vmax.bf16 %v15890_v50, %v7767_v30  ;;  %v5684_v53 = vpop.f32.mrb[182].mxu0  ;;  %9877 = vmatpush1.bf16.msra.mxu0 %v12108_v20 }
 0x58b   :  { %v7896_v22 = vmax.bf16 %v15890_v50, %v7768_v1  ;;  %v6167_v62 = vpack.c.bf16 %v5684_v53, %v5680_v58  ;;  %v5686_v45 = vpop.f32.mrb[183].mxu0  ;;  %v7085_v39 = vpop.f32.mrb[212].mxu1 }
 0x58c   :  { %v15137_v21 = vmax.bf16 %v8007_v25, %v7895_v14  ;;  %v6168_v23 = vpack.c.bf16 %v5686_v45, %v5682_v0  ;;  %v7087_v40 = vpop.f32.mrb[213].mxu1 }
 0x58d   :  { %v15139_v61 = vmax.bf16 %v8048_v56, %v7896_v22  ;;  %v6332_v43 = vadd.bf16 %v14814_v42, %v6167_v62  ;;  %5949 = vmatmul.mubr.bf16.gmra.mrb[32].mxu0 %v13843_v8  ;;  %v7089_v12 = vpop.f32.mrb[214].mxu1 }
 0x58e   :  { %v6333_v27 = vadd.bf16 %v14817_v35, %v6168_v23  ;;  %v7604_v36 = vpack.c.bf16 %v7089_v12, %v7085_v39  ;;  %v7091_v5 = vpop.f32.mrb[215].mxu1  ;;  %5958 = vmatprep.mubr.bf16.mxu0 %v15890_v50 }
 0x58f   :  { %v6460_v44 = vmax.bf16 %v15890_v50, %v6332_v43  ;;  %v7605_v28 = vpack.c.bf16 %v7091_v5, %v7087_v40 }
 0x590   :  { %v6461_v29 = vmax.bf16 %v15890_v50, %v6333_v27  ;;  %v7769_v48 = vadd.bf16 %v14916_v46, %v7604_v36  ;;  %v5690_v63 = vpop.f32.mrb[184].mxu0  ;;  %7354 = vmatmul.mubr.bf16.gmra.mrb[64].mxu1 %v15933_v55 }
 0x591   :  { %v6568_v52 = vmax.bf16 %v15129_v60, %v6460_v44  ;;  %v7770_v49 = vadd.bf16 %v14921_v34, %v7605_v28  ;;  %v5692_v25 = vpop.f32.mrb[185].mxu0  ;;  %7363 = vmatprep.mubr.bf16.mxu1 %v15890_v50 }
 0x592   :  { %v6609_v56 = vmax.bf16 %v15133_v47, %v6461_v29  ;;  %v7897_v16 = vmax.bf16 %v15890_v50, %v7769_v48  ;;  %v5694_v9 = vpop.f32.mrb[186].mxu0 }
 0x593   :  { %v7898_v15 = vmax.bf16 %v15890_v50, %v7770_v49  ;;  %v6169_v55 = vpack.c.bf16 %v5694_v9, %v5690_v63  ;;  %v5696_v17 = vpop.f32.mrb[187].mxu0  ;;  %v7095_v26 = vpop.f32.mrb[216].mxu1 }
 0x594   :  { %v8009_v31 = vmax.bf16 %v15137_v21, %v7897_v16  ;;  %v6170_v13 = vpack.c.bf16 %v5696_v17, %v5692_v25  ;;  %v7097_v18 = vpop.f32.mrb[217].mxu1 }
 0x595   :  { %v8050_v30 = vmax.bf16 %v15139_v61, %v7898_v15  ;;  %v6334_v58 = vadd.bf16 %v14814_v42, %v6169_v55  ;;  %5959 = vmatmul.mubr.bf16.gmra.mrb[36].mxu0 %v13841_v2  ;;  %v7099_v60 = vpop.f32.mrb[218].mxu1 }
 0x596   :  { %v6335_v1 = vadd.bf16 %v14817_v35, %v6170_v13  ;;  %v7606_v0 = vpack.c.bf16 %v7099_v60, %v7095_v26  ;;  %v7101_v47 = vpop.f32.mrb[219].mxu1  ;;  %5968 = vmatprep.mubr.bf16.mxu0 %v15890_v50 }
 0x597   :  { %v6462_v14 = vmax.bf16 %v15890_v50, %v6334_v58  ;;  %v7607_v53 = vpack.c.bf16 %v7101_v47, %v7097_v18 }
 0x598   :  { %v6463_v22 = vmax.bf16 %v15890_v50, %v6335_v1  ;;  %v7771_v62 = vadd.bf16 %v14916_v46, %v7606_v0  ;;  %v5700_v45 = vpop.f32.mrb[188].mxu0  ;;  %7364 = vmatmul.mubr.bf16.gmra.mrb[68].mxu1 %v15934_v11 }
 0x599   :  { %v6569_v39 = vmax.bf16 %v6568_v52, %v6462_v14  ;;  %v7772_v21 = vadd.bf16 %v14921_v34, %v7607_v53  ;;  %v5702_v23 = vpop.f32.mrb[189].mxu0  ;;  %7373 = vmatprep.mubr.bf16.mxu1 %v15890_v50 }
 0x59a   :  { %v6610_v40 = vmax.bf16 %v6609_v56, %v6463_v22  ;;  %v7899_v61 = vmax.bf16 %v15890_v50, %v7771_v62  ;;  %v5704_v43 = vpop.f32.mrb[190].mxu0 }
 0x59b   :  { %v7900_v12 = vmax.bf16 %v15890_v50, %v7772_v21  ;;  %v6171_v27 = vpack.c.bf16 %v5704_v43, %v5700_v45  ;;  %v5706_v36 = vpop.f32.mrb[191].mxu0  ;;  %v7105_v5 = vpop.f32.mrb[220].mxu1 }
 0x59c   :  { %v8010_v44 = vmax.bf16 %v8009_v31, %v7899_v61  ;;  %v6172_v28 = vpack.c.bf16 %v5706_v36, %v5702_v23  ;;  %v7107_v29 = vpop.f32.mrb[221].mxu1 }
 0x59d   :  { %v8051_v48 = vmax.bf16 %v8050_v30, %v7900_v12  ;;  %v6336_v11 = vadd.bf16 %v14814_v42, %v6171_v27  ;;  %5969 = vmatmul.mubr.bf16.gmra.mrb[40].mxu0 %v13855_v6  ;;  %v7109_v63 = vpop.f32.mrb[222].mxu1 }
 0x59e   :  { %v6337_v32 = vadd.bf16 %v14817_v35, %v6172_v28  ;;  %v7608_v4 = vpack.c.bf16 %v7109_v63, %v7105_v5  ;;  %v7111_v52 = vpop.f32.mrb[223].mxu1  ;;  %5978 = vmatprep.mubr.bf16.mxu0 %v15890_v50 }
 0x59f   :  { %v6464_v49 = vmax.bf16 %v15890_v50, %v6336_v11  ;;  %v7609_v25 = vpack.c.bf16 %v7111_v52, %v7107_v29 }
 0x5a0   :  { %v6465_v20 = vmax.bf16 %v15890_v50, %v6337_v32  ;;  %v7773_v24 = vadd.bf16 %v14916_v46, %v7608_v4  ;;  %v5710_v56 = vpop.f32.mrb[192].mxu0  ;;  %7374 = vmatmul.mubr.bf16.gmra.mrb[72].mxu1 %v13831_v10 }
 0x5a1   :  { %v6570_v16 = vmax.bf16 %v6569_v39, %v6464_v49  ;;  %v7774_v9 = vadd.bf16 %v14921_v34, %v7609_v25  ;;  %v5712_v15 = vpop.f32.mrb[193].mxu0  ;;  %7383 = vmatprep.mubr.bf16.mxu1 %v15890_v50 }
 0x5a2   :  { %v6611_v55 = vmax.bf16 %v6610_v40, %v6465_v20  ;;  %v7901_v17 = vmax.bf16 %v15890_v50, %v7773_v24  ;;  %v5714_v26 = vpop.f32.mrb[194].mxu0 }
 0x5a3   :  { %v7902_v31 = vmax.bf16 %v15890_v50, %v7774_v9  ;;  %v6173_v13 = vpack.c.bf16 %v5714_v26, %v5710_v56  ;;  %v5716_v18 = vpop.f32.mrb[195].mxu0  ;;  %v7115_v30 = vpop.f32.mrb[224].mxu1 }
 0x5a4   :  { %v8011_v58 = vmax.bf16 %v8010_v44, %v7901_v17  ;;  %v6174_v60 = vpack.c.bf16 %v5716_v18, %v5712_v15  ;;  %v7117_v1 = vpop.f32.mrb[225].mxu1 }
 0x5a5   :  { %v8052_v0 = vmax.bf16 %v8051_v48, %v7902_v31  ;;  %v6338_v10 = vadd.bf16 %v14814_v42, %v6173_v13  ;;  %5979 = vmatmul.mubr.bf16.gmra.mrb[44].mxu0 %v13853_v3  ;;  %v7119_v47 = vpop.f32.mrb[226].mxu1 }
 0x5a6   :  { %v6339_v14 = vadd.bf16 %v14817_v35, %v6174_v60  ;;  %v7610_v53 = vpack.c.bf16 %v7119_v47, %v7115_v30  ;;  %v7121_v22 = vpop.f32.mrb[227].mxu1  ;;  %5988 = vmatprep.mubr.bf16.mxu0 %v15890_v50 }
 0x5a7   :  { %v6466_v62 = vmax.bf16 %v15890_v50, %v6338_v10  ;;  %v7611_v45 = vpack.c.bf16 %v7121_v22, %v7117_v1  ;;  %v12111_v1 = vld [vmem:[#allocation8 + $0xa8] ss:$16 sps:$4 sm:$0xff]  }
 0x5a8   :  { %v6467_v39 = vmax.bf16 %v15890_v50, %v6339_v14  ;;  %v7775_v21 = vadd.bf16 %v14916_v46, %v7610_v53  ;;  %v5720_v23 = vpop.f32.mrb[196].mxu0  ;;  %7384 = vmatmul.mubr.bf16.gmra.mrb[76].mxu1 %v13829_v7  ;;  %v12114_v14 = vld [vmem:[#allocation8 + $0xe0] ss:$16 sps:$4 sm:$0xff]   ;;  %v12116_v53 = vld [vmem:[#allocation8 + $0xe4] ss:$16 sps:$4 sm:$0xff]  }
 0x5a9   :  { %v15189_v40 = vmax.bf16 %v6570_v16, %v6466_v62  ;;  %v7776_v61 = vadd.bf16 %v14921_v34, %v7611_v45  ;;  %v5722_v43 = vpop.f32.mrb[197].mxu0  ;;  %7393 = vmatprep.mubr.bf16.mxu1 %v15890_v50  ;;  %9878 = vmatprep.subr.bf16.mxu0 %v12116_v53 }
 0x5aa   :  { %v15193_v12 = vmax.bf16 %v6611_v55, %v6467_v39  ;;  %v7903_v27 = vmax.bf16 %v15890_v50, %v7775_v21  ;;  %v5724_v36 = vpop.f32.mrb[198].mxu0  ;;  %9879 = vmatpush1.bf16.msra.mxu0 %v12114_v14 }
 0x5ab   :  { %v7904_v5 = vmax.bf16 %v15890_v50, %v7776_v61  ;;  %v6175_v44 = vpack.c.bf16 %v5724_v36, %v5720_v23  ;;  %v5726_v28 = vpop.f32.mrb[199].mxu0  ;;  %v7125_v29 = vpop.f32.mrb[228].mxu1 }
 0x5ac   :  { %v15197_v48 = vmax.bf16 %v8011_v58, %v7903_v27  ;;  %v6176_v7 = vpack.c.bf16 %v5726_v28, %v5722_v43  ;;  %v7127_v11 = vpop.f32.mrb[229].mxu1 }
 0x5ad   :  { %v15199_v63 = vmax.bf16 %v8052_v0, %v7904_v5  ;;  %v6340_v32 = vadd.bf16 %v14814_v42, %v6175_v44  ;;  %5989 = vmatmul.mubr.bf16.gmra.mrb[48].mxu0 %v13867_v51  ;;  %v7129_v4 = vpop.f32.mrb[230].mxu1  ;;  %v12113_v0 = vld [vmem:[#allocation8 + $0xac] ss:$16 sps:$4 sm:$0xff]  }
 0x5ae   :  { %v6341_v52 = vadd.bf16 %v14817_v35, %v6176_v7  ;;  %v7612_v49 = vpack.c.bf16 %v7129_v4, %v7125_v29  ;;  %v7131_v25 = vpop.f32.mrb[231].mxu1  ;;  %5998 = vmatprep.mubr.bf16.mxu0 %v15890_v50  ;;  %10038 = vmatprep.subr.bf16.mxu1 %v12113_v0 }
 0x5af   :  { %v6468_v20 = vmax.bf16 %v15890_v50, %v6340_v32  ;;  %v7613_v24 = vpack.c.bf16 %v7131_v25, %v7127_v11  ;;  %10039 = vmatpush1.bf16.msra.mxu1 %v12111_v1 }
 0x5b0   :  { %v6469_v56 = vmax.bf16 %v15890_v50, %v6341_v52  ;;  %v7777_v16 = vadd.bf16 %v14916_v46, %v7612_v49  ;;  %v5730_v9 = vpop.f32.mrb[200].mxu0  ;;  %7394 = vmatmul.mubr.bf16.gmra.mrb[80].mxu1 %v13843_v8 }
 0x5b1   :  { %v6572_v15 = vmax.bf16 %v15189_v40, %v6468_v20  ;;  %v7778_v55 = vadd.bf16 %v14921_v34, %v7613_v24  ;;  %v5732_v17 = vpop.f32.mrb[201].mxu0  ;;  %7403 = vmatprep.mubr.bf16.mxu1 %v15890_v50 }
 0x5b2   :  { %v6613_v26 = vmax.bf16 %v15193_v12, %v6469_v56  ;;  %v7905_v31 = vmax.bf16 %v15890_v50, %v7777_v16  ;;  %v5734_v13 = vpop.f32.mrb[202].mxu0 }
 0x5b3   :  { %v7906_v18 = vmax.bf16 %v15890_v50, %v7778_v55  ;;  %v6177_v30 = vpack.c.bf16 %v5734_v13, %v5730_v9  ;;  %v5736_v58 = vpop.f32.mrb[203].mxu0  ;;  %v7135_v60 = vpop.f32.mrb[232].mxu1 }
 0x5b4   :  { %v8013_v8 = vmax.bf16 %v15197_v48, %v7905_v31  ;;  %v6178_v10 = vpack.c.bf16 %v5736_v58, %v5732_v17  ;;  %v7137_v47 = vpop.f32.mrb[233].mxu1 }
 0x5b5   :  { %v8054_v22 = vmax.bf16 %v15199_v63, %v7906_v18  ;;  %v6342_v62 = vadd.bf16 %v14814_v42, %v6177_v30  ;;  %5999 = vmatmul.mubr.bf16.gmra.mrb[52].mxu0 %v13865_v41  ;;  %v7139_v45 = vpop.f32.mrb[234].mxu1 }
 0x5b6   :  { %v6343_v39 = vadd.bf16 %v14817_v35, %v6178_v10  ;;  %v7614_v21 = vpack.c.bf16 %v7139_v45, %v7135_v60  ;;  %v7141_v23 = vpop.f32.mrb[235].mxu1  ;;  %6008 = vmatprep.mubr.bf16.mxu0 %v15890_v50 }
 0x5b7   :  { %v6470_v40 = vmax.bf16 %v15890_v50, %v6342_v62  ;;  %v7615_v61 = vpack.c.bf16 %v7141_v23, %v7137_v47  ;;  %v15935_v62 = vld [vmem:[#allocation48_spill] sm:$0xff] }
 0x5b8   :  { %v6471_v43 = vmax.bf16 %v15890_v50, %v6343_v39  ;;  %v7779_v12 = vadd.bf16 %v14916_v46, %v7614_v21  ;;  %v5740_v27 = vpop.f32.mrb[204].mxu0  ;;  %7404 = vmatmul.mubr.bf16.gmra.mrb[84].mxu1 %v13841_v2 }
 0x5b9   :  { %v6573_v36 = vmax.bf16 %v6572_v15, %v6470_v40  ;;  %v7780_v5 = vadd.bf16 %v14921_v34, %v7615_v61  ;;  %v5742_v44 = vpop.f32.mrb[205].mxu0  ;;  %7413 = vmatprep.mubr.bf16.mxu1 %v15890_v50 }
 0x5ba   :  { %v6614_v28 = vmax.bf16 %v6613_v26, %v6471_v43  ;;  %v7907_v29 = vmax.bf16 %v15890_v50, %v7779_v12  ;;  %v5744_v48 = vpop.f32.mrb[206].mxu0 }
 0x5bb   :  { %v7908_v7 = vmax.bf16 %v15890_v50, %v7780_v5  ;;  %v6179_v11 = vpack.c.bf16 %v5744_v48, %v5740_v27  ;;  %v5746_v63 = vpop.f32.mrb[207].mxu0  ;;  %v7145_v32 = vpop.f32.mrb[236].mxu1 }
 0x5bc   :  { %v8014_v4 = vmax.bf16 %v8013_v8, %v7907_v29  ;;  %v6180_v52 = vpack.c.bf16 %v5746_v63, %v5742_v44  ;;  %v7147_v49 = vpop.f32.mrb[237].mxu1 }
 0x5bd   :  { %v8055_v25 = vmax.bf16 %v8054_v22, %v7908_v7  ;;  %v6344_v2 = vadd.bf16 %v14814_v42, %v6179_v11  ;;  %6009 = vmatmul.mubr.bf16.gmra.mrb[56].mxu0 %v13886_v59  ;;  %v7149_v20 = vpop.f32.mrb[238].mxu1 }
 0x5be   :  { %v6345_v24 = vadd.bf16 %v14817_v35, %v6180_v52  ;;  %v7616_v56 = vpack.c.bf16 %v7149_v20, %v7145_v32  ;;  %v7151_v16 = vpop.f32.mrb[239].mxu1  ;;  %6018 = vmatprep.mubr.bf16.mxu0 %v15890_v50 }
 0x5bf   :  { %v6472_v9 = vmax.bf16 %v15890_v50, %v6344_v2  ;;  %v7617_v15 = vpack.c.bf16 %v7151_v16, %v7147_v49  ;;  %v15936_v2 = vld [vmem:[#allocation50_spill] sm:$0xff] }
 0x5c0   :  { %v6473_v55 = vmax.bf16 %v15890_v50, %v6345_v24  ;;  %v7781_v17 = vadd.bf16 %v14916_v46, %v7616_v56  ;;  %v5750_v26 = vpop.f32.mrb[208].mxu0  ;;  %7414 = vmatmul.mubr.bf16.gmra.mrb[88].mxu1 %v13855_v6  ;;  %v12117_v24 = vld [vmem:[#allocation8 + $0xc8] ss:$16 sps:$4 sm:$0xff]   ;;  %v12119_v56 = vld [vmem:[#allocation8 + $0xcc] ss:$16 sps:$4 sm:$0xff]  }
 0x5c1   :  { %v6574_v31 = vmax.bf16 %v6573_v36, %v6472_v9  ;;  %v7782_v13 = vadd.bf16 %v14921_v34, %v7617_v15  ;;  %v5752_v18 = vpop.f32.mrb[209].mxu0  ;;  %7423 = vmatprep.mubr.bf16.mxu1 %v15890_v50  ;;  %10040 = vmatprep.subr.bf16.mxu1 %v12119_v56 }
 0x5c2   :  { %v6615_v30 = vmax.bf16 %v6614_v28, %v6473_v55  ;;  %v7909_v58 = vmax.bf16 %v15890_v50, %v7781_v17  ;;  %v5754_v60 = vpop.f32.mrb[210].mxu0  ;;  %10041 = vmatpush1.bf16.msra.mxu1 %v12117_v24 }
 0x5c3   :  { %v7910_v1 = vmax.bf16 %v15890_v50, %v7782_v13  ;;  %v6181_v0 = vpack.c.bf16 %v5754_v60, %v5750_v26  ;;  %v5756_v8 = vpop.f32.mrb[211].mxu0  ;;  %v7155_v10 = vpop.f32.mrb[240].mxu1  ;;  %v12120_v60 = vld [vmem:[#allocation8 + $0x100] ss:$16 sps:$4 sm:$0xff]  }
 0x5c4   :  { %v8015_v47 = vmax.bf16 %v8014_v4, %v7909_v58  ;;  %v6182_v14 = vpack.c.bf16 %v5756_v8, %v5752_v18  ;;  %v7157_v53 = vpop.f32.mrb[241].mxu1 }
 0x5c5   :  { %v8056_v22 = vmax.bf16 %v8055_v25, %v7910_v1  ;;  %v6346_v6 = vadd.bf16 %v14814_v42, %v6181_v0  ;;  %6019 = vmatmul.mubr.bf16.gmra.mrb[60].mxu0 %v15935_v62  ;;  %v7159_v45 = vpop.f32.mrb[242].mxu1  ;;  %v12122_v1 = vld [vmem:[#allocation8 + $0x104] ss:$16 sps:$4 sm:$0xff]  }
 0x5c6   :  { %v6347_v39 = vadd.bf16 %v14817_v35, %v6182_v14  ;;  %v7618_v21 = vpack.c.bf16 %v7159_v45, %v7155_v10  ;;  %v7161_v23 = vpop.f32.mrb[243].mxu1  ;;  %6028 = vmatprep.mubr.bf16.mxu0 %v15890_v50  ;;  %9880 = vmatprep.subr.bf16.mxu0 %v12122_v1 }
 0x5c7   :  { %v6474_v40 = vmax.bf16 %v15890_v50, %v6346_v6  ;;  %v7619_v61 = vpack.c.bf16 %v7161_v23, %v7157_v53  ;;  %9881 = vmatpush1.bf16.msra.mxu0 %v12120_v60  ;;  %v15937_v23 = vld [vmem:[#allocation49_spill] sm:$0xff] }
 0x5c8   :  { %v6475_v43 = vmax.bf16 %v15890_v50, %v6347_v39  ;;  %v7783_v12 = vadd.bf16 %v14916_v46, %v7618_v21  ;;  %v5760_v27 = vpop.f32.mrb[212].mxu0  ;;  %7424 = vmatmul.mubr.bf16.gmra.mrb[92].mxu1 %v13853_v3 }
 0x5c9   :  { %v15249_v36 = vmax.bf16 %v6574_v31, %v6474_v40  ;;  %v7784_v5 = vadd.bf16 %v14921_v34, %v7619_v61  ;;  %v5762_v44 = vpop.f32.mrb[213].mxu0  ;;  %7433 = vmatprep.mubr.bf16.mxu1 %v15890_v50 }
 0x5ca   :  { %v15253_v28 = vmax.bf16 %v6615_v30, %v6475_v43  ;;  %v7911_v29 = vmax.bf16 %v15890_v50, %v7783_v12  ;;  %v5764_v48 = vpop.f32.mrb[214].mxu0 }
 0x5cb   :  { %v7912_v7 = vmax.bf16 %v15890_v50, %v7784_v5  ;;  %v6183_v11 = vpack.c.bf16 %v5764_v48, %v5760_v27  ;;  %v5766_v63 = vpop.f32.mrb[215].mxu0  ;;  %v7165_v32 = vpop.f32.mrb[244].mxu1 }
 0x5cc   :  { %v15257_v4 = vmax.bf16 %v8015_v47, %v7911_v29  ;;  %v6184_v3 = vpack.c.bf16 %v5766_v63, %v5762_v44  ;;  %v7167_v52 = vpop.f32.mrb[245].mxu1 }
 0x5cd   :  { %v15259_v49 = vmax.bf16 %v8056_v22, %v7912_v7  ;;  %v6348_v25 = vadd.bf16 %v14814_v42, %v6183_v11  ;;  %6029 = vmatmul.mubr.bf16.gmra.mrb[64].mxu0 %v15936_v2  ;;  %v7169_v20 = vpop.f32.mrb[246].mxu1 }
 0x5ce   :  { %v6349_v16 = vadd.bf16 %v14817_v35, %v6184_v3  ;;  %v7620_v9 = vpack.c.bf16 %v7169_v20, %v7165_v32  ;;  %v7171_v15 = vpop.f32.mrb[247].mxu1  ;;  %6038 = vmatprep.mubr.bf16.mxu0 %v15890_v50 }
 0x5cf   :  { %v6476_v55 = vmax.bf16 %v15890_v50, %v6348_v25  ;;  %v7621_v17 = vpack.c.bf16 %v7171_v15, %v7167_v52 }
 0x5d0   :  { %v6477_v26 = vmax.bf16 %v15890_v50, %v6349_v16  ;;  %v7785_v31 = vadd.bf16 %v14916_v46, %v7620_v9  ;;  %v5770_v13 = vpop.f32.mrb[216].mxu0  ;;  %7434 = vmatmul.mubr.bf16.gmra.mrb[96].mxu1 %v13867_v51  ;;  %v15938_v16 = vld [vmem:[#allocation53_spill] sm:$0xff] }
 0x5d1   :  { %v6576_v18 = vmax.bf16 %v15249_v36, %v6476_v55  ;;  %v7786_v30 = vadd.bf16 %v14921_v34, %v7621_v17  ;;  %v5772_v58 = vpop.f32.mrb[217].mxu0  ;;  %7443 = vmatprep.mubr.bf16.mxu1 %v15890_v50 }
 0x5d2   :  { %v6617_v0 = vmax.bf16 %v15253_v28, %v6477_v26  ;;  %v7913_v8 = vmax.bf16 %v15890_v50, %v7785_v31  ;;  %v5774_v10 = vpop.f32.mrb[218].mxu0 }
 0x5d3   :  { %v7914_v47 = vmax.bf16 %v15890_v50, %v7786_v30  ;;  %v6185_v14 = vpack.c.bf16 %v5774_v10, %v5770_v13  ;;  %v5776_v53 = vpop.f32.mrb[219].mxu0  ;;  %v7175_v51 = vpop.f32.mrb[248].mxu1 }
 0x5d4   :  { %v8017_v22 = vmax.bf16 %v15257_v4, %v7913_v8  ;;  %v6186_v6 = vpack.c.bf16 %v5776_v53, %v5772_v58  ;;  %v7177_v45 = vpop.f32.mrb[249].mxu1 }
 0x5d5   :  { %v8058_v39 = vmax.bf16 %v15259_v49, %v7914_v47  ;;  %v6350_v21 = vadd.bf16 %v14814_v42, %v6185_v14  ;;  %6039 = vmatmul.mubr.bf16.gmra.mrb[68].mxu0 %v15937_v23  ;;  %v7179_v40 = vpop.f32.mrb[250].mxu1 }
 0x5d6   :  { %v6351_v61 = vadd.bf16 %v14817_v35, %v6186_v6  ;;  %v7622_v43 = vpack.c.bf16 %v7179_v40, %v7175_v51  ;;  %v7181_v12 = vpop.f32.mrb[251].mxu1  ;;  %6048 = vmatprep.mubr.bf16.mxu0 %v15890_v50 }
 0x5d7   :  { %v6478_v27 = vmax.bf16 %v15890_v50, %v6350_v21  ;;  %v7623_v36 = vpack.c.bf16 %v7181_v12, %v7177_v45  ;;  %v15939_v21 = vld [vmem:[#allocation52_spill] sm:$0xff] }
 0x5d8   :  { %v6479_v5 = vmax.bf16 %v15890_v50, %v6351_v61  ;;  %v7787_v44 = vadd.bf16 %v14916_v46, %v7622_v43  ;;  %v5780_v28 = vpop.f32.mrb[220].mxu0  ;;  %7444 = vmatmul.mubr.bf16.gmra.mrb[100].mxu1 %v13865_v41 }
 0x5d9   :  { %v6577_v29 = vmax.bf16 %v6576_v18, %v6478_v27  ;;  %v7788_v48 = vadd.bf16 %v14921_v34, %v7623_v36  ;;  %v5782_v7 = vpop.f32.mrb[221].mxu0  ;;  %7453 = vmatprep.mubr.bf16.mxu1 %v15890_v50 }
 0x5da   :  { %v6618_v11 = vmax.bf16 %v6617_v0, %v6479_v5  ;;  %v7915_v63 = vmax.bf16 %v15890_v50, %v7787_v44  ;;  %v5784_v32 = vpop.f32.mrb[222].mxu0 }
 0x5db   :  { %v7916_v4 = vmax.bf16 %v15890_v50, %v7788_v48  ;;  %v6187_v3 = vpack.c.bf16 %v5784_v32, %v5780_v28  ;;  %v5786_v52 = vpop.f32.mrb[223].mxu0  ;;  %v7185_v49 = vpop.f32.mrb[252].mxu1 }
 0x5dc   :  { %v8018_v25 = vmax.bf16 %v8017_v22, %v7915_v63  ;;  %v6188_v20 = vpack.c.bf16 %v5786_v52, %v5782_v7  ;;  %v7187_v24 = vpop.f32.mrb[253].mxu1 }
 0x5dd   :  { %v8059_v56 = vmax.bf16 %v8058_v39, %v7916_v4  ;;  %v6352_v41 = vadd.bf16 %v14814_v42, %v6187_v3  ;;  %6049 = vmatmul.mubr.bf16.gmra.mrb[72].mxu0 %v15938_v16  ;;  %v7189_v9 = vpop.f32.mrb[254].mxu1 }
 0x5de   :  { %v6353_v15 = vadd.bf16 %v14817_v35, %v6188_v20  ;;  %v7624_v55 = vpack.c.bf16 %v7189_v9, %v7185_v49  ;;  %v7191_v17 = vpop.f32.mrb[255].mxu1  ;;  %6058 = vmatprep.mubr.bf16.mxu0 %v15890_v50 }
 0x5df   :  { %v6480_v26 = vmax.bf16 %v15890_v50, %v6352_v41  ;;  %v7625_v31 = vpack.c.bf16 %v7191_v17, %v7187_v24  ;;  %v15940_v41 = vld [vmem:[#allocation55_spill] sm:$0xff] }
 0x5e0   :  { %v6481_v13 = vmax.bf16 %v15890_v50, %v6353_v15  ;;  %v7789_v18 = vadd.bf16 %v14916_v46, %v7624_v55  ;;  %v5790_v30 = vpop.f32.mrb[224].mxu0  ;;  %7454 = vmatmul.mubr.bf16.gmra.mrb[104].mxu1 %v13886_v59  ;;  %v12123_v15 = vld [vmem:[#allocation8 + $0xe8] ss:$16 sps:$4 sm:$0xff]   ;;  %v12125_v55 = vld [vmem:[#allocation8 + $0xec] ss:$16 sps:$4 sm:$0xff]  }
 0x5e1   :  { %v6578_v58 = vmax.bf16 %v6577_v29, %v6480_v26  ;;  %v7790_v60 = vadd.bf16 %v14921_v34, %v7625_v31  ;;  %v5792_v1 = vpop.f32.mrb[225].mxu0  ;;  %7463 = vmatprep.mubr.bf16.mxu1 %v15890_v50  ;;  %10042 = vmatprep.subr.bf16.mxu1 %v12125_v55 }
 0x5e2   :  { %v6619_v0 = vmax.bf16 %v6618_v11, %v6481_v13  ;;  %v7917_v8 = vmax.bf16 %v15890_v50, %v7789_v18  ;;  %v5794_v10 = vpop.f32.mrb[226].mxu0  ;;  %10043 = vmatpush1.bf16.msra.mxu1 %v12123_v15 }
 0x5e3   :  { %v7918_v47 = vmax.bf16 %v15890_v50, %v7790_v60  ;;  %v6189_v14 = vpack.c.bf16 %v5794_v10, %v5790_v30  ;;  %v5796_v53 = vpop.f32.mrb[227].mxu0  ;;  %v7195_v51 = vpop.f32.mrb[0].mxu1  ;;  %v12126_v10 = vld [vmem:[#allocation8 + $0x120] ss:$16 sps:$4 sm:$0xff]  }
 0x5e4   :  { %v8019_v22 = vmax.bf16 %v8018_v25, %v7917_v8  ;;  %v6190_v6 = vpack.c.bf16 %v5796_v53, %v5792_v1  ;;  %v7197_v45 = vpop.f32.mrb[1].mxu1 }
 0x5e5   :  { %v8060_v39 = vmax.bf16 %v8059_v56, %v7918_v47  ;;  %v6354_v59 = vadd.bf16 %v14814_v42, %v6189_v14  ;;  %6059 = vmatmul.mubr.bf16.gmra.mrb[76].mxu0 %v15939_v21  ;;  %v7199_v40 = vpop.f32.mrb[2].mxu1  ;;  %v12128_v47 = vld [vmem:[#allocation8 + $0x124] ss:$16 sps:$4 sm:$0xff]  }
 0x5e6   :  { %v6355_v61 = vadd.bf16 %v14817_v35, %v6190_v6  ;;  %v7626_v43 = vpack.c.bf16 %v7199_v40, %v7195_v51  ;;  %v7201_v12 = vpop.f32.mrb[3].mxu1  ;;  %6068 = vmatprep.mubr.bf16.mxu0 %v15890_v50  ;;  %9882 = vmatprep.subr.bf16.mxu0 %v12128_v47 }
 0x5e7   :  { %v6482_v27 = vmax.bf16 %v15890_v50, %v6354_v59  ;;  %v7627_v36 = vpack.c.bf16 %v7201_v12, %v7197_v45  ;;  %9883 = vmatpush1.bf16.msra.mxu0 %v12126_v10 }
 0x5e8   :  { %v6483_v5 = vmax.bf16 %v15890_v50, %v6355_v61  ;;  %v7791_v44 = vadd.bf16 %v14916_v46, %v7626_v43  ;;  %v5800_v28 = vpop.f32.mrb[228].mxu0  ;;  %7464 = vmatmul.mubr.bf16.gmra.mrb[108].mxu1 %v15935_v62 }
 0x5e9   :  { %v6579_v29 = vmax.bf16 %v6578_v58, %v6482_v27  ;;  %v7792_v48 = vadd.bf16 %v14921_v34, %v7627_v36  ;;  %v5802_v7 = vpop.f32.mrb[229].mxu0  ;;  %7473 = vmatprep.mubr.bf16.mxu1 %v15890_v50 }
 0x5ea   :  { %v6620_v11 = vmax.bf16 %v6619_v0, %v6483_v5  ;;  %v7919_v63 = vmax.bf16 %v15890_v50, %v7791_v44  ;;  %v5804_v32 = vpop.f32.mrb[230].mxu0  ;;  %v15941_v44 = vld [vmem:[#allocation54_spill] sm:$0xff] }
 0x5eb   :  { %v7920_v4 = vmax.bf16 %v15890_v50, %v7792_v48  ;;  %v6191_v3 = vpack.c.bf16 %v5804_v32, %v5800_v28  ;;  %v5806_v52 = vpop.f32.mrb[231].mxu0  ;;  %v7205_v49 = vpop.f32.mrb[4].mxu1 }
 0x5ec   :  { %v15313_v25 = vmax.bf16 %v8019_v22, %v7919_v63  ;;  %v6192_v20 = vpack.c.bf16 %v5806_v52, %v5802_v7  ;;  %v7207_v24 = vpop.f32.mrb[5].mxu1 }
 0x5ed   :  { %v15315_v62 = vmax.bf16 %v8060_v39, %v7920_v4  ;;  %v6356_v56 = vadd.bf16 %v14814_v42, %v6191_v3  ;;  %6069 = vmatmul.mubr.bf16.gmra.mrb[80].mxu0 %v15940_v41  ;;  %v7209_v9 = vpop.f32.mrb[6].mxu1 }
 0x5ee   :  { %v6357_v17 = vadd.bf16 %v14817_v35, %v6192_v20  ;;  %v7628_v26 = vpack.c.bf16 %v7209_v9, %v7205_v49  ;;  %v7211_v31 = vpop.f32.mrb[7].mxu1  ;;  %6078 = vmatprep.mubr.bf16.mxu0 %v15890_v50 }
 0x5ef   :  { %v6484_v13 = vmax.bf16 %v15890_v50, %v6356_v56  ;;  %v7629_v18 = vpack.c.bf16 %v7211_v31, %v7207_v24 }
 0x5f0   :  { %v6485_v30 = vmax.bf16 %v15890_v50, %v6357_v17  ;;  %v7793_v58 = vadd.bf16 %v14916_v46, %v7628_v26  ;;  %v5810_v60 = vpop.f32.mrb[232].mxu0  ;;  %7474 = vmatmul.mubr.bf16.gmra.mrb[112].mxu1 %v15936_v2 }
 0x5f1   :  { %v6580_v1 = vmax.bf16 %v6579_v29, %v6484_v13  ;;  %v7794_v0 = vadd.bf16 %v14921_v34, %v7629_v18  ;;  %v5812_v8 = vpop.f32.mrb[233].mxu0  ;;  %7483 = vmatprep.mubr.bf16.mxu1 %v15890_v50 }
 0x5f2   :  { %v6621_v14 = vmax.bf16 %v6620_v11, %v6485_v30  ;;  %v7921_v53 = vmax.bf16 %v15890_v50, %v7793_v58  ;;  %v5814_v51 = vpop.f32.mrb[234].mxu0 }
 0x5f3   :  { %v6581_v22 = vunpack.i.l.bf16 %v6580_v1  ;;  %v6582_v6 = vunpack.i.h.bf16 %v6580_v1  ;;  %v7922_v45 = vmax.bf16 %v15890_v50, %v7794_v0  ;;  %v6193_v39 = vpack.c.bf16 %v5814_v51, %v5810_v60  ;;  %v5816_v59 = vpop.f32.mrb[235].mxu0  ;;  %v7215_v2 = vpop.f32.mrb[8].mxu1  ;;  %v15942_v0 = vld [vmem:[#allocation56_spill] sm:$0xff] }
 0x5f4   :  { %v6622_v40 = vunpack.i.l.bf16 %v6621_v14  ;;  %v6623_v61 = vunpack.i.h.bf16 %v6621_v14  ;;  %v8021_v43 = vmax.bf16 %v15313_v25, %v7921_v53  ;;  %v6194_v12 = vpack.c.bf16 %v5816_v59, %v5812_v8  ;;  %v7217_v27 = vpop.f32.mrb[9].mxu1 }
 0x5f5   :  { %v6583_v36 = vmax.f32 %v6581_v22, %v6582_v6  ;;  %v8062_v5 = vmax.bf16 %v15315_v62, %v7922_v45  ;;  %6079 = vmatmul.mubr.bf16.gmra.mrb[84].mxu0 %v15941_v44  ;;  %v7219_v28 = vpop.f32.mrb[10].mxu1  ;;  %v6358_v9 = vadd.bf16 %v14814_v42, %v6193_v39 }
 0x5f6   :  { %v6624_v29 = vmax.f32 %v6622_v40, %v6623_v61  ;;  %v7630_v48 = vpack.c.bf16 %v7219_v28, %v7215_v2  ;;  %v7221_v7 = vpop.f32.mrb[11].mxu1  ;;  %6088 = vmatprep.mubr.bf16.mxu0 %v15890_v50 }
 0x5f7   :  { %v6584_v11 = vrot.slane %v6583_v36, 4  ;;  %v7631_v63 = vpack.c.bf16 %v7221_v7, %v7217_v27  ;;  %v6486_v22 = vmax.bf16 %v15890_v50, %v6358_v9 }
 0x5f8   :  { %v6625_v32 = vrot.slane %v6624_v29, 4  ;;  %v7795_v4 = vadd.bf16 %v14916_v46, %v7630_v48  ;;  %v5820_v3 = vpop.f32.mrb[236].mxu0  ;;  %7484 = vmatmul.mubr.bf16.gmra.mrb[116].mxu1 %v15937_v23  ;;  %v6359_v23 = vadd.bf16 %v14817_v35, %v6194_v12 }
 0x5f9   :  { %v6585_v52 = vmax.f32 %v6583_v36, %v6584_v11  ;;  %v7796_v49 = vadd.bf16 %v14921_v34, %v7631_v63  ;;  %v5822_v25 = vpop.f32.mrb[237].mxu0  ;;  %7493 = vmatprep.mubr.bf16.mxu1 %v15890_v50 }
 0x5fa   :  { %v6626_v20 = vmax.f32 %v6624_v29, %v6625_v32  ;;  %v7923_v24 = vmax.bf16 %v15890_v50, %v7795_v4  ;;  %v5824_v62 = vpop.f32.mrb[238].mxu0  ;;  %v6487_v59 = vmax.bf16 %v15890_v50, %v6359_v23 }
 0x5fb   :  { %v6586_v56 = vrot.slane %v6585_v52, 2  ;;  %v7924_v15 = vmax.bf16 %v15890_v50, %v7796_v49  ;;  %v6195_v55 = vpack.c.bf16 %v5824_v62, %v5820_v3  ;;  %v5826_v17 = vpop.f32.mrb[239].mxu0  ;;  %v7225_v26 = vpop.f32.mrb[12].mxu1 }
 0x5fc   :  { %v6627_v31 = vrot.slane %v6626_v20, 2  ;;  %v15341_v13 = vmax.bf16 %v8021_v43, %v7923_v24  ;;  %v6196_v18 = vpack.c.bf16 %v5826_v17, %v5822_v25  ;;  %v7227_v30 = vpop.f32.mrb[13].mxu1 }
 0x5fd   :  { %v6587_v58 = vmax.f32 %v6585_v52, %v6586_v56  ;;  %v15343_v60 = vmax.bf16 %v8062_v5, %v7924_v15  ;;  %v6360_v1 = vadd.bf16 %v14814_v42, %v6195_v55  ;;  %6089 = vmatmul.mubr.bf16.gmra.mrb[88].mxu0 %v15942_v0  ;;  %v7229_v8 = vpop.f32.mrb[14].mxu1 }
 0x5fe   :  { %v6628_v10 = vmax.f32 %v6626_v20, %v6627_v31  ;;  %v6361_v47 = vadd.bf16 %v14817_v35, %v6196_v18  ;;  %v7632_v14 = vpack.c.bf16 %v7229_v8, %v7225_v26  ;;  %v7231_v53 = vpop.f32.mrb[15].mxu1  ;;  %6098 = vmatprep.mubr.bf16.mxu0 %v15890_v50 }
 0x5ff   :  { %v6588_v51 = vrot.slane %v6587_v58, 1  ;;  %v6488_v6 = vmax.bf16 %v15890_v50, %v6360_v1  ;;  %v7633_v45 = vpack.c.bf16 %v7231_v53, %v7227_v30 }
 0x600   :  { %v6629_v39 = vrot.slane %v6628_v10, 1  ;;  %v6489_v2 = vmax.bf16 %v15890_v50, %v6361_v47  ;;  %v7797_v40 = vadd.bf16 %v14916_v46, %v7632_v14  ;;  %v5830_v61 = vpop.f32.mrb[240].mxu0  ;;  %7494 = vmatmul.mubr.bf16.gmra.mrb[120].mxu1 %v15938_v16 }
 0x601   :  { %v6589_v43 = vmax.f32 %v6587_v58, %v6588_v51  ;;  %v6632_v12 = vmax.bf16 %v6488_v6, %v6486_v22  ;;  %v7798_v27 = vadd.bf16 %v14921_v34, %v7633_v45  ;;  %v5832_v36 = vpop.f32.mrb[241].mxu0  ;;  %7503 = vmatprep.mubr.bf16.mxu1 %v15890_v50 }
 0x602   :  { %v6630_v5 = vmax.f32 %v6628_v10, %v6629_v39  ;;  %v6673_v28 = vmax.bf16 %v6489_v2, %v6487_v59  ;;  %v7925_v29 = vmax.bf16 %v15890_v50, %v7797_v40  ;;  %v5834_v48 = vpop.f32.mrb[242].mxu0  ;;  %v12129_v39 = vld [vmem:[#allocation8 + $0x108] ss:$16 sps:$4 sm:$0xff]   ;;  %v12131_v59 = vld [vmem:[#allocation8 + $0x10c] ss:$16 sps:$4 sm:$0xff]  }
 0x603   :  { %v6590_v7 = vpack.i.bf16 %v6589_v43, %v6589_v43  ;;  %v7926_v11 = vmax.bf16 %v15890_v50, %v7798_v27  ;;  %v6197_v63 = vpack.c.bf16 %v5834_v48, %v5830_v61  ;;  %v5836_v32 = vpop.f32.mrb[243].mxu0  ;;  %v7235_v4 = vpop.f32.mrb[16].mxu1  ;;  %10044 = vmatprep.subr.bf16.mxu1 %v12131_v59 }
 0x604   :  { %v6631_v3 = vpack.i.bf16 %v6630_v5, %v6630_v5  ;;  %v8023_v16 = vmax.bf16 %v15341_v13, %v7925_v29  ;;  %v6198_v52 = vpack.c.bf16 %v5836_v32, %v5832_v36  ;;  %v7237_v49 = vpop.f32.mrb[17].mxu1  ;;  %10045 = vmatpush1.bf16.msra.mxu1 %v12129_v39 }
 0x605   :  { %v8064_v25 = vmax.bf16 %v15343_v60, %v7926_v11  ;;  %v6362_v20 = vadd.bf16 %v14814_v42, %v6197_v63  ;;  %6099 = vmatmul.mubr.bf16.gmra.mrb[92].mxu0 %v13974_v38  ;;  %v7239_v24 = vpop.f32.mrb[18].mxu1  ;;  %v12134_v11 = vld [vmem:[#allocation8 + $0x144] ss:$16 sps:$4 sm:$0xff]  }
 0x606   :  { %v15363_v62 = vcombine.low %v6590_v7, %v6631_v3  ;;  %v6363_v56 = vadd.bf16 %v14817_v35, %v6198_v52  ;;  %v7634_v9 = vpack.c.bf16 %v7239_v24, %v7235_v4  ;;  %v7241_v15 = vpop.f32.mrb[19].mxu1  ;;  %6108 = vmatprep.mubr.bf16.mxu0 %v15890_v50  ;;  %v12132_v7 = vld [vmem:[#allocation8 + $0x140] ss:$16 sps:$4 sm:$0xff]   ;;  %9884 = vmatprep.subr.bf16.mxu0 %v12134_v11 }
 0x607   :  { %v6490_v55 = vmax.bf16 %v15890_v50, %v6362_v20  ;;  %v7635_v17 = vpack.c.bf16 %v7241_v15, %v7237_v49  ;;  %9885 = vmatpush1.bf16.msra.mxu0 %v12132_v7 }
 0x608   :  { %v6491_v26 = vmax.bf16 %v15890_v50, %v6363_v56  ;;  %v7799_v31 = vadd.bf16 %v14916_v46, %v7634_v9  ;;  %v5840_v23 = vpop.f32.mrb[244].mxu0  ;;  %7504 = vmatmul.mubr.bf16.gmra.mrb[124].mxu1 %v15939_v21  ;;  %v15943_v9 = vld [vmem:[#allocation57_spill] sm:$0xff] }
 0x609   :  { %v15371_v13 = vmax.bf16 %v6632_v12, %v6490_v55  ;;  %v7800_v18 = vadd.bf16 %v14921_v34, %v7635_v17  ;;  %v5842_v30 = vpop.f32.mrb[245].mxu0  ;;  %7513 = vmatprep.mubr.bf16.mxu1 %v15890_v50 }
 0x60a   :  { %v15375_v58 = vmax.bf16 %v6673_v28, %v6491_v26  ;;  %v7927_v60 = vmax.bf16 %v15890_v50, %v7799_v31  ;;  %v5844_v1 = vpop.f32.mrb[246].mxu0 }
 0x60b   :  { %v7928_v8 = vmax.bf16 %v15890_v50, %v7800_v18  ;;  %v6199_v10 = vpack.c.bf16 %v5844_v1, %v5840_v23  ;;  %v5846_v47 = vpop.f32.mrb[247].mxu0  ;;  %v7245_v14 = vpop.f32.mrb[20].mxu1 }
 0x60c   :  { %v8024_v53 = vmax.bf16 %v8023_v16, %v7927_v60  ;;  %v6200_v51 = vpack.c.bf16 %v5846_v47, %v5842_v30  ;;  %v7247_v21 = vpop.f32.mrb[21].mxu1 }
 0x60d   :  { %v8065_v22 = vmax.bf16 %v8064_v25, %v7928_v8  ;;  %v6364_v6 = vadd.bf16 %v14814_v42, %v6199_v10  ;;  %6109 = vmatmul.mubr.bf16.gmra.mrb[96].mxu0 %v13998_v57  ;;  %v7249_v45 = vpop.f32.mrb[22].mxu1 }
 0x60e   :  { %v6365_v2 = vadd.bf16 %v14817_v35, %v6200_v51  ;;  %v7636_v40 = vpack.c.bf16 %v7249_v45, %v7245_v14  ;;  %v7251_v61 = vpop.f32.mrb[23].mxu1  ;;  %6118 = vmatprep.mubr.bf16.mxu0 %v15890_v50 }
 0x60f   :  { %v6492_v43 = vmax.bf16 %v15890_v50, %v6364_v6  ;;  %v7637_v12 = vpack.c.bf16 %v7251_v61, %v7247_v21 }
 0x610   :  { %v6493_v27 = vmax.bf16 %v15890_v50, %v6365_v2  ;;  %v7801_v36 = vadd.bf16 %v14916_v46, %v7636_v40  ;;  %v5850_v5 = vpop.f32.mrb[248].mxu0  ;;  %7514 = vmatmul.mubr.bf16.gmra.mrb[128].mxu1 %v15940_v41 }
 0x611   :  { %v6634_v28 = vmax.bf16 %v15371_v13, %v6492_v43  ;;  %v7802_v29 = vadd.bf16 %v14921_v34, %v7637_v12  ;;  %v5852_v48 = vpop.f32.mrb[249].mxu0  ;;  %7523 = vmatprep.mubr.bf16.mxu1 %v15890_v50 }
 0x612   :  { %v6675_v63 = vmax.bf16 %v15375_v58, %v6493_v27  ;;  %v7929_v32 = vmax.bf16 %v15890_v50, %v7801_v36  ;;  %v5854_v4 = vpop.f32.mrb[250].mxu0 }
 0x613   :  { %v7930_v3 = vmax.bf16 %v15890_v50, %v7802_v29  ;;  %v6201_v16 = vpack.c.bf16 %v5854_v4, %v5850_v5  ;;  %v5856_v52 = vpop.f32.mrb[251].mxu0  ;;  %v7255_v41 = vpop.f32.mrb[24].mxu1 }
 0x614   :  { %v8025_v49 = vmax.bf16 %v8024_v53, %v7929_v32  ;;  %v6202_v25 = vpack.c.bf16 %v5856_v52, %v5852_v48  ;;  %v7257_v20 = vpop.f32.mrb[25].mxu1 }
 0x615   :  { %v8066_v24 = vmax.bf16 %v8065_v22, %v7930_v3  ;;  %v6366_v56 = vadd.bf16 %v14814_v42, %v6201_v16  ;;  %6119 = vmatmul.mubr.bf16.gmra.mrb[100].mxu0 %v15943_v9  ;;  %v7259_v15 = vpop.f32.mrb[26].mxu1 }
 0x616   :  { %v8026_v55 = vunpack.i.l.bf16 %v8025_v49  ;;  %v8027_v17 = vunpack.i.h.bf16 %v8025_v49  ;;  %v6367_v26 = vadd.bf16 %v14817_v35, %v6202_v25  ;;  %v7638_v31 = vpack.c.bf16 %v7259_v15, %v7255_v41  ;;  %v7261_v23 = vpop.f32.mrb[27].mxu1 }
 0x617   :  { %v8067_v13 = vunpack.i.l.bf16 %v8066_v24  ;;  %v8068_v18 = vunpack.i.h.bf16 %v8066_v24  ;;  %v6494_v30 = vmax.bf16 %v15890_v50, %v6366_v56  ;;  %v7639_v58 = vpack.c.bf16 %v7261_v23, %v7257_v20 }
 0x618   :  { %v8028_v60 = vmax.f32 %v8026_v55, %v8027_v17  ;;  %v6495_v1 = vmax.bf16 %v15890_v50, %v6367_v26  ;;  %v5860_v8 = vpop.f32.mrb[252].mxu0  ;;  %7524 = vmatmul.mubr.bf16.gmra.mrb[132].mxu1 %v15941_v44  ;;  %v7803_v27 = vadd.bf16 %v14916_v46, %v7638_v31 }
 0x619   :  { %v8069_v10 = vmax.f32 %v8067_v13, %v8068_v18  ;;  %v15399_v47 = vmax.bf16 %v6634_v28, %v6494_v30  ;;  %v5862_v14 = vpop.f32.mrb[253].mxu0  ;;  %7533 = vmatprep.mubr.bf16.mxu1 %v15890_v50  ;;  %v7804_v48 = vadd.bf16 %v14921_v34, %v7639_v58 }
 0x61a   :  { %v8029_v53 = vrot.slane %v8028_v60, 4  ;;  %v15402_v51 = vmax.bf16 %v6675_v63, %v6495_v1  ;;  %v5864_v21 = vpop.f32.mrb[254].mxu0  ;;  %v7931_v20 = vmax.bf16 %v15890_v50, %v7803_v27 }
 0x61b   :  { %v8070_v22 = vrot.slane %v8069_v10, 4  ;;  %v6203_v6 = vpack.c.bf16 %v5864_v21, %v5860_v8  ;;  %v5866_v45 = vpop.f32.mrb[255].mxu0  ;;  %v7265_v39 = vpop.f32.mrb[28].mxu1  ;;  %v7932_v17 = vmax.bf16 %v15890_v50, %v7804_v48 }
 0x61c   :  { %v8030_v59 = vmax.f32 %v8028_v60, %v8029_v53  ;;  %v6204_v2 = vpack.c.bf16 %v5866_v45, %v5862_v14  ;;  %v7267_v40 = vpop.f32.mrb[29].mxu1 }
 0x61d   :  { %v8071_v61 = vmax.f32 %v8069_v10, %v8070_v22  ;;  %v6368_v44 = vadd.bf16 %v14814_v42, %v6203_v6  ;;  %v7269_v43 = vpop.f32.mrb[30].mxu1 }
 0x61e   :  { %v8031_v12 = vrot.slane %v8030_v59, 2  ;;  %v6369_v36 = vadd.bf16 %v14817_v35, %v6204_v2  ;;  %v7640_v5 = vpack.c.bf16 %v7269_v43, %v7265_v39  ;;  %v7271_v28 = vpop.f32.mrb[31].mxu1 }
 0x61f   :  { %v8072_v29 = vrot.slane %v8071_v61, 2  ;;  %v6496_v7 = vmax.bf16 %v15890_v50, %v6368_v44  ;;  %v7641_v11 = vpack.c.bf16 %v7271_v28, %v7267_v40 }
 0x620   :  { %v8032_v63 = vmax.f32 %v8030_v59, %v8031_v12  ;;  %v6497_v32 = vmax.bf16 %v15890_v50, %v6369_v36  ;;  %v7805_v4 = vadd.bf16 %v14916_v46, %v7640_v5  ;;  %v5870_v3 = vpop.f32.mrb[0].mxu0  ;;  %7534 = vmatmul.mubr.bf16.gmra.mrb[136].mxu1 %v15942_v0 }
 0x621   :  { %v8073_v16 = vmax.f32 %v8071_v61, %v8072_v29  ;;  %v6636_v52 = vmax.bf16 %v15399_v47, %v6496_v7  ;;  %v7806_v41 = vadd.bf16 %v14921_v34, %v7641_v11  ;;  %v5872_v49 = vpop.f32.mrb[1].mxu0  ;;  %7543 = vmatprep.mubr.bf16.mxu1 %v15890_v50 }
 0x622   :  { %v8033_v25 = vrot.slane %v8032_v63, 1  ;;  %v6677_v24 = vmax.bf16 %v15402_v51, %v6497_v32  ;;  %v7933_v56 = vmax.bf16 %v15890_v50, %v7805_v4  ;;  %v5874_v15 = vpop.f32.mrb[2].mxu0  ;;  %v12135_v4 = vld [vmem:[#allocation8 + $0x128] ss:$16 sps:$4 sm:$0xff]  }
 0x623   :  { %v8074_v55 = vrot.slane %v8073_v16, 1  ;;  %v7934_v0 = vmax.bf16 %v15890_v50, %v7806_v41  ;;  %v6205_v26 = vpack.c.bf16 %v5874_v15, %v5870_v3  ;;  %v5876_v31 = vpop.f32.mrb[3].mxu0  ;;  %v7275_v23 = vpop.f32.mrb[32].mxu1  ;;  %v12137_v3 = vld [vmem:[#allocation8 + $0x12c] ss:$16 sps:$4 sm:$0xff]  }
 0x624   :  { %v8034_v13 = vmax.f32 %v8032_v63, %v8033_v25  ;;  %v8077_v18 = vmax.bf16 %v7933_v56, %v7931_v20  ;;  %v6206_v30 = vpack.c.bf16 %v5876_v31, %v5872_v49  ;;  %v7277_v58 = vpop.f32.mrb[33].mxu1  ;;  %10046 = vmatprep.subr.bf16.mxu1 %v12137_v3 }
 0x625   :  { %v8075_v60 = vmax.f32 %v8073_v16, %v8074_v55  ;;  %v8118_v1 = vmax.bf16 %v7934_v0, %v7932_v17  ;;  %v6370_v8 = vadd.bf16 %v14814_v42, %v6205_v26  ;;  %v7279_v10 = vpop.f32.mrb[34].mxu1  ;;  %v12138_v0 = vld [vmem:[#allocation8 + $0x160] ss:$16 sps:$4 sm:$0xff]   ;;  %v12140_v26 = vld [vmem:[#allocation8 + $0x164] ss:$16 sps:$4 sm:$0xff]   ;;  %10047 = vmatpush1.bf16.msra.mxu1 %v12135_v4 }
 0x626   :  { %v8035_v47 = vpack.i.bf16 %v8034_v13, %v8034_v13  ;;  %v6371_v14 = vadd.bf16 %v14817_v35, %v6206_v30  ;;  %v7642_v53 = vpack.c.bf16 %v7279_v10, %v7275_v23  ;;  %v7281_v51 = vpop.f32.mrb[35].mxu1  ;;  %9886 = vmatprep.subr.bf16.mxu0 %v12140_v26 }
 0x627   :  { %v8076_v21 = vpack.i.bf16 %v8075_v60, %v8075_v60  ;;  %v6498_v22 = vmax.bf16 %v15890_v50, %v6370_v8  ;;  %v7643_v6 = vpack.c.bf16 %v7281_v51, %v7277_v58  ;;  %9887 = vmatpush1.bf16.msra.mxu0 %v12138_v0 }
 0x628   :  { %v6499_v45 = vmax.bf16 %v15890_v50, %v6371_v14  ;;  %v7807_v39 = vadd.bf16 %v14916_v46, %v7642_v53  ;;  %v5880_v59 = vpop.f32.mrb[4].mxu0  ;;  %7544 = vmatmul.mubr.bf16.gmra.mrb[140].mxu1 %v13974_v38 }
 0x629   :  { %v15426_v2 = vcombine.low %v8035_v47, %v8076_v21  ;;  %v6637_v40 = vmax.bf16 %v6636_v52, %v6498_v22  ;;  %v7808_v61 = vadd.bf16 %v14921_v34, %v7643_v6  ;;  %v5882_v44 = vpop.f32.mrb[5].mxu0  ;;  %7553 = vmatprep.mubr.bf16.mxu1 %v15890_v50 }
 0x62a   :  { %v6678_v43 = vmax.bf16 %v6677_v24, %v6499_v45  ;;  %v7935_v12 = vmax.bf16 %v15890_v50, %v7807_v39  ;;  %v5884_v27 = vpop.f32.mrb[6].mxu0 }
 0x62b   :  { %v7936_v36 = vmax.bf16 %v15890_v50, %v7808_v61  ;;  %v6207_v5 = vpack.c.bf16 %v5884_v27, %v5880_v59  ;;  %v5886_v28 = vpop.f32.mrb[7].mxu0  ;;  %v7285_v29 = vpop.f32.mrb[36].mxu1 }
 0x62c   :  { %v8078_v48 = vmax.bf16 %v8077_v18, %v7935_v12  ;;  %v6208_v7 = vpack.c.bf16 %v5886_v28, %v5882_v44  ;;  %v7287_v38 = vpop.f32.mrb[37].mxu1 }
 0x62d   :  { %v8119_v11 = vmax.bf16 %v8118_v1, %v7936_v36  ;;  %v6372_v63 = vadd.bf16 %v14814_v42, %v6207_v5  ;;  %v7289_v32 = vpop.f32.mrb[38].mxu1 }
 0x62e   :  { %v6373_v16 = vadd.bf16 %v14817_v35, %v6208_v7  ;;  %v7644_v52 = vpack.c.bf16 %v7289_v32, %v7285_v29  ;;  %v7291_v41 = vpop.f32.mrb[39].mxu1 }
 0x62f   :  { %v6500_v49 = vmax.bf16 %v15890_v50, %v6372_v63  ;;  %v7645_v25 = vpack.c.bf16 %v7291_v41, %v7287_v38 }
 0x630   :  { %v6501_v20 = vmax.bf16 %v15890_v50, %v6373_v16  ;;  %v7809_v24 = vadd.bf16 %v14916_v46, %v7644_v52  ;;  %v5890_v56 = vpop.f32.mrb[8].mxu0  ;;  %7554 = vmatmul.mubr.bf16.gmra.mrb[144].mxu1 %v13998_v57 }
 0x631   :  { %v6638_v15 = vmax.bf16 %v6637_v40, %v6500_v49  ;;  %v7810_v55 = vadd.bf16 %v14921_v34, %v7645_v25  ;;  %v5892_v17 = vpop.f32.mrb[9].mxu0  ;;  %7563 = vmatprep.mubr.bf16.mxu1 %v15890_v50 }
 0x632   :  { %v6679_v31 = vmax.bf16 %v6678_v43, %v6501_v20  ;;  %v7937_v23 = vmax.bf16 %v15890_v50, %v7809_v24  ;;  %v5894_v13 = vpop.f32.mrb[10].mxu0 }
 0x633   :  { %v7938_v18 = vmax.bf16 %v15890_v50, %v7810_v55  ;;  %v6209_v30 = vpack.c.bf16 %v5894_v13, %v5890_v56  ;;  %v5896_v58 = vpop.f32.mrb[11].mxu0  ;;  %v7295_v60 = vpop.f32.mrb[40].mxu1 }
 0x634   :  { %v8079_v57 = vmax.bf16 %v8078_v48, %v7937_v23  ;;  %v6210_v1 = vpack.c.bf16 %v5896_v58, %v5892_v17  ;;  %v7297_v8 = vpop.f32.mrb[41].mxu1 }
 0x635   :  { %v8120_v10 = vmax.bf16 %v8119_v11, %v7938_v18  ;;  %v6374_v47 = vadd.bf16 %v14814_v42, %v6209_v30  ;;  %v7299_v14 = vpop.f32.mrb[42].mxu1 }
 0x636   :  { %v6375_v53 = vadd.bf16 %v14817_v35, %v6210_v1  ;;  %v7646_v51 = vpack.c.bf16 %v7299_v14, %v7295_v60  ;;  %v7301_v21 = vpop.f32.mrb[43].mxu1 }
 0x637   :  { %v6502_v22 = vmax.bf16 %v15890_v50, %v6374_v47  ;;  %v7647_v6 = vpack.c.bf16 %v7301_v21, %v7297_v8 }
 0x638   :  { %v6503_v45 = vmax.bf16 %v15890_v50, %v6375_v53  ;;  %v7811_v39 = vadd.bf16 %v14916_v46, %v7646_v51  ;;  %v5900_v59 = vpop.f32.mrb[12].mxu0  ;;  %7564 = vmatmul.mubr.bf16.gmra.mrb[148].mxu1 %v15943_v9 }
 0x639   :  { %v6639_v40 = vmax.bf16 %v6638_v15, %v6502_v22  ;;  %v7812_v61 = vadd.bf16 %v14921_v34, %v7647_v6  ;;  %v5902_v44 = vpop.f32.mrb[13].mxu0 }
 0x63a   :  { %v6680_v43 = vmax.bf16 %v6679_v31, %v6503_v45  ;;  %v7939_v12 = vmax.bf16 %v15890_v50, %v7811_v39  ;;  %v5904_v27 = vpop.f32.mrb[14].mxu0 }
 0x63b   :  { %v7940_v36 = vmax.bf16 %v15890_v50, %v7812_v61  ;;  %v6211_v5 = vpack.c.bf16 %v5904_v27, %v5900_v59  ;;  %v5906_v28 = vpop.f32.mrb[15].mxu0  ;;  %v7305_v29 = vpop.f32.mrb[44].mxu1 }
 0x63c   :  { %v8080_v48 = vmax.bf16 %v8079_v57, %v7939_v12  ;;  %v6212_v7 = vpack.c.bf16 %v5906_v28, %v5902_v44  ;;  %v7307_v38 = vpop.f32.mrb[45].mxu1 }
 0x63d   :  { %v8121_v11 = vmax.bf16 %v8120_v10, %v7940_v36  ;;  %v6376_v63 = vadd.bf16 %v14814_v42, %v6211_v5  ;;  %v7309_v9 = vpop.f32.mrb[46].mxu1 }
 0x63e   :  { %v6377_v32 = vadd.bf16 %v14817_v35, %v6212_v7  ;;  %v7648_v4 = vpack.c.bf16 %v7309_v9, %v7305_v29  ;;  %v7311_v3 = vpop.f32.mrb[47].mxu1  ;;  %v12141_v7 = vld [vmem:[#allocation8 + $0x148] ss:$16 sps:$4 sm:$0xff]  }
 0x63f   :  { %v6504_v16 = vmax.bf16 %v15890_v50, %v6376_v63  ;;  %v7649_v52 = vpack.c.bf16 %v7311_v3, %v7307_v38  ;;  %v12143_v38 = vld [vmem:[#allocation8 + $0x14c] ss:$16 sps:$4 sm:$0xff]  }
 0x640   :  { %v6505_v41 = vmax.bf16 %v15890_v50, %v6377_v32  ;;  %v7813_v49 = vadd.bf16 %v14916_v46, %v7648_v4  ;;  %v5910_v25 = vpop.f32.mrb[16].mxu0  ;;  %10048 = vmatprep.subr.bf16.mxu1 %v12143_v38 }
 0x641   :  { %v6640_v20 = vmax.bf16 %v6639_v40, %v6504_v16  ;;  %v7814_v24 = vadd.bf16 %v14921_v34, %v7649_v52  ;;  %v5912_v56 = vpop.f32.mrb[17].mxu0  ;;  %10049 = vmatpush1.bf16.msra.mxu1 %v12141_v7 }
 0x642   :  { %v6681_v15 = vmax.bf16 %v6680_v43, %v6505_v41  ;;  %v7941_v55 = vmax.bf16 %v15890_v50, %v7813_v49  ;;  %v5914_v17 = vpop.f32.mrb[18].mxu0 }
 0x643   :  { %v7942_v0 = vmax.bf16 %v15890_v50, %v7814_v24  ;;  %v6213_v26 = vpack.c.bf16 %v5914_v17, %v5910_v25  ;;  %v5916_v31 = vpop.f32.mrb[19].mxu0  ;;  %v7315_v23 = vpop.f32.mrb[48].mxu1  ;;  %v12146_v24 = vld [vmem:[#allocation8 + $0x184] ss:$16 sps:$4 sm:$0xff]  }
 0x644   :  { %v8081_v13 = vmax.bf16 %v8080_v48, %v7941_v55  ;;  %v6214_v18 = vpack.c.bf16 %v5916_v31, %v5912_v56  ;;  %v7317_v30 = vpop.f32.mrb[49].mxu1  ;;  %9888 = vmatprep.subr.bf16.mxu0 %v12146_v24 }
 0x645   :  { %v8122_v58 = vmax.bf16 %v8121_v11, %v7942_v0  ;;  %v6378_v60 = vadd.bf16 %v14814_v42, %v6213_v26  ;;  %v7319_v57 = vpop.f32.mrb[50].mxu1 }
 0x646   :  { %v6379_v1 = vadd.bf16 %v14817_v35, %v6214_v18  ;;  %v7650_v8 = vpack.c.bf16 %v7319_v57, %v7315_v23  ;;  %v7321_v10 = vpop.f32.mrb[51].mxu1 }
 0x647   :  { %v6506_v47 = vmax.bf16 %v15890_v50, %v6378_v60  ;;  %v7651_v14 = vpack.c.bf16 %v7321_v10, %v7317_v30 }
 0x648   :  { %v6507_v53 = vmax.bf16 %v15890_v50, %v6379_v1  ;;  %v7815_v51 = vadd.bf16 %v14916_v46, %v7650_v8  ;;  %v5920_v21 = vpop.f32.mrb[20].mxu0 }
 0x649   :  { %v6641_v22 = vmax.bf16 %v6640_v20, %v6506_v47  ;;  %v7816_v6 = vadd.bf16 %v14921_v34, %v7651_v14  ;;  %v5922_v45 = vpop.f32.mrb[21].mxu0  ;;  %v12144_v20 = vld [vmem:[#allocation8 + $0x180] ss:$16 sps:$4 sm:$0xff]  }
 0x64a   :  { %v6682_v39 = vmax.bf16 %v6681_v15, %v6507_v53  ;;  %v7943_v59 = vmax.bf16 %v15890_v50, %v7815_v51  ;;  %v5924_v40 = vpop.f32.mrb[22].mxu0  ;;  %9889 = vmatpush1.bf16.msra.mxu0 %v12144_v20 }
 0x64b   :  { %v7944_v61 = vmax.bf16 %v15890_v50, %v7816_v6  ;;  %v6215_v44 = vpack.c.bf16 %v5924_v40, %v5920_v21  ;;  %v5926_v43 = vpop.f32.mrb[23].mxu0  ;;  %v7325_v12 = vpop.f32.mrb[52].mxu1 }
 0x64c   :  { %v8082_v27 = vmax.bf16 %v8081_v13, %v7943_v59  ;;  %v6216_v36 = vpack.c.bf16 %v5926_v43, %v5922_v45  ;;  %v7327_v5 = vpop.f32.mrb[53].mxu1 }
 0x64d   :  { %v8123_v28 = vmax.bf16 %v8122_v58, %v7944_v61  ;;  %v6380_v29 = vadd.bf16 %v14814_v42, %v6215_v44  ;;  %v7329_v48 = vpop.f32.mrb[54].mxu1 }
 0x64e   :  { %v6381_v11 = vadd.bf16 %v14817_v35, %v6216_v36  ;;  %v7652_v63 = vpack.c.bf16 %v7329_v48, %v7325_v12  ;;  %v7331_v9 = vpop.f32.mrb[55].mxu1 }
 0x64f   :  { %v6508_v32 = vmax.bf16 %v15890_v50, %v6380_v29  ;;  %v7653_v4 = vpack.c.bf16 %v7331_v9, %v7327_v5 }
 0x650   :  { %v6509_v3 = vmax.bf16 %v15890_v50, %v6381_v11  ;;  %v7817_v16 = vadd.bf16 %v14916_v46, %v7652_v63  ;;  %v5930_v52 = vpop.f32.mrb[24].mxu0 }
 0x651   :  { %v6642_v41 = vmax.bf16 %v6641_v22, %v6508_v32  ;;  %v7818_v49 = vadd.bf16 %v14921_v34, %v7653_v4  ;;  %v5932_v25 = vpop.f32.mrb[25].mxu0 }
 0x652   :  { %v6683_v56 = vmax.bf16 %v6682_v39, %v6509_v3  ;;  %v7945_v15 = vmax.bf16 %v15890_v50, %v7817_v16  ;;  %v5934_v55 = vpop.f32.mrb[26].mxu0 }
 0x653   :  { %v7946_v17 = vmax.bf16 %v15890_v50, %v7818_v49  ;;  %v6217_v0 = vpack.c.bf16 %v5934_v55, %v5930_v52  ;;  %v5936_v26 = vpop.f32.mrb[27].mxu0  ;;  %v7335_v31 = vpop.f32.mrb[56].mxu1 }
 0x654   :  { %v8083_v23 = vmax.bf16 %v8082_v27, %v7945_v15  ;;  %v6218_v13 = vpack.c.bf16 %v5936_v26, %v5932_v25  ;;  %v7337_v18 = vpop.f32.mrb[57].mxu1 }
 0x655   :  { %v8124_v30 = vmax.bf16 %v8123_v28, %v7946_v17  ;;  %v6382_v58 = vadd.bf16 %v14814_v42, %v6217_v0  ;;  %v7339_v60 = vpop.f32.mrb[58].mxu1 }
 0x656   :  { %v6383_v57 = vadd.bf16 %v14817_v35, %v6218_v13  ;;  %v7654_v1 = vpack.c.bf16 %v7339_v60, %v7335_v31  ;;  %v7341_v8 = vpop.f32.mrb[59].mxu1 }
 0x657   :  { %v6510_v10 = vmax.bf16 %v15890_v50, %v6382_v58  ;;  %v7655_v47 = vpack.c.bf16 %v7341_v8, %v7337_v18 }
 0x658   :  { %v6511_v14 = vmax.bf16 %v15890_v50, %v6383_v57  ;;  %v7819_v53 = vadd.bf16 %v14916_v46, %v7654_v1  ;;  %v5940_v51 = vpop.f32.mrb[28].mxu0 }
 0x659   :  { %v6643_v21 = vmax.bf16 %v6642_v41, %v6510_v10  ;;  %v7820_v22 = vadd.bf16 %v14921_v34, %v7655_v47  ;;  %v5942_v6 = vpop.f32.mrb[29].mxu0 }
 0x65a   :  { %v6684_v45 = vmax.bf16 %v6683_v56, %v6511_v14  ;;  %v7947_v39 = vmax.bf16 %v15890_v50, %v7819_v53  ;;  %v5944_v59 = vpop.f32.mrb[30].mxu0 }
 0x65b   :  { %v7948_v40 = vmax.bf16 %v15890_v50, %v7820_v22  ;;  %v6219_v61 = vpack.c.bf16 %v5944_v59, %v5940_v51  ;;  %v5946_v44 = vpop.f32.mrb[31].mxu0  ;;  %v7345_v43 = vpop.f32.mrb[60].mxu1 }
 0x65c   :  { %v8084_v12 = vmax.bf16 %v8083_v23, %v7947_v39  ;;  %v6220_v27 = vpack.c.bf16 %v5946_v44, %v5942_v6  ;;  %v7347_v36 = vpop.f32.mrb[61].mxu1 }
 0x65d   :  { %v8125_v5 = vmax.bf16 %v8124_v30, %v7948_v40  ;;  %v6384_v28 = vadd.bf16 %v14814_v42, %v6219_v61  ;;  %v7349_v29 = vpop.f32.mrb[62].mxu1 }
 0x65e   :  { %v6385_v48 = vadd.bf16 %v14817_v35, %v6220_v27  ;;  %v7656_v7 = vpack.c.bf16 %v7349_v29, %v7345_v43  ;;  %v7351_v38 = vpop.f32.mrb[63].mxu1  ;;  %v12147_v27 = vld [vmem:[#allocation8 + $0x168] ss:$16 sps:$4 sm:$0xff]  }
 0x65f   :  { %v6512_v11 = vmax.bf16 %v15890_v50, %v6384_v28  ;;  %v7657_v63 = vpack.c.bf16 %v7351_v38, %v7347_v36  ;;  %v12149_v36 = vld [vmem:[#allocation8 + $0x16c] ss:$16 sps:$4 sm:$0xff]  }
 0x660   :  { %v6513_v9 = vmax.bf16 %v15890_v50, %v6385_v48  ;;  %v7821_v32 = vadd.bf16 %v14916_v46, %v7656_v7  ;;  %v5950_v4 = vpop.f32.mrb[32].mxu0  ;;  %10050 = vmatprep.subr.bf16.mxu1 %v12149_v36 }
 0x661   :  { %v6644_v3 = vmax.bf16 %v6643_v21, %v6512_v11  ;;  %v7822_v16 = vadd.bf16 %v14921_v34, %v7657_v63  ;;  %v5952_v52 = vpop.f32.mrb[33].mxu0  ;;  %10051 = vmatpush1.bf16.msra.mxu1 %v12147_v27 }
 0x662   :  { %v6685_v41 = vmax.bf16 %v6684_v45, %v6513_v9  ;;  %v7949_v49 = vmax.bf16 %v15890_v50, %v7821_v32  ;;  %v5954_v25 = vpop.f32.mrb[34].mxu0 }
 0x663   :  { %v7950_v20 = vmax.bf16 %v15890_v50, %v7822_v16  ;;  %v6221_v24 = vpack.c.bf16 %v5954_v25, %v5950_v4  ;;  %v5956_v56 = vpop.f32.mrb[35].mxu0  ;;  %v7355_v15 = vpop.f32.mrb[64].mxu1 }
 0x664   :  { %v8085_v55 = vmax.bf16 %v8084_v12, %v7949_v49  ;;  %v6222_v17 = vpack.c.bf16 %v5956_v56, %v5952_v52  ;;  %v7357_v0 = vpop.f32.mrb[65].mxu1 }
 0x665   :  { %v8126_v26 = vmax.bf16 %v8125_v5, %v7950_v20  ;;  %v6386_v31 = vadd.bf16 %v14814_v42, %v6221_v24  ;;  %v7359_v23 = vpop.f32.mrb[66].mxu1 }
 0x666   :  { %v6387_v13 = vadd.bf16 %v14817_v35, %v6222_v17  ;;  %v7658_v18 = vpack.c.bf16 %v7359_v23, %v7355_v15  ;;  %v7361_v30 = vpop.f32.mrb[67].mxu1 }
 0x667   :  { %v6514_v58 = vmax.bf16 %v15890_v50, %v6386_v31  ;;  %v7659_v60 = vpack.c.bf16 %v7361_v30, %v7357_v0 }
 0x668   :  { %v6515_v57 = vmax.bf16 %v15890_v50, %v6387_v13  ;;  %v7823_v1 = vadd.bf16 %v14916_v46, %v7658_v18  ;;  %v5960_v8 = vpop.f32.mrb[36].mxu0 }
 0x669   :  { %v6645_v10 = vmax.bf16 %v6644_v3, %v6514_v58  ;;  %v7824_v47 = vadd.bf16 %v14921_v34, %v7659_v60  ;;  %v5962_v14 = vpop.f32.mrb[37].mxu0 }
 0x66a   :  { %v6686_v53 = vmax.bf16 %v6685_v41, %v6515_v57  ;;  %v7951_v51 = vmax.bf16 %v15890_v50, %v7823_v1  ;;  %v5964_v21 = vpop.f32.mrb[38].mxu0 }
 0x66b   :  { %v7952_v22 = vmax.bf16 %v15890_v50, %v7824_v47  ;;  %v6223_v6 = vpack.c.bf16 %v5964_v21, %v5960_v8  ;;  %v5966_v45 = vpop.f32.mrb[39].mxu0  ;;  %v7365_v39 = vpop.f32.mrb[68].mxu1 }
 0x66c   :  { %v8086_v59 = vmax.bf16 %v8085_v55, %v7951_v51  ;;  %v6224_v40 = vpack.c.bf16 %v5966_v45, %v5962_v14  ;;  %v7367_v61 = vpop.f32.mrb[69].mxu1 }
 0x66d   :  { %v8127_v44 = vmax.bf16 %v8126_v26, %v7952_v22  ;;  %v6388_v43 = vadd.bf16 %v14814_v42, %v6223_v6  ;;  %v7369_v12 = vpop.f32.mrb[70].mxu1 }
 0x66e   :  { %v6389_v5 = vadd.bf16 %v14817_v35, %v6224_v40  ;;  %v7660_v28 = vpack.c.bf16 %v7369_v12, %v7365_v39  ;;  %v7371_v29 = vpop.f32.mrb[71].mxu1 }
 0x66f   :  { %v6516_v48 = vmax.bf16 %v15890_v50, %v6388_v43  ;;  %v7661_v7 = vpack.c.bf16 %v7371_v29, %v7367_v61 }
 0x670   :  { %v6517_v38 = vmax.bf16 %v15890_v50, %v6389_v5  ;;  %v7825_v11 = vadd.bf16 %v14916_v46, %v7660_v28  ;;  %v5970_v63 = vpop.f32.mrb[40].mxu0 }
 0x671   :  { %v6646_v9 = vmax.bf16 %v6645_v10, %v6516_v48  ;;  %v7826_v32 = vadd.bf16 %v14921_v34, %v7661_v7  ;;  %v5972_v4 = vpop.f32.mrb[41].mxu0 }
 0x672   :  { %v6687_v3 = vmax.bf16 %v6686_v53, %v6517_v38  ;;  %v7953_v16 = vmax.bf16 %v15890_v50, %v7825_v11  ;;  %v5974_v52 = vpop.f32.mrb[42].mxu0 }
 0x673   :  { %v7954_v41 = vmax.bf16 %v15890_v50, %v7826_v32  ;;  %v6225_v49 = vpack.c.bf16 %v5974_v52, %v5970_v63  ;;  %v5976_v25 = vpop.f32.mrb[43].mxu0  ;;  %v7375_v20 = vpop.f32.mrb[72].mxu1  ;;  %v12150_v52 = vld [vmem:[#allocation8 + $0x1a0] ss:$16 sps:$4 sm:$0xff]  }
 0x674   :  { %v8087_v24 = vmax.bf16 %v8086_v59, %v7953_v16  ;;  %v6226_v56 = vpack.c.bf16 %v5976_v25, %v5972_v4  ;;  %v7377_v15 = vpop.f32.mrb[73].mxu1 }
 0x675   :  { %v8128_v55 = vmax.bf16 %v8127_v44, %v7954_v41  ;;  %v6390_v17 = vadd.bf16 %v14814_v42, %v6225_v49  ;;  %v7379_v0 = vpop.f32.mrb[74].mxu1  ;;  %v12152_v41 = vld [vmem:[#allocation8 + $0x1a4] ss:$16 sps:$4 sm:$0xff]  }
 0x676   :  { %v6391_v26 = vadd.bf16 %v14817_v35, %v6226_v56  ;;  %v7662_v31 = vpack.c.bf16 %v7379_v0, %v7375_v20  ;;  %v7381_v23 = vpop.f32.mrb[75].mxu1  ;;  %9890 = vmatprep.subr.bf16.mxu0 %v12152_v41 }
 0x677   :  { %v6518_v13 = vmax.bf16 %v15890_v50, %v6390_v17  ;;  %v7663_v18 = vpack.c.bf16 %v7381_v23, %v7377_v15  ;;  %9891 = vmatpush1.bf16.msra.mxu0 %v12150_v52 }
 0x678   :  { %v6519_v30 = vmax.bf16 %v15890_v50, %v6391_v26  ;;  %v7827_v58 = vadd.bf16 %v14916_v46, %v7662_v31  ;;  %v5980_v60 = vpop.f32.mrb[44].mxu0 }
 0x679   :  { %v6647_v57 = vmax.bf16 %v6646_v9, %v6518_v13  ;;  %v7828_v1 = vadd.bf16 %v14921_v34, %v7663_v18  ;;  %v5982_v8 = vpop.f32.mrb[45].mxu0 }
 0x67a   :  { %v6688_v10 = vmax.bf16 %v6687_v3, %v6519_v30  ;;  %v7955_v47 = vmax.bf16 %v15890_v50, %v7827_v58  ;;  %v5984_v14 = vpop.f32.mrb[46].mxu0 }
 0x67b   :  { %v7956_v53 = vmax.bf16 %v15890_v50, %v7828_v1  ;;  %v6227_v51 = vpack.c.bf16 %v5984_v14, %v5980_v60  ;;  %v5986_v21 = vpop.f32.mrb[47].mxu0  ;;  %v7385_v22 = vpop.f32.mrb[76].mxu1 }
 0x67c   :  { %v8088_v6 = vmax.bf16 %v8087_v24, %v7955_v47  ;;  %v6228_v45 = vpack.c.bf16 %v5986_v21, %v5982_v8  ;;  %v7387_v39 = vpop.f32.mrb[77].mxu1 }
 0x67d   :  { %v8129_v59 = vmax.bf16 %v8128_v55, %v7956_v53  ;;  %v6392_v40 = vadd.bf16 %v14814_v42, %v6227_v51  ;;  %v7389_v61 = vpop.f32.mrb[78].mxu1 }
 0x67e   :  { %v6393_v44 = vadd.bf16 %v14817_v35, %v6228_v45  ;;  %v7664_v43 = vpack.c.bf16 %v7389_v61, %v7385_v22  ;;  %v7391_v12 = vpop.f32.mrb[79].mxu1 }
 0x67f   :  { %v6520_v27 = vmax.bf16 %v15890_v50, %v6392_v40  ;;  %v7665_v36 = vpack.c.bf16 %v7391_v12, %v7387_v39 }
 0x680   :  { %v6521_v5 = vmax.bf16 %v15890_v50, %v6393_v44  ;;  %v7829_v28 = vadd.bf16 %v14916_v46, %v7664_v43  ;;  %v5990_v29 = vpop.f32.mrb[48].mxu0 }
 0x681   :  { %v6648_v48 = vmax.bf16 %v6647_v57, %v6520_v27  ;;  %v7830_v7 = vadd.bf16 %v14921_v34, %v7665_v36  ;;  %v5992_v38 = vpop.f32.mrb[49].mxu0 }
 0x682   :  { %v6689_v11 = vmax.bf16 %v6688_v10, %v6521_v5  ;;  %v7957_v63 = vmax.bf16 %v15890_v50, %v7829_v28  ;;  %v5994_v9 = vpop.f32.mrb[50].mxu0 }
 0x683   :  { %v7958_v32 = vmax.bf16 %v15890_v50, %v7830_v7  ;;  %v6229_v4 = vpack.c.bf16 %v5994_v9, %v5990_v29  ;;  %v5996_v3 = vpop.f32.mrb[51].mxu0  ;;  %v7395_v16 = vpop.f32.mrb[80].mxu1 }
 0x684   :  { %v8089_v49 = vmax.bf16 %v8088_v6, %v7957_v63  ;;  %v6230_v25 = vpack.c.bf16 %v5996_v3, %v5992_v38  ;;  %v7397_v20 = vpop.f32.mrb[81].mxu1 }
 0x685   :  { %v8130_v24 = vmax.bf16 %v8129_v59, %v7958_v32  ;;  %v6394_v56 = vadd.bf16 %v14814_v42, %v6229_v4  ;;  %v7399_v15 = vpop.f32.mrb[82].mxu1 }
 0x686   :  { %v6395_v55 = vadd.bf16 %v14817_v35, %v6230_v25  ;;  %v7666_v17 = vpack.c.bf16 %v7399_v15, %v7395_v16  ;;  %v7401_v0 = vpop.f32.mrb[83].mxu1 }
 0x687   :  { %v6522_v26 = vmax.bf16 %v15890_v50, %v6394_v56  ;;  %v7667_v31 = vpack.c.bf16 %v7401_v0, %v7397_v20 }
 0x688   :  { %v6523_v23 = vmax.bf16 %v15890_v50, %v6395_v55  ;;  %v7831_v13 = vadd.bf16 %v14916_v46, %v7666_v17  ;;  %v6000_v18 = vpop.f32.mrb[52].mxu0 }
 0x689   :  { %v6649_v30 = vmax.bf16 %v6648_v48, %v6522_v26  ;;  %v7832_v58 = vadd.bf16 %v14921_v34, %v7667_v31  ;;  %v6002_v60 = vpop.f32.mrb[53].mxu0 }
 0x68a   :  { %v6690_v57 = vmax.bf16 %v6689_v11, %v6523_v23  ;;  %v7959_v1 = vmax.bf16 %v15890_v50, %v7831_v13  ;;  %v6004_v8 = vpop.f32.mrb[54].mxu0  ;;  %v12153_v13 = vld [vmem:[#allocation8 + $0x188] ss:$16 sps:$4 sm:$0xff]  }
 0x68b   :  { %v7960_v10 = vmax.bf16 %v15890_v50, %v7832_v58  ;;  %v6231_v47 = vpack.c.bf16 %v6004_v8, %v6000_v18  ;;  %v6006_v14 = vpop.f32.mrb[55].mxu0  ;;  %v7405_v53 = vpop.f32.mrb[84].mxu1  ;;  %v12155_v18 = vld [vmem:[#allocation8 + $0x18c] ss:$16 sps:$4 sm:$0xff]  }
 0x68c   :  { %v8090_v51 = vmax.bf16 %v8089_v49, %v7959_v1  ;;  %v6232_v21 = vpack.c.bf16 %v6006_v14, %v6002_v60  ;;  %v7407_v22 = vpop.f32.mrb[85].mxu1  ;;  %v12158_v1 = vld [vmem:[#allocation8 + $0x1c4] ss:$16 sps:$4 sm:$0xff]   ;;  %10052 = vmatprep.subr.bf16.mxu1 %v12155_v18 }
 0x68d   :  { %v8131_v6 = vmax.bf16 %v8130_v24, %v7960_v10  ;;  %v6396_v45 = vadd.bf16 %v14814_v42, %v6231_v47  ;;  %v7409_v39 = vpop.f32.mrb[86].mxu1  ;;  %9892 = vmatprep.subr.bf16.mxu0 %v12158_v1  ;;  %10053 = vmatpush1.bf16.msra.mxu1 %v12153_v13 }
 0x68e   :  { %v6397_v59 = vadd.bf16 %v14817_v35, %v6232_v21  ;;  %v7668_v40 = vpack.c.bf16 %v7409_v39, %v7405_v53  ;;  %v7411_v61 = vpop.f32.mrb[87].mxu1 }
 0x68f   :  { %v6524_v44 = vmax.bf16 %v15890_v50, %v6396_v45  ;;  %v7669_v43 = vpack.c.bf16 %v7411_v61, %v7407_v22 }
 0x690   :  { %v6525_v12 = vmax.bf16 %v15890_v50, %v6397_v59  ;;  %v7833_v27 = vadd.bf16 %v14916_v46, %v7668_v40  ;;  %v6010_v36 = vpop.f32.mrb[56].mxu0 }
 0x691   :  { %v6650_v5 = vmax.bf16 %v6649_v30, %v6524_v44  ;;  %v7834_v28 = vadd.bf16 %v14921_v34, %v7669_v43  ;;  %v6012_v29 = vpop.f32.mrb[57].mxu0 }
 0x692   :  { %v6691_v48 = vmax.bf16 %v6690_v57, %v6525_v12  ;;  %v7961_v7 = vmax.bf16 %v15890_v50, %v7833_v27  ;;  %v6014_v38 = vpop.f32.mrb[58].mxu0  ;;  %v12156_v57 = vld [vmem:[#allocation8 + $0x1c0] ss:$16 sps:$4 sm:$0xff]  }
 0x693   :  { %v7962_v11 = vmax.bf16 %v15890_v50, %v7834_v28  ;;  %v6233_v63 = vpack.c.bf16 %v6014_v38, %v6010_v36  ;;  %v6016_v9 = vpop.f32.mrb[59].mxu0  ;;  %v7415_v32 = vpop.f32.mrb[88].mxu1  ;;  %9893 = vmatpush1.bf16.msra.mxu0 %v12156_v57 }
 0x694   :  { %v8091_v4 = vmax.bf16 %v8090_v51, %v7961_v7  ;;  %v6234_v3 = vpack.c.bf16 %v6016_v9, %v6012_v29  ;;  %v7417_v16 = vpop.f32.mrb[89].mxu1 }
 0x695   :  { %v8132_v52 = vmax.bf16 %v8131_v6, %v7962_v11  ;;  %v6398_v41 = vadd.bf16 %v14814_v42, %v6233_v63  ;;  %v7419_v49 = vpop.f32.mrb[90].mxu1 }
 0x696   :  { %v6399_v25 = vadd.bf16 %v14817_v35, %v6234_v3  ;;  %v7670_v20 = vpack.c.bf16 %v7419_v49, %v7415_v32  ;;  %v7421_v24 = vpop.f32.mrb[91].mxu1 }
 0x697   :  { %v6526_v56 = vmax.bf16 %v15890_v50, %v6398_v41  ;;  %v7671_v15 = vpack.c.bf16 %v7421_v24, %v7417_v16 }
 0x698   :  { %v6527_v55 = vmax.bf16 %v15890_v50, %v6399_v25  ;;  %v7835_v17 = vadd.bf16 %v14916_v46, %v7670_v20  ;;  %v6020_v0 = vpop.f32.mrb[60].mxu0 }
 0x699   :  { %v6651_v26 = vmax.bf16 %v6650_v5, %v6526_v56  ;;  %v7836_v31 = vadd.bf16 %v14921_v34, %v7671_v15  ;;  %v6022_v23 = vpop.f32.mrb[61].mxu0 }
 0x69a   :  { %v6692_v30 = vmax.bf16 %v6691_v48, %v6527_v55  ;;  %v7963_v58 = vmax.bf16 %v15890_v50, %v7835_v17  ;;  %v6024_v60 = vpop.f32.mrb[62].mxu0 }
 0x69b   :  { %v7964_v8 = vmax.bf16 %v15890_v50, %v7836_v31  ;;  %v6235_v10 = vpack.c.bf16 %v6024_v60, %v6020_v0  ;;  %v6026_v47 = vpop.f32.mrb[63].mxu0  ;;  %v7425_v14 = vpop.f32.mrb[92].mxu1 }
 0x69c   :  { %v8092_v53 = vmax.bf16 %v8091_v4, %v7963_v58  ;;  %v6236_v51 = vpack.c.bf16 %v6026_v47, %v6022_v23  ;;  %v7427_v21 = vpop.f32.mrb[93].mxu1 }
 0x69d   :  { %v8133_v22 = vmax.bf16 %v8132_v52, %v7964_v8  ;;  %v6400_v6 = vadd.bf16 %v14814_v42, %v6235_v10  ;;  %v7429_v45 = vpop.f32.mrb[94].mxu1 }
 0x69e   :  { %v6401_v39 = vadd.bf16 %v14817_v35, %v6236_v51  ;;  %v7672_v59 = vpack.c.bf16 %v7429_v45, %v7425_v14  ;;  %v7431_v40 = vpop.f32.mrb[95].mxu1 }
 0x69f   :  { %v6528_v61 = vmax.bf16 %v15890_v50, %v6400_v6  ;;  %v7673_v44 = vpack.c.bf16 %v7431_v40, %v7427_v21 }
 0x6a0   :  { %v6529_v43 = vmax.bf16 %v15890_v50, %v6401_v39  ;;  %v7837_v12 = vadd.bf16 %v14916_v46, %v7672_v59  ;;  %v6030_v27 = vpop.f32.mrb[64].mxu0 }
 0x6a1   :  { %v6652_v36 = vmax.bf16 %v6651_v26, %v6528_v61  ;;  %v7838_v5 = vadd.bf16 %v14921_v34, %v7673_v44  ;;  %v6032_v28 = vpop.f32.mrb[65].mxu0 }
 0x6a2   :  { %v6693_v29 = vmax.bf16 %v6692_v30, %v6529_v43  ;;  %v7965_v48 = vmax.bf16 %v15890_v50, %v7837_v12  ;;  %v6034_v7 = vpop.f32.mrb[66].mxu0 }
 0x6a3   :  { %v7966_v38 = vmax.bf16 %v15890_v50, %v7838_v5  ;;  %v6237_v11 = vpack.c.bf16 %v6034_v7, %v6030_v27  ;;  %v6036_v63 = vpop.f32.mrb[67].mxu0  ;;  %v7435_v9 = vpop.f32.mrb[96].mxu1 }
 0x6a4   :  { %v8093_v32 = vmax.bf16 %v8092_v53, %v7965_v48  ;;  %v6238_v4 = vpack.c.bf16 %v6036_v63, %v6032_v28  ;;  %v7437_v3 = vpop.f32.mrb[97].mxu1 }
 0x6a5   :  { %v8134_v16 = vmax.bf16 %v8133_v22, %v7966_v38  ;;  %v6402_v52 = vadd.bf16 %v14814_v42, %v6237_v11  ;;  %v7439_v41 = vpop.f32.mrb[98].mxu1 }
 0x6a6   :  { %v6403_v49 = vadd.bf16 %v14817_v35, %v6238_v4  ;;  %v7674_v25 = vpack.c.bf16 %v7439_v41, %v7435_v9  ;;  %v7441_v20 = vpop.f32.mrb[99].mxu1 }
 0x6a7   :  { %v6530_v24 = vmax.bf16 %v15890_v50, %v6402_v52  ;;  %v7675_v56 = vpack.c.bf16 %v7441_v20, %v7437_v3 }
 0x6a8   :  { %v6531_v15 = vmax.bf16 %v15890_v50, %v6403_v49  ;;  %v7839_v55 = vadd.bf16 %v14916_v46, %v7674_v25  ;;  %v6040_v17 = vpop.f32.mrb[68].mxu0 }
 0x6a9   :  { %v6653_v0 = vmax.bf16 %v6652_v36, %v6530_v24  ;;  %v7840_v26 = vadd.bf16 %v14921_v34, %v7675_v56  ;;  %v6042_v31 = vpop.f32.mrb[69].mxu0 }
 0x6aa   :  { %v6694_v23 = vmax.bf16 %v6693_v29, %v6531_v15  ;;  %v7967_v13 = vmax.bf16 %v15890_v50, %v7839_v55  ;;  %v6044_v18 = vpop.f32.mrb[70].mxu0 }
 0x6ab   :  { %v7968_v30 = vmax.bf16 %v15890_v50, %v7840_v26  ;;  %v6239_v58 = vpack.c.bf16 %v6044_v18, %v6040_v17  ;;  %v6046_v60 = vpop.f32.mrb[71].mxu0  ;;  %v7445_v57 = vpop.f32.mrb[100].mxu1 }
 0x6ac   :  { %v8094_v1 = vmax.bf16 %v8093_v32, %v7967_v13  ;;  %v6240_v8 = vpack.c.bf16 %v6046_v60, %v6042_v31  ;;  %v7447_v10 = vpop.f32.mrb[101].mxu1  ;;  %v12159_v60 = vld [vmem:[#allocation8 + $0x1a8] ss:$16 sps:$4 sm:$0xff]  }
 0x6ad   :  { %v8135_v47 = vmax.bf16 %v8134_v16, %v7968_v30  ;;  %v6404_v14 = vadd.bf16 %v14814_v42, %v6239_v58  ;;  %v7449_v53 = vpop.f32.mrb[102].mxu1 }
 0x6ae   :  { %v6405_v51 = vadd.bf16 %v14817_v35, %v6240_v8  ;;  %v7676_v21 = vpack.c.bf16 %v7449_v53, %v7445_v57  ;;  %v7451_v22 = vpop.f32.mrb[103].mxu1  ;;  %v12161_v57 = vld [vmem:[#allocation8 + $0x1ac] ss:$16 sps:$4 sm:$0xff]  }
 0x6af   :  { %v6532_v6 = vmax.bf16 %v15890_v50, %v6404_v14  ;;  %v7677_v45 = vpack.c.bf16 %v7451_v22, %v7447_v10  ;;  %v12164_v14 = vld [vmem:[#allocation8 + $0x1e4] ss:$16 sps:$4 sm:$0xff]   ;;  %10054 = vmatprep.subr.bf16.mxu1 %v12161_v57  ;;  %v12167_v22 = vld [vmem:[#allocation8 + $0x1cc] ss:$16 sps:$4 sm:$0xff]  }
 0x6b0   :  { %v6533_v39 = vmax.bf16 %v15890_v50, %v6405_v51  ;;  %v7841_v59 = vadd.bf16 %v14916_v46, %v7676_v21  ;;  %v6050_v40 = vpop.f32.mrb[72].mxu0  ;;  %9894 = vmatprep.subr.bf16.mxu0 %v12164_v14  ;;  %10055 = vmatpush1.bf16.msra.mxu1 %v12159_v60 }
 0x6b1   :  { %v6654_v61 = vmax.bf16 %v6653_v0, %v6532_v6  ;;  %v7842_v44 = vadd.bf16 %v14921_v34, %v7677_v45  ;;  %v6052_v43 = vpop.f32.mrb[73].mxu0  ;;  %10056 = vmatprep.subr.bf16.mxu1 %v12167_v22 }
 0x6b2   :  { %v6695_v12 = vmax.bf16 %v6694_v23, %v6533_v39  ;;  %v7969_v27 = vmax.bf16 %v15890_v50, %v7841_v59  ;;  %v6054_v36 = vpop.f32.mrb[74].mxu0  ;;  %v12165_v39 = vld [vmem:[#allocation8 + $0x1c8] ss:$16 sps:$4 sm:$0xff]  }
 0x6b3   :  { %v7970_v5 = vmax.bf16 %v15890_v50, %v7842_v44  ;;  %v6241_v28 = vpack.c.bf16 %v6054_v36, %v6050_v40  ;;  %v6056_v29 = vpop.f32.mrb[75].mxu0  ;;  %v7455_v48 = vpop.f32.mrb[104].mxu1  ;;  %v12170_v44 = vld [vmem:[#allocation8 + $0x1ec] ss:$16 sps:$4 sm:$0xff]  }
 0x6b4   :  { %v8095_v7 = vmax.bf16 %v8094_v1, %v7969_v27  ;;  %v6242_v38 = vpack.c.bf16 %v6056_v29, %v6052_v43  ;;  %v7457_v11 = vpop.f32.mrb[105].mxu1  ;;  %10057 = vmatpush1.bf16.msra.mxu1 %v12165_v39 }
 0x6b5   :  { %v8136_v63 = vmax.bf16 %v8135_v47, %v7970_v5  ;;  %v6406_v9 = vadd.bf16 %v14814_v42, %v6241_v28  ;;  %v7459_v32 = vpop.f32.mrb[106].mxu1  ;;  %v12162_v47 = vld [vmem:[#allocation8 + $0x1e0] ss:$16 sps:$4 sm:$0xff]   ;;  %10058 = vmatprep.subr.bf16.mxu1 %v12170_v44 }
 0x6b6   :  { %v6407_v4 = vadd.bf16 %v14817_v35, %v6242_v38  ;;  %v7678_v3 = vpack.c.bf16 %v7459_v32, %v7455_v48  ;;  %v7461_v16 = vpop.f32.mrb[107].mxu1  ;;  %9895 = vmatpush1.bf16.msra.mxu0 %v12162_v47 }
 0x6b7   :  { %v6534_v52 = vmax.bf16 %v15890_v50, %v6406_v9  ;;  %v7679_v41 = vpack.c.bf16 %v7461_v16, %v7457_v11  ;;  %v12168_v11 = vld [vmem:[#allocation8 + $0x1e8] ss:$16 sps:$4 sm:$0xff]  }
 0x6b8   :  { %v6535_v49 = vmax.bf16 %v15890_v50, %v6407_v4  ;;  %v7843_v25 = vadd.bf16 %v14916_v46, %v7678_v3  ;;  %v6060_v20 = vpop.f32.mrb[76].mxu0  ;;  %10059 = vmatpush1.bf16.msra.mxu1 %v12168_v11 }
 0x6b9   :  { %v15576_v24 = vmax.bf16 %v6654_v61, %v6534_v52  ;;  %v7844_v56 = vadd.bf16 %v14921_v34, %v7679_v41  ;;  %v6062_v15 = vpop.f32.mrb[77].mxu0 }
 0x6ba   :  { %v15579_v55 = vmax.bf16 %v6695_v12, %v6535_v49  ;;  %v7971_v17 = vmax.bf16 %v15890_v50, %v7843_v25  ;;  %v6064_v0 = vpop.f32.mrb[78].mxu0 }
 0x6bb   :  { %v7972_v26 = vmax.bf16 %v15890_v50, %v7844_v56  ;;  %v6243_v31 = vpack.c.bf16 %v6064_v0, %v6060_v20  ;;  %v6066_v23 = vpop.f32.mrb[79].mxu0  ;;  %v7465_v13 = vpop.f32.mrb[108].mxu1 }
 0x6bc   :  { %v15583_v18 = vmax.bf16 %v8095_v7, %v7971_v17  ;;  %v6244_v30 = vpack.c.bf16 %v6066_v23, %v6062_v15  ;;  %v7467_v58 = vpop.f32.mrb[109].mxu1 }
 0x6bd   :  { %v15585_v1 = vmax.bf16 %v8136_v63, %v7972_v26  ;;  %v6408_v8 = vadd.bf16 %v14814_v42, %v6243_v31  ;;  %v7469_v10 = vpop.f32.mrb[110].mxu1  ;;  %v12173_v26 = vld [vmem:[#allocation8 + $0x204] ss:$16 sps:$4 sm:$0xff]   ;;  %v12176_v31 = vld [vmem:[#allocation8 + $0x20c] ss:$16 sps:$4 sm:$0xff]  }
 0x6be   :  { %v6409_v53 = vadd.bf16 %v14817_v35, %v6244_v30  ;;  %v7680_v51 = vpack.c.bf16 %v7469_v10, %v7465_v13  ;;  %v7471_v21 = vpop.f32.mrb[111].mxu1  ;;  %9905 = vmatprep.subr.bf16.mxu0 %v12173_v26  ;;  %10069 = vmatprep.subr.bf16.mxu1 %v12176_v31 }
 0x6bf   :  { %v6536_v6 = vmax.bf16 %v15890_v50, %v6408_v8  ;;  %v7681_v45 = vpack.c.bf16 %v7471_v21, %v7467_v58 }
 0x6c0   :  { %v6537_v59 = vmax.bf16 %v15890_v50, %v6409_v53  ;;  %v7845_v40 = vadd.bf16 %v14916_v46, %v7680_v51  ;;  %v6070_v61 = vpop.f32.mrb[80].mxu0 }
 0x6c1   :  { %v6656_v43 = vmax.bf16 %v15576_v24, %v6536_v6  ;;  %v7846_v12 = vadd.bf16 %v14921_v34, %v7681_v45  ;;  %v6072_v27 = vpop.f32.mrb[81].mxu0 }
 0x6c2   :  { %v6697_v36 = vmax.bf16 %v15579_v55, %v6537_v59  ;;  %v7973_v5 = vmax.bf16 %v15890_v50, %v7845_v40  ;;  %v6074_v28 = vpop.f32.mrb[82].mxu0 }
 0x6c3   :  { %v7974_v29 = vmax.bf16 %v15890_v50, %v7846_v12  ;;  %v6245_v48 = vpack.c.bf16 %v6074_v28, %v6070_v61  ;;  %v6076_v7 = vpop.f32.mrb[83].mxu0  ;;  %v7475_v38 = vpop.f32.mrb[112].mxu1 }
 0x6c4   :  { %v8097_v63 = vmax.bf16 %v15583_v18, %v7973_v5  ;;  %v6246_v9 = vpack.c.bf16 %v6076_v7, %v6072_v27  ;;  %v7477_v32 = vpop.f32.mrb[113].mxu1 }
 0x6c5   :  { %v8138_v4 = vmax.bf16 %v15585_v1, %v7974_v29  ;;  %v6410_v3 = vadd.bf16 %v14814_v42, %v6245_v48  ;;  %v7479_v16 = vpop.f32.mrb[114].mxu1 }
 0x6c6   :  { %v6411_v52 = vadd.bf16 %v14817_v35, %v6246_v9  ;;  %v7682_v41 = vpack.c.bf16 %v7479_v16, %v7475_v38  ;;  %v7481_v49 = vpop.f32.mrb[115].mxu1 }
 0x6c7   :  { %v6538_v25 = vmax.bf16 %v15890_v50, %v6410_v3  ;;  %v7683_v20 = vpack.c.bf16 %v7481_v49, %v7477_v32 }
 0x6c8   :  { %v6539_v24 = vmax.bf16 %v15890_v50, %v6411_v52  ;;  %v7847_v56 = vadd.bf16 %v14916_v46, %v7682_v41  ;;  %v6080_v15 = vpop.f32.mrb[84].mxu0 }
 0x6c9   :  { %v6657_v55 = vmax.bf16 %v6656_v43, %v6538_v25  ;;  %v7848_v17 = vadd.bf16 %v14921_v34, %v7683_v20  ;;  %v6082_v0 = vpop.f32.mrb[85].mxu0 }
 0x6ca   :  { %v6698_v23 = vmax.bf16 %v6697_v36, %v6539_v24  ;;  %v7975_v13 = vmax.bf16 %v15890_v50, %v7847_v56  ;;  %v6084_v18 = vpop.f32.mrb[86].mxu0 }
 0x6cb   :  { %v7976_v30 = vmax.bf16 %v15890_v50, %v7848_v17  ;;  %v6247_v58 = vpack.c.bf16 %v6084_v18, %v6080_v15  ;;  %v6086_v60 = vpop.f32.mrb[87].mxu0  ;;  %v7485_v57 = vpop.f32.mrb[116].mxu1 }
 0x6cc   :  { %v8098_v1 = vmax.bf16 %v8097_v63, %v7975_v13  ;;  %v6248_v8 = vpack.c.bf16 %v6086_v60, %v6082_v0  ;;  %v7487_v10 = vpop.f32.mrb[117].mxu1 }
 0x6cd   :  { %v8139_v47 = vmax.bf16 %v8138_v4, %v7976_v30  ;;  %v6412_v14 = vadd.bf16 %v14814_v42, %v6247_v58  ;;  %v7489_v53 = vpop.f32.mrb[118].mxu1 }
 0x6ce   :  { %v6413_v51 = vadd.bf16 %v14817_v35, %v6248_v8  ;;  %v7684_v21 = vpack.c.bf16 %v7489_v53, %v7485_v57  ;;  %v7491_v22 = vpop.f32.mrb[119].mxu1 }
 0x6cf   :  { %v6540_v6 = vmax.bf16 %v15890_v50, %v6412_v14  ;;  %v7685_v45 = vpack.c.bf16 %v7491_v22, %v7487_v10 }
 0x6d0   :  { %v6541_v39 = vmax.bf16 %v15890_v50, %v6413_v51  ;;  %v7849_v59 = vadd.bf16 %v14916_v46, %v7684_v21  ;;  %v6090_v40 = vpop.f32.mrb[88].mxu0 }
 0x6d1   :  { %v6658_v61 = vmax.bf16 %v6657_v55, %v6540_v6  ;;  %v7850_v44 = vadd.bf16 %v14921_v34, %v7685_v45  ;;  %v6092_v43 = vpop.f32.mrb[89].mxu0 }
 0x6d2   :  { %v6699_v12 = vmax.bf16 %v6698_v23, %v6541_v39  ;;  %v7977_v27 = vmax.bf16 %v15890_v50, %v7849_v59  ;;  %v6094_v36 = vpop.f32.mrb[90].mxu0 }
 0x6d3   :  { %v7978_v5 = vmax.bf16 %v15890_v50, %v7850_v44  ;;  %v6249_v28 = vpack.c.bf16 %v6094_v36, %v6090_v40  ;;  %v6096_v29 = vpop.f32.mrb[91].mxu0  ;;  %v7495_v48 = vpop.f32.mrb[120].mxu1 }
 0x6d4   :  { %v8099_v7 = vmax.bf16 %v8098_v1, %v7977_v27  ;;  %v6250_v38 = vpack.c.bf16 %v6096_v29, %v6092_v43  ;;  %v7497_v11 = vpop.f32.mrb[121].mxu1 }
 0x6d5   :  { %v8140_v63 = vmax.bf16 %v8139_v47, %v7978_v5  ;;  %v6414_v9 = vadd.bf16 %v14814_v42, %v6249_v28  ;;  %v7499_v32 = vpop.f32.mrb[122].mxu1 }
 0x6d6   :  { %v6415_v4 = vadd.bf16 %v14817_v35, %v6250_v38  ;;  %v7686_v3 = vpack.c.bf16 %v7499_v32, %v7495_v48  ;;  %v7501_v16 = vpop.f32.mrb[123].mxu1 }
 0x6d7   :  { %v6542_v52 = vmax.bf16 %v15890_v50, %v6414_v9  ;;  %v7687_v41 = vpack.c.bf16 %v7501_v16, %v7497_v11 }
 0x6d8   :  { %v6543_v49 = vmax.bf16 %v15890_v50, %v6415_v4  ;;  %v7851_v25 = vadd.bf16 %v14916_v46, %v7686_v3  ;;  %v6100_v20 = vpop.f32.mrb[92].mxu0 }
 0x6d9   :  { %v6659_v24 = vmax.bf16 %v6658_v61, %v6542_v52  ;;  %v7852_v56 = vadd.bf16 %v14921_v34, %v7687_v41  ;;  %v6102_v15 = vpop.f32.mrb[93].mxu0 }
 0x6da   :  { %v6700_v55 = vmax.bf16 %v6699_v12, %v6543_v49  ;;  %v7979_v17 = vmax.bf16 %v15890_v50, %v7851_v25  ;;  %v6104_v0 = vpop.f32.mrb[94].mxu0 }
 0x6db   :  { %v7980_v26 = vmax.bf16 %v15890_v50, %v7852_v56  ;;  %v6251_v31 = vpack.c.bf16 %v6104_v0, %v6100_v20  ;;  %v6106_v23 = vpop.f32.mrb[95].mxu0  ;;  %v7505_v13 = vpop.f32.mrb[124].mxu1 }
 0x6dc   :  { %v8100_v18 = vmax.bf16 %v8099_v7, %v7979_v17  ;;  %v6252_v30 = vpack.c.bf16 %v6106_v23, %v6102_v15  ;;  %v7507_v58 = vpop.f32.mrb[125].mxu1 }
 0x6dd   :  { %v8141_v60 = vmax.bf16 %v8140_v63, %v7980_v26  ;;  %v6416_v57 = vadd.bf16 %v14814_v42, %v6251_v31  ;;  %v7509_v1 = vpop.f32.mrb[126].mxu1 }
 0x6de   :  { %v6417_v8 = vadd.bf16 %v14817_v35, %v6252_v30  ;;  %v7688_v10 = vpack.c.bf16 %v7509_v1, %v7505_v13  ;;  %v7511_v47 = vpop.f32.mrb[127].mxu1 }
 0x6df   :  { %v6544_v14 = vmax.bf16 %v15890_v50, %v6416_v57  ;;  %v7689_v53 = vpack.c.bf16 %v7511_v47, %v7507_v58 }
 0x6e0   :  { %v6545_v51 = vmax.bf16 %v15890_v50, %v6417_v8  ;;  %v7853_v21 = vadd.bf16 %v14916_v46, %v7688_v10  ;;  %v6110_v22 = vpop.f32.mrb[96].mxu0 }
 0x6e1   :  { %v6660_v6 = vmax.bf16 %v6659_v24, %v6544_v14  ;;  %v7854_v45 = vadd.bf16 %v14921_v34, %v7689_v53  ;;  %v6112_v39 = vpop.f32.mrb[97].mxu0 }
 0x6e2   :  { %v6701_v59 = vmax.bf16 %v6700_v55, %v6545_v51  ;;  %v7981_v40 = vmax.bf16 %v15890_v50, %v7853_v21  ;;  %v6114_v61 = vpop.f32.mrb[98].mxu0 }
 0x6e3   :  { %v7982_v44 = vmax.bf16 %v15890_v50, %v7854_v45  ;;  %v6253_v43 = vpack.c.bf16 %v6114_v61, %v6110_v22  ;;  %v6116_v12 = vpop.f32.mrb[99].mxu0  ;;  %v7515_v27 = vpop.f32.mrb[128].mxu1 }
 0x6e4   :  { %v8101_v36 = vmax.bf16 %v8100_v18, %v7981_v40  ;;  %v6254_v5 = vpack.c.bf16 %v6116_v12, %v6112_v39  ;;  %v7517_v28 = vpop.f32.mrb[129].mxu1 }
 0x6e5   :  { %v8142_v29 = vmax.bf16 %v8141_v60, %v7982_v44  ;;  %v6418_v48 = vadd.bf16 %v14814_v42, %v6253_v43  ;;  %v7519_v7 = vpop.f32.mrb[130].mxu1 }
 0x6e6   :  { %v6419_v38 = vadd.bf16 %v14817_v35, %v6254_v5  ;;  %v7690_v11 = vpack.c.bf16 %v7519_v7, %v7515_v27  ;;  %v7521_v63 = vpop.f32.mrb[131].mxu1 }
 0x6e7   :  { %v6546_v9 = vmax.bf16 %v15890_v50, %v6418_v48  ;;  %v7691_v32 = vpack.c.bf16 %v7521_v63, %v7517_v28 }
 0x6e8   :  { %v6547_v4 = vmax.bf16 %v15890_v50, %v6419_v38  ;;  %v7855_v3 = vadd.bf16 %v14916_v46, %v7690_v11  ;;  %v6120_v16 = vpop.f32.mrb[100].mxu0 }
 0x6e9   :  { %v6661_v52 = vmax.bf16 %v6660_v6, %v6546_v9  ;;  %v7856_v41 = vadd.bf16 %v14921_v34, %v7691_v32  ;;  %v6122_v49 = vpop.f32.mrb[101].mxu0 }
 0x6ea   :  { %v6702_v25 = vmax.bf16 %v6701_v59, %v6547_v4  ;;  %v7983_v20 = vmax.bf16 %v15890_v50, %v7855_v3  ;;  %v6124_v24 = vpop.f32.mrb[102].mxu0 }
 0x6eb   :  { %v7984_v56 = vmax.bf16 %v15890_v50, %v7856_v41  ;;  %v6255_v15 = vpack.c.bf16 %v6124_v24, %v6120_v16  ;;  %v6126_v55 = vpop.f32.mrb[103].mxu0  ;;  %v7525_v17 = vpop.f32.mrb[132].mxu1 }
 0x6ec   :  { %v8102_v0 = vmax.bf16 %v8101_v36, %v7983_v20  ;;  %v6256_v26 = vpack.c.bf16 %v6126_v55, %v6122_v49  ;;  %v7527_v31 = vpop.f32.mrb[133].mxu1 }
 0x6ed   :  { %v8143_v23 = vmax.bf16 %v8142_v29, %v7984_v56  ;;  %v6420_v13 = vadd.bf16 %v14814_v42, %v6255_v15  ;;  %v7529_v18 = vpop.f32.mrb[134].mxu1 }
 0x6ee   :  { %v6421_v30 = vadd.bf16 %v14817_v35, %v6256_v26  ;;  %v7692_v58 = vpack.c.bf16 %v7529_v18, %v7525_v17  ;;  %v7531_v60 = vpop.f32.mrb[135].mxu1 }
 0x6ef   :  { %v6548_v57 = vmax.bf16 %v15890_v50, %v6420_v13  ;;  %v7693_v1 = vpack.c.bf16 %v7531_v60, %v7527_v31 }
 0x6f0   :  { %v6549_v8 = vmax.bf16 %v15890_v50, %v6421_v30  ;;  %v7857_v10 = vadd.bf16 %v14916_v46, %v7692_v58 }
 0x6f1   :  { %v6662_v47 = vmax.bf16 %v6661_v52, %v6548_v57  ;;  %v7858_v14 = vadd.bf16 %v14921_v34, %v7693_v1 }
 0x6f2   :  { %v6703_v53 = vmax.bf16 %v6702_v25, %v6549_v8  ;;  %v7985_v51 = vmax.bf16 %v15890_v50, %v7857_v10 }
 0x6f3   :  { %v6663_v21 = vunpack.i.l.bf16 %v6662_v47  ;;  %v6664_v42 = vunpack.i.h.bf16 %v6662_v47  ;;  %v7986_v22 = vmax.bf16 %v15890_v50, %v7858_v14  ;;  %v7535_v35 = vpop.f32.mrb[136].mxu1 }
 0x6f4   :  { %v6704_v6 = vunpack.i.l.bf16 %v6703_v53  ;;  %v6705_v45 = vunpack.i.h.bf16 %v6703_v53  ;;  %v8103_v39 = vmax.bf16 %v8102_v0, %v7985_v51  ;;  %v7537_v59 = vpop.f32.mrb[137].mxu1  ;;  %v6725_v0 = vrot.slane %v15363_v62, %v13889_v37 }
 0x6f5   :  { %v6665_v40 = vmax.f32 %v6663_v21, %v6664_v42  ;;  %v8144_v61 = vmax.bf16 %v8143_v23, %v7986_v22  ;;  %v7539_v44 = vpop.f32.mrb[138].mxu1 }
 0x6f6   :  { %v6706_v43 = vmax.f32 %v6704_v6, %v6705_v45  ;;  %v7694_v12 = vpack.c.bf16 %v7539_v44, %v7535_v35  ;;  %v7541_v27 = vpop.f32.mrb[139].mxu1  ;;  %v6732_v8 = vrot.slane %v6725_v0, %v13889_v37 }
 0x6f7   :  { %v6666_v36 = vrot.slane %v6665_v40, 4  ;;  %v7695_v5 = vpack.c.bf16 %v7541_v27, %v7537_v59 }
 0x6f8   :  { %v6707_v28 = vrot.slane %v6706_v43, 4  ;;  %v7859_v29 = vadd.bf16 %v14916_v46, %v7694_v12  ;;  %v6754_v22 = vrot.slane %v6732_v8, %v14846_v54 }
 0x6f9   :  { %v6667_v48 = vmax.f32 %v6665_v40, %v6666_v36  ;;  %v7860_v7 = vadd.bf16 %v14921_v34, %v7695_v5 }
 0x6fa   :  { %v6708_v38 = vmax.f32 %v6706_v43, %v6707_v28  ;;  %v7987_v11 = vmax.bf16 %v15890_v50, %v7859_v29  ;;  %v6761_v43 = vrot.slane %v6754_v22, %v14846_v54 }
 0x6fb   :  { %v6668_v63 = vrot.slane %v6667_v48, 2  ;;  %v7988_v9 = vmax.bf16 %v15890_v50, %v7860_v7  ;;  %v7545_v32 = vpop.f32.mrb[140].mxu1 }
 0x6fc   :  { %v6709_v4 = vrot.slane %v6708_v38, 2  ;;  %v8104_v3 = vmax.bf16 %v8103_v39, %v7987_v11  ;;  %v7547_v16 = vpop.f32.mrb[141].mxu1  ;;  %v6776_v11 = vunpack.c.l.b16 %v6761_v43 }
 0x6fd   :  { %v6669_v52 = vmax.f32 %v6667_v48, %v6668_v63  ;;  %v8145_v41 = vmax.bf16 %v8144_v61, %v7988_v9  ;;  %v7549_v49 = vpop.f32.mrb[142].mxu1  ;;  %v6777_v9 = vunpack.c.h.b16 %v6761_v43 }
 0x6fe   :  { %v6710_v25 = vmax.f32 %v6708_v38, %v6709_v4  ;;  %v7696_v20 = vpack.c.bf16 %v7549_v49, %v7545_v32  ;;  %v7551_v24 = vpop.f32.mrb[143].mxu1 }
 0x6ff   :  { %v6670_v56 = vrot.slane %v6669_v52, 1  ;;  %v7697_v15 = vpack.c.bf16 %v7551_v24, %v7547_v16 }
 0x700   :  { %v6711_v55 = vrot.slane %v6710_v25, 1  ;;  %v7861_v17 = vadd.bf16 %v14916_v46, %v7696_v20 }
 0x701   :  { %v6671_v26 = vmax.f32 %v6669_v52, %v6670_v56  ;;  %v7862_v31 = vadd.bf16 %v14921_v34, %v7697_v15 }
 0x702   :  { %v6712_v23 = vmax.f32 %v6710_v25, %v6711_v55  ;;  %v7989_v13 = vmax.bf16 %v15890_v50, %v7861_v17 }
 0x703   :  { %v6672_v18 = vpack.i.bf16 %v6671_v26, %v6671_v26  ;;  %v7990_v30 = vmax.bf16 %v15890_v50, %v7862_v31  ;;  %v7555_v58 = vpop.f32.mrb[144].mxu1 }
 0x704   :  { %v6713_v60 = vpack.i.bf16 %v6712_v23, %v6712_v23  ;;  %v8105_v57 = vmax.bf16 %v8104_v3, %v7989_v13  ;;  %v7557_v1 = vpop.f32.mrb[145].mxu1 }
 0x705   :  { %v8146_v10 = vmax.bf16 %v8145_v41, %v7990_v30  ;;  %v7559_v47 = vpop.f32.mrb[146].mxu1 }
 0x706   :  { %v6733_v14 = vcombine.low %v6672_v18, %v6713_v60  ;;  %v7698_v53 = vpack.c.bf16 %v7559_v47, %v7555_v58  ;;  %v7561_v62 = vpop.f32.mrb[147].mxu1 }
 0x707   :  { %v7699_v51 = vpack.c.bf16 %v7561_v62, %v7557_v1  ;;  %v8170_v1 = vrot.slane %v15426_v2, %v13889_v37 }
 0x708   :  { %v6740_v21 = vrot.slane %v6733_v14, %v13889_v37  ;;  %v7863_v42 = vadd.bf16 %v14916_v46, %v7698_v53 }
 0x709   :  { %v7864_v35 = vadd.bf16 %v14921_v34, %v7699_v51  ;;  %v8177_v14 = vrot.slane %v8170_v1, %v13889_v37  ;;  %v12222_v1 = vld [vmem:[#allocation8 + $0x308] ss:$16 sps:$4 sm:$0xff]  }
 0x70a   :  { %v6747_v6 = vrot.slane %v6740_v21, %v13889_v37  ;;  %v7991_v45 = vmax.bf16 %v15890_v50, %v7863_v42 }
 0x70b   :  { %v7992_v39 = vmax.bf16 %v15890_v50, %v7864_v35  ;;  %v7565_v59 = vpop.f32.mrb[148].mxu1  ;;  %v8199_v51 = vrot.slane %v8177_v14, %v14846_v54  ;;  %v12228_v14 = vld [vmem:[#allocation8 + $0x328] ss:$16 sps:$4 sm:$0xff]  }
 0x70c   :  { %v6768_v40 = vrot.slane %v6747_v6, %v14846_v54  ;;  %v8106_v61 = vmax.bf16 %v8105_v57, %v7991_v45  ;;  %v7567_v44 = vpop.f32.mrb[149].mxu1 }
 0x70d   :  { %v8147_v12 = vmax.bf16 %v8146_v10, %v7992_v39  ;;  %v7569_v27 = vpop.f32.mrb[150].mxu1  ;;  %v8206_v22 = vrot.slane %v8199_v51, %v14846_v54  ;;  %v12231_v51 = vld [vmem:[#allocation8 + $0x340] ss:$16 sps:$4 sm:$0xff]  }
 0x70e   :  { %v6775_v36 = vrot.slane %v6768_v40, %v14846_v54  ;;  %v7700_v5 = vpack.c.bf16 %v7569_v27, %v7565_v59  ;;  %v7571_v28 = vpop.f32.mrb[151].mxu1 }
 0x70f   :  { %v7701_v29 = vpack.c.bf16 %v7571_v28, %v7567_v44  ;;  %v8221_v45 = vunpack.c.l.b16 %v8206_v22  ;;  %v8222_v39 = vunpack.c.h.b16 %v8206_v22  ;;  %v12171_v28 = vld [vmem:[#allocation8 + $0x200] ss:$16 sps:$4 sm:$0xff]   ;;  %v12242_v22 = vld [vmem:[#allocation8 + $0x36c] ss:$16 sps:$4 sm:$0xff]  }
 0x710   :  { %v6778_v48 = vunpack.c.l.b16 %v6775_v36  ;;  %v6779_v7 = vunpack.c.h.b16 %v6775_v36  ;;  %v7865_v38 = vadd.bf16 %v14916_v46, %v7700_v5 }
 0x711   :  { %v7866_v63 = vadd.bf16 %v14921_v34, %v7701_v29  ;;  %v12174_v29 = vld [vmem:[#allocation8 + $0x208] ss:$16 sps:$4 sm:$0xff]  }
 0x712   :  { %v6780_v32 = vrot.slane %v6778_v48, 7  ;;  %v6782_v4 = vrot.slane %v6779_v7, 7  ;;  %v7993_v3 = vmax.bf16 %v15890_v50, %v7865_v38  ;;  %v12179_v38 = vld [vmem:[#allocation8 + $0x224] ss:$16 sps:$4 sm:$0xff]  }
 0x713   :  { %v7994_v16 = vmax.bf16 %v15890_v50, %v7866_v63  ;;  %v12177_v63 = vld [vmem:[#allocation8 + $0x220] ss:$16 sps:$4 sm:$0xff]  }
 0x714   :  { %v6781_v52 = vsel %vm3891_vm3, %v6780_v32, %v6776_v11  ;;  %v6783_v41 = vsel %vm3891_vm3, %v6782_v4, %v6777_v9  ;;  %v8107_v49 = vmax.bf16 %v8106_v61, %v7993_v3  ;;  %v12182_v11 = vld [vmem:[#allocation8 + $0x22c] ss:$16 sps:$4 sm:$0xff]   ;;  %v12180_v9 = vld [vmem:[#allocation8 + $0x228] ss:$16 sps:$4 sm:$0xff]   ;;  %v12185_v32 = vld [vmem:[#allocation8 + $0x244] ss:$16 sps:$4 sm:$0xff]  }
 0x715   :  { %v6784_v25 = vpack.c.b16 %v6783_v41, %v6781_v52  ;;  %v8148_v20 = vmax.bf16 %v8147_v12, %v7994_v16  ;;  %v12188_v4 = vld [vmem:[#allocation8 + $0x24c] ss:$16 sps:$4 sm:$0xff]   ;;  %v12183_v3 = vld [vmem:[#allocation8 + $0x240] ss:$16 sps:$4 sm:$0xff]   ;;  %v12186_v16 = vld [vmem:[#allocation8 + $0x248] ss:$16 sps:$4 sm:$0xff]  }
 0x716   :  { %v8108_v24 = vunpack.i.l.bf16 %v8107_v49  ;;  %v8109_v56 = vunpack.i.h.bf16 %v8107_v49  ;;  %v12191_v52 = vld [vmem:[#allocation8 + $0x264] ss:$16 sps:$4 sm:$0xff]   ;;  %v12194_v41 = vld [vmem:[#allocation8 + $0x26c] ss:$16 sps:$4 sm:$0xff]   ;;  %v12189_v49 = vld [vmem:[#allocation8 + $0x260] ss:$16 sps:$4 sm:$0xff]  }
 0x717   :  { %v6791_v46 = vrot.slane %v6784_v25, %v13889_v37  ;;  %v8149_v15 = vunpack.i.l.bf16 %v8148_v20  ;;  %v8150_v34 = vunpack.i.h.bf16 %v8148_v20  ;;  %v12192_v25 = vld [vmem:[#allocation8 + $0x268] ss:$16 sps:$4 sm:$0xff]   ;;  %v12197_v20 = vld [vmem:[#allocation8 + $0x284] ss:$16 sps:$4 sm:$0xff]  }
 0x718   :  { %v8110_v55 = vmax.f32 %v8108_v24, %v8109_v56  ;;  %v12200_v24 = vld [vmem:[#allocation8 + $0x28c] ss:$16 sps:$4 sm:$0xff]   ;;  %v12195_v56 = vld [vmem:[#allocation8 + $0x280] ss:$16 sps:$4 sm:$0xff]  }
 0x719   :  { %11160 = vst.sshfl [vmem:[#allocation2 + $0x4] sm:$0x5 pattern:$0x73625140] %v6791_v46  ;;  %v8151_v17 = vmax.f32 %v8149_v15, %v8150_v34  ;;  %v12198_v46 = vld [vmem:[#allocation8 + $0x288] ss:$16 sps:$4 sm:$0xff]  }
 0x71a   :  { %v8111_v0 = vrot.slane %v8110_v55, 4  ;;  %v12203_v15 = vld [vmem:[#allocation8 + $0x2a4] ss:$16 sps:$4 sm:$0xff]   ;;  %v12206_v34 = vld [vmem:[#allocation8 + $0x2ac] ss:$16 sps:$4 sm:$0xff]  }
 0x71b   :  { %v8152_v26 = vrot.slane %v8151_v17, 4 }
 0x71c   :  { %v8112_v31 = vmax.f32 %v8110_v55, %v8111_v0  ;;  %v12201_v55 = vld [vmem:[#allocation8 + $0x2a0] ss:$16 sps:$4 sm:$0xff]   ;;  %v12209_v0 = vld [vmem:[#allocation8 + $0x2c4] ss:$16 sps:$4 sm:$0xff]  }
 0x71d   :  { %v8153_v50 = vmax.f32 %v8151_v17, %v8152_v26  ;;  %v12204_v17 = vld [vmem:[#allocation8 + $0x2a8] ss:$16 sps:$4 sm:$0xff]   ;;  %v12212_v26 = vld [vmem:[#allocation8 + $0x2cc] ss:$16 sps:$4 sm:$0xff]  }
 0x71e   :  { %v8113_v23 = vrot.slane %v8112_v31, 2 }
 0x71f   :  { %v8154_v13 = vrot.slane %v8153_v50, 2 }
 0x720   :  { %v8114_v18 = vmax.f32 %v8112_v31, %v8113_v23  ;;  %v12207_v31 = vld [vmem:[#allocation8 + $0x2c0] ss:$16 sps:$4 sm:$0xff]   ;;  %v12215_v23 = vld [vmem:[#allocation8 + $0x2e4] ss:$16 sps:$4 sm:$0xff]  }
 0x721   :  { %v8155_v30 = vmax.f32 %v8153_v50, %v8154_v13  ;;  %v12210_v50 = vld [vmem:[#allocation8 + $0x2c8] ss:$16 sps:$4 sm:$0xff]   ;;  %v12218_v13 = vld [vmem:[#allocation8 + $0x2ec] ss:$16 sps:$4 sm:$0xff]  }
 0x722   :  { %v8115_v58 = vrot.slane %v8114_v18, 1 }
 0x723   :  { %v8156_v60 = vrot.slane %v8155_v30, 1 }
 0x724   :  { %v8116_v57 = vmax.f32 %v8114_v18, %v8115_v58  ;;  %v12213_v18 = vld [vmem:[#allocation8 + $0x2e0] ss:$16 sps:$4 sm:$0xff]   ;;  %v12221_v58 = vld [vmem:[#allocation8 + $0x304] ss:$16 sps:$4 sm:$0xff]  }
 0x725   :  { %v8157_v8 = vmax.f32 %v8155_v30, %v8156_v60  ;;  %v12216_v30 = vld [vmem:[#allocation8 + $0x2e8] ss:$16 sps:$4 sm:$0xff]   ;;  %v12224_v60 = vld [vmem:[#allocation8 + $0x30c] ss:$16 sps:$4 sm:$0xff]  }
 0x726   :  { %v8117_v10 = vpack.i.bf16 %v8116_v57, %v8116_v57  ;;  %v12219_v57 = vld [vmem:[#allocation8 + $0x300] ss:$16 sps:$4 sm:$0xff]  }
 0x727   :  { %v8158_v47 = vpack.i.bf16 %v8157_v8, %v8157_v8  ;;  %v12227_v8 = vld [vmem:[#allocation8 + $0x324] ss:$16 sps:$4 sm:$0xff]  }
 0x729   :  { %v8178_v53 = vcombine.low %v8117_v10, %v8158_v47  ;;  %v12230_v10 = vld [vmem:[#allocation8 + $0x32c] ss:$16 sps:$4 sm:$0xff]   ;;  %v12225_v47 = vld [vmem:[#allocation8 + $0x320] ss:$16 sps:$4 sm:$0xff]  }
 0x72b   :  { %v8185_v62 = vrot.slane %v8178_v53, %v13889_v37  ;;  %v12233_v53 = vld [vmem:[#allocation8 + $0x344] ss:$16 sps:$4 sm:$0xff]  }
 0x72d   :  { %v8192_v21 = vrot.slane %v8185_v62, %v13889_v37  ;;  %v12236_v62 = vld [vmem:[#allocation8 + $0x34c] ss:$16 sps:$4 sm:$0xff]  }
 0x72f   :  { %v8213_v42 = vrot.slane %v8192_v21, %v14846_v54  ;;  %v12234_v21 = vld [vmem:[#allocation8 + $0x348] ss:$16 sps:$4 sm:$0xff]  }
 0x731   :  { %v8220_v35 = vrot.slane %v8213_v42, %v14846_v54  ;;  %v12239_v42 = vld [vmem:[#allocation8 + $0x364] ss:$16 sps:$4 sm:$0xff]  }
 0x733   :  { %v8223_v6 = vunpack.c.l.b16 %v8220_v35  ;;  %v8224_v2 = vunpack.c.h.b16 %v8220_v35  ;;  %v12237_v35 = vld [vmem:[#allocation8 + $0x360] ss:$16 sps:$4 sm:$0xff]  }
 0x735   :  { %v8225_v59 = vrot.slane %v8223_v6, 7  ;;  %v8227_v40 = vrot.slane %v8224_v2, 7  ;;  %v12240_v6 = vld [vmem:[#allocation8 + $0x368] ss:$16 sps:$4 sm:$0xff]   ;;  %v12245_v2 = vld [vmem:[#allocation8 + $0x384] ss:$16 sps:$4 sm:$0xff]  }
 0x737   :  { %v8226_v61 = vsel %vm3891_vm3, %v8225_v59, %v8221_v45  ;;  %v8228_v44 = vsel %vm3891_vm3, %v8227_v40, %v8222_v39  ;;  %v12248_v45 = vld [vmem:[#allocation8 + $0x38c] ss:$16 sps:$4 sm:$0xff]   ;;  %v12243_v39 = vld [vmem:[#allocation8 + $0x380] ss:$16 sps:$4 sm:$0xff]   ;;  %v12246_v59 = vld [vmem:[#allocation8 + $0x388] ss:$16 sps:$4 sm:$0xff]  }
 0x738   :  { %v8229_v43 = vpack.c.b16 %v8228_v44, %v8226_v61  ;;  %v12251_v40 = vld [vmem:[#allocation8 + $0x3a4] ss:$16 sps:$4 sm:$0xff]   ;;  %v12254_v61 = vld [vmem:[#allocation8 + $0x3ac] ss:$16 sps:$4 sm:$0xff]   ;;  %v12249_v44 = vld [vmem:[#allocation8 + $0x3a0] ss:$16 sps:$4 sm:$0xff]  }
 0x73a   :  { %v8236_v12 = vrot.slane %v8229_v43, %v13889_v37  ;;  %v12252_v43 = vld [vmem:[#allocation8 + $0x3a8] ss:$16 sps:$4 sm:$0xff]  }
 0x73c   :  { %11195 = vst.sshfl [vmem:[#allocation2 + $0x6] sm:$0x5 pattern:$0x73625140] %v8236_v12  ;;  %v12257_v12 = vld [vmem:[#allocation8 + $0x3c4] ss:$16 sps:$4 sm:$0xff]  }
 0x743   :  { %v15687_v27 = vld [vmem:[#allocation2] sm:$0xff] }
 0x744   :  { %v8534_v36 = vrot.slane %v15687_v27, %v13889_v37 }
 0x746   :  { %v8542_v54 = vcombine.high %v8534_v36, %v8534_v36  ;;  %v15693_v48 = vrot.slane %v8534_v36, %v13889_v37  ;;  %v12260_v36 = vld [vmem:[#allocation8 + $0x3cc] ss:$16 sps:$4 sm:$0xff]  }
 0x748   :  { %v8564_v5 = vrot.slane %v8542_v54, %v13889_v37  ;;  %v8527_v54 = vcombine.high %v15687_v27, %v15687_v27 }
 0x74a   :  { %9896 = vmatprep.mubr.bf16.mxu0 %v8564_v5  ;;  %10060 = vmatprep.mubr.bf16.mxu1 %v8564_v5  ;;  %v8574_v7 = vcombine.high %v8564_v5, %v8564_v5  ;;  %v12255_v5 = vld [vmem:[#allocation8 + $0x3c0] ss:$16 sps:$4 sm:$0xff]  }
 0x74b   :  { %9897 = vmatmul.mubr.bf16.vlgmr.msra.gmra.mrb[104].mxu0 %v15693_v48  ;;  %10061 = vmatmul.mubr.bf16.vlgmr.msra.gmra.mrb[152].mxu1 %v15693_v48 }
 0x74c   :  { %9906 = vmatpush1.bf16.msra.mxu0 %v12171_v28  ;;  %10070 = vmatpush1.bf16.msra.mxu1 %v12174_v29  ;;  %v12258_v28 = vld [vmem:[#allocation8 + $0x3c8] ss:$16 sps:$4 sm:$0xff]   ;;  %v12263_v29 = vld [vmem:[#allocation8 + $0x3e4] ss:$16 sps:$4 sm:$0xff]  }
 0x74d   :  { %9937 = vmatprep.mubr.bf16.mxu0 %v8574_v7  ;;  %10101 = vmatprep.mubr.bf16.mxu1 %v8574_v7  ;;  %v12266_v7 = vld [vmem:[#allocation8 + $0x3ec] ss:$16 sps:$4 sm:$0xff]  }
 0x74e   :  { %9907 = vmatprep.subr.bf16.mxu0 %v12179_v38  ;;  %10071 = vmatprep.subr.bf16.mxu1 %v12182_v11  ;;  %v15700_v38 = vrot.slane %v8527_v54, %v13889_v37  ;;  %v12261_v11 = vld [vmem:[#allocation8 + $0x3e0] ss:$16 sps:$4 sm:$0xff]  }
 0x74f   :  { %v12340_v54 = vld [vmem:[#allocation8 + $0x580] ss:$16 sps:$4 sm:$0xff]  }
 0x750   :  { %9908 = vmatpush1.bf16.msra.mxu0 %v12177_v63  ;;  %10072 = vmatpush1.bf16.msra.mxu1 %v12180_v9  ;;  %v12264_v63 = vld [vmem:[#allocation8 + $0x3e8] ss:$16 sps:$4 sm:$0xff]   ;;  %v12269_v9 = vld [vmem:[#allocation8 + $0x404] ss:$16 sps:$4 sm:$0xff]   ;;  %v8543_v27 = vcombine.high %v15700_v38, %v15700_v38 }
 0x751   :  { %9909 = vmatprep.subr.bf16.mxu0 %v12185_v32  ;;  %10073 = vmatprep.subr.bf16.mxu1 %v12188_v4  ;;  %v12272_v32 = vld [vmem:[#allocation8 + $0x40c] ss:$16 sps:$4 sm:$0xff]   ;;  %v12267_v4 = vld [vmem:[#allocation8 + $0x400] ss:$16 sps:$4 sm:$0xff]  }
 0x754   :  { %9910 = vmatpush1.bf16.msra.mxu0 %v12183_v3  ;;  %10074 = vmatpush1.bf16.msra.mxu1 %v12186_v16  ;;  %v8572_v3 = vcombine.high %v15693_v48, %v15693_v48  ;;  %v12270_v16 = vld [vmem:[#allocation8 + $0x408] ss:$16 sps:$4 sm:$0xff]   ;;  %v12285_v48 = vld [vmem:[#allocation8 + $0x44c] ss:$16 sps:$4 sm:$0xff]  }
 0x755   :  { %9911 = vmatprep.subr.bf16.mxu0 %v12191_v52  ;;  %10075 = vmatprep.subr.bf16.mxu1 %v12194_v41  ;;  %v15707_v52 = vrot.slane %v8543_v27, %v13889_v37  ;;  %v12276_v41 = vld [vmem:[#allocation8 + $0x424] ss:$16 sps:$4 sm:$0xff]   ;;  %v12355_v27 = vld [vmem:[#allocation8 + $0x5c8] ss:$16 sps:$4 sm:$0xff]  }
 0x758   :  { %9912 = vmatpush1.bf16.msra.mxu0 %v12189_v49  ;;  %10076 = vmatpush1.bf16.msra.mxu1 %v12192_v25  ;;  %v12279_v49 = vld [vmem:[#allocation8 + $0x42c] ss:$16 sps:$4 sm:$0xff]   ;;  %v12274_v25 = vld [vmem:[#allocation8 + $0x420] ss:$16 sps:$4 sm:$0xff]  }
 0x759   :  { %9913 = vmatprep.subr.bf16.mxu0 %v12197_v20  ;;  %10077 = vmatprep.subr.bf16.mxu1 %v12200_v24  ;;  %v12277_v20 = vld [vmem:[#allocation8 + $0x428] ss:$16 sps:$4 sm:$0xff]   ;;  %v12282_v24 = vld [vmem:[#allocation8 + $0x444] ss:$16 sps:$4 sm:$0xff]  }
 0x75c   :  { %9914 = vmatpush1.bf16.msra.mxu0 %v12195_v56  ;;  %10078 = vmatpush1.bf16.msra.mxu1 %v12198_v46  ;;  %v12280_v56 = vld [vmem:[#allocation8 + $0x440] ss:$16 sps:$4 sm:$0xff]   ;;  %v12283_v46 = vld [vmem:[#allocation8 + $0x448] ss:$16 sps:$4 sm:$0xff]  }
 0x75d   :  { %9915 = vmatprep.subr.bf16.mxu0 %v12203_v15  ;;  %10079 = vmatprep.subr.bf16.mxu1 %v12206_v34  ;;  %v12288_v15 = vld [vmem:[#allocation8 + $0x464] ss:$16 sps:$4 sm:$0xff]   ;;  %v12291_v34 = vld [vmem:[#allocation8 + $0x46c] ss:$16 sps:$4 sm:$0xff]  }
 0x760   :  { %9916 = vmatpush1.bf16.msra.mxu0 %v12201_v55  ;;  %10080 = vmatpush1.bf16.msra.mxu1 %v12204_v17  ;;  %v12286_v55 = vld [vmem:[#allocation8 + $0x460] ss:$16 sps:$4 sm:$0xff]   ;;  %v12289_v17 = vld [vmem:[#allocation8 + $0x468] ss:$16 sps:$4 sm:$0xff]  }
 0x761   :  { %9917 = vmatprep.subr.bf16.mxu0 %v12209_v0  ;;  %10081 = vmatprep.subr.bf16.mxu1 %v12212_v26  ;;  %v12294_v0 = vld [vmem:[#allocation8 + $0x484] ss:$16 sps:$4 sm:$0xff]   ;;  %v12297_v26 = vld [vmem:[#allocation8 + $0x48c] ss:$16 sps:$4 sm:$0xff]  }
 0x764   :  { %9918 = vmatpush1.bf16.msra.mxu0 %v12207_v31  ;;  %10082 = vmatpush1.bf16.msra.mxu1 %v12210_v50  ;;  %v12292_v31 = vld [vmem:[#allocation8 + $0x480] ss:$16 sps:$4 sm:$0xff]   ;;  %v12295_v50 = vld [vmem:[#allocation8 + $0x488] ss:$16 sps:$4 sm:$0xff]  }
 0x765   :  { %9919 = vmatprep.subr.bf16.mxu0 %v12215_v23  ;;  %10083 = vmatprep.subr.bf16.mxu1 %v12218_v13  ;;  %v12300_v23 = vld [vmem:[#allocation8 + $0x4a4] ss:$16 sps:$4 sm:$0xff]   ;;  %v12303_v13 = vld [vmem:[#allocation8 + $0x4ac] ss:$16 sps:$4 sm:$0xff]  }
 0x768   :  { %9920 = vmatpush1.bf16.msra.mxu0 %v12213_v18  ;;  %10084 = vmatpush1.bf16.msra.mxu1 %v12216_v30  ;;  %v12298_v18 = vld [vmem:[#allocation8 + $0x4a0] ss:$16 sps:$4 sm:$0xff]   ;;  %v12301_v30 = vld [vmem:[#allocation8 + $0x4a8] ss:$16 sps:$4 sm:$0xff]  }
 0x769   :  { %9921 = vmatprep.subr.bf16.mxu0 %v12221_v58  ;;  %10085 = vmatprep.subr.bf16.mxu1 %v12224_v60  ;;  %v12306_v58 = vld [vmem:[#allocation8 + $0x4c4] ss:$16 sps:$4 sm:$0xff]   ;;  %v12309_v60 = vld [vmem:[#allocation8 + $0x4cc] ss:$16 sps:$4 sm:$0xff]  }
 0x76c   :  { %9922 = vmatpush1.bf16.msra.mxu0 %v12219_v57  ;;  %10086 = vmatpush1.bf16.msra.mxu1 %v12222_v1  ;;  %v12304_v57 = vld [vmem:[#allocation8 + $0x4c0] ss:$16 sps:$4 sm:$0xff]   ;;  %v12307_v1 = vld [vmem:[#allocation8 + $0x4c8] ss:$16 sps:$4 sm:$0xff]  }
 0x76d   :  { %9923 = vmatprep.subr.bf16.mxu0 %v12227_v8  ;;  %10087 = vmatprep.subr.bf16.mxu1 %v12230_v10  ;;  %v12312_v8 = vld [vmem:[#allocation8 + $0x4e4] ss:$16 sps:$4 sm:$0xff]   ;;  %v12315_v10 = vld [vmem:[#allocation8 + $0x4ec] ss:$16 sps:$4 sm:$0xff]  }
 0x770   :  { %9924 = vmatpush1.bf16.msra.mxu0 %v12225_v47  ;;  %10088 = vmatpush1.bf16.msra.mxu1 %v12228_v14  ;;  %v12310_v47 = vld [vmem:[#allocation8 + $0x4e0] ss:$16 sps:$4 sm:$0xff]   ;;  %v12313_v14 = vld [vmem:[#allocation8 + $0x4e8] ss:$16 sps:$4 sm:$0xff]  }
 0x771   :  { %9925 = vmatprep.subr.bf16.mxu0 %v12233_v53  ;;  %10089 = vmatprep.subr.bf16.mxu1 %v12236_v62  ;;  %v12318_v53 = vld [vmem:[#allocation8 + $0x504] ss:$16 sps:$4 sm:$0xff]   ;;  %v12321_v62 = vld [vmem:[#allocation8 + $0x50c] ss:$16 sps:$4 sm:$0xff]  }
 0x774   :  { %9926 = vmatpush1.bf16.msra.mxu0 %v12231_v51  ;;  %10090 = vmatpush1.bf16.msra.mxu1 %v12234_v21  ;;  %v12316_v51 = vld [vmem:[#allocation8 + $0x500] ss:$16 sps:$4 sm:$0xff]   ;;  %v12319_v21 = vld [vmem:[#allocation8 + $0x508] ss:$16 sps:$4 sm:$0xff]  }
 0x775   :  { %9927 = vmatprep.subr.bf16.mxu0 %v12239_v42  ;;  %10091 = vmatprep.subr.bf16.mxu1 %v12242_v22  ;;  %v12324_v42 = vld [vmem:[#allocation8 + $0x524] ss:$16 sps:$4 sm:$0xff]   ;;  %v12327_v22 = vld [vmem:[#allocation8 + $0x52c] ss:$16 sps:$4 sm:$0xff]  }
 0x778   :  { %9928 = vmatpush1.bf16.msra.mxu0 %v12237_v35  ;;  %10092 = vmatpush1.bf16.msra.mxu1 %v12240_v6  ;;  %v12322_v35 = vld [vmem:[#allocation8 + $0x520] ss:$16 sps:$4 sm:$0xff]   ;;  %v12325_v6 = vld [vmem:[#allocation8 + $0x528] ss:$16 sps:$4 sm:$0xff]  }
 0x779   :  { %9929 = vmatprep.subr.bf16.mxu0 %v12245_v2  ;;  %10093 = vmatprep.subr.bf16.mxu1 %v12248_v45  ;;  %v12330_v2 = vld [vmem:[#allocation8 + $0x544] ss:$16 sps:$4 sm:$0xff]   ;;  %v12333_v45 = vld [vmem:[#allocation8 + $0x54c] ss:$16 sps:$4 sm:$0xff]  }
 0x77c   :  { %9930 = vmatpush1.bf16.msra.mxu0 %v12243_v39  ;;  %10094 = vmatpush1.bf16.msra.mxu1 %v12246_v59  ;;  %v12328_v39 = vld [vmem:[#allocation8 + $0x540] ss:$16 sps:$4 sm:$0xff]   ;;  %v12331_v59 = vld [vmem:[#allocation8 + $0x548] ss:$16 sps:$4 sm:$0xff]  }
 0x77d   :  { %9931 = vmatprep.subr.bf16.mxu0 %v12251_v40  ;;  %10095 = vmatprep.subr.bf16.mxu1 %v12254_v61  ;;  %v12336_v40 = vld [vmem:[#allocation8 + $0x564] ss:$16 sps:$4 sm:$0xff]   ;;  %v12339_v61 = vld [vmem:[#allocation8 + $0x56c] ss:$16 sps:$4 sm:$0xff]  }
 0x780   :  { %9932 = vmatpush1.bf16.msra.mxu0 %v12249_v44  ;;  %10096 = vmatpush1.bf16.msra.mxu1 %v12252_v43  ;;  %v12334_v44 = vld [vmem:[#allocation8 + $0x560] ss:$16 sps:$4 sm:$0xff]   ;;  %v12337_v43 = vld [vmem:[#allocation8 + $0x568] ss:$16 sps:$4 sm:$0xff]  }
 0x781   :  { %9933 = vmatprep.subr.bf16.mxu0 %v12257_v12  ;;  %10097 = vmatprep.subr.bf16.mxu1 %v12260_v36  ;;  %v12342_v12 = vld [vmem:[#allocation8 + $0x584] ss:$16 sps:$4 sm:$0xff]   ;;  %v12345_v36 = vld [vmem:[#allocation8 + $0x58c] ss:$16 sps:$4 sm:$0xff]  }
 0x784   :  { %9934 = vmatpush1.bf16.msra.mxu0 %v12255_v5  ;;  %10098 = vmatpush1.bf16.msra.mxu1 %v12258_v28  ;;  %v12343_v5 = vld [vmem:[#allocation8 + $0x588] ss:$16 sps:$4 sm:$0xff]   ;;  %v12348_v28 = vld [vmem:[#allocation8 + $0x5a4] ss:$16 sps:$4 sm:$0xff]  }
 0x785   :  { %9935 = vmatprep.subr.bf16.mxu0 %v12263_v29  ;;  %10099 = vmatprep.subr.bf16.mxu1 %v12266_v7  ;;  %v12351_v29 = vld [vmem:[#allocation8 + $0x5ac] ss:$16 sps:$4 sm:$0xff]   ;;  %v12346_v7 = vld [vmem:[#allocation8 + $0x5a0] ss:$16 sps:$4 sm:$0xff]  }
 0x788   :  { %9936 = vmatpush1.bf16.msra.mxu0 %v12261_v11  ;;  %10100 = vmatpush1.bf16.msra.mxu1 %v12264_v63  ;;  %v12349_v11 = vld [vmem:[#allocation8 + $0x5a8] ss:$16 sps:$4 sm:$0xff]   ;;  %v12354_v63 = vld [vmem:[#allocation8 + $0x5c4] ss:$16 sps:$4 sm:$0xff]  }
 0x789   :  { %9946 = vmatprep.subr.bf16.mxu0 %v12269_v9  ;;  %10110 = vmatprep.subr.bf16.mxu1 %v12272_v32  ;;  %v12357_v9 = vld [vmem:[#allocation8 + $0x5cc] ss:$16 sps:$4 sm:$0xff]   ;;  %v12352_v32 = vld [vmem:[#allocation8 + $0x5c0] ss:$16 sps:$4 sm:$0xff]  }
 0x78b   :  { %9938 = vmatmul.mubr.bf16.vlgmr.msra.gmra.mrb[104].mxu0 %v8572_v3  ;;  %10102 = vmatmul.mubr.bf16.vlgmr.msra.gmra.mrb[152].mxu1 %v8572_v3  ;;  %v12363_v3 = vld [vmem:[#allocation8 + $0x5ec] ss:$16 sps:$4 sm:$0xff]  }
 0x78c   :  { %9947 = vmatpush1.bf16.msra.mxu0 %v12267_v4  ;;  %9978 = vmatprep.mubr.bf16.mxu0 %v15707_v52  ;;  %v12360_v4 = vld [vmem:[#allocation8 + $0x5e4] ss:$16 sps:$4 sm:$0xff]  }
 0x78d   :  { %10111 = vmatpush1.bf16.msra.mxu1 %v12270_v16  ;;  %10142 = vmatprep.mubr.bf16.mxu1 %v15707_v52  ;;  %v12358_v16 = vld [vmem:[#allocation8 + $0x5e0] ss:$16 sps:$4 sm:$0xff]  }
 0x78e   :  { %9948 = vmatprep.subr.bf16.mxu0 %v12276_v41  ;;  %10112 = vmatprep.subr.bf16.mxu1 %v12279_v49  ;;  %v12361_v41 = vld [vmem:[#allocation8 + $0x5e8] ss:$16 sps:$4 sm:$0xff]   ;;  %v12366_v49 = vld [vmem:[#allocation8 + $0x604] ss:$16 sps:$4 sm:$0xff]  }
 0x790   :  { %9949 = vmatpush1.bf16.msra.mxu0 %v12274_v25  ;;  %v12369_v25 = vld [vmem:[#allocation8 + $0x60c] ss:$16 sps:$4 sm:$0xff]  }
 0x791   :  { %10113 = vmatpush1.bf16.msra.mxu1 %v12277_v20  ;;  %9950 = vmatprep.subr.bf16.mxu0 %v12282_v24  ;;  %v12364_v20 = vld [vmem:[#allocation8 + $0x600] ss:$16 sps:$4 sm:$0xff]   ;;  %v15713_v24 = vrot.slane %v15700_v38, %v13889_v37  ;;  %v12378_v37 = vld [vmem:[#allocation8 + $0x644] ss:$16 sps:$4 sm:$0xff]   ;;  %v12381_v38 = vld [vmem:[#allocation8 + $0x64c] ss:$16 sps:$4 sm:$0xff]  }
 0x792   :  { %10114 = vmatprep.subr.bf16.mxu1 %v12285_v48  ;;  %v12367_v48 = vld [vmem:[#allocation8 + $0x608] ss:$16 sps:$4 sm:$0xff]  }
 0x794   :  { %9951 = vmatpush1.bf16.msra.mxu0 %v12280_v56  ;;  %v12372_v56 = vld [vmem:[#allocation8 + $0x624] ss:$16 sps:$4 sm:$0xff]  }
 0x795   :  { %10115 = vmatpush1.bf16.msra.mxu1 %v12283_v46  ;;  %9952 = vmatprep.subr.bf16.mxu0 %v12288_v15  ;;  %v8575_v46 = vcombine.high %v15707_v52, %v15707_v52  ;;  %v12375_v15 = vld [vmem:[#allocation8 + $0x62c] ss:$16 sps:$4 sm:$0xff]  }
 0x796   :  { %10116 = vmatprep.subr.bf16.mxu1 %v12291_v34  ;;  %v12370_v34 = vld [vmem:[#allocation8 + $0x620] ss:$16 sps:$4 sm:$0xff]   ;;  %v12387_v52 = vld [vmem:[#allocation8 + $0x66c] ss:$16 sps:$4 sm:$0xff]  }
 0x798   :  { %9953 = vmatpush1.bf16.msra.mxu0 %v12286_v55  ;;  %v12373_v55 = vld [vmem:[#allocation8 + $0x628] ss:$16 sps:$4 sm:$0xff]  }
 0x799   :  { %10117 = vmatpush1.bf16.msra.mxu1 %v12289_v17  ;;  %9954 = vmatprep.subr.bf16.mxu0 %v12294_v0  ;;  %v12376_v17 = vld [vmem:[#allocation8 + $0x640] ss:$16 sps:$4 sm:$0xff]   ;;  %v12379_v0 = vld [vmem:[#allocation8 + $0x648] ss:$16 sps:$4 sm:$0xff]  }
 0x79a   :  { %10118 = vmatprep.subr.bf16.mxu1 %v12297_v26  ;;  %v12384_v26 = vld [vmem:[#allocation8 + $0x664] ss:$16 sps:$4 sm:$0xff]  }
 0x79c   :  { %9955 = vmatpush1.bf16.msra.mxu0 %v12292_v31  ;;  %v12382_v31 = vld [vmem:[#allocation8 + $0x660] ss:$16 sps:$4 sm:$0xff]  }
 0x79d   :  { %10119 = vmatpush1.bf16.msra.mxu1 %v12295_v50  ;;  %9956 = vmatprep.subr.bf16.mxu0 %v12300_v23  ;;  %v12385_v50 = vld [vmem:[#allocation8 + $0x668] ss:$16 sps:$4 sm:$0xff]   ;;  %v12390_v23 = vld [vmem:[#allocation8 + $0x684] ss:$16 sps:$4 sm:$0xff]  }
 0x79e   :  { %10120 = vmatprep.subr.bf16.mxu1 %v12303_v13  ;;  %v12393_v13 = vld [vmem:[#allocation8 + $0x68c] ss:$16 sps:$4 sm:$0xff]  }
 0x7a0   :  { %9957 = vmatpush1.bf16.msra.mxu0 %v12298_v18  ;;  %v12388_v18 = vld [vmem:[#allocation8 + $0x680] ss:$16 sps:$4 sm:$0xff]  }
 0x7a1   :  { %10121 = vmatpush1.bf16.msra.mxu1 %v12301_v30  ;;  %9958 = vmatprep.subr.bf16.mxu0 %v12306_v58  ;;  %v12391_v30 = vld [vmem:[#allocation8 + $0x688] ss:$16 sps:$4 sm:$0xff]   ;;  %v12396_v58 = vld [vmem:[#allocation8 + $0x6a4] ss:$16 sps:$4 sm:$0xff]  }
 0x7a2   :  { %10122 = vmatprep.subr.bf16.mxu1 %v12309_v60  ;;  %v12399_v60 = vld [vmem:[#allocation8 + $0x6ac] ss:$16 sps:$4 sm:$0xff]  }
 0x7a4   :  { %9959 = vmatpush1.bf16.msra.mxu0 %v12304_v57  ;;  %v12394_v57 = vld [vmem:[#allocation8 + $0x6a0] ss:$16 sps:$4 sm:$0xff]  }
 0x7a5   :  { %10123 = vmatpush1.bf16.msra.mxu1 %v12307_v1  ;;  %9960 = vmatprep.subr.bf16.mxu0 %v12312_v8  ;;  %v12397_v1 = vld [vmem:[#allocation8 + $0x6a8] ss:$16 sps:$4 sm:$0xff]   ;;  %v12402_v8 = vld [vmem:[#allocation8 + $0x6c4] ss:$16 sps:$4 sm:$0xff]  }
 0x7a6   :  { %10124 = vmatprep.subr.bf16.mxu1 %v12315_v10  ;;  %v12405_v10 = vld [vmem:[#allocation8 + $0x6cc] ss:$16 sps:$4 sm:$0xff]  }
 0x7a8   :  { %9961 = vmatpush1.bf16.msra.mxu0 %v12310_v47  ;;  %v12400_v47 = vld [vmem:[#allocation8 + $0x6c0] ss:$16 sps:$4 sm:$0xff]  }
 0x7a9   :  { %10125 = vmatpush1.bf16.msra.mxu1 %v12313_v14  ;;  %9962 = vmatprep.subr.bf16.mxu0 %v12318_v53  ;;  %v12403_v14 = vld [vmem:[#allocation8 + $0x6c8] ss:$16 sps:$4 sm:$0xff]   ;;  %v12408_v53 = vld [vmem:[#allocation8 + $0x6e4] ss:$16 sps:$4 sm:$0xff]  }
 0x7aa   :  { %10126 = vmatprep.subr.bf16.mxu1 %v12321_v62  ;;  %v12411_v62 = vld [vmem:[#allocation8 + $0x6ec] ss:$16 sps:$4 sm:$0xff]  }
 0x7ac   :  { %9963 = vmatpush1.bf16.msra.mxu0 %v12316_v51  ;;  %v12406_v51 = vld [vmem:[#allocation8 + $0x6e0] ss:$16 sps:$4 sm:$0xff]  }
 0x7ad   :  { %10127 = vmatpush1.bf16.msra.mxu1 %v12319_v21  ;;  %9964 = vmatprep.subr.bf16.mxu0 %v12324_v42  ;;  %v12409_v21 = vld [vmem:[#allocation8 + $0x6e8] ss:$16 sps:$4 sm:$0xff]   ;;  %v12414_v42 = vld [vmem:[#allocation8 + $0x704] ss:$16 sps:$4 sm:$0xff]  }
 0x7ae   :  { %10128 = vmatprep.subr.bf16.mxu1 %v12327_v22  ;;  %v12417_v22 = vld [vmem:[#allocation8 + $0x70c] ss:$16 sps:$4 sm:$0xff]  }
 0x7b0   :  { %9965 = vmatpush1.bf16.msra.mxu0 %v12322_v35  ;;  %v12412_v35 = vld [vmem:[#allocation8 + $0x700] ss:$16 sps:$4 sm:$0xff]  }
 0x7b1   :  { %10129 = vmatpush1.bf16.msra.mxu1 %v12325_v6  ;;  %9966 = vmatprep.subr.bf16.mxu0 %v12330_v2  ;;  %v12415_v6 = vld [vmem:[#allocation8 + $0x708] ss:$16 sps:$4 sm:$0xff]   ;;  %v12420_v2 = vld [vmem:[#allocation8 + $0x724] ss:$16 sps:$4 sm:$0xff]  }
 0x7b2   :  { %10130 = vmatprep.subr.bf16.mxu1 %v12333_v45  ;;  %v12423_v45 = vld [vmem:[#allocation8 + $0x72c] ss:$16 sps:$4 sm:$0xff]  }
 0x7b4   :  { %9967 = vmatpush1.bf16.msra.mxu0 %v12328_v39  ;;  %v12418_v39 = vld [vmem:[#allocation8 + $0x720] ss:$16 sps:$4 sm:$0xff]  }
 0x7b5   :  { %10131 = vmatpush1.bf16.msra.mxu1 %v12331_v59  ;;  %9968 = vmatprep.subr.bf16.mxu0 %v12336_v40  ;;  %v12421_v59 = vld [vmem:[#allocation8 + $0x728] ss:$16 sps:$4 sm:$0xff]   ;;  %v12426_v40 = vld [vmem:[#allocation8 + $0x744] ss:$16 sps:$4 sm:$0xff]  }
 0x7b6   :  { %10132 = vmatprep.subr.bf16.mxu1 %v12339_v61  ;;  %v12429_v61 = vld [vmem:[#allocation8 + $0x74c] ss:$16 sps:$4 sm:$0xff]  }
 0x7b8   :  { %9969 = vmatpush1.bf16.msra.mxu0 %v12334_v44  ;;  %v12424_v44 = vld [vmem:[#allocation8 + $0x740] ss:$16 sps:$4 sm:$0xff]  }
 0x7b9   :  { %10133 = vmatpush1.bf16.msra.mxu1 %v12337_v43  ;;  %9970 = vmatprep.subr.bf16.mxu0 %v12342_v12  ;;  %v12427_v43 = vld [vmem:[#allocation8 + $0x748] ss:$16 sps:$4 sm:$0xff]   ;;  %v12432_v12 = vld [vmem:[#allocation8 + $0x764] ss:$16 sps:$4 sm:$0xff]  }
 0x7ba   :  { %10134 = vmatprep.subr.bf16.mxu1 %v12345_v36  ;;  %v12435_v36 = vld [vmem:[#allocation8 + $0x76c] ss:$16 sps:$4 sm:$0xff]  }
 0x7bc   :  { %9971 = vmatpush1.bf16.msra.mxu0 %v12340_v54  ;;  %v12430_v54 = vld [vmem:[#allocation8 + $0x760] ss:$16 sps:$4 sm:$0xff]  }
 0x7bd   :  { %10135 = vmatpush1.bf16.msra.mxu1 %v12343_v5  ;;  %9972 = vmatprep.subr.bf16.mxu0 %v12348_v28  ;;  %v12433_v5 = vld [vmem:[#allocation8 + $0x768] ss:$16 sps:$4 sm:$0xff]   ;;  %v12438_v28 = vld [vmem:[#allocation8 + $0x784] ss:$16 sps:$4 sm:$0xff]  }
 0x7be   :  { %10136 = vmatprep.subr.bf16.mxu1 %v12351_v29  ;;  %v12441_v29 = vld [vmem:[#allocation8 + $0x78c] ss:$16 sps:$4 sm:$0xff]  }
 0x7c0   :  { %9973 = vmatpush1.bf16.msra.mxu0 %v12346_v7  ;;  %v12436_v7 = vld [vmem:[#allocation8 + $0x780] ss:$16 sps:$4 sm:$0xff]  }
 0x7c1   :  { %10137 = vmatpush1.bf16.msra.mxu1 %v12349_v11  ;;  %9974 = vmatprep.subr.bf16.mxu0 %v12354_v63  ;;  %v12439_v11 = vld [vmem:[#allocation8 + $0x788] ss:$16 sps:$4 sm:$0xff]   ;;  %v12444_v63 = vld [vmem:[#allocation8 + $0x7a4] ss:$16 sps:$4 sm:$0xff]  }
 0x7c2   :  { %10138 = vmatprep.subr.bf16.mxu1 %v12357_v9  ;;  %v12447_v9 = vld [vmem:[#allocation8 + $0x7ac] ss:$16 sps:$4 sm:$0xff]  }
 0x7c4   :  { %9975 = vmatpush1.bf16.msra.mxu0 %v12352_v32  ;;  %v12442_v32 = vld [vmem:[#allocation8 + $0x7a0] ss:$16 sps:$4 sm:$0xff]  }
 0x7c5   :  { %10139 = vmatpush1.bf16.msra.mxu1 %v12355_v27  ;;  %9976 = vmatprep.subr.bf16.mxu0 %v12360_v4  ;;  %v12445_v27 = vld [vmem:[#allocation8 + $0x7a8] ss:$16 sps:$4 sm:$0xff]   ;;  %v12450_v4 = vld [vmem:[#allocation8 + $0x7c4] ss:$16 sps:$4 sm:$0xff]  }
 0x7c6   :  { %10140 = vmatprep.subr.bf16.mxu1 %v12363_v3  ;;  %v12453_v3 = vld [vmem:[#allocation8 + $0x7cc] ss:$16 sps:$4 sm:$0xff]  }
 0x7c8   :  { %9977 = vmatpush1.bf16.msra.mxu0 %v12358_v16  ;;  %v12448_v16 = vld [vmem:[#allocation8 + $0x7c0] ss:$16 sps:$4 sm:$0xff]  }
 0x7c9   :  { %10141 = vmatpush1.bf16.msra.mxu1 %v12361_v41  ;;  %9987 = vmatprep.subr.bf16.mxu0 %v12366_v49  ;;  %v12451_v41 = vld [vmem:[#allocation8 + $0x7c8] ss:$16 sps:$4 sm:$0xff]   ;;  %v12456_v49 = vld [vmem:[#allocation8 + $0x7e4] ss:$16 sps:$4 sm:$0xff]  }
 0x7ca   :  { %10151 = vmatprep.subr.bf16.mxu1 %v12369_v25  ;;  %v12459_v25 = vld [vmem:[#allocation8 + $0x7ec] ss:$16 sps:$4 sm:$0xff]  }
 0x7cb   :  { %9979 = vmatmul.mubr.bf16.vlgmr.msra.gmra.mrb[104].mxu0 %v15713_v24 }
 0x7cc   :  { %10143 = vmatmul.mubr.bf16.vlgmr.msra.gmra.mrb[152].mxu1 %v15713_v24  ;;  %9988 = vmatpush1.bf16.msra.mxu0 %v12364_v20  ;;  %v12454_v20 = vld [vmem:[#allocation8 + $0x7e0] ss:$16 sps:$4 sm:$0xff]  }
 0x7cd   :  { %10019 = vmatprep.mubr.bf16.mxu0 %v8575_v46  ;;  %10152 = vmatpush1.bf16.msra.mxu1 %v12367_v48  ;;  %v12457_v48 = vld [vmem:[#allocation8 + $0x7e8] ss:$16 sps:$4 sm:$0xff]  }
 0x7ce   :  { %10183 = vmatprep.mubr.bf16.mxu1 %v8575_v46  ;;  %9989 = vmatprep.subr.bf16.mxu0 %v12372_v56  ;;  %v12462_v56 = vld [vmem:[#allocation9 + $0x4] ss:$8 sps:$4 sm:$0xff]   ;;  %v12460_v46 = vld [vmem:[#allocation9] ss:$8 sps:$4 sm:$0xff]  }
 0x7cf   :  { %10153 = vmatprep.subr.bf16.mxu1 %v12375_v15  ;;  %v8573_v15 = vcombine.high %v15713_v24, %v15713_v24  ;;  %v12477_v24 = vld [vmem:[#allocation9 + $0x54] ss:$8 sps:$4 sm:$0xff]  }
 0x7d0   :  { %9990 = vmatpush1.bf16.msra.mxu0 %v12370_v34  ;;  %v12465_v34 = vld [vmem:[#allocation9 + $0x14] ss:$8 sps:$4 sm:$0xff]  }
 0x7d1   :  { %10154 = vmatpush1.bf16.msra.mxu1 %v12373_v55  ;;  %9991 = vmatprep.subr.bf16.mxu0 %v12378_v37  ;;  %v12463_v55 = vld [vmem:[#allocation9 + $0x10] ss:$8 sps:$4 sm:$0xff]   ;;  %v12468_v37 = vld [vmem:[#allocation9 + $0x24] ss:$8 sps:$4 sm:$0xff]  }
 0x7d2   :  { %10155 = vmatprep.subr.bf16.mxu1 %v12381_v38  ;;  %v12466_v38 = vld [vmem:[#allocation9 + $0x20] ss:$8 sps:$4 sm:$0xff]  }
 0x7d4   :  { %9992 = vmatpush1.bf16.msra.mxu0 %v12376_v17  ;;  %v12471_v17 = vld [vmem:[#allocation9 + $0x34] ss:$8 sps:$4 sm:$0xff]  }
 0x7d5   :  { %10156 = vmatpush1.bf16.msra.mxu1 %v12379_v0  ;;  %9993 = vmatprep.subr.bf16.mxu0 %v12384_v26  ;;  %v12469_v0 = vld [vmem:[#allocation9 + $0x30] ss:$8 sps:$4 sm:$0xff]   ;;  %v12474_v26 = vld [vmem:[#allocation9 + $0x44] ss:$8 sps:$4 sm:$0xff]  }
 0x7d6   :  { %10157 = vmatprep.subr.bf16.mxu1 %v12387_v52  ;;  %v12472_v52 = vld [vmem:[#allocation9 + $0x40] ss:$8 sps:$4 sm:$0xff]  }
 0x7d8   :  { %9994 = vmatpush1.bf16.msra.mxu0 %v12382_v31  ;;  %v12475_v31 = vld [vmem:[#allocation9 + $0x50] ss:$8 sps:$4 sm:$0xff]  }
 0x7d9   :  { %10158 = vmatpush1.bf16.msra.mxu1 %v12385_v50  ;;  %9995 = vmatprep.subr.bf16.mxu0 %v12390_v23  ;;  %v12480_v50 = vld [vmem:[#allocation9 + $0x64] ss:$8 sps:$4 sm:$0xff]   ;;  %v12478_v23 = vld [vmem:[#allocation9 + $0x60] ss:$8 sps:$4 sm:$0xff]  }
 0x7da   :  { %10159 = vmatprep.subr.bf16.mxu1 %v12393_v13  ;;  %v12483_v13 = vld [vmem:[#allocation9 + $0x74] ss:$8 sps:$4 sm:$0xff]  }
 0x7dc   :  { %9996 = vmatpush1.bf16.msra.mxu0 %v12388_v18  ;;  %v12481_v18 = vld [vmem:[#allocation9 + $0x70] ss:$8 sps:$4 sm:$0xff]  }
 0x7dd   :  { %10160 = vmatpush1.bf16.msra.mxu1 %v12391_v30  ;;  %9997 = vmatprep.subr.bf16.mxu0 %v12396_v58  ;;  %v12486_v30 = vld [vmem:[#allocation9 + $0x84] ss:$8 sps:$4 sm:$0xff]   ;;  %v12484_v58 = vld [vmem:[#allocation9 + $0x80] ss:$8 sps:$4 sm:$0xff]  }
 0x7de   :  { %10161 = vmatprep.subr.bf16.mxu1 %v12399_v60  ;;  %v12489_v60 = vld [vmem:[#allocation9 + $0x94] ss:$8 sps:$4 sm:$0xff]  }
 0x7e0   :  { %9998 = vmatpush1.bf16.msra.mxu0 %v12394_v57  ;;  %v12487_v57 = vld [vmem:[#allocation9 + $0x90] ss:$8 sps:$4 sm:$0xff]  }
 0x7e1   :  { %10162 = vmatpush1.bf16.msra.mxu1 %v12397_v1  ;;  %9999 = vmatprep.subr.bf16.mxu0 %v12402_v8  ;;  %v12492_v1 = vld [vmem:[#allocation9 + $0xa4] ss:$8 sps:$4 sm:$0xff]   ;;  %v12490_v8 = vld [vmem:[#allocation9 + $0xa0] ss:$8 sps:$4 sm:$0xff]  }
 0x7e2   :  { %10163 = vmatprep.subr.bf16.mxu1 %v12405_v10  ;;  %v12495_v10 = vld [vmem:[#allocation9 + $0xb4] ss:$8 sps:$4 sm:$0xff]  }
 0x7e4   :  { %10000 = vmatpush1.bf16.msra.mxu0 %v12400_v47  ;;  %v12493_v47 = vld [vmem:[#allocation9 + $0xb0] ss:$8 sps:$4 sm:$0xff]  }
 0x7e5   :  { %10164 = vmatpush1.bf16.msra.mxu1 %v12403_v14  ;;  %10001 = vmatprep.subr.bf16.mxu0 %v12408_v53  ;;  %v12498_v14 = vld [vmem:[#allocation9 + $0xc4] ss:$8 sps:$4 sm:$0xff]   ;;  %v12496_v53 = vld [vmem:[#allocation9 + $0xc0] ss:$8 sps:$4 sm:$0xff]  }
 0x7e6   :  { %10165 = vmatprep.subr.bf16.mxu1 %v12411_v62  ;;  %v12501_v62 = vld [vmem:[#allocation9 + $0xd4] ss:$8 sps:$4 sm:$0xff]  }
 0x7e8   :  { %10002 = vmatpush1.bf16.msra.mxu0 %v12406_v51  ;;  %v12499_v51 = vld [vmem:[#allocation9 + $0xd0] ss:$8 sps:$4 sm:$0xff]  }
 0x7e9   :  { %10166 = vmatpush1.bf16.msra.mxu1 %v12409_v21  ;;  %10003 = vmatprep.subr.bf16.mxu0 %v12414_v42  ;;  %v12504_v21 = vld [vmem:[#allocation9 + $0xe4] ss:$8 sps:$4 sm:$0xff]   ;;  %v12502_v42 = vld [vmem:[#allocation9 + $0xe0] ss:$8 sps:$4 sm:$0xff]  }
 0x7ea   :  { %10167 = vmatprep.subr.bf16.mxu1 %v12417_v22  ;;  %v12507_v22 = vld [vmem:[#allocation9 + $0xf4] ss:$8 sps:$4 sm:$0xff]  }
 0x7ec   :  { %10004 = vmatpush1.bf16.msra.mxu0 %v12412_v35  ;;  %v12505_v35 = vld [vmem:[#allocation9 + $0xf0] ss:$8 sps:$4 sm:$0xff]  }
 0x7ed   :  { %10168 = vmatpush1.bf16.msra.mxu1 %v12415_v6  ;;  %10005 = vmatprep.subr.bf16.mxu0 %v12420_v2  ;;  %v12510_v6 = vld [vmem:[#allocation9 + $0x104] ss:$8 sps:$4 sm:$0xff]  }
 0x7ee   :  { %10169 = vmatprep.subr.bf16.mxu1 %v12423_v45  ;;  %v12556_v2 = vld [vmem:[#allocation11 + $0x40] sm:$0xff]  }
 0x7ef   :  { %v12557_v45 = vld [vmem:[#allocation11] sm:$0xff]  }
 0x7f0   :  { %10006 = vmatpush1.bf16.msra.mxu0 %v12418_v39  ;;  %v12558_v39 = vld [vmem:[#allocation11 + $0x48] sm:$0xff]  }
 0x7f1   :  { %10170 = vmatpush1.bf16.msra.mxu1 %v12421_v59  ;;  %10007 = vmatprep.subr.bf16.mxu0 %v12426_v40  ;;  %v12559_v59 = vld [vmem:[#allocation11 + $0x8] sm:$0xff]   ;;  %v12560_v40 = vld [vmem:[#allocation11 + $0x50] sm:$0xff]  }
 0x7f2   :  { %10171 = vmatprep.subr.bf16.mxu1 %v12429_v61  ;;  %v12561_v61 = vld [vmem:[#allocation11 + $0x10] sm:$0xff]  }
 0x7f4   :  { %10008 = vmatpush1.bf16.msra.mxu0 %v12424_v44  ;;  %v12562_v44 = vld [vmem:[#allocation11 + $0x58] sm:$0xff]  }
 0x7f5   :  { %10172 = vmatpush1.bf16.msra.mxu1 %v12427_v43  ;;  %10009 = vmatprep.subr.bf16.mxu0 %v12432_v12  ;;  %v12563_v43 = vld [vmem:[#allocation11 + $0x18] sm:$0xff]   ;;  %v12564_v12 = vld [vmem:[#allocation11 + $0x60] sm:$0xff]  }
 0x7f6   :  { %10173 = vmatprep.subr.bf16.mxu1 %v12435_v36  ;;  %v12565_v36 = vld [vmem:[#allocation11 + $0x20] sm:$0xff]  }
 0x7f8   :  { %10010 = vmatpush1.bf16.msra.mxu0 %v12430_v54  ;;  %v12566_v54 = vld [vmem:[#allocation11 + $0x68] sm:$0xff]  }
 0x7f9   :  { %10174 = vmatpush1.bf16.msra.mxu1 %v12433_v5  ;;  %10011 = vmatprep.subr.bf16.mxu0 %v12438_v28  ;;  %v12567_v5 = vld [vmem:[#allocation11 + $0x28] sm:$0xff]   ;;  %v15724_v28 = vld [vmem:[%s15768_s8] sm:$0xf] }
 0x7fa   :  { %10175 = vmatprep.subr.bf16.mxu1 %v12441_v29  ;;  %v8512_v29 = vsub.s32 1, %v15930_v19 }
 0x7fc   :  { %10012 = vmatpush1.bf16.msra.mxu0 %v12436_v7  ;;  %v8520_v7 = vsub.s32 3, %v15930_v19 }
 0x7fd   :  { %10176 = vmatpush1.bf16.msra.mxu1 %v12439_v11  ;;  %10013 = vmatprep.subr.bf16.mxu0 %v12444_v63  ;;  %v8509_v11 = vrot.slane %v15724_v28, %v15928_v33  ;;  %v8513_v63 = vrot.slane %v15724_v28, %v8512_v29 }
 0x7fe   :  { %10177 = vmatprep.subr.bf16.mxu1 %v12447_v9  ;;  %v8521_v9 = vrot.slane %v15724_v28, %v8520_v7  ;;  %v10264_v7 = vld [vmem:[%s15770_s10] sm:$0x3] }
 0x800   :  { %10014 = vmatpush1.bf16.msra.mxu0 %v12442_v32 }
 0x801   :  { %10178 = vmatpush1.bf16.msra.mxu1 %v12445_v27  ;;  %10015 = vmatprep.subr.bf16.mxu0 %v12450_v4 }
 0x802   :  { %10179 = vmatprep.subr.bf16.mxu1 %v12453_v3 }
 0x804   :  { %10016 = vmatpush1.bf16.msra.mxu0 %v12448_v16 }
 0x805   :  { %10180 = vmatpush1.bf16.msra.mxu1 %v12451_v41  ;;  %10017 = vmatprep.subr.bf16.mxu0 %v12456_v49 }
 0x806   :  { %10181 = vmatprep.subr.bf16.mxu1 %v12459_v25 }
 0x808   :  { %10018 = vmatpush1.bf16.msra.mxu0 %v12454_v20 }
 0x809   :  { %10182 = vmatpush1.bf16.msra.mxu1 %v12457_v48  ;;  %10596 = vmatprep.subr.bf16.mxu0 %v12462_v56 }
 0x80a   :  { %11666 = vmatprep.subr.bf16.mxu1 %v12556_v2  ;;  %v12547_v2 = vld [vmem:[#allocation9 + $0x1d0] ss:$8 sps:$4 sm:$0xff]  }
 0x80b   :  { %10020 = vmatmul.mubr.bf16.vlgmr.msra.gmra.mrb[104].mxu0 %v8573_v15 }
 0x80c   :  { %10184 = vmatmul.mubr.bf16.vlgmr.msra.gmra.mrb[152].mxu1 %v8573_v15  ;;  %10597 = vmatpush1.bf16.msra.mxu0 %v12460_v46 }
 0x80d   :  { %10598 = vmatprep.subr.bf16.mxu0 %v12465_v34  ;;  %11667 = vmatpush3.bf16.msra.mxu1 %v12557_v45 }
 0x80e   :  { %11668 = vmatprep.subr.bf16.mxu1 %v12558_v39  ;;  %v12552_v39 = vld [vmem:[#allocation9 + $0x1e4] ss:$8 sps:$4 sm:$0xff]  }
 0x810   :  { %10599 = vmatpush1.bf16.msra.mxu0 %v12463_v55 }
 0x811   :  { %10600 = vmatprep.subr.bf16.mxu0 %v12468_v37  ;;  %11669 = vmatpush3.bf16.msra.mxu1 %v12559_v59  ;;  %v12508_v37 = vld [vmem:[#allocation9 + $0x100] ss:$8 sps:$4 sm:$0xff]  }
 0x812   :  { %11670 = vmatprep.subr.bf16.mxu1 %v12560_v40  ;;  %v12550_v59 = vld [vmem:[#allocation9 + $0x1e0] ss:$8 sps:$4 sm:$0xff]  }
 0x814   :  { %10601 = vmatpush1.bf16.msra.mxu0 %v12466_v38 }
 0x815   :  { %10602 = vmatprep.subr.bf16.mxu0 %v12471_v17  ;;  %11671 = vmatpush3.bf16.msra.mxu1 %v12561_v61  ;;  %v12513_v17 = vld [vmem:[#allocation9 + $0x114] ss:$8 sps:$4 sm:$0xff]  }
 0x816   :  { %11672 = vmatprep.subr.bf16.mxu1 %v12562_v44  ;;  %v12555_v61 = vld [vmem:[#allocation9 + $0x1f4] ss:$8 sps:$4 sm:$0xff]   ;;  %v12553_v44 = vld [vmem:[#allocation9 + $0x1f0] ss:$8 sps:$4 sm:$0xff]  }
 0x818   :  { %10603 = vmatpush1.bf16.msra.mxu0 %v12469_v0 }
 0x819   :  { %10604 = vmatprep.subr.bf16.mxu0 %v12474_v26  ;;  %11673 = vmatpush3.bf16.msra.mxu1 %v12563_v43  ;;  %v12511_v26 = vld [vmem:[#allocation9 + $0x110] ss:$8 sps:$4 sm:$0xff]  }
 0x81a   :  { %11674 = vmatprep.subr.bf16.mxu1 %v12564_v12 }
 0x81c   :  { %10605 = vmatpush1.bf16.msra.mxu0 %v12472_v52  ;;  %v12516_v52 = vld [vmem:[#allocation9 + $0x124] ss:$8 sps:$4 sm:$0xff]  }
 0x81d   :  { %10606 = vmatprep.subr.bf16.mxu0 %v12477_v24  ;;  %11675 = vmatpush3.bf16.msra.mxu1 %v12565_v36  ;;  %v12514_v24 = vld [vmem:[#allocation9 + $0x120] ss:$8 sps:$4 sm:$0xff]   ;;  %v12568_v36 = vld [vmem:[#allocation11 + $0x70] sm:$0xff]  }
 0x81e   :  { %11676 = vmatprep.subr.bf16.mxu1 %v12566_v54  ;;  %v12569_v54 = vld [vmem:[#allocation11 + $0x30] sm:$0xff]  }
 0x820   :  { %10607 = vmatpush1.bf16.msra.mxu0 %v12475_v31  ;;  %v12519_v31 = vld [vmem:[#allocation9 + $0x134] ss:$8 sps:$4 sm:$0xff]  }
 0x821   :  { %10608 = vmatprep.subr.bf16.mxu0 %v12480_v50  ;;  %11677 = vmatpush3.bf16.msra.mxu1 %v12567_v5  ;;  %v12517_v50 = vld [vmem:[#allocation9 + $0x130] ss:$8 sps:$4 sm:$0xff]  }
 0x822   :  { %11678 = vmatprep.subr.bf16.mxu1 %v12568_v36  ;;  %v12570_v5 = vld [vmem:[#allocation11 + $0x78] sm:$0xff]  }
 0x824   :  { %10609 = vmatpush1.bf16.msra.mxu0 %v12478_v23  ;;  %v12522_v23 = vld [vmem:[#allocation9 + $0x144] ss:$8 sps:$4 sm:$0xff]  }
 0x825   :  { %10610 = vmatprep.subr.bf16.mxu0 %v12483_v13  ;;  %v12520_v13 = vld [vmem:[#allocation9 + $0x140] ss:$8 sps:$4 sm:$0xff]   ;;  %11679 = vmatpush3.bf16.msra.mxu1 %v12569_v54 }
 0x826   :  { %11680 = vmatprep.subr.bf16.mxu1 %v12570_v5 }
 0x828   :  { %10611 = vmatpush1.bf16.msra.mxu0 %v12481_v18  ;;  %v12525_v18 = vld [vmem:[#allocation9 + $0x154] ss:$8 sps:$4 sm:$0xff]  }
 0x829   :  { %10612 = vmatprep.subr.bf16.mxu0 %v12486_v30  ;;  %v12523_v30 = vld [vmem:[#allocation9 + $0x150] ss:$8 sps:$4 sm:$0xff]  }
 0x82c   :  { %10613 = vmatpush1.bf16.msra.mxu0 %v12484_v58  ;;  %v12528_v58 = vld [vmem:[#allocation9 + $0x164] ss:$8 sps:$4 sm:$0xff]  }
 0x82d   :  { %10614 = vmatprep.subr.bf16.mxu0 %v12489_v60  ;;  %v12526_v60 = vld [vmem:[#allocation9 + $0x160] ss:$8 sps:$4 sm:$0xff]  }
 0x830   :  { %10615 = vmatpush1.bf16.msra.mxu0 %v12487_v57  ;;  %v12531_v57 = vld [vmem:[#allocation9 + $0x174] ss:$8 sps:$4 sm:$0xff]  }
 0x831   :  { %10616 = vmatprep.subr.bf16.mxu0 %v12492_v1  ;;  %v12529_v1 = vld [vmem:[#allocation9 + $0x170] ss:$8 sps:$4 sm:$0xff]  }
 0x834   :  { %10617 = vmatpush1.bf16.msra.mxu0 %v12490_v8  ;;  %v12534_v8 = vld [vmem:[#allocation9 + $0x184] ss:$8 sps:$4 sm:$0xff]  }
 0x835   :  { %10618 = vmatprep.subr.bf16.mxu0 %v12495_v10  ;;  %v12532_v10 = vld [vmem:[#allocation9 + $0x180] ss:$8 sps:$4 sm:$0xff]  }
 0x838   :  { %10619 = vmatpush1.bf16.msra.mxu0 %v12493_v47  ;;  %v12537_v47 = vld [vmem:[#allocation9 + $0x194] ss:$8 sps:$4 sm:$0xff]  }
 0x839   :  { %10620 = vmatprep.subr.bf16.mxu0 %v12498_v14  ;;  %v12535_v14 = vld [vmem:[#allocation9 + $0x190] ss:$8 sps:$4 sm:$0xff]  }
 0x83c   :  { %10621 = vmatpush1.bf16.msra.mxu0 %v12496_v53  ;;  %v12540_v53 = vld [vmem:[#allocation9 + $0x1a4] ss:$8 sps:$4 sm:$0xff]  }
 0x83d   :  { %10622 = vmatprep.subr.bf16.mxu0 %v12501_v62  ;;  %v12538_v62 = vld [vmem:[#allocation9 + $0x1a0] ss:$8 sps:$4 sm:$0xff]  }
 0x840   :  { %10623 = vmatpush1.bf16.msra.mxu0 %v12499_v51  ;;  %v12543_v51 = vld [vmem:[#allocation9 + $0x1b4] ss:$8 sps:$4 sm:$0xff]  }
 0x841   :  { %10624 = vmatprep.subr.bf16.mxu0 %v12504_v21  ;;  %v12541_v21 = vld [vmem:[#allocation9 + $0x1b0] ss:$8 sps:$4 sm:$0xff]  }
 0x844   :  { %10625 = vmatpush1.bf16.msra.mxu0 %v12502_v42  ;;  %v12546_v42 = vld [vmem:[#allocation9 + $0x1c4] ss:$8 sps:$4 sm:$0xff]  }
 0x845   :  { %10626 = vmatprep.subr.bf16.mxu0 %v12507_v22  ;;  %v12544_v22 = vld [vmem:[#allocation9 + $0x1c0] ss:$8 sps:$4 sm:$0xff]  }
 0x848   :  { %10627 = vmatpush1.bf16.msra.mxu0 %v12505_v35  ;;  %v8516_v35 = vsub.s32 2, %v15930_v19 }
 0x849   :  { %10637 = vmatprep.subr.bf16.mxu0 %v12510_v6  ;;  %v12549_v6 = vld [vmem:[#allocation9 + $0x1d4] ss:$8 sps:$4 sm:$0xff]  }
 0x84a   :  { %v8517_v45 = vrot.slane %v15724_v28, %v8516_v35  ;;  %v12571_v28 = vld [vmem:[#allocation11 + $0x38] sm:$0xff]  }
 0x84b   :  { %11681 = vmatpush3.bf16.msra.mxu1 %v12571_v28 }
 0x8de   :  { %v10021_v32 = vpop.f32.mrb[104].mxu0 }
 0x8df   :  { %v11956_v27 = vadd.f32 %v10021_v32, %v8509_v11  ;;  %v15734_v4 = vpop.f32.mrb[152].mxu1  ;;  %v10023_v3 = vpop.f32.mrb[105].mxu0  ;;  %v10269_v11 = vrot.slane %v10264_v7, %v15928_v33  ;;  %v11516_v33 = vld [vmem:[%s15772_s12] ss:$0 sm:$0xff] }
 0x8e0   :  { %v11957_v16 = vadd.f32 %v10023_v3, %v8513_v63  ;;  %v10187_v41 = vpop.f32.mrb[153].mxu1  ;;  %v10025_v49 = vpop.f32.mrb[106].mxu0  ;;  %v11958_v40 = vadd.f32 %v15734_v4, %v8517_v45  ;;  %v10273_v63 = vrot.slane %v10264_v7, %v8512_v29 }
 0x8e1   :  { %v10192_v25 = vmax.f32 %v11956_v27, 0.0  ;;  %v11959_v20 = vadd.f32 %v10187_v41, %v8521_v9  ;;  %v10189_v48 = vpop.f32.mrb[154].mxu1  ;;  %v10026_v56 = vpop.f32.mrb[107].mxu0 }
 0x8e2   :  { %v10193_v46 = vmax.f32 %v11957_v16, 0.0  ;;  %v10190_v15 = vpop.f32.mrb[155].mxu1  ;;  %v10194_v43 = vmax.f32 %v11958_v40, 0.0 }
 0x8e3   :  { %v10195_v34 = vmax.f32 %v11959_v20, 0.0  ;;  %v10196_v38 = vpack.c.bf16 %v10192_v25, %v10192_v25 }
 0x8e4   :  { %v10197_v55 = vpack.c.bf16 %v10193_v46, %v10193_v46  ;;  %v10198_v12 = vpack.c.bf16 %v10194_v43, %v10194_v43 }
 0x8e5   :  { %v10199_v0 = vpack.c.bf16 %v10195_v34, %v10195_v34 }
 0x8e6   :  { %10628 = vmatprep.mubr.bf16.mxu0 %v10197_v55 }
 0x8e7   :  { %10629 = vmatmul.mubr.bf16.vlgmr.msra.gmra.mrb[108].mxu0 %v10196_v38 }
 0x8e8   :  { %10638 = vmatpush1.bf16.msra.mxu0 %v12508_v37  ;;  %10669 = vmatprep.mubr.bf16.mxu0 %v10199_v0 }
 0x8e9   :  { %10639 = vmatprep.subr.bf16.mxu0 %v12513_v17 }
 0x8ec   :  { %10640 = vmatpush1.bf16.msra.mxu0 %v12511_v26 }
 0x8ed   :  { %10641 = vmatprep.subr.bf16.mxu0 %v12516_v52 }
 0x8f0   :  { %10642 = vmatpush1.bf16.msra.mxu0 %v12514_v24 }
 0x8f1   :  { %10643 = vmatprep.subr.bf16.mxu0 %v12519_v31 }
 0x8f4   :  { %10644 = vmatpush1.bf16.msra.mxu0 %v12517_v50 }
 0x8f5   :  { %10645 = vmatprep.subr.bf16.mxu0 %v12522_v23 }
 0x8f8   :  { %10646 = vmatpush1.bf16.msra.mxu0 %v12520_v13 }
 0x8f9   :  { %10647 = vmatprep.subr.bf16.mxu0 %v12525_v18 }
 0x8fc   :  { %10648 = vmatpush1.bf16.msra.mxu0 %v12523_v30 }
 0x8fd   :  { %10649 = vmatprep.subr.bf16.mxu0 %v12528_v58 }
 0x900   :  { %10650 = vmatpush1.bf16.msra.mxu0 %v12526_v60 }
 0x901   :  { %10651 = vmatprep.subr.bf16.mxu0 %v12531_v57 }
 0x904   :  { %10652 = vmatpush1.bf16.msra.mxu0 %v12529_v1 }
 0x905   :  { %10653 = vmatprep.subr.bf16.mxu0 %v12534_v8 }
 0x908   :  { %10654 = vmatpush1.bf16.msra.mxu0 %v12532_v10 }
 0x909   :  { %10655 = vmatprep.subr.bf16.mxu0 %v12537_v47 }
 0x90c   :  { %10656 = vmatpush1.bf16.msra.mxu0 %v12535_v14 }
 0x90d   :  { %10657 = vmatprep.subr.bf16.mxu0 %v12540_v53 }
 0x910   :  { %10658 = vmatpush1.bf16.msra.mxu0 %v12538_v62 }
 0x911   :  { %10659 = vmatprep.subr.bf16.mxu0 %v12543_v51 }
 0x914   :  { %10660 = vmatpush1.bf16.msra.mxu0 %v12541_v21 }
 0x915   :  { %10661 = vmatprep.subr.bf16.mxu0 %v12546_v42 }
 0x918   :  { %10662 = vmatpush1.bf16.msra.mxu0 %v12544_v22 }
 0x919   :  { %10663 = vmatprep.subr.bf16.mxu0 %v12549_v6 }
 0x91c   :  { %10664 = vmatpush1.bf16.msra.mxu0 %v12547_v2 }
 0x91d   :  { %10665 = vmatprep.subr.bf16.mxu0 %v12552_v39 }
 0x920   :  { %10666 = vmatpush1.bf16.msra.mxu0 %v12550_v59 }
 0x921   :  { %10667 = vmatprep.subr.bf16.mxu0 %v12555_v61 }
 0x924   :  { %10668 = vmatpush1.bf16.msra.mxu0 %v12553_v44 }
 0x927   :  { %10670 = vmatmul.mubr.bf16.vlgmr.msra.gmra.mrb[108].mxu0 %v10198_v12 }
 0x9fa   :  { %v10671_v9 = vpop.f32.mrb[108].mxu0 }
 0x9fb   :  { %v11960_v32 = vadd.f32 %v10671_v9, %v10269_v11  ;;  %v10673_v27 = vpop.f32.mrb[109].mxu0 }
 0x9fc   :  { %v11961_v4 = vadd.f32 %v10673_v27, %v10273_v63  ;;  %v10675_v3 = vpop.f32.mrb[110].mxu0 }
 0x9fd   :  { %v10678_v16 = vmax.f32 %v11960_v32, 0.0  ;;  %v10676_v41 = vpop.f32.mrb[111].mxu0 }
 0x9fe   :  { %v10679_v49 = vmax.f32 %v11961_v4, 0.0 }
 0x9ff   :  { %v10680_v20 = vpack.c.bf16 %v10678_v16, %v10678_v16 }
 0xa00   :  { %v10681_v25 = vpack.c.bf16 %v10679_v49, %v10679_v49 }
 0xa02   :  { %10849 = vmatprep.mubr.bf16.mxu1 %v10681_v25 }
 0xa03   :  { %10850 = vmatmul.mubr.bf16.vlgmr.msra.gmra.mrb[156].mxu1 %v10680_v20 }
 0xad6   :  { %v11682_v48 = vpop.f32.mrb[156].mxu1 }
 0xad7   :  { %v11683_v56 = vpop.f32.mrb[157].mxu1 }
 0xad8   :  { %v11684_v19 = vadd.f32 %v11683_v56, %v11682_v48  ;;  %v11685_v29 = vpop.f32.mrb[158].mxu1 }
 0xad9   :  { %v11686_v46 = vpop.f32.mrb[159].mxu1 }
 0xada   :  { %v10852_v15 = vadd.f32 %v11684_v19, %v11516_v33 }
 0xadc   :  { %10857 = vst [vmem:[#allocation12] sm:$0x3] %v10852_v15 }
 0xadd   :  { %12695 = shalt.err (!%p12692_p2)
}
 0xade   :  { %s12696_s12 = scalar_lea.hbm %s15773_s13, 32 }
 0xadf   :  { %p12697_p3 = scmp.ne.s32.totalorder %s15773_s13, %s12696_s12  ;;  %p12700_p4 = scmp.lt.u32.totalorder %s12696_s12, %s15773_s13 }
 0xae1   :  { %p12702_p5 = pnand %p12700_p4, %p12697_p3 }
 0xae3   :  { %12705 = shalt.err (!%p12702_p5)
}
 0xae4   :  { %10867 = dma.vmem_to_hbm [thread:$0]  %s10865_s29, 32, %s15773_s13, [#allocation5]  }
 0xae5   :  { %12712 = dma.done.wait [#allocation5], 32  }
 0xae6   :  { %12713 = vsyncadd [#allocation5], 4294967264 }
 0xae7   :  { %10871 = vsyncpa [#allocation4], 1 }
 0xae8   :  { %10872 = vsyncpa [#allocation7], 1 }
 0xae9   :  { %10873 = vsyncpa [#allocation10], 1 }
 0xaea   :  { %10874 = vsyncpa [#allocation5], 1 }

</bundles_post_ra>
